<compile_context>
chip_gen: v7x
topology: tpu7x:2x2x1
jax: 0.10.0
libtpu: 0.0.40
codegen_flags: <defaults>
</compile_context>

<pallas_src>
import functools
import math

import jax
import jax.numpy as jnp
from jax.experimental import pallas as pl
from jax.experimental.pallas import tpu as pltpu

_EPS = 1e-5
_INV_SQRT2 = 1.0 / math.sqrt(2.0)
_LANE = 128                      # pad channel dims to a multiple of the lane width
_VMEM_LIMIT = 32 * 1024 * 1024   # scoped VMEM budget, safe on v5e / v6e / v7x


def _round_up(x, m):
    return ((x + m - 1) // m) * m


def _pick_tile_h(h, w):
    """Row-tile height: even, divides h, targets a few-thousand GEMM rows per tile."""
    th = h
    while th % 4 == 0 and th * w > 2048:
        th //= 2
    return th


# ---------------------------------------------------------------------------
# In-kernel 3x3 / stride-1 / pad-1 convolution on an NHWC block (no im2col):
# nine shifted (tile_rows*W, Cin_p) x (Cin_p, Cout_p) MXU GEMMs, f32 accumulate.
# ---------------------------------------------------------------------------
def _conv3x3_rows(x_ref, w_ref, r0, th, w_out):
    """x_ref: (1, H+2, W+2, Cin_p) padded NHWC block; w_ref: (3, 3, Cin_p, Cout_p).
    Returns the bias-free conv output for output rows [r0, r0+th), flattened to
    (th * w_out, Cout_p) float32."""
    cout = w_ref.shape[-1]
    acc = jnp.zeros((th * w_out, cout), jnp.float32)
    for ky in range(3):
        for kx in range(3):
            patch = x_ref[0, pl.ds(r0 + ky, th), pl.ds(kx, w_out), :]
            patch = patch.reshape(th * w_out, patch.shape[-1])
            acc = acc + jnp.dot(patch, w_ref[ky, kx, :, :],
                                preferred_element_type=jnp.float32)
    return acc


def _conv_stats_kernel(x_ref, w_ref, sum_ref, sq_ref, *, th, w_out, n_tiles):
    """Pass 1: accumulate per-channel sum and sum-of-squares of the conv output over the
    full (N, H, W) extent -> training-mode BatchNorm statistics."""
    if n_tiles == 1:
        r0 = 0
    else:
        r0 = pl.multiple_of(pl.program_id(1) * th, th)
    z = _conv3x3_rows(x_ref, w_ref, r0, th, w_out)

    @pl.when((pl.program_id(0) == 0) & (pl.program_id(1) == 0))
    def _init():
        sum_ref[...] = jnp.zeros_like(sum_ref)
        sq_ref[...] = jnp.zeros_like(sq_ref)

    sum_ref[...] += jnp.sum(z, axis=0, keepdims=True)
    sq_ref[...] += jnp.sum(z * z, axis=0, keepdims=True)


def _conv_bn_gelu_kernel(x_ref, w_ref, s_ref, t_ref, o_ref, *scratch,
                         th, w_out, n_tiles, pool):
    """Pass 2: conv + folded BatchNorm (y = conv*s + t) + exact GELU; for the second
    block the 2x2 max-pool is fused here and done entirely in VMEM."""
    if n_tiles == 1:
        r0 = 0
    else:
        r0 = pl.multiple_of(pl.program_id(1) * th, th)
    z = _conv3x3_rows(x_ref, w_ref, r0, th, w_out)
    y = z * s_ref[...] + t_ref[...]
    y = 0.5 * y * (1.0 + jax.lax.erf(y * _INV_SQRT2))        # exact erf-GELU
    cout = y.shape[-1]

    if pool:
        (y_scr,) = scratch
        y_scr[...] = y.reshape(th, w_out, cout)
        # Column pairs via strided VMEM reads, row pairs via a leading-dim reshape;
        # the full-resolution tile never leaves VMEM.
        even = y_scr[:, pl.ds(0, w_out // 2, stride=2), :]
        odd = y_scr[:, pl.ds(1, w_out // 2, stride=2), :]
        cmax = jnp.maximum(even, odd)                        # (th, w/2, c)
        cmax = cmax.reshape(th // 2, 2, w_out // 2, cout)
        o_ref[0] = jnp.max(cmax, axis=1).astype(o_ref.dtype)
    else:
        o_ref[0] = y.reshape(th, w_out, cout).astype(o_ref.dtype)


# ---------------------------------------------------------------------------
# One Conv3x3 + BN + GELU block (optionally with fused 2x2 max-pool)
# ---------------------------------------------------------------------------
def _conv_bn_gelu_block(x_pad, w, gamma, beta, *, pool):
    """x_pad: (N, H+2, W+2, Cin_p) padded NHWC; w: (3,3,Cin_p,Cout_p); gamma/beta: (Cout_p,).
    Returns (N, H, W, Cout_p) or, with pool=True, (N, H//2, W//2, Cout_p)."""
    n, hp, wp, cin_p = x_pad.shape
    h, w_out = hp - 2, wp - 2
    cout_p = w.shape[-1]
    th = _pick_tile_h(h, w_out)
    n_tiles = h // th
    m_total = n * h * w_out

    x_spec = pl.BlockSpec((1, hp, wp, cin_p), lambda ni, ti: (ni, 0, 0, 0))
    w_spec = pl.BlockSpec(w.shape, lambda ni, ti: (0, 0, 0, 0))       # VMEM-resident
    c_spec = pl.BlockSpec((1, cout_p), lambda ni, ti: (0, 0))         # VMEM-resident

    # Pass 1: global (training-mode, biased) BatchNorm statistics.
    sums, sqs = pl.pallas_call(
        functools.partial(_conv_stats_kernel, th=th, w_out=w_out, n_tiles=n_tiles),
        grid=(n, n_tiles),
        in_specs=[x_spec, w_spec],
        out_specs=(c_spec, c_spec),
        out_shape=(jax.ShapeDtypeStruct((1, cout_p), jnp.float32),
                   jax.ShapeDtypeStruct((1, cout_p), jnp.float32)),
        compiler_params=pltpu.CompilerParams(
            dimension_semantics=("arbitrary", "arbitrary"),
            vmem_limit_bytes=_VMEM_LIMIT),
    )(x_pad, w)

    mean = sums / m_total
    var = jnp.maximum(sqs / m_total - mean * mean, 0.0)
    scale = gamma.reshape(1, -1) * jax.lax.rsqrt(var + _EPS)
    shift = beta.reshape(1, -1) - mean * scale        # conv bias cancels under BN

    # Pass 2: conv + BN apply + GELU (+ fused 2x2 max-pool).
    if pool:
        out_shape = jax.ShapeDtypeStruct((n, h // 2, w_out // 2, cout_p), jnp.float32)
        o_spec = pl.BlockSpec((1, th // 2, w_out // 2, cout_p),
                              lambda ni, ti: (ni, ti, 0, 0))
        scratch = [pltpu.VMEM((th, w_out, cout_p), jnp.float32)]
    else:
        out_shape = jax.ShapeDtypeStruct((n, h, w_out, cout_p), jnp.float32)
        o_spec = pl.BlockSpec((1, th, w_out, cout_p), lambda ni, ti: (ni, ti, 0, 0))
        scratch = []

    return pl.pallas_call(
        functools.partial(_conv_bn_gelu_kernel, th=th, w_out=w_out,
                          n_tiles=n_tiles, pool=pool),
        grid=(n, n_tiles),
        in_specs=[x_spec, w_spec, c_spec, c_spec],
        out_specs=o_spec,
        out_shape=out_shape,
        scratch_shapes=scratch,
        compiler_params=pltpu.CompilerParams(
            dimension_semantics=("parallel", "parallel"),
            vmem_limit_bytes=_VMEM_LIMIT),
    )(x_pad, w, scale, shift)


# ---------------------------------------------------------------------------
# Parameters, wrapper, and a pure-JAX reference
# ---------------------------------------------------------------------------
def init_unet_down_params(key, in_channels, out_channels, z_channels):
    """Synthetic parameters with PyTorch-equivalent shapes.  Conv weights are stored HWIO
    (k, k, Cin, Cout) (== torch (Cout, Cin, k, k) transposed (2, 3, 1, 0)); BatchNorm
    gamma=1, beta=0 as at nn.BatchNorm2d init."""
    k = z_channels
    k1, k2, k3, k4 = jax.random.split(key, 4)
    return {
        "w1": 0.1 * jax.random.normal(k1, (k, k, in_channels, out_channels), jnp.float32),
        "b1": 0.1 * jax.random.normal(k2, (out_channels,), jnp.float32),
        "g1": jnp.ones((out_channels,), jnp.float32),
        "be1": jnp.zeros((out_channels,), jnp.float32),
        "w2": 0.1 * jax.random.normal(k3, (k, k, out_channels, out_channels), jnp.float32),
        "b2": 0.1 * jax.random.normal(k4, (out_channels,), jnp.float32),
        "g2": jnp.ones((out_channels,), jnp.float32),
        "be2": jnp.zeros((out_channels,), jnp.float32),
    }


def _pad_w(w, cin_p, cout_p):
    k0, k1, cin, cout = w.shape
    return jnp.zeros((k0, k1, cin_p, cout_p), w.dtype).at[:, :, :cin, :cout].set(w)


def _pad_v(v, cout_p):
    return jnp.zeros((cout_p,), v.dtype).at[: v.shape[0]].set(v)


def unet_down_forward(x_nchw, params, z_channels):
    """UnetDown.forward: ResidualConvBlock(is_res=False) then MaxPool2d(2). NCHW in/out."""
    assert z_channels == 3, "Conv2d(k, stride=1, pad=1) preserves H,W only for k=3"
    n, cin, h, w = x_nchw.shape
    assert h % 2 == 0 and w % 2 == 0, "MaxPool2d(2) needs even spatial dims"
    cout = params["g1"].shape[0]
    cin_p = _round_up(cin, _LANE)
    cout_p = _round_up(cout, _LANE)

    x = jnp.transpose(x_nchw, (0, 2, 3, 1)).astype(jnp.float32)        # NCHW -> NHWC

    # Block 1: Conv3x3 + BN + GELU.  (conv bias folds into the BN shift, see kernel)
    xp = jnp.pad(x, ((0, 0), (1, 1), (1, 1), (0, cin_p - cin)))
    h1 = _conv_bn_gelu_block(xp,
                             _pad_w(params["w1"], cin_p, cout_p),
                             _pad_v(params["g1"], cout_p),
                             _pad_v(params["be1"], cout_p),
                             pool=False)                               # (N, H, W, Cp)

    # Block 2: Conv3x3 + BN + GELU with the 2x2 max-pool fused into the kernel epilogue.
    h1p = jnp.pad(h1, ((0, 0), (1, 1), (1, 1), (0, 0)))
    y = _conv_bn_gelu_block(h1p,
                            _pad_w(params["w2"], cout_p, cout_p),
                            _pad_v(params["g2"], cout_p),
                            _pad_v(params["be2"], cout_p),
                            pool=True)                                 # (N, H/2, W/2, Cp)

    y = y[:, :, :, :cout]
    return jnp.transpose(y, (0, 3, 1, 2))                              # NHWC -> NCHW


def _reference_forward(x_nchw, params, z_channels):
    """Pure-JAX reference with identical forward semantics (no Pallas)."""
    x = jnp.transpose(x_nchw, (0, 2, 3, 1)).astype(jnp.float32)

    def block(xin, wk, bk, gk, bek):
        z = jax.lax.conv_general_dilated(
            xin, wk, window_strides=(1, 1), padding=((1, 1), (1, 1)),
            dimension_numbers=("NHWC", "HWIO", "NHWC")) + bk
        mean = jnp.mean(z, axis=(0, 1, 2), keepdims=True)
        var = jnp.mean((z - mean) ** 2, axis=(0, 1, 2), keepdims=True)
        yb = (z - mean) * jax.lax.rsqrt(var + _EPS) * gk + bek
        return 0.5 * yb * (1.0 + jax.lax.erf(yb * _INV_SQRT2))

    h1 = block(x, params["w1"], params["b1"], params["g1"], params["be1"])
    h2 = block(h1, params["w2"], params["b2"], params["g2"], params["be2"])
    nb, hh, ww, c = h2.shape
    r = h2.reshape(nb, hh // 2, 2, ww // 2, 2, c).max(axis=(2, 4))
    return jnp.transpose(r, (0, 3, 1, 2))


if __name__ == "__main__":
    batch, in_ch, out_ch, z_ch, spatial = 2, 4, 8, 3, 16

    key = jax.random.PRNGKey(0)
    k_x, k_p = jax.random.split(key)
    x = jax.random.normal(k_x, (batch, in_ch, spatial, spatial), jnp.float32)
    params = init_unet_down_params(k_p, in_ch, out_ch, z_ch)

    fwd = jax.jit(functools.partial(unet_down_forward, z_channels=z_ch))
    out = jax.block_until_ready(fwd(x, params))
    assert out.shape == (batch, out_ch, spatial // 2, spatial // 2), out.shape

    ref = jax.block_until_ready(_reference_forward(x, params, z_ch))
    max_err = float(jnp.max(jnp.abs(out - ref)))
    assert max_err < 1e-2, f"max abs error vs reference: {max_err}"

    print("KERNEL_OK")
</pallas_src>

<mosaic_0001>
module attributes {stable_mosaic.version = 11 : i64} {
  func.func @_conv_stats_kernel(%arg0: i32, %arg1: i32, %arg2: memref<1x18x18x128xf32, #tpu.memory_space<vmem>>, %arg3: memref<3x3x128x128xf32, #tpu.memory_space<vmem>>, %arg4: memref<1x128xf32, #tpu.memory_space<vmem>>, %arg5: memref<1x128xf32, #tpu.memory_space<vmem>>) attributes {dimension_semantics = [#tpu.dimension_semantics<arbitrary>, #tpu.dimension_semantics<arbitrary>], iteration_bounds = array<i64: 2, 1>, scalar_prefetch = 0 : i64, scratch_operands = 0 : i64, tpu.core_type = #tpu.core_type<tc>, window_params = [{transform_indices = @transform_0, window_bounds = array<i64: 1, 18, 18, 128>}, {pipeline_mode = #tpu.pipeline_mode<synchronous>, transform_indices = @transform_1, window_bounds = array<i64: 3, 3, 128, 128>}, {pipeline_mode = #tpu.pipeline_mode<synchronous>, transform_indices = @transform_2, window_bounds = array<i64: 1, 128>}, {pipeline_mode = #tpu.pipeline_mode<synchronous>, transform_indices = @transform_3, window_bounds = array<i64: 1, 128>}]} {
    %cst = arith.constant 0.000000e+00 : f32
    %0 = vector.broadcast %cst : f32 to vector<256x128xf32>
    %c0 = arith.constant 0 : index
    %c0_0 = arith.constant 0 : index
    %c0_1 = arith.constant 0 : index
    %c0_2 = arith.constant 0 : index
    %1 = vector.load %arg2[%c0, %c0_0, %c0_1, %c0_2] : memref<1x18x18x128xf32, #tpu.memory_space<vmem>>, vector<1x16x16x128xf32>
    %2 = vector.shape_cast %1 : vector<1x16x16x128xf32> to vector<16x16x128xf32>
    %3 = vector.shape_cast %2 : vector<16x16x128xf32> to vector<256x128xf32>
    %c0_3 = arith.constant 0 : index
    %c0_4 = arith.constant 0 : index
    %c0_5 = arith.constant 0 : index
    %c0_6 = arith.constant 0 : index
    %4 = vector.load %arg3[%c0_3, %c0_4, %c0_5, %c0_6] : memref<3x3x128x128xf32, #tpu.memory_space<vmem>>, vector<1x1x128x128xf32>
    %5 = vector.shape_cast %4 : vector<1x1x128x128xf32> to vector<128x128xf32>
    %cst_7 = arith.constant dense<0.000000e+00> : vector<256x128xf32>
    %6 = tpu.matmul %3, %5, %cst_7 {dimension_numbers = #tpu.dot_dimension_numbers<[1], [0], [0], [1], [0, 0, 1, 1], [], []>} : vector<256x128xf32>, vector<128x128xf32>, vector<256x128xf32> -> vector<256x128xf32>
    %7 = arith.addf %0, %6 : vector<256x128xf32>
    %c0_8 = arith.constant 0 : index
    %c0_9 = arith.constant 0 : index
    %c1 = arith.constant 1 : index
    %c0_10 = arith.constant 0 : index
    %8 = vector.load %arg2[%c0_8, %c0_9, %c1, %c0_10] : memref<1x18x18x128xf32, #tpu.memory_space<vmem>>, vector<1x16x16x128xf32>
    %9 = vector.shape_cast %8 : vector<1x16x16x128xf32> to vector<16x16x128xf32>
    %10 = vector.shape_cast %9 : vector<16x16x128xf32> to vector<256x128xf32>
    %c0_11 = arith.constant 0 : index
    %c1_12 = arith.constant 1 : index
    %c0_13 = arith.constant 0 : index
    %c0_14 = arith.constant 0 : index
    %11 = vector.load %arg3[%c0_11, %c1_12, %c0_13, %c0_14] : memref<3x3x128x128xf32, #tpu.memory_space<vmem>>, vector<1x1x128x128xf32>
    %12 = vector.shape_cast %11 : vector<1x1x128x128xf32> to vector<128x128xf32>
    %cst_15 = arith.constant dense<0.000000e+00> : vector<256x128xf32>
    %13 = tpu.matmul %10, %12, %cst_15 {dimension_numbers = #tpu.dot_dimension_numbers<[1], [0], [0], [1], [0, 0, 1, 1], [], []>} : vector<256x128xf32>, vector<128x128xf32>, vector<256x128xf32> -> vector<256x128xf32>
    %14 = arith.addf %7, %13 : vector<256x128xf32>
    %c0_16 = arith.constant 0 : index
    %c0_17 = arith.constant 0 : index
    %c2 = arith.constant 2 : index
    %c0_18 = arith.constant 0 : index
    %15 = vector.load %arg2[%c0_16, %c0_17, %c2, %c0_18] : memref<1x18x18x128xf32, #tpu.memory_space<vmem>>, vector<1x16x16x128xf32>
    %16 = vector.shape_cast %15 : vector<1x16x16x128xf32> to vector<16x16x128xf32>
    %17 = vector.shape_cast %16 : vector<16x16x128xf32> to vector<256x128xf32>
    %c0_19 = arith.constant 0 : index
    %c2_20 = arith.constant 2 : index
    %c0_21 = arith.constant 0 : index
    %c0_22 = arith.constant 0 : index
    %18 = vector.load %arg3[%c0_19, %c2_20, %c0_21, %c0_22] : memref<3x3x128x128xf32, #tpu.memory_space<vmem>>, vector<1x1x128x128xf32>
    %19 = vector.shape_cast %18 : vector<1x1x128x128xf32> to vector<128x128xf32>
    %cst_23 = arith.constant dense<0.000000e+00> : vector<256x128xf32>
    %20 = tpu.matmul %17, %19, %cst_23 {dimension_numbers = #tpu.dot_dimension_numbers<[1], [0], [0], [1], [0, 0, 1, 1], [], []>} : vector<256x128xf32>, vector<128x128xf32>, vector<256x128xf32> -> vector<256x128xf32>
    %21 = arith.addf %14, %20 : vector<256x128xf32>
    %c0_24 = arith.constant 0 : index
    %c1_25 = arith.constant 1 : index
    %c0_26 = arith.constant 0 : index
    %c0_27 = arith.constant 0 : index
    %22 = vector.load %arg2[%c0_24, %c1_25, %c0_26, %c0_27] : memref<1x18x18x128xf32, #tpu.memory_space<vmem>>, vector<1x16x16x128xf32>
    %23 = vector.shape_cast %22 : vector<1x16x16x128xf32> to vector<16x16x128xf32>
    %24 = vector.shape_cast %23 : vector<16x16x128xf32> to vector<256x128xf32>
    %c1_28 = arith.constant 1 : index
    %c0_29 = arith.constant 0 : index
    %c0_30 = arith.constant 0 : index
    %c0_31 = arith.constant 0 : index
    %25 = vector.load %arg3[%c1_28, %c0_29, %c0_30, %c0_31] : memref<3x3x128x128xf32, #tpu.memory_space<vmem>>, vector<1x1x128x128xf32>
    %26 = vector.shape_cast %25 : vector<1x1x128x128xf32> to vector<128x128xf32>
    %cst_32 = arith.constant dense<0.000000e+00> : vector<256x128xf32>
    %27 = tpu.matmul %24, %26, %cst_32 {dimension_numbers = #tpu.dot_dimension_numbers<[1], [0], [0], [1], [0, 0, 1, 1], [], []>} : vector<256x128xf32>, vector<128x128xf32>, vector<256x128xf32> -> vector<256x128xf32>
    %28 = arith.addf %21, %27 : vector<256x128xf32>
    %c0_33 = arith.constant 0 : index
    %c1_34 = arith.constant 1 : index
    %c1_35 = arith.constant 1 : index
    %c0_36 = arith.constant 0 : index
    %29 = vector.load %arg2[%c0_33, %c1_34, %c1_35, %c0_36] : memref<1x18x18x128xf32, #tpu.memory_space<vmem>>, vector<1x16x16x128xf32>
    %30 = vector.shape_cast %29 : vector<1x16x16x128xf32> to vector<16x16x128xf32>
    %31 = vector.shape_cast %30 : vector<16x16x128xf32> to vector<256x128xf32>
    %c1_37 = arith.constant 1 : index
    %c1_38 = arith.constant 1 : index
    %c0_39 = arith.constant 0 : index
    %c0_40 = arith.constant 0 : index
    %32 = vector.load %arg3[%c1_37, %c1_38, %c0_39, %c0_40] : memref<3x3x128x128xf32, #tpu.memory_space<vmem>>, vector<1x1x128x128xf32>
    %33 = vector.shape_cast %32 : vector<1x1x128x128xf32> to vector<128x128xf32>
    %cst_41 = arith.constant dense<0.000000e+00> : vector<256x128xf32>
    %34 = tpu.matmul %31, %33, %cst_41 {dimension_numbers = #tpu.dot_dimension_numbers<[1], [0], [0], [1], [0, 0, 1, 1], [], []>} : vector<256x128xf32>, vector<128x128xf32>, vector<256x128xf32> -> vector<256x128xf32>
    %35 = arith.addf %28, %34 : vector<256x128xf32>
    %c0_42 = arith.constant 0 : index
    %c1_43 = arith.constant 1 : index
    %c2_44 = arith.constant 2 : index
    %c0_45 = arith.constant 0 : index
    %36 = vector.load %arg2[%c0_42, %c1_43, %c2_44, %c0_45] : memref<1x18x18x128xf32, #tpu.memory_space<vmem>>, vector<1x16x16x128xf32>
    %37 = vector.shape_cast %36 : vector<1x16x16x128xf32> to vector<16x16x128xf32>
    %38 = vector.shape_cast %37 : vector<16x16x128xf32> to vector<256x128xf32>
    %c1_46 = arith.constant 1 : index
    %c2_47 = arith.constant 2 : index
    %c0_48 = arith.constant 0 : index
    %c0_49 = arith.constant 0 : index
    %39 = vector.load %arg3[%c1_46, %c2_47, %c0_48, %c0_49] : memref<3x3x128x128xf32, #tpu.memory_space<vmem>>, vector<1x1x128x128xf32>
    %40 = vector.shape_cast %39 : vector<1x1x128x128xf32> to vector<128x128xf32>
    %cst_50 = arith.constant dense<0.000000e+00> : vector<256x128xf32>
    %41 = tpu.matmul %38, %40, %cst_50 {dimension_numbers = #tpu.dot_dimension_numbers<[1], [0], [0], [1], [0, 0, 1, 1], [], []>} : vector<256x128xf32>, vector<128x128xf32>, vector<256x128xf32> -> vector<256x128xf32>
    %42 = arith.addf %35, %41 : vector<256x128xf32>
    %c0_51 = arith.constant 0 : index
    %c2_52 = arith.constant 2 : index
    %c0_53 = arith.constant 0 : index
    %c0_54 = arith.constant 0 : index
    %43 = vector.load %arg2[%c0_51, %c2_52, %c0_53, %c0_54] : memref<1x18x18x128xf32, #tpu.memory_space<vmem>>, vector<1x16x16x128xf32>
    %44 = vector.shape_cast %43 : vector<1x16x16x128xf32> to vector<16x16x128xf32>
    %45 = vector.shape_cast %44 : vector<16x16x128xf32> to vector<256x128xf32>
    %c2_55 = arith.constant 2 : index
    %c0_56 = arith.constant 0 : index
    %c0_57 = arith.constant 0 : index
    %c0_58 = arith.constant 0 : index
    %46 = vector.load %arg3[%c2_55, %c0_56, %c0_57, %c0_58] : memref<3x3x128x128xf32, #tpu.memory_space<vmem>>, vector<1x1x128x128xf32>
    %47 = vector.shape_cast %46 : vector<1x1x128x128xf32> to vector<128x128xf32>
    %cst_59 = arith.constant dense<0.000000e+00> : vector<256x128xf32>
    %48 = tpu.matmul %45, %47, %cst_59 {dimension_numbers = #tpu.dot_dimension_numbers<[1], [0], [0], [1], [0, 0, 1, 1], [], []>} : vector<256x128xf32>, vector<128x128xf32>, vector<256x128xf32> -> vector<256x128xf32>
    %49 = arith.addf %42, %48 : vector<256x128xf32>
    %c0_60 = arith.constant 0 : index
    %c2_61 = arith.constant 2 : index
    %c1_62 = arith.constant 1 : index
    %c0_63 = arith.constant 0 : index
    %50 = vector.load %arg2[%c0_60, %c2_61, %c1_62, %c0_63] : memref<1x18x18x128xf32, #tpu.memory_space<vmem>>, vector<1x16x16x128xf32>
    %51 = vector.shape_cast %50 : vector<1x16x16x128xf32> to vector<16x16x128xf32>
    %52 = vector.shape_cast %51 : vector<16x16x128xf32> to vector<256x128xf32>
    %c2_64 = arith.constant 2 : index
    %c1_65 = arith.constant 1 : index
    %c0_66 = arith.constant 0 : index
    %c0_67 = arith.constant 0 : index
    %53 = vector.load %arg3[%c2_64, %c1_65, %c0_66, %c0_67] : memref<3x3x128x128xf32, #tpu.memory_space<vmem>>, vector<1x1x128x128xf32>
    %54 = vector.shape_cast %53 : vector<1x1x128x128xf32> to vector<128x128xf32>
    %cst_68 = arith.constant dense<0.000000e+00> : vector<256x128xf32>
    %55 = tpu.matmul %52, %54, %cst_68 {dimension_numbers = #tpu.dot_dimension_numbers<[1], [0], [0], [1], [0, 0, 1, 1], [], []>} : vector<256x128xf32>, vector<128x128xf32>, vector<256x128xf32> -> vector<256x128xf32>
    %56 = arith.addf %49, %55 : vector<256x128xf32>
    %c0_69 = arith.constant 0 : index
    %c2_70 = arith.constant 2 : index
    %c2_71 = arith.constant 2 : index
    %c0_72 = arith.constant 0 : index
    %57 = vector.load %arg2[%c0_69, %c2_70, %c2_71, %c0_72] : memref<1x18x18x128xf32, #tpu.memory_space<vmem>>, vector<1x16x16x128xf32>
    %58 = vector.shape_cast %57 : vector<1x16x16x128xf32> to vector<16x16x128xf32>
    %59 = vector.shape_cast %58 : vector<16x16x128xf32> to vector<256x128xf32>
    %c2_73 = arith.constant 2 : index
    %c2_74 = arith.constant 2 : index
    %c0_75 = arith.constant 0 : index
    %c0_76 = arith.constant 0 : index
    %60 = vector.load %arg3[%c2_73, %c2_74, %c0_75, %c0_76] : memref<3x3x128x128xf32, #tpu.memory_space<vmem>>, vector<1x1x128x128xf32>
    %61 = vector.shape_cast %60 : vector<1x1x128x128xf32> to vector<128x128xf32>
    %cst_77 = arith.constant dense<0.000000e+00> : vector<256x128xf32>
    %62 = tpu.matmul %59, %61, %cst_77 {dimension_numbers = #tpu.dot_dimension_numbers<[1], [0], [0], [1], [0, 0, 1, 1], [], []>} : vector<256x128xf32>, vector<128x128xf32>, vector<256x128xf32> -> vector<256x128xf32>
    %63 = arith.addf %56, %62 : vector<256x128xf32>
    %c0_i32 = arith.constant 0 : i32
    %64 = arith.cmpi eq, %arg0, %c0_i32 : i32
    %c0_i32_78 = arith.constant 0 : i32
    %65 = arith.cmpi eq, %arg1, %c0_i32_78 : i32
    %66 = arith.andi %64, %65 : i1
    %67 = arith.extui %66 : i1 to i32
    %c0_i32_79 = arith.constant 0 : i32
    %68 = arith.cmpi ne, %67, %c0_i32_79 : i32
    scf.if %68 {
      %cst_90 = arith.constant 0.000000e+00 : f32
      %80 = vector.broadcast %cst_90 : f32 to vector<1x128xf32>
      %c0_91 = arith.constant 0 : index
      %c0_92 = arith.constant 0 : index
      %81 = vector.load %arg4[%c0_91, %c0_92] : memref<1x128xf32, #tpu.memory_space<vmem>>, vector<1x128xf32>
      tpu.vector_store %arg4[%c0_91, %c0_92], %80 {strides = array<i32>} : memref<1x128xf32, #tpu.memory_space<vmem>>, vector<1x128xf32>,
      %cst_93 = arith.constant 0.000000e+00 : f32
      %82 = vector.broadcast %cst_93 : f32 to vector<1x128xf32>
      %c0_94 = arith.constant 0 : index
      %c0_95 = arith.constant 0 : index
      %83 = vector.load %arg5[%c0_94, %c0_95] : memref<1x128xf32, #tpu.memory_space<vmem>>, vector<1x128xf32>
      tpu.vector_store %arg5[%c0_94, %c0_95], %82 {strides = array<i32>} : memref<1x128xf32, #tpu.memory_space<vmem>>, vector<1x128xf32>,
    } else {
    }
    %c0_80 = arith.constant 0 : index
    %c0_81 = arith.constant 0 : index
    %69 = vector.load %arg4[%c0_80, %c0_81] : memref<1x128xf32, #tpu.memory_space<vmem>>, vector<1x128xf32>
    %cst_82 = arith.constant dense<0.000000e+00> : vector<128xf32>
    %70 = vector.multi_reduction <add>, %63, %cst_82 [0] : vector<256x128xf32> to vector<128xf32>
    %71 = vector.shape_cast %70 : vector<128xf32> to vector<1x128xf32>
    %72 = arith.addf %69, %71 : vector<1x128xf32>
    %c0_83 = arith.constant 0 : index
    %c0_84 = arith.constant 0 : index
    %73 = vector.load %arg4[%c0_83, %c0_84] : memref<1x128xf32, #tpu.memory_space<vmem>>, vector<1x128xf32>
    tpu.vector_store %arg4[%c0_83, %c0_84], %72 {strides = array<i32>} : memref<1x128xf32, #tpu.memory_space<vmem>>, vector<1x128xf32>,
    %c0_85 = arith.constant 0 : index
    %c0_86 = arith.constant 0 : index
    %74 = vector.load %arg5[%c0_85, %c0_86] : memref<1x128xf32, #tpu.memory_space<vmem>>, vector<1x128xf32>
    %75 = arith.mulf %63, %63 : vector<256x128xf32>
    %cst_87 = arith.constant dense<0.000000e+00> : vector<128xf32>
    %76 = vector.multi_reduction <add>, %75, %cst_87 [0] : vector<256x128xf32> to vector<128xf32>
    %77 = vector.shape_cast %76 : vector<128xf32> to vector<1x128xf32>
    %78 = arith.addf %74, %77 : vector<1x128xf32>
    %c0_88 = arith.constant 0 : index
    %c0_89 = arith.constant 0 : index
    %79 = vector.load %arg5[%c0_88, %c0_89] : memref<1x128xf32, #tpu.memory_space<vmem>>, vector<1x128xf32>
    tpu.vector_store %arg5[%c0_88, %c0_89], %78 {strides = array<i32>} : memref<1x128xf32, #tpu.memory_space<vmem>>, vector<1x128xf32>,
    return
  }
  func.func @transform_0(%arg0: i32, %arg1: i32) -> (i32, i32, i32, i32) {
    %c0_i32 = arith.constant 0 : i32
    %c0_i32_0 = arith.constant 0 : i32
    %c0_i32_1 = arith.constant 0 : i32
    %c0_i32_2 = arith.constant 0 : i32
    return %arg0, %c0_i32, %c0_i32_0, %c0_i32_1 : i32, i32, i32, i32
  }
  func.func @transform_1(%arg0: i32, %arg1: i32) -> (i32, i32, i32, i32) {
    %c0_i32 = arith.constant 0 : i32
    %c0_i32_0 = arith.constant 0 : i32
    %c0_i32_1 = arith.constant 0 : i32
    %c0_i32_2 = arith.constant 0 : i32
    %c0_i32_3 = arith.constant 0 : i32
    return %c0_i32, %c0_i32_0, %c0_i32_1, %c0_i32_2 : i32, i32, i32, i32
  }
  func.func @transform_2(%arg0: i32, %arg1: i32) -> (i32, i32) {
    %c0_i32 = arith.constant 0 : i32
    %c0_i32_0 = arith.constant 0 : i32
    %c0_i32_1 = arith.constant 0 : i32
    return %c0_i32, %c0_i32_0 : i32, i32
  }
  func.func @transform_3(%arg0: i32, %arg1: i32) -> (i32, i32) {
    %c0_i32 = arith.constant 0 : i32
    %c0_i32_0 = arith.constant 0 : i32
    %c0_i32_1 = arith.constant 0 : i32
    return %c0_i32, %c0_i32_0 : i32, i32
  }
}

module attributes {stable_mosaic.version = 11 : i64} {
  func.func @_conv_bn_gelu_kernel(%arg0: i32, %arg1: i32, %arg2: memref<1x18x18x128xf32, #tpu.memory_space<vmem>>, %arg3: memref<3x3x128x128xf32, #tpu.memory_space<vmem>>, %arg4: memref<1x128xf32, #tpu.memory_space<vmem>>, %arg5: memref<1x128xf32, #tpu.memory_space<vmem>>, %arg6: memref<1x16x16x128xf32, #tpu.memory_space<vmem>>) attributes {dimension_semantics = [#tpu.dimension_semantics<parallel>, #tpu.dimension_semantics<parallel>], iteration_bounds = array<i64: 2, 1>, scalar_prefetch = 0 : i64, scratch_operands = 0 : i64, tpu.core_type = #tpu.core_type<tc>, window_params = [{transform_indices = @transform_0, window_bounds = array<i64: 1, 18, 18, 128>}, {pipeline_mode = #tpu.pipeline_mode<synchronous>, transform_indices = @transform_1, window_bounds = array<i64: 3, 3, 128, 128>}, {pipeline_mode = #tpu.pipeline_mode<synchronous>, transform_indices = @transform_2, window_bounds = array<i64: 1, 128>}, {pipeline_mode = #tpu.pipeline_mode<synchronous>, transform_indices = @transform_3, window_bounds = array<i64: 1, 128>}, {transform_indices = @transform_4, window_bounds = array<i64: 1, 16, 16, 128>}]} {
    %cst = arith.constant 0.000000e+00 : f32
    %0 = vector.broadcast %cst : f32 to vector<256x128xf32>
    %c0 = arith.constant 0 : index
    %c0_0 = arith.constant 0 : index
    %c0_1 = arith.constant 0 : index
    %c0_2 = arith.constant 0 : index
    %1 = vector.load %arg2[%c0, %c0_0, %c0_1, %c0_2] : memref<1x18x18x128xf32, #tpu.memory_space<vmem>>, vector<1x16x16x128xf32>
    %2 = vector.shape_cast %1 : vector<1x16x16x128xf32> to vector<16x16x128xf32>
    %3 = vector.shape_cast %2 : vector<16x16x128xf32> to vector<256x128xf32>
    %c0_3 = arith.constant 0 : index
    %c0_4 = arith.constant 0 : index
    %c0_5 = arith.constant 0 : index
    %c0_6 = arith.constant 0 : index
    %4 = vector.load %arg3[%c0_3, %c0_4, %c0_5, %c0_6] : memref<3x3x128x128xf32, #tpu.memory_space<vmem>>, vector<1x1x128x128xf32>
    %5 = vector.shape_cast %4 : vector<1x1x128x128xf32> to vector<128x128xf32>
    %cst_7 = arith.constant dense<0.000000e+00> : vector<256x128xf32>
    %6 = tpu.matmul %3, %5, %cst_7 {dimension_numbers = #tpu.dot_dimension_numbers<[1], [0], [0], [1], [0, 0, 1, 1], [], []>} : vector<256x128xf32>, vector<128x128xf32>, vector<256x128xf32> -> vector<256x128xf32>
    %7 = arith.addf %0, %6 : vector<256x128xf32>
    %c0_8 = arith.constant 0 : index
    %c0_9 = arith.constant 0 : index
    %c1 = arith.constant 1 : index
    %c0_10 = arith.constant 0 : index
    %8 = vector.load %arg2[%c0_8, %c0_9, %c1, %c0_10] : memref<1x18x18x128xf32, #tpu.memory_space<vmem>>, vector<1x16x16x128xf32>
    %9 = vector.shape_cast %8 : vector<1x16x16x128xf32> to vector<16x16x128xf32>
    %10 = vector.shape_cast %9 : vector<16x16x128xf32> to vector<256x128xf32>
    %c0_11 = arith.constant 0 : index
    %c1_12 = arith.constant 1 : index
    %c0_13 = arith.constant 0 : index
    %c0_14 = arith.constant 0 : index
    %11 = vector.load %arg3[%c0_11, %c1_12, %c0_13, %c0_14] : memref<3x3x128x128xf32, #tpu.memory_space<vmem>>, vector<1x1x128x128xf32>
    %12 = vector.shape_cast %11 : vector<1x1x128x128xf32> to vector<128x128xf32>
    %cst_15 = arith.constant dense<0.000000e+00> : vector<256x128xf32>
    %13 = tpu.matmul %10, %12, %cst_15 {dimension_numbers = #tpu.dot_dimension_numbers<[1], [0], [0], [1], [0, 0, 1, 1], [], []>} : vector<256x128xf32>, vector<128x128xf32>, vector<256x128xf32> -> vector<256x128xf32>
    %14 = arith.addf %7, %13 : vector<256x128xf32>
    %c0_16 = arith.constant 0 : index
    %c0_17 = arith.constant 0 : index
    %c2 = arith.constant 2 : index
    %c0_18 = arith.constant 0 : index
    %15 = vector.load %arg2[%c0_16, %c0_17, %c2, %c0_18] : memref<1x18x18x128xf32, #tpu.memory_space<vmem>>, vector<1x16x16x128xf32>
    %16 = vector.shape_cast %15 : vector<1x16x16x128xf32> to vector<16x16x128xf32>
    %17 = vector.shape_cast %16 : vector<16x16x128xf32> to vector<256x128xf32>
    %c0_19 = arith.constant 0 : index
    %c2_20 = arith.constant 2 : index
    %c0_21 = arith.constant 0 : index
    %c0_22 = arith.constant 0 : index
    %18 = vector.load %arg3[%c0_19, %c2_20, %c0_21, %c0_22] : memref<3x3x128x128xf32, #tpu.memory_space<vmem>>, vector<1x1x128x128xf32>
    %19 = vector.shape_cast %18 : vector<1x1x128x128xf32> to vector<128x128xf32>
    %cst_23 = arith.constant dense<0.000000e+00> : vector<256x128xf32>
    %20 = tpu.matmul %17, %19, %cst_23 {dimension_numbers = #tpu.dot_dimension_numbers<[1], [0], [0], [1], [0, 0, 1, 1], [], []>} : vector<256x128xf32>, vector<128x128xf32>, vector<256x128xf32> -> vector<256x128xf32>
    %21 = arith.addf %14, %20 : vector<256x128xf32>
    %c0_24 = arith.constant 0 : index
    %c1_25 = arith.constant 1 : index
    %c0_26 = arith.constant 0 : index
    %c0_27 = arith.constant 0 : index
    %22 = vector.load %arg2[%c0_24, %c1_25, %c0_26, %c0_27] : memref<1x18x18x128xf32, #tpu.memory_space<vmem>>, vector<1x16x16x128xf32>
    %23 = vector.shape_cast %22 : vector<1x16x16x128xf32> to vector<16x16x128xf32>
    %24 = vector.shape_cast %23 : vector<16x16x128xf32> to vector<256x128xf32>
    %c1_28 = arith.constant 1 : index
    %c0_29 = arith.constant 0 : index
    %c0_30 = arith.constant 0 : index
    %c0_31 = arith.constant 0 : index
    %25 = vector.load %arg3[%c1_28, %c0_29, %c0_30, %c0_31] : memref<3x3x128x128xf32, #tpu.memory_space<vmem>>, vector<1x1x128x128xf32>
    %26 = vector.shape_cast %25 : vector<1x1x128x128xf32> to vector<128x128xf32>
    %cst_32 = arith.constant dense<0.000000e+00> : vector<256x128xf32>
    %27 = tpu.matmul %24, %26, %cst_32 {dimension_numbers = #tpu.dot_dimension_numbers<[1], [0], [0], [1], [0, 0, 1, 1], [], []>} : vector<256x128xf32>, vector<128x128xf32>, vector<256x128xf32> -> vector<256x128xf32>
    %28 = arith.addf %21, %27 : vector<256x128xf32>
    %c0_33 = arith.constant 0 : index
    %c1_34 = arith.constant 1 : index
    %c1_35 = arith.constant 1 : index
    %c0_36 = arith.constant 0 : index
    %29 = vector.load %arg2[%c0_33, %c1_34, %c1_35, %c0_36] : memref<1x18x18x128xf32, #tpu.memory_space<vmem>>, vector<1x16x16x128xf32>
    %30 = vector.shape_cast %29 : vector<1x16x16x128xf32> to vector<16x16x128xf32>
    %31 = vector.shape_cast %30 : vector<16x16x128xf32> to vector<256x128xf32>
    %c1_37 = arith.constant 1 : index
    %c1_38 = arith.constant 1 : index
    %c0_39 = arith.constant 0 : index
    %c0_40 = arith.constant 0 : index
    %32 = vector.load %arg3[%c1_37, %c1_38, %c0_39, %c0_40] : memref<3x3x128x128xf32, #tpu.memory_space<vmem>>, vector<1x1x128x128xf32>
    %33 = vector.shape_cast %32 : vector<1x1x128x128xf32> to vector<128x128xf32>
    %cst_41 = arith.constant dense<0.000000e+00> : vector<256x128xf32>
    %34 = tpu.matmul %31, %33, %cst_41 {dimension_numbers = #tpu.dot_dimension_numbers<[1], [0], [0], [1], [0, 0, 1, 1], [], []>} : vector<256x128xf32>, vector<128x128xf32>, vector<256x128xf32> -> vector<256x128xf32>
    %35 = arith.addf %28, %34 : vector<256x128xf32>
    %c0_42 = arith.constant 0 : index
    %c1_43 = arith.constant 1 : index
    %c2_44 = arith.constant 2 : index
    %c0_45 = arith.constant 0 : index
    %36 = vector.load %arg2[%c0_42, %c1_43, %c2_44, %c0_45] : memref<1x18x18x128xf32, #tpu.memory_space<vmem>>, vector<1x16x16x128xf32>
    %37 = vector.shape_cast %36 : vector<1x16x16x128xf32> to vector<16x16x128xf32>
    %38 = vector.shape_cast %37 : vector<16x16x128xf32> to vector<256x128xf32>
    %c1_46 = arith.constant 1 : index
    %c2_47 = arith.constant 2 : index
    %c0_48 = arith.constant 0 : index
    %c0_49 = arith.constant 0 : index
    %39 = vector.load %arg3[%c1_46, %c2_47, %c0_48, %c0_49] : memref<3x3x128x128xf32, #tpu.memory_space<vmem>>, vector<1x1x128x128xf32>
    %40 = vector.shape_cast %39 : vector<1x1x128x128xf32> to vector<128x128xf32>
    %cst_50 = arith.constant dense<0.000000e+00> : vector<256x128xf32>
    %41 = tpu.matmul %38, %40, %cst_50 {dimension_numbers = #tpu.dot_dimension_numbers<[1], [0], [0], [1], [0, 0, 1, 1], [], []>} : vector<256x128xf32>, vector<128x128xf32>, vector<256x128xf32> -> vector<256x128xf32>
    %42 = arith.addf %35, %41 : vector<256x128xf32>
    %c0_51 = arith.constant 0 : index
    %c2_52 = arith.constant 2 : index
    %c0_53 = arith.constant 0 : index
    %c0_54 = arith.constant 0 : index
    %43 = vector.load %arg2[%c0_51, %c2_52, %c0_53, %c0_54] : memref<1x18x18x128xf32, #tpu.memory_space<vmem>>, vector<1x16x16x128xf32>
    %44 = vector.shape_cast %43 : vector<1x16x16x128xf32> to vector<16x16x128xf32>
    %45 = vector.shape_cast %44 : vector<16x16x128xf32> to vector<256x128xf32>
    %c2_55 = arith.constant 2 : index
    %c0_56 = arith.constant 0 : index
    %c0_57 = arith.constant 0 : index
    %c0_58 = arith.constant 0 : index
    %46 = vector.load %arg3[%c2_55, %c0_56, %c0_57, %c0_58] : memref<3x3x128x128xf32, #tpu.memory_space<vmem>>, vector<1x1x128x128xf32>
    %47 = vector.shape_cast %46 : vector<1x1x128x128xf32> to vector<128x128xf32>
    %cst_59 = arith.constant dense<0.000000e+00> : vector<256x128xf32>
    %48 = tpu.matmul %45, %47, %cst_59 {dimension_numbers = #tpu.dot_dimension_numbers<[1], [0], [0], [1], [0, 0, 1, 1], [], []>} : vector<256x128xf32>, vector<128x128xf32>, vector<256x128xf32> -> vector<256x128xf32>
    %49 = arith.addf %42, %48 : vector<256x128xf32>
    %c0_60 = arith.constant 0 : index
    %c2_61 = arith.constant 2 : index
    %c1_62 = arith.constant 1 : index
    %c0_63 = arith.constant 0 : index
    %50 = vector.load %arg2[%c0_60, %c2_61, %c1_62, %c0_63] : memref<1x18x18x128xf32, #tpu.memory_space<vmem>>, vector<1x16x16x128xf32>
    %51 = vector.shape_cast %50 : vector<1x16x16x128xf32> to vector<16x16x128xf32>
    %52 = vector.shape_cast %51 : vector<16x16x128xf32> to vector<256x128xf32>
    %c2_64 = arith.constant 2 : index
    %c1_65 = arith.constant 1 : index
    %c0_66 = arith.constant 0 : index
    %c0_67 = arith.constant 0 : index
    %53 = vector.load %arg3[%c2_64, %c1_65, %c0_66, %c0_67] : memref<3x3x128x128xf32, #tpu.memory_space<vmem>>, vector<1x1x128x128xf32>
    %54 = vector.shape_cast %53 : vector<1x1x128x128xf32> to vector<128x128xf32>
    %cst_68 = arith.constant dense<0.000000e+00> : vector<256x128xf32>
    %55 = tpu.matmul %52, %54, %cst_68 {dimension_numbers = #tpu.dot_dimension_numbers<[1], [0], [0], [1], [0, 0, 1, 1], [], []>} : vector<256x128xf32>, vector<128x128xf32>, vector<256x128xf32> -> vector<256x128xf32>
    %56 = arith.addf %49, %55 : vector<256x128xf32>
    %c0_69 = arith.constant 0 : index
    %c2_70 = arith.constant 2 : index
    %c2_71 = arith.constant 2 : index
    %c0_72 = arith.constant 0 : index
    %57 = vector.load %arg2[%c0_69, %c2_70, %c2_71, %c0_72] : memref<1x18x18x128xf32, #tpu.memory_space<vmem>>, vector<1x16x16x128xf32>
    %58 = vector.shape_cast %57 : vector<1x16x16x128xf32> to vector<16x16x128xf32>
    %59 = vector.shape_cast %58 : vector<16x16x128xf32> to vector<256x128xf32>
    %c2_73 = arith.constant 2 : index
    %c2_74 = arith.constant 2 : index
    %c0_75 = arith.constant 0 : index
    %c0_76 = arith.constant 0 : index
    %60 = vector.load %arg3[%c2_73, %c2_74, %c0_75, %c0_76] : memref<3x3x128x128xf32, #tpu.memory_space<vmem>>, vector<1x1x128x128xf32>
    %61 = vector.shape_cast %60 : vector<1x1x128x128xf32> to vector<128x128xf32>
    %cst_77 = arith.constant dense<0.000000e+00> : vector<256x128xf32>
    %62 = tpu.matmul %59, %61, %cst_77 {dimension_numbers = #tpu.dot_dimension_numbers<[1], [0], [0], [1], [0, 0, 1, 1], [], []>} : vector<256x128xf32>, vector<128x128xf32>, vector<256x128xf32> -> vector<256x128xf32>
    %63 = arith.addf %56, %62 : vector<256x128xf32>
    %c0_78 = arith.constant 0 : index
    %c0_79 = arith.constant 0 : index
    %64 = vector.load %arg4[%c0_78, %c0_79] : memref<1x128xf32, #tpu.memory_space<vmem>>, vector<1x128xf32>
    %65 = vector.broadcast %64 : vector<1x128xf32> to vector<256x128xf32>
    %66 = arith.mulf %63, %65 : vector<256x128xf32>
    %c0_80 = arith.constant 0 : index
    %c0_81 = arith.constant 0 : index
    %67 = vector.load %arg5[%c0_80, %c0_81] : memref<1x128xf32, #tpu.memory_space<vmem>>, vector<1x128xf32>
    %68 = vector.broadcast %67 : vector<1x128xf32> to vector<256x128xf32>
    %69 = arith.addf %66, %68 : vector<256x128xf32>
    %cst_82 = arith.constant 5.000000e-01 : f32
    %70 = vector.broadcast %cst_82 : f32 to vector<256x128xf32>
    %71 = arith.mulf %70, %69 : vector<256x128xf32>
    %cst_83 = arith.constant 0.707106769 : f32
    %72 = vector.broadcast %cst_83 : f32 to vector<256x128xf32>
    %73 = arith.mulf %69, %72 : vector<256x128xf32>
    %74 = math.erf %73 : vector<256x128xf32>
    %cst_84 = arith.constant 1.000000e+00 : f32
    %75 = vector.broadcast %cst_84 : f32 to vector<256x128xf32>
    %76 = arith.addf %75, %74 : vector<256x128xf32>
    %77 = arith.mulf %71, %76 : vector<256x128xf32>
    %78 = vector.shape_cast %77 : vector<256x128xf32> to vector<16x16x128xf32>
    %c0_85 = arith.constant 0 : index
    %c0_86 = arith.constant 0 : index
    %c0_87 = arith.constant 0 : index
    %c0_88 = arith.constant 0 : index
    %79 = vector.load %arg6[%c0_85, %c0_86, %c0_87, %c0_88] : memref<1x16x16x128xf32, #tpu.memory_space<vmem>>, vector<1x16x16x128xf32>
    %80 = vector.shape_cast %79 : vector<1x16x16x128xf32> to vector<16x16x128xf32>
    %81 = vector.shape_cast %78 : vector<16x16x128xf32> to vector<1x16x16x128xf32>
    tpu.vector_store %arg6[%c0_85, %c0_86, %c0_87, %c0_88], %81 {strides = array<i32>} : memref<1x16x16x128xf32, #tpu.memory_space<vmem>>, vector<1x16x16x128xf32>,
    return
  }
  func.func @transform_0(%arg0: i32, %arg1: i32) -> (i32, i32, i32, i32) {
    %c0_i32 = arith.constant 0 : i32
    %c0_i32_0 = arith.constant 0 : i32
    %c0_i32_1 = arith.constant 0 : i32
    %c0_i32_2 = arith.constant 0 : i32
    return %arg0, %c0_i32, %c0_i32_0, %c0_i32_1 : i32, i32, i32, i32
  }
  func.func @transform_1(%arg0: i32, %arg1: i32) -> (i32, i32, i32, i32) {
    %c0_i32 = arith.constant 0 : i32
    %c0_i32_0 = arith.constant 0 : i32
    %c0_i32_1 = arith.constant 0 : i32
    %c0_i32_2 = arith.constant 0 : i32
    %c0_i32_3 = arith.constant 0 : i32
    return %c0_i32, %c0_i32_0, %c0_i32_1, %c0_i32_2 : i32, i32, i32, i32
  }
  func.func @transform_2(%arg0: i32, %arg1: i32) -> (i32, i32) {
    %c0_i32 = arith.constant 0 : i32
    %c0_i32_0 = arith.constant 0 : i32
    %c0_i32_1 = arith.constant 0 : i32
    return %c0_i32, %c0_i32_0 : i32, i32
  }
  func.func @transform_3(%arg0: i32, %arg1: i32) -> (i32, i32) {
    %c0_i32 = arith.constant 0 : i32
    %c0_i32_0 = arith.constant 0 : i32
    %c0_i32_1 = arith.constant 0 : i32
    return %c0_i32, %c0_i32_0 : i32, i32
  }
  func.func @transform_4(%arg0: i32, %arg1: i32) -> (i32, i32, i32, i32) {
    %c0_i32 = arith.constant 0 : i32
    %c0_i32_0 = arith.constant 0 : i32
    %c0_i32_1 = arith.constant 0 : i32
    return %arg0, %arg1, %c0_i32, %c0_i32_0 : i32, i32, i32, i32
  }
}

module attributes {stable_mosaic.version = 11 : i64} {
  func.func @_conv_bn_gelu_kernel(%arg0: i32, %arg1: i32, %arg2: memref<1x18x18x128xf32, #tpu.memory_space<vmem>>, %arg3: memref<3x3x128x128xf32, #tpu.memory_space<vmem>>, %arg4: memref<1x128xf32, #tpu.memory_space<vmem>>, %arg5: memref<1x128xf32, #tpu.memory_space<vmem>>, %arg6: memref<1x8x8x128xf32, #tpu.memory_space<vmem>>, %arg7: memref<16x16x128xf32, #tpu.memory_space<vmem>>) attributes {dimension_semantics = [#tpu.dimension_semantics<parallel>, #tpu.dimension_semantics<parallel>], iteration_bounds = array<i64: 2, 1>, scalar_prefetch = 0 : i64, scratch_operands = 1 : i64, tpu.core_type = #tpu.core_type<tc>, window_params = [{transform_indices = @transform_0, window_bounds = array<i64: 1, 18, 18, 128>}, {pipeline_mode = #tpu.pipeline_mode<synchronous>, transform_indices = @transform_1, window_bounds = array<i64: 3, 3, 128, 128>}, {pipeline_mode = #tpu.pipeline_mode<synchronous>, transform_indices = @transform_2, window_bounds = array<i64: 1, 128>}, {pipeline_mode = #tpu.pipeline_mode<synchronous>, transform_indices = @transform_3, window_bounds = array<i64: 1, 128>}, {transform_indices = @transform_4, window_bounds = array<i64: 1, 8, 8, 128>}]} {
    %cst = arith.constant 0.000000e+00 : f32
    %0 = vector.broadcast %cst : f32 to vector<256x128xf32>
    %c0 = arith.constant 0 : index
    %c0_0 = arith.constant 0 : index
    %c0_1 = arith.constant 0 : index
    %c0_2 = arith.constant 0 : index
    %1 = vector.load %arg2[%c0, %c0_0, %c0_1, %c0_2] : memref<1x18x18x128xf32, #tpu.memory_space<vmem>>, vector<1x16x16x128xf32>
    %2 = vector.shape_cast %1 : vector<1x16x16x128xf32> to vector<16x16x128xf32>
    %3 = vector.shape_cast %2 : vector<16x16x128xf32> to vector<256x128xf32>
    %c0_3 = arith.constant 0 : index
    %c0_4 = arith.constant 0 : index
    %c0_5 = arith.constant 0 : index
    %c0_6 = arith.constant 0 : index
    %4 = vector.load %arg3[%c0_3, %c0_4, %c0_5, %c0_6] : memref<3x3x128x128xf32, #tpu.memory_space<vmem>>, vector<1x1x128x128xf32>
    %5 = vector.shape_cast %4 : vector<1x1x128x128xf32> to vector<128x128xf32>
    %cst_7 = arith.constant dense<0.000000e+00> : vector<256x128xf32>
    %6 = tpu.matmul %3, %5, %cst_7 {dimension_numbers = #tpu.dot_dimension_numbers<[1], [0], [0], [1], [0, 0, 1, 1], [], []>} : vector<256x128xf32>, vector<128x128xf32>, vector<256x128xf32> -> vector<256x128xf32>
    %7 = arith.addf %0, %6 : vector<256x128xf32>
    %c0_8 = arith.constant 0 : index
    %c0_9 = arith.constant 0 : index
    %c1 = arith.constant 1 : index
    %c0_10 = arith.constant 0 : index
    %8 = vector.load %arg2[%c0_8, %c0_9, %c1, %c0_10] : memref<1x18x18x128xf32, #tpu.memory_space<vmem>>, vector<1x16x16x128xf32>
    %9 = vector.shape_cast %8 : vector<1x16x16x128xf32> to vector<16x16x128xf32>
    %10 = vector.shape_cast %9 : vector<16x16x128xf32> to vector<256x128xf32>
    %c0_11 = arith.constant 0 : index
    %c1_12 = arith.constant 1 : index
    %c0_13 = arith.constant 0 : index
    %c0_14 = arith.constant 0 : index
    %11 = vector.load %arg3[%c0_11, %c1_12, %c0_13, %c0_14] : memref<3x3x128x128xf32, #tpu.memory_space<vmem>>, vector<1x1x128x128xf32>
    %12 = vector.shape_cast %11 : vector<1x1x128x128xf32> to vector<128x128xf32>
    %cst_15 = arith.constant dense<0.000000e+00> : vector<256x128xf32>
    %13 = tpu.matmul %10, %12, %cst_15 {dimension_numbers = #tpu.dot_dimension_numbers<[1], [0], [0], [1], [0, 0, 1, 1], [], []>} : vector<256x128xf32>, vector<128x128xf32>, vector<256x128xf32> -> vector<256x128xf32>
    %14 = arith.addf %7, %13 : vector<256x128xf32>
    %c0_16 = arith.constant 0 : index
    %c0_17 = arith.constant 0 : index
    %c2 = arith.constant 2 : index
    %c0_18 = arith.constant 0 : index
    %15 = vector.load %arg2[%c0_16, %c0_17, %c2, %c0_18] : memref<1x18x18x128xf32, #tpu.memory_space<vmem>>, vector<1x16x16x128xf32>
    %16 = vector.shape_cast %15 : vector<1x16x16x128xf32> to vector<16x16x128xf32>
    %17 = vector.shape_cast %16 : vector<16x16x128xf32> to vector<256x128xf32>
    %c0_19 = arith.constant 0 : index
    %c2_20 = arith.constant 2 : index
    %c0_21 = arith.constant 0 : index
    %c0_22 = arith.constant 0 : index
    %18 = vector.load %arg3[%c0_19, %c2_20, %c0_21, %c0_22] : memref<3x3x128x128xf32, #tpu.memory_space<vmem>>, vector<1x1x128x128xf32>
    %19 = vector.shape_cast %18 : vector<1x1x128x128xf32> to vector<128x128xf32>
    %cst_23 = arith.constant dense<0.000000e+00> : vector<256x128xf32>
    %20 = tpu.matmul %17, %19, %cst_23 {dimension_numbers = #tpu.dot_dimension_numbers<[1], [0], [0], [1], [0, 0, 1, 1], [], []>} : vector<256x128xf32>, vector<128x128xf32>, vector<256x128xf32> -> vector<256x128xf32>
    %21 = arith.addf %14, %20 : vector<256x128xf32>
    %c0_24 = arith.constant 0 : index
    %c1_25 = arith.constant 1 : index
    %c0_26 = arith.constant 0 : index
    %c0_27 = arith.constant 0 : index
    %22 = vector.load %arg2[%c0_24, %c1_25, %c0_26, %c0_27] : memref<1x18x18x128xf32, #tpu.memory_space<vmem>>, vector<1x16x16x128xf32>
    %23 = vector.shape_cast %22 : vector<1x16x16x128xf32> to vector<16x16x128xf32>
    %24 = vector.shape_cast %23 : vector<16x16x128xf32> to vector<256x128xf32>
    %c1_28 = arith.constant 1 : index
    %c0_29 = arith.constant 0 : index
    %c0_30 = arith.constant 0 : index
    %c0_31 = arith.constant 0 : index
    %25 = vector.load %arg3[%c1_28, %c0_29, %c0_30, %c0_31] : memref<3x3x128x128xf32, #tpu.memory_space<vmem>>, vector<1x1x128x128xf32>
    %26 = vector.shape_cast %25 : vector<1x1x128x128xf32> to vector<128x128xf32>
    %cst_32 = arith.constant dense<0.000000e+00> : vector<256x128xf32>
    %27 = tpu.matmul %24, %26, %cst_32 {dimension_numbers = #tpu.dot_dimension_numbers<[1], [0], [0], [1], [0, 0, 1, 1], [], []>} : vector<256x128xf32>, vector<128x128xf32>, vector<256x128xf32> -> vector<256x128xf32>
    %28 = arith.addf %21, %27 : vector<256x128xf32>
    %c0_33 = arith.constant 0 : index
    %c1_34 = arith.constant 1 : index
    %c1_35 = arith.constant 1 : index
    %c0_36 = arith.constant 0 : index
    %29 = vector.load %arg2[%c0_33, %c1_34, %c1_35, %c0_36] : memref<1x18x18x128xf32, #tpu.memory_space<vmem>>, vector<1x16x16x128xf32>
    %30 = vector.shape_cast %29 : vector<1x16x16x128xf32> to vector<16x16x128xf32>
    %31 = vector.shape_cast %30 : vector<16x16x128xf32> to vector<256x128xf32>
    %c1_37 = arith.constant 1 : index
    %c1_38 = arith.constant 1 : index
    %c0_39 = arith.constant 0 : index
    %c0_40 = arith.constant 0 : index
    %32 = vector.load %arg3[%c1_37, %c1_38, %c0_39, %c0_40] : memref<3x3x128x128xf32, #tpu.memory_space<vmem>>, vector<1x1x128x128xf32>
    %33 = vector.shape_cast %32 : vector<1x1x128x128xf32> to vector<128x128xf32>
    %cst_41 = arith.constant dense<0.000000e+00> : vector<256x128xf32>
    %34 = tpu.matmul %31, %33, %cst_41 {dimension_numbers = #tpu.dot_dimension_numbers<[1], [0], [0], [1], [0, 0, 1, 1], [], []>} : vector<256x128xf32>, vector<128x128xf32>, vector<256x128xf32> -> vector<256x128xf32>
    %35 = arith.addf %28, %34 : vector<256x128xf32>
    %c0_42 = arith.constant 0 : index
    %c1_43 = arith.constant 1 : index
    %c2_44 = arith.constant 2 : index
    %c0_45 = arith.constant 0 : index
    %36 = vector.load %arg2[%c0_42, %c1_43, %c2_44, %c0_45] : memref<1x18x18x128xf32, #tpu.memory_space<vmem>>, vector<1x16x16x128xf32>
    %37 = vector.shape_cast %36 : vector<1x16x16x128xf32> to vector<16x16x128xf32>
    %38 = vector.shape_cast %37 : vector<16x16x128xf32> to vector<256x128xf32>
    %c1_46 = arith.constant 1 : index
    %c2_47 = arith.constant 2 : index
    %c0_48 = arith.constant 0 : index
    %c0_49 = arith.constant 0 : index
    %39 = vector.load %arg3[%c1_46, %c2_47, %c0_48, %c0_49] : memref<3x3x128x128xf32, #tpu.memory_space<vmem>>, vector<1x1x128x128xf32>
    %40 = vector.shape_cast %39 : vector<1x1x128x128xf32> to vector<128x128xf32>
    %cst_50 = arith.constant dense<0.000000e+00> : vector<256x128xf32>
    %41 = tpu.matmul %38, %40, %cst_50 {dimension_numbers = #tpu.dot_dimension_numbers<[1], [0], [0], [1], [0, 0, 1, 1], [], []>} : vector<256x128xf32>, vector<128x128xf32>, vector<256x128xf32> -> vector<256x128xf32>
    %42 = arith.addf %35, %41 : vector<256x128xf32>
    %c0_51 = arith.constant 0 : index
    %c2_52 = arith.constant 2 : index
    %c0_53 = arith.constant 0 : index
    %c0_54 = arith.constant 0 : index
    %43 = vector.load %arg2[%c0_51, %c2_52, %c0_53, %c0_54] : memref<1x18x18x128xf32, #tpu.memory_space<vmem>>, vector<1x16x16x128xf32>
    %44 = vector.shape_cast %43 : vector<1x16x16x128xf32> to vector<16x16x128xf32>
    %45 = vector.shape_cast %44 : vector<16x16x128xf32> to vector<256x128xf32>
    %c2_55 = arith.constant 2 : index
    %c0_56 = arith.constant 0 : index
    %c0_57 = arith.constant 0 : index
    %c0_58 = arith.constant 0 : index
    %46 = vector.load %arg3[%c2_55, %c0_56, %c0_57, %c0_58] : memref<3x3x128x128xf32, #tpu.memory_space<vmem>>, vector<1x1x128x128xf32>
    %47 = vector.shape_cast %46 : vector<1x1x128x128xf32> to vector<128x128xf32>
    %cst_59 = arith.constant dense<0.000000e+00> : vector<256x128xf32>
    %48 = tpu.matmul %45, %47, %cst_59 {dimension_numbers = #tpu.dot_dimension_numbers<[1], [0], [0], [1], [0, 0, 1, 1], [], []>} : vector<256x128xf32>, vector<128x128xf32>, vector<256x128xf32> -> vector<256x128xf32>
    %49 = arith.addf %42, %48 : vector<256x128xf32>
    %c0_60 = arith.constant 0 : index
    %c2_61 = arith.constant 2 : index
    %c1_62 = arith.constant 1 : index
    %c0_63 = arith.constant 0 : index
    %50 = vector.load %arg2[%c0_60, %c2_61, %c1_62, %c0_63] : memref<1x18x18x128xf32, #tpu.memory_space<vmem>>, vector<1x16x16x128xf32>
    %51 = vector.shape_cast %50 : vector<1x16x16x128xf32> to vector<16x16x128xf32>
    %52 = vector.shape_cast %51 : vector<16x16x128xf32> to vector<256x128xf32>
    %c2_64 = arith.constant 2 : index
    %c1_65 = arith.constant 1 : index
    %c0_66 = arith.constant 0 : index
    %c0_67 = arith.constant 0 : index
    %53 = vector.load %arg3[%c2_64, %c1_65, %c0_66, %c0_67] : memref<3x3x128x128xf32, #tpu.memory_space<vmem>>, vector<1x1x128x128xf32>
    %54 = vector.shape_cast %53 : vector<1x1x128x128xf32> to vector<128x128xf32>
    %cst_68 = arith.constant dense<0.000000e+00> : vector<256x128xf32>
    %55 = tpu.matmul %52, %54, %cst_68 {dimension_numbers = #tpu.dot_dimension_numbers<[1], [0], [0], [1], [0, 0, 1, 1], [], []>} : vector<256x128xf32>, vector<128x128xf32>, vector<256x128xf32> -> vector<256x128xf32>
    %56 = arith.addf %49, %55 : vector<256x128xf32>
    %c0_69 = arith.constant 0 : index
    %c2_70 = arith.constant 2 : index
    %c2_71 = arith.constant 2 : index
    %c0_72 = arith.constant 0 : index
    %57 = vector.load %arg2[%c0_69, %c2_70, %c2_71, %c0_72] : memref<1x18x18x128xf32, #tpu.memory_space<vmem>>, vector<1x16x16x128xf32>
    %58 = vector.shape_cast %57 : vector<1x16x16x128xf32> to vector<16x16x128xf32>
    %59 = vector.shape_cast %58 : vector<16x16x128xf32> to vector<256x128xf32>
    %c2_73 = arith.constant 2 : index
    %c2_74 = arith.constant 2 : index
    %c0_75 = arith.constant 0 : index
    %c0_76 = arith.constant 0 : index
    %60 = vector.load %arg3[%c2_73, %c2_74, %c0_75, %c0_76] : memref<3x3x128x128xf32, #tpu.memory_space<vmem>>, vector<1x1x128x128xf32>
    %61 = vector.shape_cast %60 : vector<1x1x128x128xf32> to vector<128x128xf32>
    %cst_77 = arith.constant dense<0.000000e+00> : vector<256x128xf32>
    %62 = tpu.matmul %59, %61, %cst_77 {dimension_numbers = #tpu.dot_dimension_numbers<[1], [0], [0], [1], [0, 0, 1, 1], [], []>} : vector<256x128xf32>, vector<128x128xf32>, vector<256x128xf32> -> vector<256x128xf32>
    %63 = arith.addf %56, %62 : vector<256x128xf32>
    %c0_78 = arith.constant 0 : index
    %c0_79 = arith.constant 0 : index
    %64 = vector.load %arg4[%c0_78, %c0_79] : memref<1x128xf32, #tpu.memory_space<vmem>>, vector<1x128xf32>
    %65 = vector.broadcast %64 : vector<1x128xf32> to vector<256x128xf32>
    %66 = arith.mulf %63, %65 : vector<256x128xf32>
    %c0_80 = arith.constant 0 : index
    %c0_81 = arith.constant 0 : index
    %67 = vector.load %arg5[%c0_80, %c0_81] : memref<1x128xf32, #tpu.memory_space<vmem>>, vector<1x128xf32>
    %68 = vector.broadcast %67 : vector<1x128xf32> to vector<256x128xf32>
    %69 = arith.addf %66, %68 : vector<256x128xf32>
    %cst_82 = arith.constant 5.000000e-01 : f32
    %70 = vector.broadcast %cst_82 : f32 to vector<256x128xf32>
    %71 = arith.mulf %70, %69 : vector<256x128xf32>
    %cst_83 = arith.constant 0.707106769 : f32
    %72 = vector.broadcast %cst_83 : f32 to vector<256x128xf32>
    %73 = arith.mulf %69, %72 : vector<256x128xf32>
    %74 = math.erf %73 : vector<256x128xf32>
    %cst_84 = arith.constant 1.000000e+00 : f32
    %75 = vector.broadcast %cst_84 : f32 to vector<256x128xf32>
    %76 = arith.addf %75, %74 : vector<256x128xf32>
    %77 = arith.mulf %71, %76 : vector<256x128xf32>
    %78 = vector.shape_cast %77 : vector<256x128xf32> to vector<16x16x128xf32>
    %c0_85 = arith.constant 0 : index
    %c0_86 = arith.constant 0 : index
    %c0_87 = arith.constant 0 : index
    %79 = vector.load %arg7[%c0_85, %c0_86, %c0_87] : memref<16x16x128xf32, #tpu.memory_space<vmem>>, vector<16x16x128xf32>
    tpu.vector_store %arg7[%c0_85, %c0_86, %c0_87], %78 {strides = array<i32>} : memref<16x16x128xf32, #tpu.memory_space<vmem>>, vector<16x16x128xf32>,
    %c0_88 = arith.constant 0 : index
    %c0_89 = arith.constant 0 : index
    %c0_90 = arith.constant 0 : index
    %80 = tpu.strided_load %arg7[%c0_88, %c0_89, %c0_90] {strides = array<i32: 1, 2, 1>} : memref<16x16x128xf32, #tpu.memory_space<vmem>>, vector<16x8x128xf32>
    %c0_91 = arith.constant 0 : index
    %c1_92 = arith.constant 1 : index
    %c0_93 = arith.constant 0 : index
    %81 = tpu.strided_load %arg7[%c0_91, %c1_92, %c0_93] {strides = array<i32: 1, 2, 1>} : memref<16x16x128xf32, #tpu.memory_space<vmem>>, vector<16x8x128xf32>
    %82 = arith.maximumf %80, %81 : vector<16x8x128xf32>
    %83 = vector.shape_cast %82 : vector<16x8x128xf32> to vector<8x2x8x128xf32>
    %cst_94 = arith.constant dense<0xFF800000> : vector<8x8x128xf32>
    %84 = vector.multi_reduction <maximumf>, %83, %cst_94 [1] : vector<8x2x8x128xf32> to vector<8x8x128xf32>
    %c0_95 = arith.constant 0 : index
    %c0_96 = arith.constant 0 : index
    %c0_97 = arith.constant 0 : index
    %c0_98 = arith.constant 0 : index
    %85 = vector.load %arg6[%c0_95, %c0_96, %c0_97, %c0_98] : memref<1x8x8x128xf32, #tpu.memory_space<vmem>>, vector<1x8x8x128xf32>
    %86 = vector.shape_cast %85 : vector<1x8x8x128xf32> to vector<8x8x128xf32>
    %87 = vector.shape_cast %84 : vector<8x8x128xf32> to vector<1x8x8x128xf32>
    tpu.vector_store %arg6[%c0_95, %c0_96, %c0_97, %c0_98], %87 {strides = array<i32>} : memref<1x8x8x128xf32, #tpu.memory_space<vmem>>, vector<1x8x8x128xf32>,
    return
  }
  func.func @transform_0(%arg0: i32, %arg1: i32) -> (i32, i32, i32, i32) {
    %c0_i32 = arith.constant 0 : i32
    %c0_i32_0 = arith.constant 0 : i32
    %c0_i32_1 = arith.constant 0 : i32
    %c0_i32_2 = arith.constant 0 : i32
    return %arg0, %c0_i32, %c0_i32_0, %c0_i32_1 : i32, i32, i32, i32
  }
  func.func @transform_1(%arg0: i32, %arg1: i32) -> (i32, i32, i32, i32) {
    %c0_i32 = arith.constant 0 : i32
    %c0_i32_0 = arith.constant 0 : i32
    %c0_i32_1 = arith.constant 0 : i32
    %c0_i32_2 = arith.constant 0 : i32
    %c0_i32_3 = arith.constant 0 : i32
    return %c0_i32, %c0_i32_0, %c0_i32_1, %c0_i32_2 : i32, i32, i32, i32
  }
  func.func @transform_2(%arg0: i32, %arg1: i32) -> (i32, i32) {
    %c0_i32 = arith.constant 0 : i32
    %c0_i32_0 = arith.constant 0 : i32
    %c0_i32_1 = arith.constant 0 : i32
    return %c0_i32, %c0_i32_0 : i32, i32
  }
  func.func @transform_3(%arg0: i32, %arg1: i32) -> (i32, i32) {
    %c0_i32 = arith.constant 0 : i32
    %c0_i32_0 = arith.constant 0 : i32
    %c0_i32_1 = arith.constant 0 : i32
    return %c0_i32, %c0_i32_0 : i32, i32
  }
  func.func @transform_4(%arg0: i32, %arg1: i32) -> (i32, i32, i32, i32) {
    %c0_i32 = arith.constant 0 : i32
    %c0_i32_0 = arith.constant 0 : i32
    %c0_i32_1 = arith.constant 0 : i32
    return %arg0, %arg1, %c0_i32, %c0_i32_0 : i32, i32, i32, i32
  }
}

</mosaic_0001>

<bundles_post_ra>
// kernel: unet_down_forward.4
= control target key start
LH: loop header
LB: loop body
LE: loop exit
PB: predicated region body
PF: predicated region fallthrough
CT: control target
= control target key end

     0   :  { %s5131_s12 = smov 0   ;;  %s5133_s13 = smov 0   ;;  %s6366_s0 = inlined_call_operand.vmem [shape: f32[2,18,18,128], index: 0, kind: input, shape index: {}]   ;;  %s6367_s1 = inlined_call_operand.vmem [shape: f32[3,3,128,128], index: 1, kind: input, shape index: {}]   ;;  %s6368_s2 = inlined_call_operand.vmem [shape: f32[1,128], index: 2, kind: output, shape index: {0}]   ;;  %s6369_s3 = inlined_call_operand.vmem [shape: f32[1,128], index: 3, kind: output, shape index: {1}]  }
   0x1   :  { %s5135_s14 = smov 0  }
   0x2 LB: > { %s26_s15 = sadd.s32 1, %s5104_s13  ;;  %p3022_p0 = scmp.ge.s32.totalorder %s5108_s14, 1  ;;  %s5108_s14 = sphi %s5135_s14, %s14_s14   ;;  %s5104_s13 = sphi %s5133_s13, %s6471_s13   ;;  %s5100_s12 = sphi %s5131_s12, %s6470_s12  }
   0x3   : > { %p28_p1 = scmp.ge.s32.totalorder %s26_s15, 2  ;;  %p142_p2 = scmp.lt.s32.totalorder %s5108_s14, 3 }
   0x5   : > { %s6473_s15 = smov (%p28_p1, %s26_s15), 0  ;;  %p143_p3 = pnand %p3022_p0, %p142_p2 }
   0x7   : > { %146 = sbr.rel (%p143_p3) target bundleno = 627 (0x273), region = 28 }
   0xe   : > { %v3024_v0 = vld [vmem:[%s6367_s1 + $0x80] sm:$0xff]  ;;  %v3025_v1 = vld [vmem:[%s6367_s1 + $0x88] sm:$0xff]  ;;  %p161_p4 = scmp.lt.s32.totalorder %s5100_s12, 1  ;;  %v3026_v5 = vld [vmem:[%s6367_s1 + $0x90] sm:$0xff]  ;;  %p2857_p5 = scmp.eq.s32.totalorder %s5100_s12, 0 }
   0xf   : > { %v3136_v2 = vld [vmem:[%s6367_s1 + $0x200] sm:$0xff]  ;;  %v4500_v3 = vpack.c.bf16 %v3025_v1, %v3024_v0  ;;  %v3137_v4 = vld [vmem:[%s6367_s1 + $0x208] sm:$0xff]  ;;  %v3027_v6 = vld [vmem:[%s6367_s1 + $0x98] sm:$0xff] }
  0x10   : > { %v5170_v7 = vpack.c.bf16 %v3137_v4, %v3136_v2  ;;  %v4504_v8 = vpack.c.bf16 %v3027_v6, %v3026_v5  ;;  %v3138_v9 = vld [vmem:[%s6367_s1 + $0x210] sm:$0xff]  ;;  %v3139_v10 = vld [vmem:[%s6367_s1 + $0x218] sm:$0xff]  ;;  %v3028_v11 = vld [vmem:[%s6367_s1 + $0xa0] sm:$0xff]  ;;  %s162_s7 = scalar_select %p161_p4, %s5100_s12, 1 }
  0x11   : > { %4501 = vmatprep.subr.bf16.mxu1 %v4500_v3  ;;  %v5182_v12 = vpack.c.bf16 %v3139_v10, %v3138_v9  ;;  %v3029_v13 = vld [vmem:[%s6367_s1 + $0xa8] sm:$0xff]  ;;  %v3140_v14 = vld [vmem:[%s6367_s1 + $0x220] sm:$0xff]  ;;  %v3030_v18 = vld [vmem:[%s6367_s1 + $0xb0] sm:$0xff] }
  0x12   : > { %v3141_v15 = vld [vmem:[%s6367_s1 + $0x228] sm:$0xff]  ;;  %4629 = vmatprep.subr.bf16.mxu0 %v5170_v7  ;;  %4503 = vmatpush3.bf16.msra.mxu1 %v4500_v3  ;;  %s5060_s18 = smul.u32 432, %s162_s7  ;;  %v4508_v16 = vpack.c.bf16 %v3029_v13, %v3028_v11  ;;  %v3031_v19 = vld [vmem:[%s6367_s1 + $0xb8] sm:$0xff]  ;;  %v3142_v20 = vld [vmem:[%s6367_s1 + $0x230] sm:$0xff] }
  0x13   : > { %6408 = vst [vmem:[#allocation2_spill] sm:$0xff] %v5182_v12  ;;  %4631 = vmatpush3.bf16.msra.mxu0 %v5170_v7  ;;  %4505 = vmatprep.subr.bf16.mxu1 %v4504_v8  ;;  %v5196_v17 = vpack.c.bf16 %v3141_v15, %v3140_v14  ;;  %v3143_v21 = vld [vmem:[%s6367_s1 + $0x238] sm:$0xff]  ;;  %v4512_v22 = vpack.c.bf16 %v3031_v19, %v3030_v18  ;;  %v3032_v24 = vld [vmem:[%s6367_s1 + $0xc0] sm:$0xff]  ;;  %v3033_v25 = vld [vmem:[%s6367_s1 + $0xc8] sm:$0xff] }
  0x14   : > { %4633 = vmatprep.subr.bf16.mxu0 %v5182_v12  ;;  %s5213_s29 = scalar_lea.vmem %s6366_s0, %s5060_s18  ;;  %v5217_v23 = vpack.c.bf16 %v3143_v21, %v3142_v20  ;;  %v3144_v27 = vld [vmem:[%s6367_s1 + $0x240] sm:$0xff]  ;;  %v3145_v28 = vld [vmem:[%s6367_s1 + $0x248] sm:$0xff]  ;;  %v4516_v30 = vpack.c.bf16 %v3033_v25, %v3032_v24  ;;  %v3034_v32 = vld [vmem:[%s6367_s1 + $0xd0] sm:$0xff] }
  0x15   : > { %6409 = vst [vmem:[#allocation3_spill] sm:$0xff] %v5196_v17  ;;  %v214_v26 = vld [vmem:[%s5213_s29 + $0x1] sm:$0xff]  ;;  %v5233_v29 = vld [vmem:[%s5213_s29 + $0x19] sm:$0xff]  ;;  %v5238_v31 = vpack.c.bf16 %v3145_v28, %v3144_v27  ;;  %v3146_v34 = vld [vmem:[%s6367_s1 + $0x250] sm:$0xff] }
  0x16   : > { %4507 = vmatpush3.bf16.msra.mxu1 %v4504_v8  ;;  %6410 = vst [vmem:[#allocation4_spill] sm:$0xff] %v5217_v23  ;;  %3812 = vmatprep.mubr.f32.mxu1 %v214_v26  ;;  %v3035_v33 = vld [vmem:[%s6367_s1 + $0xd8] sm:$0xff]  ;;  %v3036_v38 = vld [vmem:[%s6367_s1 + $0xe0] sm:$0xff]  ;;  %v3037_v39 = vld [vmem:[%s6367_s1 + $0xe8] sm:$0xff] }
  0x17   : > { %4635 = vmatpush3.bf16.msra.mxu0 %v5182_v12  ;;  %4509 = vmatprep.subr.bf16.mxu1 %v4508_v16  ;;  %6411 = vst [vmem:[#allocation5_spill] sm:$0xff] %v5238_v31  ;;  %v3147_v35 = vld [vmem:[%s6367_s1 + $0x258] sm:$0xff]  ;;  %v4520_v36 = vpack.c.bf16 %v3035_v33, %v3034_v32  ;;  %v3148_v40 = vld [vmem:[%s6367_s1 + $0x260] sm:$0xff]  ;;  %v3149_v41 = vld [vmem:[%s6367_s1 + $0x268] sm:$0xff]  ;;  %v4524_v42 = vpack.c.bf16 %v3037_v39, %v3036_v38 }
  0x18   : > { %4637 = vmatprep.subr.bf16.mxu0 %v5196_v17  ;;  %4132 = vmatprep.mubr.f32.mxu0 %v5233_v29  ;;  %v5254_v37 = vpack.c.bf16 %v3147_v35, %v3146_v34  ;;  %v5270_v43 = vpack.c.bf16 %v3149_v41, %v3148_v40  ;;  %v3038_v44 = vld [vmem:[%s6367_s1 + $0xf0] sm:$0xff]  ;;  %v3039_v45 = vld [vmem:[%s6367_s1 + $0xf8] sm:$0xff]  ;;  %v198_v50 = vld [vmem:[%s6367_s1] sm:$0xff] }
  0x19   : > { %v3150_v46 = vld [vmem:[%s6367_s1 + $0x270] sm:$0xff]  ;;  %v3151_v47 = vld [vmem:[%s6367_s1 + $0x278] sm:$0xff]  ;;  %v4528_v48 = vpack.c.bf16 %v3039_v45, %v3038_v44  ;;  %v199_v51 = vld [vmem:[%s6367_s1 + $0x8] sm:$0xff] }
  0x1a   : > { %4511 = vmatpush3.bf16.msra.mxu1 %v4508_v16  ;;  %6412 = vst [vmem:[#allocation6_spill] sm:$0xff] %v5254_v37  ;;  %6413 = vst [vmem:[#allocation7_spill] sm:$0xff] %v5270_v43  ;;  %v5286_v49 = vpack.c.bf16 %v3151_v47, %v3150_v46  ;;  %v3184_v52 = vld [vmem:[%s6367_s1 + $0x280] sm:$0xff]  ;;  %v3185_v53 = vld [vmem:[%s6367_s1 + $0x288] sm:$0xff]  ;;  %v4532_v54 = vpack.c.bf16 %v199_v51, %v198_v50 }
  0x1b   : > { %4639 = vmatpush3.bf16.msra.mxu0 %v5196_v17  ;;  %4513 = vmatprep.subr.bf16.mxu1 %v4512_v22  ;;  %v4660_v55 = vpack.c.bf16 %v3185_v53, %v3184_v52  ;;  %v3186_v56 = vld [vmem:[%s6367_s1 + $0x290] sm:$0xff]  ;;  %v3187_v57 = vld [vmem:[%s6367_s1 + $0x298] sm:$0xff]  ;;  %v3105_v61 = vld [vmem:[%s5213_s29 + $0x21] sm:$0xff] }
  0x1c   : > { %4641 = vmatprep.subr.bf16.mxu0 %v5217_v23  ;;  %6414 = vst [vmem:[#allocation8_spill] sm:$0xff] %v5286_v49  ;;  %v215_v58 = vld [vmem:[%s5213_s29 + $0x9] sm:$0xff]  ;;  %v201_v60 = vld [vmem:[%s6367_s1 + $0x18] sm:$0xff]  ;;  %v4664_v62 = vpack.c.bf16 %v3187_v57, %v3186_v56  ;;  %v3188_v1 = vld [vmem:[%s6367_s1 + $0x2a0] sm:$0xff] }
  0x1d   : > { %v200_v59 = vld [vmem:[%s6367_s1 + $0x10] sm:$0xff]  ;;  %v3189_v2 = vld [vmem:[%s6367_s1 + $0x2a8] sm:$0xff]  ;;  %v202_v3 = vld [vmem:[%s6367_s1 + $0x20] sm:$0xff] }
  0x1e   : > { %4515 = vmatpush3.bf16.msra.mxu1 %v4512_v22  ;;  %v3106_v63 = vld [vmem:[%s5213_s29 + $0x31] sm:$0xff]  ;;  %v4536_v0 = vpack.c.bf16 %v201_v60, %v200_v59  ;;  %v203_v4 = vld [vmem:[%s6367_s1 + $0x28] sm:$0xff]  ;;  %v3107_v5 = vld [vmem:[%s5213_s29 + $0x39] sm:$0xff]  ;;  %v4668_v8 = vpack.c.bf16 %v3189_v2, %v3188_v1 }
  0x1f   : > { %4643 = vmatpush3.bf16.msra.mxu0 %v5217_v23  ;;  %4517 = vmatprep.subr.bf16.mxu1 %v4516_v30  ;;  %v3108_v6 = vld [vmem:[%s5213_s29 + $0x49] sm:$0xff]  ;;  %v3191_v10 = vld [vmem:[%s6367_s1 + $0x2b8] sm:$0xff]  ;;  %v4540_v11 = vpack.c.bf16 %v203_v4, %v202_v3  ;;  %v3110_v16 = vld [vmem:[%s5213_s29 + $0x61] sm:$0xff] }
  0x20   : > { %4645 = vmatprep.subr.bf16.mxu0 %v5238_v31  ;;  %v3190_v9 = vld [vmem:[%s6367_s1 + $0x2b0] sm:$0xff]  ;;  %v205_v14 = vld [vmem:[%s6367_s1 + $0x38] sm:$0xff]  ;;  %v3192_v19 = vld [vmem:[%s6367_s1 + $0x2c0] sm:$0xff] }
  0x21   : > { %v204_v13 = vld [vmem:[%s6367_s1 + $0x30] sm:$0xff]  ;;  %v4672_v18 = vpack.c.bf16 %v3191_v10, %v3190_v9  ;;  %v3193_v20 = vld [vmem:[%s6367_s1 + $0x2c8] sm:$0xff]  ;;  %v206_v22 = vld [vmem:[%s6367_s1 + $0x40] sm:$0xff] }
  0x22   : > { %4519 = vmatpush3.bf16.msra.mxu1 %v4516_v30  ;;  %v3109_v15 = vld [vmem:[%s5213_s29 + $0x51] sm:$0xff]  ;;  %v4544_v21 = vpack.c.bf16 %v205_v14, %v204_v13  ;;  %v207_v24 = vld [vmem:[%s6367_s1 + $0x48] sm:$0xff]  ;;  %v3112_v26 = vld [vmem:[%s5213_s29 + $0x79] sm:$0xff]  ;;  %v4676_v27 = vpack.c.bf16 %v3193_v20, %v3192_v19 }
  0x23   : > { %4647 = vmatpush3.bf16.msra.mxu0 %v5238_v31  ;;  %4521 = vmatprep.subr.bf16.mxu1 %v4520_v36  ;;  %v3111_v25 = vld [vmem:[%s5213_s29 + $0x69] sm:$0xff]  ;;  %v4548_v30 = vpack.c.bf16 %v207_v24, %v206_v22  ;;  %v209_v33 = vld [vmem:[%s6367_s1 + $0x58] sm:$0xff]  ;;  %v3113_v34 = vld [vmem:[%s5213_s29 + $0x81] sm:$0xff] }
  0x24   : > { %4649 = vmatprep.subr.bf16.mxu0 %v5254_v37  ;;  %v3194_v28 = vld [vmem:[%s6367_s1 + $0x2d0] sm:$0xff]  ;;  %v3196_v38 = vld [vmem:[%s6367_s1 + $0x2e0] sm:$0xff]  ;;  %v3197_v39 = vld [vmem:[%s6367_s1 + $0x2e8] sm:$0xff] }
  0x25   : > { %v208_v32 = vld [vmem:[%s6367_s1 + $0x50] sm:$0xff]  ;;  %v210_v41 = vld [vmem:[%s6367_s1 + $0x60] sm:$0xff]  ;;  %v4684_v46 = vpack.c.bf16 %v3197_v39, %v3196_v38  ;;  %v213_v52 = vld [vmem:[%s6367_s1 + $0x78] sm:$0xff] }
  0x26   : > { %4523 = vmatpush3.bf16.msra.mxu1 %v4520_v36  ;;  %v5375_v35 = vld [vmem:[%s5213_s29 + $0x91] sm:$0xff]  ;;  %v4552_v40 = vpack.c.bf16 %v209_v33, %v208_v32  ;;  %v3115_v44 = vld [vmem:[%s5213_s29 + $0x99] sm:$0xff]  ;;  %v3116_v45 = vld [vmem:[%s5213_s29 + $0xa9] sm:$0xff] }
  0x27   : > { %4651 = vmatpush3.bf16.msra.mxu0 %v5254_v37  ;;  %4525 = vmatprep.subr.bf16.mxu1 %v4524_v42  ;;  %v3198_v47 = vld [vmem:[%s6367_s1 + $0x2f0] sm:$0xff]  ;;  %v3232_v56 = vld [vmem:[%s6367_s1 + $0x300] sm:$0xff]  ;;  %v3233_v57 = vld [vmem:[%s6367_s1 + $0x308] sm:$0xff] }
  0x28   : > { %4653 = vmatprep.subr.bf16.mxu0 %v5270_v43  ;;  %v212_v51 = vld [vmem:[%s6367_s1 + $0x70] sm:$0xff]  ;;  %v3040_v59 = vld [vmem:[%s6367_s1 + $0x100] sm:$0xff]  ;;  %v3041_v60 = vld [vmem:[%s6367_s1 + $0x108] sm:$0xff] }
  0x29   : > { %v3117_v53 = vld [vmem:[%s5213_s29 + $0xb1] sm:$0xff]  ;;  %v5434_v2 = vpack.c.bf16 %v3041_v60, %v3040_v59  ;;  %v5440_v3 = vld [vmem:[%s5213_s29 + $0x22] sm:$0xff]  ;;  %v5443_v4 = vld [vmem:[%s5213_s29 + $0xd9] sm:$0xff] }
  0x2a   : > { %4527 = vmatpush3.bf16.msra.mxu1 %v4524_v42  ;;  %v211_v42 = vld [vmem:[%s6367_s1 + $0x68] sm:$0xff]  ;;  %v3235_v1 = vld [vmem:[%s6367_s1 + $0x318] sm:$0xff]  ;;  %v3242_v33 = vld [vmem:[%s6367_s1 + $0x350] sm:$0xff] }
  0x2b   : > { %4655 = vmatpush3.bf16.msra.mxu0 %v5270_v43  ;;  %4529 = vmatprep.subr.bf16.mxu1 %v4528_v48  ;;  %v4556_v50 = vpack.c.bf16 %v211_v42, %v210_v41  ;;  %v3237_v9 = vld [vmem:[%s6367_s1 + $0x328] sm:$0xff]  ;;  %v5466_v13 = vld [vmem:[%s5213_s29 + $0xf1] sm:$0xff]  ;;  %v5481_v19 = vld [vmem:[%s5213_s29 + $0xf9] sm:$0xff] }
  0x2c   : > { %4657 = vmatprep.subr.bf16.mxu0 %v5286_v49  ;;  %v5459_v10 = vld [vmem:[%s5213_s29 + $0xe1] sm:$0xff]  ;;  %v5469_v14 = vld [vmem:[%s5213_s29 + $0x4a] sm:$0xff]  ;;  %v5485_v20 = vld [vmem:[%s5213_s29 + $0x52] sm:$0xff] }
  0x2d   : > { %v5491_v22 = vld [vmem:[%s5213_s29 + $0x62] sm:$0xff]  ;;  %v5532_v39 = vld [vmem:[%s5213_s29 + $0x139] sm:$0xff] }
  0x2e   : > { %4531 = vmatpush3.bf16.msra.mxu1 %v4528_v48  ;;  %v3199_v48 = vld [vmem:[%s6367_s1 + $0x2f8] sm:$0xff]  ;;  %v5529_v38 = vld [vmem:[%s5213_s29 + $0x82] sm:$0xff]  ;;  %6419 = vst [vmem:[#allocation13_spill] sm:$0xff] %v5532_v39 }
  0x2f   : > { %4659 = vmatpush3.bf16.msra.mxu0 %v5286_v49  ;;  %4533 = vmatprep.subr.bf16.mxu1 %v4532_v54  ;;  %v3244_v42 = vld [vmem:[%s6367_s1 + $0x360] sm:$0xff]  ;;  %v3281_v60 = vld [vmem:[%s6367_s1 + $0x388] sm:$0xff]  ;;  %v3051_v49 = vld [vmem:[%s6367_s1 + $0x158] sm:$0xff] }
  0x30   : > { %4661 = vmatprep.subr.bf16.mxu0 %v4660_v55  ;;  %v3280_v59 = vld [vmem:[%s6367_s1 + $0x380] sm:$0xff]  ;;  %v5709_v43 = vld [vmem:[%s5213_s29 + $0x152] sm:$0xff]  ;;  %v3089_v17 = vld [vmem:[%s6367_s1 + $0x188] sm:$0xff] }
  0x31   : > { %3813 = vmatmul.mubr.f32.vlgmr.msra.gmra.mrb[0].mxu1 %v215_v58  ;;  %v4560_v58 = vpack.c.bf16 %v213_v52, %v212_v51  ;;  %v3246_v51 = vld [vmem:[%s6367_s1 + $0x370] sm:$0xff]  ;;  %v3247_v52 = vld [vmem:[%s6367_s1 + $0x378] sm:$0xff]  ;;  %v3052_v37 = vld [vmem:[%s6367_s1 + $0x160] sm:$0xff] }
  0x32   : > { %4133 = vmatmul.mubr.f32.vlgmr.msra.gmra.mrb[0].mxu0 %v3105_v61  ;;  %4535 = vmatpush3.bf16.msra.mxu1 %v4532_v54  ;;  %v5407_v54 = vld [vmem:[%s5213_s29 + $0xc1] sm:$0xff]  ;;  %v3283_v12 = vld [vmem:[%s6367_s1 + $0x398] sm:$0xff] }
  0x33   : > { %4663 = vmatpush3.bf16.msra.mxu0 %v4660_v55  ;;  %3815 = vmatprep.mubr.f32.mxu1 %v5233_v29  ;;  %v3195_v29 = vld [vmem:[%s6367_s1 + $0x2d8] sm:$0xff]  ;;  %v4688_v55 = vpack.c.bf16 %v3199_v48, %v3198_v47  ;;  %v5557_v48 = vld [vmem:[%s5213_s29 + $0xaa] sm:$0xff]  ;;  %v3182_v23 = vld [vmem:[%s5213_s29 + $0x182] sm:$0xff] }
  0x34   : > { %4135 = vmatprep.mubr.f32.mxu0 %v3106_v63  ;;  %4665 = vmatprep.subr.bf16.mxu0 %v4664_v62  ;;  %v4680_v36 = vpack.c.bf16 %v3195_v29, %v3194_v28  ;;  %v5507_v28 = vld [vmem:[%s5213_s29 + $0x6a] sm:$0xff]  ;;  %v5510_v29 = vld [vmem:[%s5213_s29 + $0x121] sm:$0xff] }
  0x35   : > { %3816 = vmatmul.mubr.f32.gmra.mrb[2].mxu1 %v3105_v61  ;;  %4537 = vmatprep.subr.bf16.mxu1 %v4536_v0  ;;  %v5423_v61 = vld [vmem:[%s5213_s29 + $0xc9] sm:$0xff]  ;;  %6417 = vst [vmem:[#allocation11_spill] sm:$0xff] %v5510_v29  ;;  %v5554_v47 = vld [vmem:[%s5213_s29 + $0x151] sm:$0xff] }
  0x36   : > { %4136 = vmatmul.mubr.f32.gmra.mrb[2].mxu0 %v3107_v5  ;;  %3818 = vmatprep.mubr.f32.mxu1 %v3106_v63  ;;  %v4692_v63 = vpack.c.bf16 %v3233_v57, %v3232_v56  ;;  %6421 = vst [vmem:[#allocation15_spill] sm:$0xff] %v5554_v47  ;;  %v5576_v56 = vld [vmem:[%s5213_s29 + $0x169] sm:$0xff] }
  0x37   : > { %4667 = vmatpush3.bf16.msra.mxu0 %v4664_v62  ;;  %4138 = vmatprep.mubr.f32.mxu0 %v3108_v6  ;;  %v5426_v62 = vld [vmem:[%s5213_s29 + $0x1a] sm:$0xff]  ;;  %6423 = vst [vmem:[#allocation17_spill] sm:$0xff] %v5576_v56  ;;  %v5579_v57 = vld [vmem:[%s5213_s29 + $0xc2] sm:$0xff] }
  0x38   : > { %4669 = vmatprep.subr.bf16.mxu0 %v4668_v8  ;;  %4539 = vmatpush3.bf16.msra.mxu1 %v4536_v0  ;;  %v3234_v0 = vld [vmem:[%s6367_s1 + $0x310] sm:$0xff] }
  0x39   : > { %3819 = vmatmul.mubr.f32.gmra.mrb[4].mxu1 %v3107_v5  ;;  %4541 = vmatprep.subr.bf16.mxu1 %v4540_v11  ;;  %v5446_v5 = vld [vmem:[%s5213_s29 + $0x32] sm:$0xff] }
  0x3a   : > { %4139 = vmatmul.mubr.f32.gmra.mrb[4].mxu0 %v3109_v15  ;;  %3821 = vmatprep.mubr.f32.mxu1 %v3108_v6  ;;  %v4696_v6 = vpack.c.bf16 %v3235_v1, %v3234_v0  ;;  %v5595_v0 = vld [vmem:[%s5213_s29 + $0xca] sm:$0xff]  ;;  %v166_v1 = vld [vmem:[%s5213_s29] sm:$0xff] }
  0x3b   : > { %4671 = vmatpush3.bf16.msra.mxu0 %v4668_v8  ;;  %4141 = vmatprep.mubr.f32.mxu0 %v3110_v16  ;;  %v3236_v8 = vld [vmem:[%s6367_s1 + $0x320] sm:$0xff] }
  0x3c   : > { %4673 = vmatprep.subr.bf16.mxu0 %v4672_v18  ;;  %4543 = vmatpush3.bf16.msra.mxu1 %v4540_v11  ;;  %v5463_v11 = vld [vmem:[%s5213_s29 + $0x3a] sm:$0xff] }
  0x3d   : > { %3822 = vmatmul.mubr.f32.gmra.mrb[6].mxu1 %v3109_v15  ;;  %4545 = vmatprep.subr.bf16.mxu1 %v4544_v21  ;;  %v4700_v15 = vpack.c.bf16 %v3237_v9, %v3236_v8  ;;  %v5601_v8 = vpack.c.bf16 %v3281_v60, %v3280_v59  ;;  %v3042_v9 = vld [vmem:[%s6367_s1 + $0x110] sm:$0xff]  ;;  %v5662_v59 = vld [vmem:[%s5213_s29 + $0x48] sm:$0xff] }
  0x3e   : > { %4142 = vmatmul.mubr.f32.gmra.mrb[6].mxu0 %v3111_v25  ;;  %3824 = vmatprep.mubr.f32.mxu1 %v3110_v16  ;;  %v3238_v16 = vld [vmem:[%s6367_s1 + $0x330] sm:$0xff]  ;;  %6427 = vst [vmem:[#allocation21_spill] sm:$0xff] %v5662_v59  ;;  %v5665_v60 = vld [vmem:[%s5213_s29 + $0x122] sm:$0xff] }
  0x3f   : > { %4675 = vmatpush3.bf16.msra.mxu0 %v4672_v18  ;;  %4144 = vmatprep.mubr.f32.mxu0 %v3112_v26  ;;  %v3239_v18 = vld [vmem:[%s6367_s1 + $0x338] sm:$0xff] }
  0x40   : > { %4677 = vmatprep.subr.bf16.mxu0 %v4676_v27  ;;  %4547 = vmatpush3.bf16.msra.mxu1 %v4544_v21  ;;  %v5488_v21 = vld [vmem:[%s5213_s29 + $0x109] sm:$0xff]  ;;  %v4704_v24 = vpack.c.bf16 %v3239_v18, %v3238_v16 }
  0x41   : > { %3825 = vmatmul.mubr.f32.gmra.mrb[8].mxu1 %v3111_v25  ;;  %4549 = vmatprep.subr.bf16.mxu1 %v4548_v30  ;;  %6415 = vst [vmem:[#allocation9_spill] sm:$0xff] %v5488_v21  ;;  %v3240_v25 = vld [vmem:[%s6367_s1 + $0x340] sm:$0xff]  ;;  %v167_v16 = vld [vmem:[%s5213_s29 + $0x8] sm:$0xff] }
  0x42   : > { %4145 = vmatmul.mubr.f32.gmra.mrb[8].mxu0 %v3113_v34  ;;  %3827 = vmatprep.mubr.f32.mxu1 %v3112_v26  ;;  %v3241_v26 = vld [vmem:[%s6367_s1 + $0x348] sm:$0xff] }
  0x43   : > { %4679 = vmatpush3.bf16.msra.mxu0 %v4676_v27  ;;  %4147 = vmatprep.mubr.f32.mxu0 %v5375_v35  ;;  %v5503_v27 = vld [vmem:[%s5213_s29 + $0x111] sm:$0xff]  ;;  %v4708_v32 = vpack.c.bf16 %v3241_v26, %v3240_v25  ;;  %v5614_v18 = vld [vmem:[%s5213_s29 + $0xe2] sm:$0xff] }
  0x44   : > { %4681 = vmatprep.subr.bf16.mxu0 %v4680_v36  ;;  %4551 = vmatpush3.bf16.msra.mxu1 %v4548_v30  ;;  %6416 = vst [vmem:[#allocation10_spill] sm:$0xff] %v5503_v27  ;;  %v5513_v30 = vld [vmem:[%s5213_s29 + $0x7a] sm:$0xff]  ;;  %v5620_v25 = vld [vmem:[%s5213_s29 + $0xf2] sm:$0xff] }
  0x45   : > { %3828 = vmatmul.mubr.f32.gmra.mrb[10].mxu1 %v3113_v34  ;;  %4553 = vmatprep.subr.bf16.mxu1 %v4552_v40  ;;  %v3243_v34 = vld [vmem:[%s6367_s1 + $0x358] sm:$0xff] }
  0x46   : > { %4148 = vmatmul.mubr.f32.gmra.mrb[10].mxu0 %v3115_v44  ;;  %3830 = vmatprep.mubr.f32.mxu1 %v5375_v35  ;;  %v4712_v41 = vpack.c.bf16 %v3243_v34, %v3242_v33  ;;  %v3045_v33 = vld [vmem:[%s6367_s1 + $0x128] sm:$0xff]  ;;  %v5632_v34 = vld [vmem:[%s5213_s29 + $0x20] sm:$0xff] }
  0x47   : > { %4683 = vmatpush3.bf16.msra.mxu0 %v4680_v36  ;;  %4150 = vmatprep.mubr.f32.mxu0 %v3116_v45  ;;  %v5525_v36 = vld [vmem:[%s5213_s29 + $0x129] sm:$0xff] }
  0x48   : > { %4685 = vmatprep.subr.bf16.mxu0 %v4684_v46  ;;  %4555 = vmatpush3.bf16.msra.mxu1 %v4552_v40  ;;  %6418 = vst [vmem:[#allocation12_spill] sm:$0xff] %v5525_v36  ;;  %v5535_v40 = vld [vmem:[%s5213_s29 + $0x92] sm:$0xff] }
  0x49   : > { %3831 = vmatmul.mubr.f32.gmra.mrb[12].mxu1 %v3115_v44  ;;  %4557 = vmatprep.subr.bf16.mxu1 %v4556_v50  ;;  %v3245_v44 = vld [vmem:[%s6367_s1 + $0x368] sm:$0xff] }
  0x4a   : > { %4151 = vmatmul.mubr.f32.gmra.mrb[12].mxu0 %v3117_v53  ;;  %3833 = vmatprep.mubr.f32.mxu1 %v3116_v45  ;;  %v5547_v45 = vld [vmem:[%s5213_s29 + $0x141] sm:$0xff] }
  0x4b   : > { %4687 = vmatpush3.bf16.msra.mxu0 %v4684_v46  ;;  %4153 = vmatprep.mubr.f32.mxu0 %v5407_v54  ;;  %6420 = vst [vmem:[#allocation14_spill] sm:$0xff] %v5547_v45  ;;  %v5551_v46 = vld [vmem:[%s5213_s29 + $0x9a] sm:$0xff] }
  0x4c   : > { %4689 = vmatprep.subr.bf16.mxu0 %v4688_v55  ;;  %4559 = vmatpush3.bf16.msra.mxu1 %v4556_v50  ;;  %v4716_v50 = vpack.c.bf16 %v3245_v44, %v3244_v42  ;;  %v5640_v42 = vld [vmem:[%s5213_s29 + $0x30] sm:$0xff] }
  0x4d   : > { %3834 = vmatmul.mubr.f32.gmra.mrb[14].mxu1 %v3117_v53  ;;  %4561 = vmatprep.subr.bf16.mxu1 %v4560_v58  ;;  %v5569_v53 = vld [vmem:[%s5213_s29 + $0x159] sm:$0xff]  ;;  %6425 = vst [vmem:[#allocation19_spill] sm:$0xff] %v5640_v42  ;;  %v5643_v44 = vld [vmem:[%s5213_s29 + $0x10a] sm:$0xff] }
  0x4e   : > { %4154 = vmatmul.mubr.f32.gmra.mrb[14].mxu0 %v5423_v61  ;;  %3836 = vmatprep.mubr.f32.mxu1 %v5407_v54  ;;  %6422 = vst [vmem:[#allocation16_spill] sm:$0xff] %v5569_v53 }
  0x4f   : > { %4691 = vmatpush3.bf16.msra.mxu0 %v4688_v55  ;;  %4212 = vmatprep.mubr.f32.mxu0 %v5426_v62  ;;  %v5573_v55 = vld [vmem:[%s5213_s29 + $0xb2] sm:$0xff] }
  0x50   : > { %4693 = vmatprep.subr.bf16.mxu0 %v4692_v63  ;;  %4563 = vmatpush3.bf16.msra.mxu1 %v4560_v58  ;;  %v4720_v58 = vpack.c.bf16 %v3247_v52, %v3246_v51  ;;  %v3047_v51 = vld [vmem:[%s6367_s1 + $0x138] sm:$0xff] }
  0x51   : > { %3837 = vmatmul.mubr.f32.gmra.mrb[16].mxu1 %v5423_v61  ;;  %4565 = vmatprep.subr.bf16.mxu1 %v5434_v2  ;;  %v5655_v52 = vld [vmem:[%s5213_s29 + $0x38] sm:$0xff] }
  0x52   : > { %4213 = vmatmul.mubr.f32.vlgmr.msra.gmra.mrb[0].mxu0 %v5440_v3  ;;  %3839 = vmatprep.mubr.f32.mxu1 %v5443_v4  ;;  %6426 = vst [vmem:[#allocation20_spill] sm:$0xff] %v5655_v52 }
  0x53   : > { %4695 = vmatpush3.bf16.msra.mxu0 %v4692_v63  ;;  %4215 = vmatprep.mubr.f32.mxu0 %v5446_v5  ;;  %v5591_v63 = vld [vmem:[%s5213_s29 + $0x171] sm:$0xff] }
  0x54   : > { %4697 = vmatprep.subr.bf16.mxu0 %v4696_v6  ;;  %6424 = vst [vmem:[#allocation18_spill] sm:$0xff] %v5591_v63 }
  0x55   : > { %3840 = vmatmul.mubr.f32.gmra.mrb[18].mxu1 %v5459_v10 }
  0x56   : > { %4216 = vmatmul.mubr.f32.gmra.mrb[2].mxu0 %v5463_v11  ;;  %3842 = vmatprep.mubr.f32.mxu1 %v5466_v13 }
  0x57   : > { %4218 = vmatprep.mubr.f32.mxu0 %v5469_v14  ;;  %4699 = vmatpush3.bf16.msra.mxu0 %v4696_v6  ;;  %v5599_v6 = vld [vmem:[%s5213_s29 + $0xda] sm:$0xff] }
  0x58   : > { %4701 = vmatprep.subr.bf16.mxu0 %v4700_v15 }
  0x59   : > { %3843 = vmatmul.mubr.f32.gmra.mrb[20].mxu1 %v5481_v19 }
  0x5a   : > { %4219 = vmatmul.mubr.f32.gmra.mrb[4].mxu0 %v5485_v20  ;;  %3845 = vmatprep.mubr.f32.mxu1 %v5488_v21  ;;  %v3287_v21 = vld [vmem:[%s6367_s1 + $0x3b8] sm:$0xff] }
  0x5b   : > { %4221 = vmatprep.mubr.f32.mxu0 %v5491_v22  ;;  %4703 = vmatpush3.bf16.msra.mxu0 %v4700_v15  ;;  %v3043_v15 = vld [vmem:[%s6367_s1 + $0x118] sm:$0xff] }
  0x5c   : > { %4705 = vmatprep.subr.bf16.mxu0 %v4704_v24  ;;  %v4568_v26 = vpack.c.bf16 %v3043_v15, %v3042_v9  ;;  %v3048_v9 = vld [vmem:[%s6367_s1 + $0x140] sm:$0xff]  ;;  %v3049_v15 = vld [vmem:[%s6367_s1 + $0x148] sm:$0xff] }
  0x5d   : > { %3846 = vmatmul.mubr.f32.gmra.mrb[22].mxu1 %v5503_v27  ;;  %v3282_v27 = vld [vmem:[%s6367_s1 + $0x390] sm:$0xff] }
  0x5e   : > { %4222 = vmatmul.mubr.f32.gmra.mrb[6].mxu0 %v5507_v28  ;;  %3848 = vmatprep.mubr.f32.mxu1 %v5510_v29 }
  0x5f   : > { %4224 = vmatprep.mubr.f32.mxu0 %v5513_v30  ;;  %4707 = vmatpush3.bf16.msra.mxu0 %v4704_v24  ;;  %v5617_v24 = vld [vmem:[%s5213_s29 + $0x18] sm:$0xff] }
  0x60   : > { %4709 = vmatprep.subr.bf16.mxu0 %v4708_v32 }
  0x61   : > { %3849 = vmatmul.mubr.f32.gmra.mrb[24].mxu1 %v5525_v36  ;;  %v3088_v36 = vld [vmem:[%s6367_s1 + $0x180] sm:$0xff] }
  0x62   : > { %4225 = vmatmul.mubr.f32.gmra.mrb[8].mxu0 %v5529_v38  ;;  %3851 = vmatprep.mubr.f32.mxu1 %v5532_v39  ;;  %v5769_v29 = vpack.c.bf16 %v3089_v17, %v3088_v36  ;;  %v5784_v17 = vld [vmem:[%s5213_s29 + $0xd8] sm:$0xff]  ;;  %v3284_v36 = vld [vmem:[%s6367_s1 + $0x3a0] sm:$0xff] }
  0x63   : > { %4227 = vmatprep.mubr.f32.mxu0 %v5535_v40  ;;  %4711 = vmatpush3.bf16.msra.mxu0 %v4708_v32  ;;  %v3044_v32 = vld [vmem:[%s6367_s1 + $0x120] sm:$0xff] }
  0x64   : > { %4713 = vmatprep.subr.bf16.mxu0 %v4712_v41 }
  0x65   : > { %3852 = vmatmul.mubr.f32.gmra.mrb[26].mxu1 %v5547_v45  ;;  %v3055_v45 = vld [vmem:[%s6367_s1 + $0x178] sm:$0xff] }
  0x66   : > { %4228 = vmatmul.mubr.f32.gmra.mrb[10].mxu0 %v5551_v46  ;;  %3854 = vmatprep.mubr.f32.mxu1 %v5554_v47  ;;  %v3054_v47 = vld [vmem:[%s6367_s1 + $0x170] sm:$0xff] }
  0x67   : > { %4230 = vmatprep.mubr.f32.mxu0 %v5557_v48  ;;  %4715 = vmatpush3.bf16.msra.mxu0 %v4712_v41  ;;  %v5637_v41 = vld [vmem:[%s5213_s29 + $0xfa] sm:$0xff]  ;;  %v4592_v39 = vpack.c.bf16 %v3055_v45, %v3054_v47  ;;  %v3183_v45 = vld [vmem:[%s5213_s29 + $0x18a] sm:$0xff] }
  0x68   : > { %4717 = vmatprep.subr.bf16.mxu0 %v4716_v50  ;;  %v5767_v47 = vld [vmem:[%s5213_s29 + $0xc0] sm:$0xff] }
  0x69   : > { %3855 = vmatmul.mubr.f32.gmra.mrb[28].mxu1 %v5569_v53  ;;  %v5731_v53 = vld [vmem:[%s5213_s29 + $0x16a] sm:$0xff]  ;;  %6437 = vst [vmem:[#allocation31_spill] sm:$0xff] %v5767_v47 }
  0x6a   : > { %4231 = vmatmul.mubr.f32.gmra.mrb[12].mxu0 %v5573_v55  ;;  %3857 = vmatprep.mubr.f32.mxu1 %v5576_v56  ;;  %v3053_v56 = vld [vmem:[%s6367_s1 + $0x168] sm:$0xff] }
  0x6b   : > { %4233 = vmatprep.mubr.f32.mxu0 %v5579_v57  ;;  %4719 = vmatpush3.bf16.msra.mxu0 %v4716_v50  ;;  %v4572_v50 = vpack.c.bf16 %v3045_v33, %v3044_v32  ;;  %v5684_v32 = vld [vmem:[%s5213_s29 + $0x60] sm:$0xff]  ;;  %v4588_v31 = vpack.c.bf16 %v3053_v56, %v3052_v37  ;;  %v5747_v37 = vld [vmem:[%s5213_s29 + $0x172] sm:$0xff]  ;;  %v5750_v56 = vld [vmem:[%s5213_s29 + $0xa8] sm:$0xff] }
  0x6c   : > { %4721 = vmatprep.subr.bf16.mxu0 %v4720_v58  ;;  %6429 = vst [vmem:[#allocation23_spill] sm:$0xff] %v5684_v32  ;;  %v5687_v33 = vld [vmem:[%s5213_s29 + $0x13a] sm:$0xff]  ;;  %6435 = vst [vmem:[#allocation29_spill] sm:$0xff] %v5750_v56 }
  0x6d   : > { %3858 = vmatmul.mubr.f32.gmra.mrb[30].mxu1 %v5591_v63 }
  0x6e   : > { %4234 = vmatmul.mubr.f32.gmra.mrb[14].mxu0 %v5595_v0  ;;  %3892 = vmatprep.mubr.f32.mxu1 %v166_v1 }
  0x6f   : > { %4236 = vmatprep.mubr.f32.mxu0 %v5599_v6  ;;  %4723 = vmatpush3.bf16.msra.mxu0 %v4720_v58  ;;  %v5659_v58 = vld [vmem:[%s5213_s29 + $0x112] sm:$0xff] }
  0x70   : > { %4725 = vmatprep.subr.bf16.mxu0 %v5601_v8 }
  0x71   : > { %3893 = vmatmul.mubr.f32.vlgmr.msra.gmra.mrb[0].mxu1 %v167_v16  ;;  %v5677_v16 = vld [vmem:[%s5213_s29 + $0x50] sm:$0xff] }
  0x72   : > { %4237 = vmatmul.mubr.f32.gmra.mrb[16].mxu0 %v5614_v18  ;;  %4567 = vmatpush3.bf16.msra.mxu1 %v5434_v2  ;;  %v3046_v2 = vld [vmem:[%s6367_s1 + $0x130] sm:$0xff]  ;;  %6428 = vst [vmem:[#allocation22_spill] sm:$0xff] %v5677_v16 }
  0x73   : > { %3895 = vmatprep.mubr.f32.mxu1 %v5617_v24  ;;  %4239 = vmatprep.mubr.f32.mxu0 %v5620_v25  ;;  %v4576_v1 = vpack.c.bf16 %v3047_v51, %v3046_v2  ;;  %v4580_v2 = vpack.c.bf16 %v3049_v15, %v3048_v9  ;;  %v3050_v51 = vld [vmem:[%s6367_s1 + $0x150] sm:$0xff]  ;;  %v5703_v9 = vld [vmem:[%s5213_s29 + $0x142] sm:$0xff]  ;;  %v5706_v15 = vld [vmem:[%s5213_s29 + $0x78] sm:$0xff] }
  0x74   : > { %4569 = vmatprep.subr.bf16.mxu1 %v4568_v26  ;;  %6431 = vst [vmem:[#allocation25_spill] sm:$0xff] %v5706_v15  ;;  %v4584_v63 = vpack.c.bf16 %v3051_v49, %v3050_v51  ;;  %v5725_v49 = vld [vmem:[%s5213_s29 + $0x15a] sm:$0xff]  ;;  %v5728_v51 = vld [vmem:[%s5213_s29 + $0x90] sm:$0xff] }
  0x75   : > { %3896 = vmatmul.mubr.f32.gmra.mrb[2].mxu1 %v5632_v34  ;;  %6433 = vst [vmem:[#allocation27_spill] sm:$0xff] %v5728_v51 }
  0x76   : > { %4240 = vmatmul.mubr.f32.gmra.mrb[18].mxu0 %v5637_v41  ;;  %3898 = vmatprep.mubr.f32.mxu1 %v5640_v42 }
  0x77   : > { %4242 = vmatprep.mubr.f32.mxu0 %v5643_v44  ;;  %4571 = vmatpush3.bf16.msra.mxu1 %v4568_v26  ;;  %v5681_v26 = vld [vmem:[%s5213_s29 + $0x12a] sm:$0xff] }
  0x78   : > { %4573 = vmatprep.subr.bf16.mxu1 %v4572_v50 }
  0x79   : > { %3899 = vmatmul.mubr.f32.gmra.mrb[4].mxu1 %v5655_v52 }
  0x7a   : > { %4243 = vmatmul.mubr.f32.gmra.mrb[20].mxu0 %v5659_v58  ;;  %3901 = vmatprep.mubr.f32.mxu1 %v5662_v59 }
  0x7b   : > { %4245 = vmatprep.mubr.f32.mxu0 %v5665_v60  ;;  %4575 = vmatpush3.bf16.msra.mxu1 %v4572_v50  ;;  %v5699_v50 = vld [vmem:[%s5213_s29 + $0x68] sm:$0xff] }
  0x7c   : > { %4577 = vmatprep.subr.bf16.mxu1 %v4576_v1  ;;  %6430 = vst [vmem:[#allocation24_spill] sm:$0xff] %v5699_v50 }
  0x7d   : > { %3902 = vmatmul.mubr.f32.gmra.mrb[6].mxu1 %v5677_v16 }
  0x7e   : > { %4246 = vmatmul.mubr.f32.gmra.mrb[22].mxu0 %v5681_v26  ;;  %3904 = vmatprep.mubr.f32.mxu1 %v5684_v32 }
  0x7f   : > { %4248 = vmatprep.mubr.f32.mxu0 %v5687_v33  ;;  %4579 = vmatpush3.bf16.msra.mxu1 %v4576_v1  ;;  %v5721_v1 = vld [vmem:[%s5213_s29 + $0x80] sm:$0xff] }
  0x80   : > { %4581 = vmatprep.subr.bf16.mxu1 %v4580_v2  ;;  %6432 = vst [vmem:[#allocation26_spill] sm:$0xff] %v5721_v1 }
  0x81   : > { %3905 = vmatmul.mubr.f32.gmra.mrb[8].mxu1 %v5699_v50 }
  0x82   : > { %4249 = vmatmul.mubr.f32.gmra.mrb[24].mxu0 %v5703_v9  ;;  %3907 = vmatprep.mubr.f32.mxu1 %v5706_v15 }
  0x83   : > { %4251 = vmatprep.mubr.f32.mxu0 %v5709_v43  ;;  %4583 = vmatpush3.bf16.msra.mxu1 %v4580_v2  ;;  %v5743_v2 = vld [vmem:[%s5213_s29 + $0x98] sm:$0xff] }
  0x84   : > { %4585 = vmatprep.subr.bf16.mxu1 %v4584_v63  ;;  %6434 = vst [vmem:[#allocation28_spill] sm:$0xff] %v5743_v2 }
  0x85   : > { %3908 = vmatmul.mubr.f32.gmra.mrb[10].mxu1 %v5721_v1 }
  0x86   : > { %4252 = vmatmul.mubr.f32.gmra.mrb[26].mxu0 %v5725_v49  ;;  %3910 = vmatprep.mubr.f32.mxu1 %v5728_v51 }
  0x87   : > { %4254 = vmatprep.mubr.f32.mxu0 %v5731_v53  ;;  %4587 = vmatpush3.bf16.msra.mxu1 %v4584_v63  ;;  %v5763_v63 = vld [vmem:[%s5213_s29 + $0xb0] sm:$0xff] }
  0x88   : > { %4589 = vmatprep.subr.bf16.mxu1 %v4588_v31  ;;  %6436 = vst [vmem:[#allocation30_spill] sm:$0xff] %v5763_v63 }
  0x89   : > { %3911 = vmatmul.mubr.f32.gmra.mrb[12].mxu1 %v5743_v2 }
  0x8a   : > { %4255 = vmatmul.mubr.f32.gmra.mrb[28].mxu0 %v5747_v37  ;;  %3913 = vmatprep.mubr.f32.mxu1 %v5750_v56 }
  0x8b   : > { %4257 = vmatprep.mubr.f32.mxu0 %v3182_v23  ;;  %4591 = vmatpush3.bf16.msra.mxu1 %v4588_v31  ;;  %v5780_v23 = vld [vmem:[%s5213_s29 + $0xc8] sm:$0xff]  ;;  %v4728_v31 = vpack.c.bf16 %v3283_v12, %v3282_v27  ;;  %v5802_v12 = vld [vmem:[%s5213_s29 + $0xf0] sm:$0xff] }
  0x8c   : > { %4593 = vmatprep.subr.bf16.mxu1 %v4592_v39  ;;  %6438 = vst [vmem:[#allocation32_spill] sm:$0xff] %v5780_v23 }
  0x8d   : > { %3914 = vmatmul.mubr.f32.gmra.mrb[14].mxu1 %v5763_v63 }
  0x8e   : > { %4258 = vmatmul.mubr.f32.gmra.mrb[30].mxu0 %v3183_v45  ;;  %3916 = vmatprep.mubr.f32.mxu1 %v5767_v47  ;;  %v3285_v45 = vld [vmem:[%s6367_s1 + $0x3a8] sm:$0xff] }
  0x8f   : > { %4292 = vmatprep.mubr.f32.mxu0 %v5640_v42  ;;  %4595 = vmatpush3.bf16.msra.mxu1 %v4592_v39  ;;  %v5797_v39 = vld [vmem:[%s5213_s29 + $0xe0] sm:$0xff]  ;;  %v4732_v27 = vpack.c.bf16 %v3285_v45, %v3284_v36  ;;  %v5818_v36 = vld [vmem:[%s5213_s29 + $0x108] sm:$0xff] }
  0x90   : > { %4597 = vmatprep.subr.bf16.mxu1 %v5769_v29  ;;  %v714_v42 = vld [vmem:[%s5213_s29 + $0xa] sm:$0xff] }
  0x91   : > { %3917 = vmatmul.mubr.f32.gmra.mrb[16].mxu1 %v5780_v23 }
  0x92   : > { %4293 = vmatmul.mubr.f32.vlgmr.msra.gmra.mrb[0].mxu0 %v5655_v52  ;;  %3919 = vmatprep.mubr.f32.mxu1 %v5784_v17  ;;  %v3286_v52 = vld [vmem:[%s6367_s1 + $0x3b0] sm:$0xff] }
  0x93   : > { %4727 = vmatpush3.bf16.msra.mxu0 %v5601_v8  ;;  %4295 = vmatprep.mubr.f32.mxu0 %v5662_v59  ;;  %v5814_v8 = vld [vmem:[%s5213_s29 + $0xf8] sm:$0xff]  ;;  %v4736_v45 = vpack.c.bf16 %v3287_v21, %v3286_v52  ;;  %v3288_v59 = vld [vmem:[%s6367_s1 + $0x3c0] sm:$0xff] }
  0x94   : > { %4729 = vmatprep.subr.bf16.mxu0 %v4728_v31  ;;  %v5834_v21 = vld [vmem:[%s5213_s29 + $0x120] sm:$0xff] }
  0x95   : > { %3920 = vmatmul.mubr.f32.gmra.mrb[18].mxu1 %v5797_v39 }
  0x96   : > { %4296 = vmatmul.mubr.f32.gmra.mrb[2].mxu0 %v5677_v16  ;;  %3922 = vmatprep.mubr.f32.mxu1 %v5802_v12  ;;  %v3289_v16 = vld [vmem:[%s6367_s1 + $0x3c8] sm:$0xff] }
  0x97   : > { %4298 = vmatprep.mubr.f32.mxu0 %v5684_v32  ;;  %4731 = vmatpush3.bf16.msra.mxu0 %v4728_v31  ;;  %v5830_v31 = vld [vmem:[%s5213_s29 + $0x110] sm:$0xff]  ;;  %v4740_v52 = vpack.c.bf16 %v3289_v16, %v3288_v59  ;;  %v5850_v59 = vld [vmem:[%s5213_s29 + $0x138] sm:$0xff] }
  0x98   : > { %4733 = vmatprep.subr.bf16.mxu0 %v4732_v27  ;;  %v3290_v32 = vld [vmem:[%s6367_s1 + $0x3d0] sm:$0xff] }
  0x99   : > { %3923 = vmatmul.mubr.f32.gmra.mrb[20].mxu1 %v5814_v8 }
  0x9a   : > { %4299 = vmatmul.mubr.f32.gmra.mrb[4].mxu0 %v5699_v50  ;;  %3925 = vmatprep.mubr.f32.mxu1 %v5818_v36  ;;  %v3291_v50 = vld [vmem:[%s6367_s1 + $0x3d8] sm:$0xff] }
  0x9b   : > { %4301 = vmatprep.mubr.f32.mxu0 %v5706_v15  ;;  %4735 = vmatpush3.bf16.msra.mxu0 %v4732_v27  ;;  %v5846_v15 = vld [vmem:[%s5213_s29 + $0x128] sm:$0xff]  ;;  %v4744_v16 = vpack.c.bf16 %v3291_v50, %v3290_v32  ;;  %v3292_v27 = vld [vmem:[%s6367_s1 + $0x3e0] sm:$0xff]  ;;  %v5866_v32 = vld [vmem:[%s5213_s29 + $0x150] sm:$0xff] }
  0x9c   : > { %4737 = vmatprep.subr.bf16.mxu0 %v4736_v45 }
  0x9d   : > { %3926 = vmatmul.mubr.f32.gmra.mrb[22].mxu1 %v5830_v31 }
  0x9e   : > { %4302 = vmatmul.mubr.f32.gmra.mrb[6].mxu0 %v5721_v1  ;;  %3928 = vmatprep.mubr.f32.mxu1 %v5834_v21  ;;  %v3293_v1 = vld [vmem:[%s6367_s1 + $0x3e8] sm:$0xff] }
  0x9f   : > { %4304 = vmatprep.mubr.f32.mxu0 %v5728_v51  ;;  %4739 = vmatpush3.bf16.msra.mxu0 %v4736_v45  ;;  %v5862_v51 = vld [vmem:[%s5213_s29 + $0x140] sm:$0xff]  ;;  %v4748_v50 = vpack.c.bf16 %v3293_v1, %v3292_v27  ;;  %v3294_v45 = vld [vmem:[%s6367_s1 + $0x3f0] sm:$0xff]  ;;  %v5882_v1 = vld [vmem:[%s5213_s29 + $0x168] sm:$0xff] }
  0xa0   : > { %4741 = vmatprep.subr.bf16.mxu0 %v4740_v52  ;;  %v3328_v27 = vld [vmem:[%s6367_s1 + $0x400] sm:$0xff] }
  0xa1   : > { %3929 = vmatmul.mubr.f32.gmra.mrb[24].mxu1 %v5846_v15 }
  0xa2   : > { %4305 = vmatmul.mubr.f32.gmra.mrb[8].mxu0 %v5743_v2  ;;  %3931 = vmatprep.mubr.f32.mxu1 %v5850_v59  ;;  %v3295_v2 = vld [vmem:[%s6367_s1 + $0x3f8] sm:$0xff] }
  0xa3   : > { %4307 = vmatprep.mubr.f32.mxu0 %v5750_v56  ;;  %4743 = vmatpush3.bf16.msra.mxu0 %v4740_v52  ;;  %v5878_v56 = vld [vmem:[%s5213_s29 + $0x158] sm:$0xff]  ;;  %v4752_v52 = vpack.c.bf16 %v3295_v2, %v3294_v45  ;;  %v713_v2 = vld [vmem:[%s5213_s29 + $0x2] sm:$0xff]  ;;  %v3090_v45 = vld [vmem:[%s6367_s1 + $0x190] sm:$0xff] }
  0xa4   : > { %4745 = vmatprep.subr.bf16.mxu0 %v4744_v16 }
  0xa5   : > { %3932 = vmatmul.mubr.f32.gmra.mrb[26].mxu1 %v5862_v51 }
  0xa6   : > { %4308 = vmatmul.mubr.f32.gmra.mrb[10].mxu0 %v5763_v63  ;;  %3934 = vmatprep.mubr.f32.mxu1 %v5866_v32  ;;  %v3329_v63 = vld [vmem:[%s6367_s1 + $0x408] sm:$0xff] }
  0xa7   : > { %4310 = vmatprep.mubr.f32.mxu0 %v5767_v47  ;;  %4747 = vmatpush3.bf16.msra.mxu0 %v4744_v16  ;;  %v5894_v47 = vld [vmem:[%s5213_s29 + $0x170] sm:$0xff]  ;;  %v5898_v16 = vpack.c.bf16 %v3329_v63, %v3328_v27  ;;  %v3092_v63 = vld [vmem:[%s6367_s1 + $0x1a0] sm:$0xff]  ;;  %v3093_v27 = vld [vmem:[%s6367_s1 + $0x1a8] sm:$0xff] }
  0xa8   : > { %4749 = vmatprep.subr.bf16.mxu0 %v4748_v50 }
  0xa9   : > { %3935 = vmatmul.mubr.f32.gmra.mrb[28].mxu1 %v5878_v56 }
  0xaa   : > { %4311 = vmatmul.mubr.f32.gmra.mrb[12].mxu0 %v5780_v23  ;;  %3937 = vmatprep.mubr.f32.mxu1 %v5882_v1  ;;  %v3091_v23 = vld [vmem:[%s6367_s1 + $0x198] sm:$0xff] }
  0xab   : > { %4313 = vmatprep.mubr.f32.mxu0 %v5784_v17  ;;  %4751 = vmatpush3.bf16.msra.mxu0 %v4748_v50  ;;  %v4600_v50 = vpack.c.bf16 %v3091_v23, %v3090_v45  ;;  %v4604_v23 = vpack.c.bf16 %v3093_v27, %v3092_v63  ;;  %v3101_v45 = vld [vmem:[%s6367_s1 + $0x1e8] sm:$0xff]  ;;  %v3103_v63 = vld [vmem:[%s6367_s1 + $0x1f8] sm:$0xff] }
  0xac   : > { %4753 = vmatprep.subr.bf16.mxu0 %v4752_v52  ;;  %v3230_v27 = vld [vmem:[%s5213_s29 + $0x198] sm:$0xff] }
  0xad   : > { %3938 = vmatmul.mubr.f32.gmra.mrb[30].mxu1 %v5894_v47 }
  0xae   : > { %4314 = vmatmul.mubr.f32.gmra.mrb[14].mxu0 %v5797_v39  ;;  %3972 = vmatprep.mubr.f32.mxu1 %v713_v2  ;;  %v3099_v2 = vld [vmem:[%s6367_s1 + $0x1d8] sm:$0xff] }
  0xaf   : > { %4316 = vmatprep.mubr.f32.mxu0 %v5802_v12  ;;  %4755 = vmatpush3.bf16.msra.mxu0 %v4752_v52  ;;  %v3095_v52 = vld [vmem:[%s6367_s1 + $0x1b8] sm:$0xff] }
  0xb0   : > { %4757 = vmatprep.subr.bf16.mxu0 %v5898_v16 }
  0xb1   : > { %3973 = vmatmul.mubr.f32.vlgmr.msra.gmra.mrb[0].mxu1 %v714_v42  ;;  %v3094_v42 = vld [vmem:[%s6367_s1 + $0x1b0] sm:$0xff] }
  0xb2   : > { %4317 = vmatmul.mubr.f32.gmra.mrb[16].mxu0 %v5814_v8  ;;  %4599 = vmatpush3.bf16.msra.mxu1 %v5769_v29  ;;  %v3097_v29 = vld [vmem:[%s6367_s1 + $0x1c8] sm:$0xff] }
  0xb3   : > { %3975 = vmatprep.mubr.f32.mxu1 %v5426_v62  ;;  %4319 = vmatprep.mubr.f32.mxu0 %v5818_v36  ;;  %v4608_v62 = vpack.c.bf16 %v3095_v52, %v3094_v42  ;;  %v3330_v42 = vld [vmem:[%s6367_s1 + $0x410] sm:$0xff] }
  0xb4   : > { %4601 = vmatprep.subr.bf16.mxu1 %v4600_v50  ;;  %v3250_v52 = vld [vmem:[%s5213_s29 + $0x49] sm:$0xff] }
  0xb5   : > { %3976 = vmatmul.mubr.f32.gmra.mrb[2].mxu1 %v5440_v3  ;;  %v3096_v3 = vld [vmem:[%s6367_s1 + $0x1c0] sm:$0xff] }
  0xb6   : > { %4320 = vmatmul.mubr.f32.gmra.mrb[18].mxu0 %v5830_v31  ;;  %3978 = vmatprep.mubr.f32.mxu1 %v5446_v5  ;;  %v4612_v5 = vpack.c.bf16 %v3097_v29, %v3096_v3  ;;  %v3333_v3 = vld [vmem:[%s6367_s1 + $0x428] sm:$0xff] }
  0xb7   : > { %4322 = vmatprep.mubr.f32.mxu0 %v5834_v21  ;;  %4603 = vmatpush3.bf16.msra.mxu1 %v4600_v50  ;;  %v3102_v50 = vld [vmem:[%s6367_s1 + $0x1f0] sm:$0xff]  ;;  %v3252_v29 = vld [vmem:[%s5213_s29 + $0x61] sm:$0xff] }
  0xb8   : > { %4605 = vmatprep.subr.bf16.mxu1 %v4604_v23 }
  0xb9   : > { %3979 = vmatmul.mubr.f32.gmra.mrb[4].mxu1 %v5463_v11  ;;  %v3098_v11 = vld [vmem:[%s6367_s1 + $0x1d0] sm:$0xff] }
  0xba   : > { %4323 = vmatmul.mubr.f32.gmra.mrb[20].mxu0 %v5846_v15  ;;  %3981 = vmatprep.mubr.f32.mxu1 %v5469_v14  ;;  %v4616_v14 = vpack.c.bf16 %v3099_v2, %v3098_v11  ;;  %v3335_v11 = vld [vmem:[%s6367_s1 + $0x438] sm:$0xff] }
  0xbb   : > { %4325 = vmatprep.mubr.f32.mxu0 %v5850_v59  ;;  %4607 = vmatpush3.bf16.msra.mxu1 %v4604_v23  ;;  %v3231_v23 = vld [vmem:[%s5213_s29 + $0x1a0] sm:$0xff] }
  0xbc   : > { %4609 = vmatprep.subr.bf16.mxu1 %v4608_v62 }
  0xbd   : > { %3982 = vmatmul.mubr.f32.gmra.mrb[6].mxu1 %v5485_v20  ;;  %v3100_v20 = vld [vmem:[%s6367_s1 + $0x1e0] sm:$0xff] }
  0xbe   : > { %4326 = vmatmul.mubr.f32.gmra.mrb[22].mxu0 %v5862_v51  ;;  %3984 = vmatprep.mubr.f32.mxu1 %v5491_v22  ;;  %v5962_v22 = vld [vmem:[%s5213_s29 + $0x180] sm:$0xff] }
  0xbf   : > { %4328 = vmatprep.mubr.f32.mxu0 %v5866_v32  ;;  %4611 = vmatpush3.bf16.msra.mxu1 %v4608_v62 }
  0xc0   : > { %4613 = vmatprep.subr.bf16.mxu1 %v4612_v5 }
  0xc1   : > { %3985 = vmatmul.mubr.f32.gmra.mrb[8].mxu1 %v5507_v28  ;;  %v4620_v28 = vpack.c.bf16 %v3101_v45, %v3100_v20  ;;  %v3339_v45 = vld [vmem:[%s6367_s1 + $0x458] sm:$0xff] }
  0xc2   : > { %4329 = vmatmul.mubr.f32.gmra.mrb[24].mxu0 %v5878_v56  ;;  %3987 = vmatprep.mubr.f32.mxu1 %v5513_v30  ;;  %v5975_v30 = vld [vmem:[%s5213_s29 + $0x188] sm:$0xff] }
  0xc3   : > { %4331 = vmatprep.mubr.f32.mxu0 %v5882_v1  ;;  %4615 = vmatpush3.bf16.msra.mxu1 %v4612_v5  ;;  %v3334_v5 = vld [vmem:[%s6367_s1 + $0x430] sm:$0xff] }
  0xc4   : > { %4617 = vmatprep.subr.bf16.mxu1 %v4616_v14  ;;  %v4768_v2 = vpack.c.bf16 %v3335_v11, %v3334_v5  ;;  %v6099_v5 = vld [vmem:[%s5213_s29 + $0x189] sm:$0xff]  ;;  %v3278_v11 = vld [vmem:[%s5213_s29 + $0x199] sm:$0xff] }
  0xc5   : > { %3988 = vmatmul.mubr.f32.gmra.mrb[10].mxu1 %v5529_v38  ;;  %v4624_v38 = vpack.c.bf16 %v3103_v63, %v3102_v50  ;;  %v3341_v63 = vld [vmem:[%s6367_s1 + $0x468] sm:$0xff] }
  0xc6   : > { %4332 = vmatmul.mubr.f32.gmra.mrb[26].mxu0 %v5894_v47  ;;  %3990 = vmatprep.mubr.f32.mxu1 %v5535_v40  ;;  %v3248_v40 = vld [vmem:[%s5213_s29 + $0x31] sm:$0xff] }
  0xc7   : > { %4334 = vmatprep.mubr.f32.mxu0 %v5962_v22  ;;  %4619 = vmatpush3.bf16.msra.mxu1 %v4616_v14  ;;  %v3337_v14 = vld [vmem:[%s6367_s1 + $0x448] sm:$0xff] }
  0xc8   : > { %4621 = vmatprep.subr.bf16.mxu1 %v4620_v28 }
  0xc9   : > { %3991 = vmatmul.mubr.f32.gmra.mrb[12].mxu1 %v5551_v46  ;;  %v3331_v46 = vld [vmem:[%s6367_s1 + $0x418] sm:$0xff] }
  0xca   : > { %4335 = vmatmul.mubr.f32.gmra.mrb[28].mxu0 %v5975_v30  ;;  %3993 = vmatprep.mubr.f32.mxu1 %v5557_v48  ;;  %v3249_v48 = vld [vmem:[%s5213_s29 + $0x39] sm:$0xff]  ;;  %v4760_v62 = vpack.c.bf16 %v3331_v46, %v3330_v42 }
  0xcb   : > { %4337 = vmatprep.mubr.f32.mxu0 %v3230_v27  ;;  %4623 = vmatpush3.bf16.msra.mxu1 %v4620_v28  ;;  %v3258_v28 = vld [vmem:[%s5213_s29 + $0xa9] sm:$0xff]  ;;  %v3343_v27 = vld [vmem:[%s6367_s1 + $0x478] sm:$0xff]  ;;  %v6457_v46 = vld [vmem:[#allocation26_spill] sm:$0xff] }
  0xcc   : > { %4625 = vmatprep.subr.bf16.mxu1 %v4624_v38  ;;  %v6456_v42 = vld [vmem:[#allocation5_spill] sm:$0xff] }
  0xcd   : > { %3994 = vmatmul.mubr.f32.gmra.mrb[14].mxu1 %v5573_v55  ;;  %v3332_v55 = vld [vmem:[%s6367_s1 + $0x420] sm:$0xff] }
  0xce   : > { %4338 = vmatmul.mubr.f32.gmra.mrb[30].mxu0 %v3231_v23  ;;  %3996 = vmatprep.mubr.f32.mxu1 %v5579_v57  ;;  %v3251_v57 = vld [vmem:[%s5213_s29 + $0x51] sm:$0xff] }
  0xcf   : > { %4372 = vmatprep.mubr.f32.mxu0 %v3248_v40  ;;  %4627 = vmatpush3.bf16.msra.mxu1 %v4624_v38  ;;  %v6453_v38 = vld [vmem:[#allocation14_spill] sm:$0xff]  ;;  %v6454_v23 = vld [vmem:[#allocation25_spill] sm:$0xff]  ;;  %v6455_v40 = vld [vmem:[#allocation15_spill] sm:$0xff] }
  0xd0   : > { %4788 = vmatprep.subr.bf16.mxu1 %v5170_v7 }
  0xd1   : > { %3997 = vmatmul.mubr.f32.gmra.mrb[16].mxu1 %v5595_v0  ;;  %v4764_v0 = vpack.c.bf16 %v3333_v3, %v3332_v55  ;;  %v6091_v55 = vld [vmem:[%s5213_s29 + $0x181] sm:$0xff] }
  0xd2   : > { %4373 = vmatmul.mubr.f32.vlgmr.msra.gmra.mrb[0].mxu0 %v3249_v48  ;;  %3999 = vmatprep.mubr.f32.mxu1 %v5599_v6  ;;  %v3253_v6 = vld [vmem:[%s5213_s29 + $0x69] sm:$0xff]  ;;  %v6461_v3 = vld [vmem:[#allocation6_spill] sm:$0xff] }
  0xd3   : > { %4759 = vmatpush3.bf16.msra.mxu0 %v5898_v16  ;;  %4375 = vmatprep.mubr.f32.mxu0 %v3250_v52  ;;  %v3254_v16 = vld [vmem:[%s5213_s29 + $0x79] sm:$0xff]  ;;  %v6458_v48 = vld [vmem:[#allocation16_spill] sm:$0xff]  ;;  %v6459_v52 = vld [vmem:[#allocation27_spill] sm:$0xff] }
  0xd4   : > { %4761 = vmatprep.subr.bf16.mxu0 %v4760_v62 }
  0xd5   : > { %4000 = vmatmul.mubr.f32.gmra.mrb[18].mxu1 %v5614_v18  ;;  %v3336_v18 = vld [vmem:[%s6367_s1 + $0x440] sm:$0xff] }
  0xd6   : > { %4376 = vmatmul.mubr.f32.gmra.mrb[2].mxu0 %v3251_v57  ;;  %4002 = vmatprep.mubr.f32.mxu1 %v5620_v25  ;;  %v3255_v25 = vld [vmem:[%s5213_s29 + $0x81] sm:$0xff]  ;;  %v4772_v20 = vpack.c.bf16 %v3337_v14, %v3336_v18  ;;  %v6462_v57 = vld [vmem:[#allocation28_spill] sm:$0xff] }
  0xd7   : > { %4378 = vmatprep.mubr.f32.mxu0 %v3252_v29  ;;  %4763 = vmatpush3.bf16.msra.mxu0 %v4760_v62  ;;  %v6460_v62 = vld [vmem:[#allocation17_spill] sm:$0xff]  ;;  %v6463_v29 = vld [vmem:[#allocation18_spill] sm:$0xff] }
  0xd8   : > { %4765 = vmatprep.subr.bf16.mxu0 %v4764_v0  ;;  %v3279_v18 = vld [vmem:[%s5213_s29 + $0x1a1] sm:$0xff]  ;;  %v3296_v14 = vld [vmem:[%s5213_s29 + $0x32] sm:$0xff] }
  0xd9   : > { %4003 = vmatmul.mubr.f32.gmra.mrb[20].mxu1 %v5637_v41  ;;  %v3338_v41 = vld [vmem:[%s6367_s1 + $0x450] sm:$0xff] }
  0xda   : > { %4379 = vmatmul.mubr.f32.gmra.mrb[4].mxu0 %v3253_v6  ;;  %4005 = vmatprep.mubr.f32.mxu1 %v5643_v44  ;;  %v3257_v44 = vld [vmem:[%s5213_s29 + $0x99] sm:$0xff]  ;;  %v4776_v50 = vpack.c.bf16 %v3339_v45, %v3338_v41  ;;  %v6465_v6 = vld [vmem:[#allocation7_spill] sm:$0xff] }
  0xdb   : > { %4381 = vmatprep.mubr.f32.mxu0 %v3254_v16  ;;  %4767 = vmatpush3.bf16.msra.mxu0 %v4764_v0  ;;  %v6464_v0 = vld [vmem:[#allocation29_spill] sm:$0xff]  ;;  %v6466_v16 = vld [vmem:[#allocation30_spill] sm:$0xff]  ;;  %v3298_v45 = vld [vmem:[%s5213_s29 + $0x4a] sm:$0xff] }
  0xdc   : > { %4769 = vmatprep.subr.bf16.mxu0 %v4768_v2  ;;  %v3297_v41 = vld [vmem:[%s5213_s29 + $0x3a] sm:$0xff] }
  0xdd   : > { %4006 = vmatmul.mubr.f32.gmra.mrb[22].mxu1 %v5659_v58  ;;  %v3340_v58 = vld [vmem:[%s6367_s1 + $0x460] sm:$0xff] }
  0xde   : > { %4382 = vmatmul.mubr.f32.gmra.mrb[6].mxu0 %v3255_v25  ;;  %4008 = vmatprep.mubr.f32.mxu1 %v5665_v60  ;;  %v4780_v60 = vpack.c.bf16 %v3341_v63, %v3340_v58  ;;  %v6468_v25 = vld [vmem:[#allocation8_spill] sm:$0xff]  ;;  %v3313_v58 = vld [vmem:[%s5213_s29 + $0xfa] sm:$0xff] }
  0xdf   : > { %4384 = vmatprep.mubr.f32.mxu0 %v5375_v35  ;;  %4771 = vmatpush3.bf16.msra.mxu0 %v4768_v2  ;;  %v3259_v35 = vld [vmem:[%s5213_s29 + $0xb1] sm:$0xff]  ;;  %v6467_v2 = vld [vmem:[#allocation31_spill] sm:$0xff]  ;;  %v3123_v63 = vld [vmem:[%s5213_s29 + $0xf9] sm:$0xff] }
  0xe0   : > { %4773 = vmatprep.subr.bf16.mxu0 %v4772_v20 }
  0xe1   : > { %4009 = vmatmul.mubr.f32.gmra.mrb[24].mxu1 %v5681_v26  ;;  %v3342_v26 = vld [vmem:[%s6367_s1 + $0x470] sm:$0xff] }
  0xe2   : > { %4385 = vmatmul.mubr.f32.gmra.mrb[8].mxu0 %v3257_v44  ;;  %4011 = vmatprep.mubr.f32.mxu1 %v5687_v33  ;;  %v4784_v33 = vpack.c.bf16 %v3343_v27, %v3342_v26  ;;  %v3299_v44 = vld [vmem:[%s5213_s29 + $0x52] sm:$0xff]  ;;  %v3317_v27 = vld [vmem:[%s5213_s29 + $0x12a] sm:$0xff] }
  0xe3   : > { %4387 = vmatprep.mubr.f32.mxu0 %v3258_v28  ;;  %4775 = vmatpush3.bf16.msra.mxu0 %v4772_v20  ;;  %v6469_v20 = vld [vmem:[#allocation32_spill] sm:$0xff]  ;;  %v3300_v28 = vld [vmem:[%s5213_s29 + $0x62] sm:$0xff] }
  0xe4   : > { %4777 = vmatprep.subr.bf16.mxu0 %v4776_v50  ;;  %v3125_v26 = vld [vmem:[%s5213_s29 + $0x111] sm:$0xff] }
  0xe5   : > { %4012 = vmatmul.mubr.f32.gmra.mrb[26].mxu1 %v5703_v9  ;;  %v6450_v9 = vld [vmem:[#allocation13_spill] sm:$0xff] }
  0xe6   : > { %4388 = vmatmul.mubr.f32.gmra.mrb[10].mxu0 %v3259_v35  ;;  %4014 = vmatprep.mubr.f32.mxu1 %v5709_v43  ;;  %v6439_v43 = vld [vmem:[#allocation19_spill] sm:$0xff]  ;;  %v3315_v35 = vld [vmem:[%s5213_s29 + $0x112] sm:$0xff] }
  0xe7   : > { %4390 = vmatprep.mubr.f32.mxu0 %v5407_v54  ;;  %4779 = vmatpush3.bf16.msra.mxu0 %v4776_v50  ;;  %v6440_v54 = vld [vmem:[#allocation9_spill] sm:$0xff] }
  0xe8   : > { %4781 = vmatprep.subr.bf16.mxu0 %v4780_v60  ;;  %v3302_v50 = vld [vmem:[%s5213_s29 + $0x7a] sm:$0xff] }
  0xe9   : > { %4015 = vmatmul.mubr.f32.gmra.mrb[28].mxu1 %v5725_v49  ;;  %v6451_v49 = vld [vmem:[#allocation4_spill] sm:$0xff] }
  0xea   : > { %4391 = vmatmul.mubr.f32.gmra.mrb[12].mxu0 %v5423_v61  ;;  %4017 = vmatprep.mubr.f32.mxu1 %v5731_v53  ;;  %v6441_v61 = vld [vmem:[#allocation2_spill] sm:$0xff]  ;;  %v6444_v53 = vld [vmem:[#allocation21_spill] sm:$0xff] }
  0xeb   : > { %4393 = vmatprep.mubr.f32.mxu0 %v5443_v4  ;;  %4783 = vmatpush3.bf16.msra.mxu0 %v4780_v60  ;;  %v6442_v4 = vld [vmem:[#allocation20_spill] sm:$0xff]  ;;  %v3316_v60 = vld [vmem:[%s5213_s29 + $0x122] sm:$0xff] }
  0xec   : > { %4785 = vmatprep.subr.bf16.mxu0 %v4784_v33 }
  0xed   : > { %4018 = vmatmul.mubr.f32.gmra.mrb[30].mxu1 %v5747_v37  ;;  %v6452_v37 = vld [vmem:[#allocation24_spill] sm:$0xff] }
  0xee   : > { %4394 = vmatmul.mubr.f32.gmra.mrb[14].mxu0 %v5459_v10  ;;  %4052 = vmatprep.mubr.f32.mxu1 %v5617_v24  ;;  %v6443_v10 = vld [vmem:[#allocation10_spill] sm:$0xff]  ;;  %v6446_v24 = vld [vmem:[#allocation3_spill] sm:$0xff] }
  0xef   : > { %4396 = vmatprep.mubr.f32.mxu0 %v5466_v13  ;;  %4787 = vmatpush3.bf16.msra.mxu0 %v4784_v33  ;;  %v6445_v13 = vld [vmem:[#allocation11_spill] sm:$0xff] }
  0xf0   : > { %v3126_v33 = vld [vmem:[%s5213_s29 + $0x121] sm:$0xff] }
  0xf1   : > { %4053 = vmatmul.mubr.f32.vlgmr.msra.gmra.mrb[0].mxu1 %v5632_v34  ;;  %v6449_v34 = vld [vmem:[#allocation23_spill] sm:$0xff] }
  0xf2   : > { %4397 = vmatmul.mubr.f32.gmra.mrb[16].mxu0 %v5481_v19  ;;  %4796 = vmatpush3.bf16.msra.mxu1 %v5170_v7  ;;  %v6447_v19 = vld [vmem:[#allocation22_spill] sm:$0xff]  ;;  %v6448_v7 = vld [vmem:[#allocation12_spill] sm:$0xff] }
  0xf3   : > { %4055 = vmatprep.mubr.f32.mxu1 %v6439_v43  ;;  %4399 = vmatprep.mubr.f32.mxu0 %v6440_v54  ;;  %v3318_v43 = vld [vmem:[%s5213_s29 + $0x13a] sm:$0xff]  ;;  %v3127_v54 = vld [vmem:[%s5213_s29 + $0x129] sm:$0xff] }
  0xf4   : > { %4789 = vmatprep.subr.bf16.mxu1 %v6441_v61 }
  0xf5   : > { %4056 = vmatmul.mubr.f32.gmra.mrb[2].mxu1 %v6442_v4  ;;  %v3128_v4 = vld [vmem:[%s5213_s29 + $0x139] sm:$0xff] }
  0xf6   : > { %4400 = vmatmul.mubr.f32.gmra.mrb[18].mxu0 %v6443_v10  ;;  %4058 = vmatprep.mubr.f32.mxu1 %v6444_v53  ;;  %v3320_v10 = vld [vmem:[%s5213_s29 + $0x152] sm:$0xff]  ;;  %v3129_v53 = vld [vmem:[%s5213_s29 + $0x141] sm:$0xff] }
  0xf7   : > { %4402 = vmatprep.mubr.f32.mxu0 %v6445_v13  ;;  %4797 = vmatpush3.bf16.msra.mxu1 %v6441_v61  ;;  %v3319_v61 = vld [vmem:[%s5213_s29 + $0x142] sm:$0xff]  ;;  %v3321_v13 = vld [vmem:[%s5213_s29 + $0x15a] sm:$0xff] }
  0xf8   : > { %4790 = vmatprep.subr.bf16.mxu1 %v6446_v24 }
  0xf9   : > { %4059 = vmatmul.mubr.f32.gmra.mrb[4].mxu1 %v6447_v19  ;;  %v3322_v19 = vld [vmem:[%s5213_s29 + $0x16a] sm:$0xff] }
  0xfa   : > { %4403 = vmatmul.mubr.f32.gmra.mrb[20].mxu0 %v6448_v7  ;;  %4061 = vmatprep.mubr.f32.mxu1 %v6449_v34  ;;  %v3131_v7 = vld [vmem:[%s5213_s29 + $0x159] sm:$0xff] }
  0xfb   : > { %4405 = vmatprep.mubr.f32.mxu0 %v6450_v9  ;;  %4798 = vmatpush3.bf16.msra.mxu1 %v6446_v24  ;;  %v3130_v24 = vld [vmem:[%s5213_s29 + $0x151] sm:$0xff]  ;;  %v3132_v9 = vld [vmem:[%s5213_s29 + $0x169] sm:$0xff] }
  0xfc   : > { %4791 = vmatprep.subr.bf16.mxu1 %v6451_v49  ;;  %v3323_v34 = vld [vmem:[%s5213_s29 + $0x172] sm:$0xff] }
  0xfd   : > { %4062 = vmatmul.mubr.f32.gmra.mrb[6].mxu1 %v6452_v37  ;;  %v3133_v37 = vld [vmem:[%s5213_s29 + $0x171] sm:$0xff] }
  0xfe   : > { %4406 = vmatmul.mubr.f32.gmra.mrb[22].mxu0 %v6453_v38  ;;  %4064 = vmatprep.mubr.f32.mxu1 %v6454_v23  ;;  %v3325_v38 = vld [vmem:[%s5213_s29 + $0x18a] sm:$0xff]  ;;  %v3326_v23 = vld [vmem:[%s5213_s29 + $0x19a] sm:$0xff] }
  0xff   : > { %4408 = vmatprep.mubr.f32.mxu0 %v6455_v40  ;;  %4799 = vmatpush3.bf16.msra.mxu1 %v6451_v49  ;;  %v3324_v49 = vld [vmem:[%s5213_s29 + $0x182] sm:$0xff] }
 0x100   : > { %4792 = vmatprep.subr.bf16.mxu1 %v6456_v42  ;;  %v3327_v40 = vld [vmem:[%s5213_s29 + $0x1a2] sm:$0xff] }
 0x101   : > { %4065 = vmatmul.mubr.f32.gmra.mrb[8].mxu1 %v6457_v46 }
 0x102   : > { %4409 = vmatmul.mubr.f32.gmra.mrb[24].mxu0 %v6458_v48  ;;  %4067 = vmatprep.mubr.f32.mxu1 %v6459_v52 }
 0x103   : > { %4411 = vmatprep.mubr.f32.mxu0 %v6460_v62  ;;  %4800 = vmatpush3.bf16.msra.mxu1 %v6456_v42 }
 0x104   : > { %4793 = vmatprep.subr.bf16.mxu1 %v6461_v3 }
 0x105   : > { %4068 = vmatmul.mubr.f32.gmra.mrb[10].mxu1 %v6462_v57 }
 0x106   : > { %4412 = vmatmul.mubr.f32.gmra.mrb[26].mxu0 %v6463_v29  ;;  %4070 = vmatprep.mubr.f32.mxu1 %v6464_v0 }
 0x107   : > { %4414 = vmatprep.mubr.f32.mxu0 %v6091_v55  ;;  %4801 = vmatpush3.bf16.msra.mxu1 %v6461_v3 }
 0x108   : > { %4794 = vmatprep.subr.bf16.mxu1 %v6465_v6 }
 0x109   : > { %4071 = vmatmul.mubr.f32.gmra.mrb[12].mxu1 %v6466_v16 }
 0x10a   : > { %4415 = vmatmul.mubr.f32.gmra.mrb[28].mxu0 %v6099_v5  ;;  %4073 = vmatprep.mubr.f32.mxu1 %v6467_v2 }
 0x10b   : > { %4417 = vmatprep.mubr.f32.mxu0 %v3278_v11  ;;  %4802 = vmatpush3.bf16.msra.mxu1 %v6465_v6 }
 0x10c   : > { %4795 = vmatprep.subr.bf16.mxu1 %v6468_v25 }
 0x10d   : > { %4074 = vmatmul.mubr.f32.gmra.mrb[14].mxu1 %v6469_v20 }
 0x10e   : > { %4418 = vmatmul.mubr.f32.gmra.mrb[30].mxu0 %v3279_v18  ;;  %4076 = vmatprep.mubr.f32.mxu1 %v5784_v17  ;;  %v3301_v17 = vld [vmem:[%s5213_s29 + $0x6a] sm:$0xff] }
 0x10f   : > { %4452 = vmatprep.mubr.f32.mxu0 %v3296_v14  ;;  %4803 = vmatpush3.bf16.msra.mxu1 %v6468_v25 }
 0x111   : > { %4077 = vmatmul.mubr.f32.gmra.mrb[16].mxu1 %v5797_v39  ;;  %v3303_v39 = vld [vmem:[%s5213_s29 + $0x82] sm:$0xff] }
 0x112   : > { %4453 = vmatmul.mubr.f32.vlgmr.msra.gmra.mrb[0].mxu0 %v3297_v41  ;;  %4079 = vmatprep.mubr.f32.mxu1 %v5802_v12  ;;  %v3304_v12 = vld [vmem:[%s5213_s29 + $0x92] sm:$0xff] }
 0x113   : > { %4455 = vmatprep.mubr.f32.mxu0 %v3298_v45 }
 0x115   : > { %4080 = vmatmul.mubr.f32.gmra.mrb[18].mxu1 %v5814_v8  ;;  %v3305_v8 = vld [vmem:[%s5213_s29 + $0x9a] sm:$0xff] }
 0x116   : > { %4456 = vmatmul.mubr.f32.gmra.mrb[2].mxu0 %v3299_v44  ;;  %4082 = vmatprep.mubr.f32.mxu1 %v5818_v36  ;;  %v3306_v36 = vld [vmem:[%s5213_s29 + $0xaa] sm:$0xff] }
 0x117   : > { %4458 = vmatprep.mubr.f32.mxu0 %v3300_v28 }
 0x119   : > { %4083 = vmatmul.mubr.f32.gmra.mrb[20].mxu1 %v5830_v31  ;;  %v3307_v31 = vld [vmem:[%s5213_s29 + $0xb2] sm:$0xff] }
 0x11a   : > { %4459 = vmatmul.mubr.f32.gmra.mrb[4].mxu0 %v3301_v17  ;;  %4085 = vmatprep.mubr.f32.mxu1 %v5834_v21  ;;  %v3308_v21 = vld [vmem:[%s5213_s29 + $0xc2] sm:$0xff] }
 0x11b   : > { %4461 = vmatprep.mubr.f32.mxu0 %v3302_v50 }
 0x11d   : > { %4086 = vmatmul.mubr.f32.gmra.mrb[22].mxu1 %v5846_v15  ;;  %v3309_v15 = vld [vmem:[%s5213_s29 + $0xca] sm:$0xff] }
 0x11e   : > { %4462 = vmatmul.mubr.f32.gmra.mrb[6].mxu0 %v3303_v39  ;;  %4088 = vmatprep.mubr.f32.mxu1 %v5850_v59  ;;  %v3311_v59 = vld [vmem:[%s5213_s29 + $0xe2] sm:$0xff] }
 0x11f   : > { %4464 = vmatprep.mubr.f32.mxu0 %v3304_v12 }
 0x121   : > { %4089 = vmatmul.mubr.f32.gmra.mrb[24].mxu1 %v5862_v51  ;;  %v3310_v51 = vld [vmem:[%s5213_s29 + $0xda] sm:$0xff] }
 0x122   : > { %4465 = vmatmul.mubr.f32.gmra.mrb[8].mxu0 %v3305_v8  ;;  %4091 = vmatprep.mubr.f32.mxu1 %v5866_v32  ;;  %v3312_v32 = vld [vmem:[%s5213_s29 + $0xf2] sm:$0xff] }
 0x123   : > { %4467 = vmatprep.mubr.f32.mxu0 %v3306_v36 }
 0x125   : > { %4092 = vmatmul.mubr.f32.gmra.mrb[26].mxu1 %v5878_v56  ;;  %v3120_v56 = vld [vmem:[%s5213_s29 + $0xd9] sm:$0xff] }
 0x126   : > { %4468 = vmatmul.mubr.f32.gmra.mrb[10].mxu0 %v3307_v31  ;;  %4094 = vmatprep.mubr.f32.mxu1 %v5882_v1  ;;  %v3121_v1 = vld [vmem:[%s5213_s29 + $0xe1] sm:$0xff] }
 0x127   : > { %4470 = vmatprep.mubr.f32.mxu0 %v3308_v21 }
 0x129   : > { %4095 = vmatmul.mubr.f32.gmra.mrb[28].mxu1 %v5894_v47  ;;  %v3122_v47 = vld [vmem:[%s5213_s29 + $0xf1] sm:$0xff] }
 0x12a   : > { %4471 = vmatmul.mubr.f32.gmra.mrb[12].mxu0 %v3309_v15  ;;  %4097 = vmatprep.mubr.f32.mxu1 %v5962_v22  ;;  %v3314_v22 = vld [vmem:[%s5213_s29 + $0x10a] sm:$0xff] }
 0x12b   : > { %4473 = vmatprep.mubr.f32.mxu0 %v3310_v51 }
 0x12d   : > { %4098 = vmatmul.mubr.f32.gmra.mrb[30].mxu1 %v5975_v30  ;;  %v3124_v30 = vld [vmem:[%s5213_s29 + $0x109] sm:$0xff] }
 0x12e   : > { %4474 = vmatmul.mubr.f32.gmra.mrb[14].mxu0 %v3311_v59  ;;  %4156 = vmatprep.mubr.f32.mxu1 %v3120_v56 }
 0x12f   : > { %4476 = vmatprep.mubr.f32.mxu0 %v3312_v32 }
 0x131   : > { %4157 = vmatmul.mubr.f32.vlgmr.msra.gmra.mrb[16].mxu1 %v3121_v1 }
 0x132   : > { %4477 = vmatmul.mubr.f32.gmra.mrb[16].mxu0 %v3313_v58  ;;  %4159 = vmatprep.mubr.f32.mxu1 %v3122_v47 }
 0x133   : > { %4479 = vmatprep.mubr.f32.mxu0 %v3314_v22 }
 0x135   : > { %4160 = vmatmul.mubr.f32.gmra.mrb[18].mxu1 %v3123_v63 }
 0x136   : > { %4480 = vmatmul.mubr.f32.gmra.mrb[18].mxu0 %v3315_v35  ;;  %4162 = vmatprep.mubr.f32.mxu1 %v3124_v30 }
 0x137   : > { %4482 = vmatprep.mubr.f32.mxu0 %v3316_v60 }
 0x139   : > { %4163 = vmatmul.mubr.f32.gmra.mrb[20].mxu1 %v3125_v26 }
 0x13a   : > { %4483 = vmatmul.mubr.f32.gmra.mrb[20].mxu0 %v3317_v27  ;;  %4165 = vmatprep.mubr.f32.mxu1 %v3126_v33 }
 0x13b   : > { %4485 = vmatprep.mubr.f32.mxu0 %v3318_v43 }
 0x13d   : > { %4166 = vmatmul.mubr.f32.gmra.mrb[22].mxu1 %v3127_v54 }
 0x13e   : > { %4486 = vmatmul.mubr.f32.gmra.mrb[22].mxu0 %v3319_v61  ;;  %4168 = vmatprep.mubr.f32.mxu1 %v3128_v4 }
 0x13f   : > { %4488 = vmatprep.mubr.f32.mxu0 %v3320_v10 }
 0x141   : > { %4169 = vmatmul.mubr.f32.gmra.mrb[24].mxu1 %v3129_v53 }
 0x142   : > { %4489 = vmatmul.mubr.f32.gmra.mrb[24].mxu0 %v3321_v13  ;;  %4171 = vmatprep.mubr.f32.mxu1 %v3130_v24 }
 0x143   : > { %4491 = vmatprep.mubr.f32.mxu0 %v3322_v19 }
 0x145   : > { %4172 = vmatmul.mubr.f32.gmra.mrb[26].mxu1 %v3131_v7 }
 0x146   : > { %4492 = vmatmul.mubr.f32.gmra.mrb[26].mxu0 %v3323_v34  ;;  %4174 = vmatprep.mubr.f32.mxu1 %v3132_v9 }
 0x147   : > { %4494 = vmatprep.mubr.f32.mxu0 %v3324_v49 }
 0x149   : > { %4175 = vmatmul.mubr.f32.gmra.mrb[28].mxu1 %v3133_v37 }
 0x14a   : > { %4495 = vmatmul.mubr.f32.gmra.mrb[28].mxu0 %v3325_v38  ;;  %4177 = vmatprep.mubr.f32.mxu1 %v6091_v55 }
 0x14b   : > { %4497 = vmatprep.mubr.f32.mxu0 %v3326_v23 }
 0x14d   : > { %4178 = vmatmul.mubr.f32.gmra.mrb[30].mxu1 %v6099_v5 }
 0x14e   : > { %4498 = vmatmul.mubr.f32.gmra.mrb[30].mxu0 %v3327_v40 }
 0x1c4   : > { %v4054_v42 = vpop.f32.mrb[0].mxu1 }
 0x1c5   : > { %v1135_v46 = vpop.f32.mrb[1].mxu1 }
 0x1c8   : > { %v4057_v48 = vpop.f32.mrb[2].mxu1 }
 0x1c9   : > { %v1145_v52 = vpop.f32.mrb[3].mxu1 }
 0x1cc   : > { %v4060_v62 = vpop.f32.mrb[4].mxu1 }
 0x1cd   : > { %v1155_v3 = vpop.f32.mrb[5].mxu1 }
 0x1d0   : > { %v4063_v57 = vpop.f32.mrb[6].mxu1 }
 0x1d1   : > { %v1165_v29 = vpop.f32.mrb[7].mxu1 }
 0x1d4   : > { %v4066_v0 = vpop.f32.mrb[8].mxu1 }
 0x1d5   : > { %v1175_v11 = vpop.f32.mrb[9].mxu1 }
 0x1d8   : > { %v4069_v6 = vpop.f32.mrb[10].mxu1 }
 0x1d9   : > { %v1185_v16 = vpop.f32.mrb[11].mxu1 }
 0x1dc   : > { %v4072_v2 = vpop.f32.mrb[12].mxu1 }
 0x1dd   : > { %v1195_v55 = vpop.f32.mrb[13].mxu1 }
 0x1e0   : > { %v4075_v18 = vpop.f32.mrb[14].mxu1 }
 0x1e1   : > { %v1205_v14 = vpop.f32.mrb[15].mxu1 }
 0x1e5   : > { %v4454_v25 = vpop.f32.mrb[0].mxu0 }
 0x1e6   : > { %v6177_v5 = vadd.f32 %v4454_v25, %v4054_v42  ;;  %v2666_v20 = vpop.f32.mrb[1].mxu0 }
 0x1e7   : > { %v6179_v41 = vadd.f32 %v2666_v20, %v1135_v46 }
 0x1e9   : > { %v4457_v45 = vpop.f32.mrb[2].mxu0 }
 0x1ea   : > { %v6181_v44 = vadd.f32 %v4457_v45, %v4057_v48  ;;  %v2676_v28 = vpop.f32.mrb[3].mxu0 }
 0x1eb   : > { %v6183_v17 = vadd.f32 %v2676_v28, %v1145_v52 }
 0x1ed   : > { %v4460_v50 = vpop.f32.mrb[4].mxu0 }
 0x1ee   : > { %v6185_v39 = vadd.f32 %v4460_v50, %v4060_v62  ;;  %v2686_v12 = vpop.f32.mrb[5].mxu0 }
 0x1ef   : > { %v6187_v8 = vadd.f32 %v2686_v12, %v1155_v3 }
 0x1f1   : > { %v4463_v36 = vpop.f32.mrb[6].mxu0 }
 0x1f2   : > { %v6189_v31 = vadd.f32 %v4463_v36, %v4063_v57  ;;  %v2696_v21 = vpop.f32.mrb[7].mxu0 }
 0x1f3   : > { %v6191_v15 = vadd.f32 %v2696_v21, %v1165_v29 }
 0x1f5   : > { %v4466_v51 = vpop.f32.mrb[8].mxu0 }
 0x1f6   : > { %v6193_v59 = vadd.f32 %v4466_v51, %v4066_v0  ;;  %v2706_v56 = vpop.f32.mrb[9].mxu0 }
 0x1f7   : > { %v6195_v32 = vadd.f32 %v2706_v56, %v1175_v11 }
 0x1f9   : > { %v4469_v1 = vpop.f32.mrb[10].mxu0 }
 0x1fa   : > { %v6197_v58 = vadd.f32 %v4469_v1, %v4069_v6  ;;  %v2716_v47 = vpop.f32.mrb[11].mxu0 }
 0x1fb   : > { %v6199_v22 = vadd.f32 %v2716_v47, %v1185_v16 }
 0x1fd   : > { %v4472_v63 = vpop.f32.mrb[12].mxu0 }
 0x1fe   : > { %v6201_v35 = vadd.f32 %v4472_v63, %v4072_v2  ;;  %v2726_v30 = vpop.f32.mrb[13].mxu0 }
 0x1ff   : > { %v6203_v60 = vadd.f32 %v2726_v30, %v1195_v55 }
 0x201   : > { %v4475_v26 = vpop.f32.mrb[14].mxu0 }
 0x202   : > { %v6205_v27 = vadd.f32 %v4475_v26, %v4075_v18  ;;  %v2736_v33 = vpop.f32.mrb[15].mxu0 }
 0x203   : > { %v6207_v43 = vadd.f32 %v2736_v33, %v1205_v14 }
 0x204   : > { %v4158_v54 = vpop.f32.mrb[16].mxu1 }
 0x205   : > { %v4478_v61 = vpop.f32.mrb[16].mxu0  ;;  %v1521_v4 = vpop.f32.mrb[17].mxu1 }
 0x206   : > { %v6209_v10 = vadd.f32 %v4478_v61, %v4158_v54  ;;  %v2746_v53 = vpop.f32.mrb[17].mxu0  ;;  %v5110_v54 = vmov (%p2857_p5), 0.0  }
 0x207   : > { %v6211_v13 = vadd.f32 %v2746_v53, %v1521_v4  ;;  %2863 = vst [vmem:[%s6368_s2] sm:$0x1] (%p2857_p5), %v5110_v54  ;;  %2864 = vst [vmem:[%s6369_s3] sm:$0x1] (%p2857_p5), %v5110_v54 }
 0x208   : > { %v4161_v24 = vpop.f32.mrb[18].mxu1 }
 0x209   : > { %v4481_v19 = vpop.f32.mrb[18].mxu0  ;;  %v1531_v7 = vpop.f32.mrb[19].mxu1 }
 0x20a   : > { %v6213_v34 = vadd.f32 %v4481_v19, %v4161_v24  ;;  %v2756_v9 = vpop.f32.mrb[19].mxu0 }
 0x20b   : > { %v6215_v49 = vadd.f32 %v2756_v9, %v1531_v7 }
 0x20c   : > { %v4164_v37 = vpop.f32.mrb[20].mxu1 }
 0x20d   : > { %v4484_v38 = vpop.f32.mrb[20].mxu0  ;;  %v1541_v23 = vpop.f32.mrb[21].mxu1 }
 0x20e   : > { %v6217_v40 = vadd.f32 %v4484_v38, %v4164_v37  ;;  %v2766_v42 = vpop.f32.mrb[21].mxu0 }
 0x20f   : > { %v6219_v46 = vadd.f32 %v2766_v42, %v1541_v23 }
 0x210   : > { %v4167_v48 = vpop.f32.mrb[22].mxu1 }
 0x211   : > { %v4487_v52 = vpop.f32.mrb[22].mxu0  ;;  %v1551_v62 = vpop.f32.mrb[23].mxu1 }
 0x212   : > { %v6221_v3 = vadd.f32 %v4487_v52, %v4167_v48  ;;  %v2776_v57 = vpop.f32.mrb[23].mxu0 }
 0x213   : > { %v6223_v29 = vadd.f32 %v2776_v57, %v1551_v62 }
 0x214   : > { %v4170_v0 = vpop.f32.mrb[24].mxu1 }
 0x215   : > { %v4490_v11 = vpop.f32.mrb[24].mxu0  ;;  %v1561_v6 = vpop.f32.mrb[25].mxu1 }
 0x216   : > { %v6225_v16 = vadd.f32 %v4490_v11, %v4170_v0  ;;  %v2786_v2 = vpop.f32.mrb[25].mxu0 }
 0x217   : > { %v6227_v55 = vadd.f32 %v2786_v2, %v1561_v6 }
 0x218   : > { %v4173_v18 = vpop.f32.mrb[26].mxu1 }
 0x219   : > { %v4493_v14 = vpop.f32.mrb[26].mxu0  ;;  %v1571_v25 = vpop.f32.mrb[27].mxu1 }
 0x21a   : > { %v6229_v20 = vadd.f32 %v4493_v14, %v4173_v18  ;;  %v2796_v45 = vpop.f32.mrb[27].mxu0 }
 0x21b   : > { %v6231_v28 = vadd.f32 %v2796_v45, %v1571_v25 }
 0x21c   : > { %v4176_v50 = vpop.f32.mrb[28].mxu1 }
 0x21d   : > { %v4496_v12 = vpop.f32.mrb[28].mxu0  ;;  %v1581_v36 = vpop.f32.mrb[29].mxu1  ;;  %2862 = sbr.rel (!%p2857_p5) target bundleno = 548 (0x224), region = 32 }
 0x21e   : > { %v6233_v21 = vadd.f32 %v4496_v12, %v4176_v50  ;;  %v2806_v51 = vpop.f32.mrb[29].mxu0 }
 0x21f   : > { %v6235_v56 = vadd.f32 %v2806_v51, %v1581_v36 }
 0x220   : > { %v4179_v1 = vpop.f32.mrb[30].mxu1 }
 0x221   : > { %v4499_v47 = vpop.f32.mrb[30].mxu0  ;;  %v1591_v63 = vpop.f32.mrb[31].mxu1 }
 0x222   : > { %v6237_v30 = vadd.f32 %v4499_v47, %v4179_v1  ;;  %v2816_v26 = vpop.f32.mrb[31].mxu0 }
 0x223   : > { %v6239_v33 = vadd.f32 %v2816_v26, %v1591_v63 }
 0x224 PF: > { %v2866_v61 = vadd.f32 %v6179_v41, %v6177_v5  ;;  %v2906_v24 = vmul.f32 %v6179_v41, %v6179_v41  ;;  %v2907_v19 = vmul.f32 %v6177_v5, %v6177_v5  ;;  %v2908_v9 = vmul.f32 %v6183_v17, %v6183_v17 }
 0x225   : > { %v2909_v38 = vmul.f32 %v6181_v44, %v6181_v44  ;;  %v2910_v48 = vmul.f32 %v6187_v8, %v6187_v8  ;;  %v2911_v5 = vmul.f32 %v6185_v39, %v6185_v39  ;;  %v2912_v57 = vmul.f32 %v6191_v15, %v6191_v15 }
 0x226   : > { %v2867_v4 = vadd.f32 %v6183_v17, %v2866_v61  ;;  %v2938_v23 = vadd.f32 %v2907_v19, %v2906_v24  ;;  %v2913_v11 = vmul.f32 %v6189_v31, %v6189_v31  ;;  %v2914_v2 = vmul.f32 %v6195_v32, %v6195_v32 }
 0x227   : > { %v2915_v14 = vmul.f32 %v6193_v59, %v6193_v59  ;;  %v2916_v45 = vmul.f32 %v6199_v22, %v6199_v22  ;;  %v2917_v12 = vmul.f32 %v6197_v58, %v6197_v58  ;;  %v2918_v51 = vmul.f32 %v6203_v60, %v6203_v60 }
 0x228   : > { %v2868_v53 = vadd.f32 %v6181_v44, %v2867_v4  ;;  %v2939_v41 = vadd.f32 %v2938_v23, %v2908_v9  ;;  %v2919_v47 = vmul.f32 %v6201_v35, %v6201_v35  ;;  %v2920_v26 = vmul.f32 %v6207_v43, %v6207_v43 }
 0x229   : > { %v2921_v61 = vmul.f32 %v6205_v27, %v6205_v27  ;;  %v2923_v19 = vmul.f32 %v6209_v10, %v6209_v10  ;;  %v2924_v9 = vmul.f32 %v6215_v49, %v6215_v49 }
 0x22a   : > { %v2869_v7 = vadd.f32 %v6187_v8, %v2868_v53  ;;  %v2940_v62 = vadd.f32 %v2939_v41, %v2909_v38  ;;  %v2922_v53 = vmul.f32 %v6211_v13, %v6211_v13  ;;  %v2925_v38 = vmul.f32 %v6213_v34, %v6213_v34 }
 0x22b   : > { %v2927_v41 = vmul.f32 %v6217_v40, %v6217_v40 }
 0x22c   : > { %v2870_v37 = vadd.f32 %v6185_v39, %v2869_v7  ;;  %v2941_v0 = vadd.f32 %v2940_v62, %v2910_v48 }
 0x22e   : > { %v2871_v42 = vadd.f32 %v6191_v15, %v2870_v37  ;;  %v2942_v6 = vadd.f32 %v2941_v0, %v2911_v5  ;;  %v2928_v5 = vmul.f32 %v6223_v29, %v6223_v29  ;;  %v2930_v0 = vmul.f32 %v6227_v55, %v6227_v55 }
 0x230   : > { %v2872_v52 = vadd.f32 %v6189_v31, %v2871_v42  ;;  %v2943_v18 = vadd.f32 %v2942_v6, %v2912_v57  ;;  %v2926_v42 = vmul.f32 %v6219_v46, %v6219_v46 }
 0x232   : > { %v2873_v17 = vadd.f32 %v6195_v32, %v2872_v52  ;;  %v2944_v25 = vadd.f32 %v2943_v18, %v2913_v11  ;;  %v2931_v11 = vmul.f32 %v6225_v16, %v6225_v16  ;;  %v2933_v18 = vmul.f32 %v6229_v20, %v6229_v20 }
 0x234   : > { %v2874_v44 = vadd.f32 %v6193_v59, %v2873_v17  ;;  %v2945_v50 = vadd.f32 %v2944_v25, %v2914_v2  ;;  %v2929_v17 = vmul.f32 %v6221_v3, %v6221_v3 }
 0x236   : > { %v2875_v8 = vadd.f32 %v6199_v22, %v2874_v44  ;;  %v2946_v36 = vadd.f32 %v2945_v50, %v2915_v14  ;;  %v2934_v14 = vmul.f32 %v6235_v56, %v6235_v56  ;;  %v2936_v50 = vmul.f32 %v6239_v33, %v6239_v33 }
 0x238   : > { %v2876_v39 = vadd.f32 %v6197_v58, %v2875_v8  ;;  %v2947_v1 = vadd.f32 %v2946_v36, %v2916_v45  ;;  %v2932_v8 = vmul.f32 %v6231_v28, %v6231_v28 }
 0x23a   : > { %v2877_v15 = vadd.f32 %v6203_v60, %v2876_v39  ;;  %v2948_v63 = vadd.f32 %v2947_v1, %v2917_v12 }
 0x23c   : > { %v2878_v31 = vadd.f32 %v6201_v35, %v2877_v15  ;;  %v2949_v54 = vadd.f32 %v2948_v63, %v2918_v51  ;;  %v2935_v15 = vmul.f32 %v6233_v21, %v6233_v21 }
 0x23e   : > { %v2879_v32 = vadd.f32 %v6207_v43, %v2878_v31  ;;  %v2950_v4 = vadd.f32 %v2949_v54, %v2919_v47 }
 0x240   : > { %v2880_v59 = vadd.f32 %v6205_v27, %v2879_v32  ;;  %v2951_v24 = vadd.f32 %v2950_v4, %v2920_v26 }
 0x242   : > { %v2881_v22 = vadd.f32 %v6211_v13, %v2880_v59  ;;  %v2952_v7 = vadd.f32 %v2951_v24, %v2921_v61 }
 0x244   : > { %v2882_v58 = vadd.f32 %v6209_v10, %v2881_v22  ;;  %v2953_v37 = vadd.f32 %v2952_v7, %v2922_v53 }
 0x246   : > { %v2883_v60 = vadd.f32 %v6215_v49, %v2882_v58  ;;  %v2954_v23 = vadd.f32 %v2953_v37, %v2923_v19  ;;  %v2905_v58 = vld [vmem:[%s6369_s3] sm:$0x1] }
 0x248   : > { %v2884_v35 = vadd.f32 %v6213_v34, %v2883_v60  ;;  %v2955_v48 = vadd.f32 %v2954_v23, %v2924_v9 }
 0x24a   : > { %v2885_v43 = vadd.f32 %v6219_v46, %v2884_v35  ;;  %v2956_v52 = vadd.f32 %v2955_v48, %v2925_v38 }
 0x24c   : > { %v2886_v27 = vadd.f32 %v6217_v40, %v2885_v43  ;;  %v2957_v62 = vadd.f32 %v2956_v52, %v2926_v42 }
 0x24e   : > { %v2887_v13 = vadd.f32 %v6223_v29, %v2886_v27  ;;  %v2958_v57 = vadd.f32 %v2957_v62, %v2927_v41 }
 0x250   : > { %v2888_v10 = vadd.f32 %v6221_v3, %v2887_v13  ;;  %v2959_v44 = vadd.f32 %v2958_v57, %v2928_v5 }
 0x252   : > { %v2889_v49 = vadd.f32 %v6227_v55, %v2888_v10  ;;  %v2960_v6 = vadd.f32 %v2959_v44, %v2929_v17 }
 0x254   : > { %v2890_v34 = vadd.f32 %v6225_v16, %v2889_v49  ;;  %v2961_v2 = vadd.f32 %v2960_v6, %v2930_v0 }
 0x256   : > { %v2891_v46 = vadd.f32 %v6231_v28, %v2890_v34  ;;  %v2962_v39 = vadd.f32 %v2961_v2, %v2931_v11 }
 0x258   : > { %v2892_v40 = vadd.f32 %v6229_v20, %v2891_v46  ;;  %v2963_v25 = vadd.f32 %v2962_v39, %v2932_v8  ;;  %v2937_v20 = vmul.f32 %v6237_v30, %v6237_v30 }
 0x25a   : > { %v2893_v29 = vadd.f32 %v6235_v56, %v2892_v40  ;;  %v2964_v45 = vadd.f32 %v2963_v25, %v2933_v18 }
 0x25c   : > { %v2894_v3 = vadd.f32 %v6233_v21, %v2893_v29  ;;  %v2965_v31 = vadd.f32 %v2964_v45, %v2934_v14  ;;  %v2865_v21 = vld [vmem:[%s6368_s2] sm:$0x1] }
 0x25e   : > { %v2895_v55 = vadd.f32 %v6239_v33, %v2894_v3  ;;  %v2966_v36 = vadd.f32 %v2965_v31, %v2935_v15 }
 0x260   : > { %v2896_v16 = vadd.f32 %v6237_v30, %v2895_v55  ;;  %v2967_v51 = vadd.f32 %v2966_v36, %v2936_v50 }
 0x262   : > { %v2897_v28 = vrot.slane %v2896_v16, 4  ;;  %v2968_v1 = vadd.f32 %v2967_v51, %v2937_v20 }
 0x264   : > { %v2898_v12 = vadd.f32 %v2897_v28, %v2896_v16  ;;  %v2969_v47 = vrot.slane %v2968_v1, 4 }
 0x266   : > { %v2899_v32 = vrot.slane %v2898_v12, 2  ;;  %v2970_v22 = vadd.f32 %v2969_v47, %v2968_v1 }
 0x268   : > { %v2900_v56 = vadd.f32 %v2899_v32, %v2898_v12  ;;  %v2971_v33 = vrot.slane %v2970_v22, 2 }
 0x26a   : > { %v2901_v59 = vrot.slane %v2900_v56, 1  ;;  %v2972_v30 = vadd.f32 %v2971_v33, %v2970_v22 }
 0x26c   : > { %v2902_v63 = vadd.f32 %v2901_v59, %v2900_v56  ;;  %v2973_v54 = vrot.slane %v2972_v30, 1 }
 0x26e   : > { %v2903_v26 = vadd.f32 %v2902_v63, %v2865_v21  ;;  %v2974_v61 = vadd.f32 %v2973_v54, %v2972_v30 }
 0x270   : > { %2904 = vst [vmem:[%s6368_s2] sm:$0x1] %v2903_v26  ;;  %v2975_v4 = vadd.f32 %v2974_v61, %v2905_v58 }
 0x272   : > { %2976 = vst [vmem:[%s6369_s3] sm:$0x1] %v2975_v4 }
 0x273 PF: > { %s14_s14 = sadd.s32 1, %s5108_s14   ;;  %s6470_s12 = smov %s5104_s13 }
 0x274   : > { %p11_p6 = scmp.ge.s32.totalorder %s14_s14, 4   ;;  %s6471_s13 = smov %s6473_s15 }
 0x276   :  { %13 = sbr.rel (!%p11_p6) target bundleno = 2 (0x2), region = 76 }

// kernel: unet_down_forward.5
= control target key start
LH: loop header
LB: loop body
LE: loop exit
PB: predicated region body
PF: predicated region fallthrough
CT: control target
= control target key end

     0   :  { %s5454_s15 = smov 0   ;;  %s5456_s16 = smov 0   ;;  %s6733_s0 = inlined_call_operand.vmem [shape: f32[2,18,18,128], index: 0, kind: input, shape index: {}]   ;;  %s6734_s1 = inlined_call_operand.vmem [shape: f32[3,3,128,128], index: 1, kind: input, shape index: {}]   ;;  %s6735_s2 = inlined_call_operand.vmem [shape: f32[1,128], index: 2, kind: input, shape index: {}]   ;;  %s6736_s3 = inlined_call_operand.vmem [shape: f32[1,128], index: 3, kind: input, shape index: {}]   ;;  %s6737_s4 = inlined_call_operand.vmem [shape: f32[2,16,16,128], index: 4, kind: output, shape index: {}]  }
   0x1   :  { %s5458_s17 = smov 0  }
   0x2 LB: > { %s26_s18 = sadd.s32 1, %s5423_s16  ;;  %p3275_p0 = scmp.ge.s32.totalorder %s5427_s17, 1  ;;  %s5427_s17 = sphi %s5458_s17, %s14_s17   ;;  %s5423_s16 = sphi %s5456_s16, %s6839_s16   ;;  %s5419_s15 = sphi %s5454_s15, %s6838_s15  }
   0x3   : > { %p28_p1 = scmp.ge.s32.totalorder %s26_s18, 2  ;;  %p176_p2 = scmp.lt.s32.totalorder %s5427_s17, 3 }
   0x5   : > { %s6841_s18 = smov (%p28_p1, %s26_s18), 0  ;;  %p177_p3 = pnand %p3275_p0, %p176_p2 }
   0x7   : > { %180 = sbr.rel (%p177_p3) target bundleno = 571 (0x23b), region = 36 }
   0xe   : > { %v3279_v0 = vld [vmem:[%s6734_s1 + $0x80] sm:$0xff]  ;;  %v3280_v1 = vld [vmem:[%s6734_s1 + $0x88] sm:$0xff]  ;;  %p207_p4 = scmp.lt.s32.totalorder %s5419_s15, 1  ;;  %v3281_v5 = vld [vmem:[%s6734_s1 + $0x90] sm:$0xff] }
   0xf   : > { %v3391_v2 = vld [vmem:[%s6734_s1 + $0x200] sm:$0xff]  ;;  %v4756_v3 = vpack.c.bf16 %v3280_v1, %v3279_v0  ;;  %v3392_v4 = vld [vmem:[%s6734_s1 + $0x208] sm:$0xff]  ;;  %v3282_v6 = vld [vmem:[%s6734_s1 + $0x98] sm:$0xff] }
  0x10   : > { %v5490_v7 = vpack.c.bf16 %v3392_v4, %v3391_v2  ;;  %v4760_v8 = vpack.c.bf16 %v3282_v6, %v3281_v5  ;;  %v3393_v9 = vld [vmem:[%s6734_s1 + $0x210] sm:$0xff]  ;;  %v3394_v10 = vld [vmem:[%s6734_s1 + $0x218] sm:$0xff]  ;;  %v3283_v11 = vld [vmem:[%s6734_s1 + $0xa0] sm:$0xff]  ;;  %s6843_s15 = smov (!%p207_p4, %s5419_s15), 1 }
  0x11   : > { %4757 = vmatprep.subr.bf16.mxu1 %v4756_v3  ;;  %v5503_v12 = vpack.c.bf16 %v3394_v10, %v3393_v9  ;;  %v3284_v13 = vld [vmem:[%s6734_s1 + $0xa8] sm:$0xff]  ;;  %v3395_v14 = vld [vmem:[%s6734_s1 + $0x220] sm:$0xff]  ;;  %s5316_s21 = smul.u32 432, %s6843_s15  ;;  %v3285_v18 = vld [vmem:[%s6734_s1 + $0xb0] sm:$0xff]  ;;  %s3603_s14 = sshll.u32 %s6843_s15, 8 }
  0x12   : > { %v3396_v15 = vld [vmem:[%s6734_s1 + $0x228] sm:$0xff]  ;;  %4885 = vmatprep.subr.bf16.mxu0 %v5490_v7  ;;  %4759 = vmatpush3.bf16.msra.mxu1 %v4756_v3  ;;  %v4764_v16 = vpack.c.bf16 %v3284_v13, %v3283_v11  ;;  %v3286_v19 = vld [vmem:[%s6734_s1 + $0xb8] sm:$0xff]  ;;  %v3397_v20 = vld [vmem:[%s6734_s1 + $0x230] sm:$0xff]  ;;  %s6554_s20 = scalar_lea.vmem %s6737_s4, %s3603_s14 }
  0x13   : > { %6776 = vst [vmem:[#allocation2_spill] sm:$0xff] %v5503_v12  ;;  %4887 = vmatpush3.bf16.msra.mxu0 %v5490_v7  ;;  %4761 = vmatprep.subr.bf16.mxu1 %v4760_v8  ;;  %v5518_v17 = vpack.c.bf16 %v3396_v15, %v3395_v14  ;;  %v3398_v21 = vld [vmem:[%s6734_s1 + $0x238] sm:$0xff]  ;;  %s5535_s6 = scalar_lea.vmem %s6733_s0, %s5316_s21  ;;  %v4768_v22 = vpack.c.bf16 %v3286_v19, %v3285_v18  ;;  %v3287_v24 = vld [vmem:[%s6734_s1 + $0xc0] sm:$0xff]  ;;  %v3288_v25 = vld [vmem:[%s6734_s1 + $0xc8] sm:$0xff] }
  0x14   : > { %4889 = vmatprep.subr.bf16.mxu0 %v5503_v12  ;;  %v5539_v23 = vpack.c.bf16 %v3398_v21, %v3397_v20  ;;  %v271_v26 = vld [vmem:[%s5535_s6 + $0x1] sm:$0xff]  ;;  %v5555_v29 = vld [vmem:[%s5535_s6 + $0x19] sm:$0xff]  ;;  %v4772_v30 = vpack.c.bf16 %v3288_v25, %v3287_v24  ;;  %v3289_v32 = vld [vmem:[%s6734_s1 + $0xd0] sm:$0xff] }
  0x15   : > { %6777 = vst [vmem:[#allocation3_spill] sm:$0xff] %v5518_v17  ;;  %v3399_v27 = vld [vmem:[%s6734_s1 + $0x240] sm:$0xff]  ;;  %v3400_v28 = vld [vmem:[%s6734_s1 + $0x248] sm:$0xff]  ;;  %4068 = vmatprep.mubr.f32.mxu1 %v271_v26  ;;  %4388 = vmatprep.mubr.f32.mxu0 %v5555_v29  ;;  %v3290_v33 = vld [vmem:[%s6734_s1 + $0xd8] sm:$0xff] }
  0x16   : > { %4763 = vmatpush3.bf16.msra.mxu1 %v4760_v8  ;;  %6778 = vst [vmem:[#allocation4_spill] sm:$0xff] %v5539_v23  ;;  %v5560_v31 = vpack.c.bf16 %v3400_v28, %v3399_v27  ;;  %v3401_v34 = vld [vmem:[%s6734_s1 + $0x250] sm:$0xff]  ;;  %v3402_v35 = vld [vmem:[%s6734_s1 + $0x258] sm:$0xff]  ;;  %v4776_v36 = vpack.c.bf16 %v3290_v33, %v3289_v32  ;;  %v3291_v38 = vld [vmem:[%s6734_s1 + $0xe0] sm:$0xff] }
  0x17   : > { %4891 = vmatpush3.bf16.msra.mxu0 %v5503_v12  ;;  %4765 = vmatprep.subr.bf16.mxu1 %v4764_v16  ;;  %v5576_v37 = vpack.c.bf16 %v3402_v35, %v3401_v34  ;;  %v3292_v39 = vld [vmem:[%s6734_s1 + $0xe8] sm:$0xff]  ;;  %v3403_v40 = vld [vmem:[%s6734_s1 + $0x260] sm:$0xff]  ;;  %v3293_v44 = vld [vmem:[%s6734_s1 + $0xf0] sm:$0xff] }
  0x18   : > { %4893 = vmatprep.subr.bf16.mxu0 %v5518_v17  ;;  %6779 = vst [vmem:[#allocation5_spill] sm:$0xff] %v5560_v31  ;;  %v3404_v41 = vld [vmem:[%s6734_s1 + $0x268] sm:$0xff]  ;;  %v4780_v42 = vpack.c.bf16 %v3292_v39, %v3291_v38  ;;  %v3294_v45 = vld [vmem:[%s6734_s1 + $0xf8] sm:$0xff]  ;;  %v3405_v46 = vld [vmem:[%s6734_s1 + $0x270] sm:$0xff] }
  0x19   : > { %6780 = vst [vmem:[#allocation6_spill] sm:$0xff] %v5576_v37  ;;  %v5592_v43 = vpack.c.bf16 %v3404_v41, %v3403_v40  ;;  %v3406_v47 = vld [vmem:[%s6734_s1 + $0x278] sm:$0xff]  ;;  %v4784_v48 = vpack.c.bf16 %v3294_v45, %v3293_v44  ;;  %v255_v50 = vld [vmem:[%s6734_s1] sm:$0xff]  ;;  %v256_v51 = vld [vmem:[%s6734_s1 + $0x8] sm:$0xff] }
  0x1a   : > { %4767 = vmatpush3.bf16.msra.mxu1 %v4764_v16  ;;  %v5608_v49 = vpack.c.bf16 %v3406_v47, %v3405_v46  ;;  %v3439_v52 = vld [vmem:[%s6734_s1 + $0x280] sm:$0xff]  ;;  %v3440_v53 = vld [vmem:[%s6734_s1 + $0x288] sm:$0xff]  ;;  %v4788_v54 = vpack.c.bf16 %v256_v51, %v255_v50  ;;  %v3441_v56 = vld [vmem:[%s6734_s1 + $0x290] sm:$0xff] }
  0x1b   : > { %4895 = vmatpush3.bf16.msra.mxu0 %v5518_v17  ;;  %4769 = vmatprep.subr.bf16.mxu1 %v4768_v22  ;;  %6781 = vst [vmem:[#allocation7_spill] sm:$0xff] %v5592_v43  ;;  %v4916_v55 = vpack.c.bf16 %v3440_v53, %v3439_v52  ;;  %v3442_v57 = vld [vmem:[%s6734_s1 + $0x298] sm:$0xff]  ;;  %v272_v58 = vld [vmem:[%s5535_s6 + $0x9] sm:$0xff]  ;;  %v3360_v61 = vld [vmem:[%s5535_s6 + $0x21] sm:$0xff] }
  0x1c   : > { %4897 = vmatprep.subr.bf16.mxu0 %v5539_v23  ;;  %6782 = vst [vmem:[#allocation8_spill] sm:$0xff] %v5608_v49  ;;  %v257_v59 = vld [vmem:[%s6734_s1 + $0x10] sm:$0xff]  ;;  %v258_v60 = vld [vmem:[%s6734_s1 + $0x18] sm:$0xff]  ;;  %v4920_v62 = vpack.c.bf16 %v3442_v57, %v3441_v56  ;;  %v3443_v1 = vld [vmem:[%s6734_s1 + $0x2a0] sm:$0xff] }
  0x1d   : > { %v3361_v63 = vld [vmem:[%s5535_s6 + $0x31] sm:$0xff]  ;;  %v4792_v0 = vpack.c.bf16 %v258_v60, %v257_v59  ;;  %v3444_v2 = vld [vmem:[%s6734_s1 + $0x2a8] sm:$0xff]  ;;  %v259_v3 = vld [vmem:[%s6734_s1 + $0x20] sm:$0xff] }
  0x1e   : > { %4771 = vmatpush3.bf16.msra.mxu1 %v4768_v22  ;;  %v260_v4 = vld [vmem:[%s6734_s1 + $0x28] sm:$0xff]  ;;  %v3362_v5 = vld [vmem:[%s5535_s6 + $0x39] sm:$0xff]  ;;  %v4924_v8 = vpack.c.bf16 %v3444_v2, %v3443_v1  ;;  %v3445_v9 = vld [vmem:[%s6734_s1 + $0x2b0] sm:$0xff] }
  0x1f   : > { %4899 = vmatpush3.bf16.msra.mxu0 %v5539_v23  ;;  %4773 = vmatprep.subr.bf16.mxu1 %v4772_v30  ;;  %v3363_v6 = vld [vmem:[%s5535_s6 + $0x49] sm:$0xff]  ;;  %v3446_v10 = vld [vmem:[%s6734_s1 + $0x2b8] sm:$0xff]  ;;  %v4796_v11 = vpack.c.bf16 %v260_v4, %v259_v3  ;;  %v3365_v16 = vld [vmem:[%s5535_s6 + $0x61] sm:$0xff] }
  0x20   : > { %4901 = vmatprep.subr.bf16.mxu0 %v5560_v31  ;;  %v261_v13 = vld [vmem:[%s6734_s1 + $0x30] sm:$0xff]  ;;  %v262_v14 = vld [vmem:[%s6734_s1 + $0x38] sm:$0xff]  ;;  %v4928_v18 = vpack.c.bf16 %v3446_v10, %v3445_v9  ;;  %v3447_v19 = vld [vmem:[%s6734_s1 + $0x2c0] sm:$0xff] }
  0x21   : > { %v3364_v15 = vld [vmem:[%s5535_s6 + $0x51] sm:$0xff]  ;;  %v3448_v20 = vld [vmem:[%s6734_s1 + $0x2c8] sm:$0xff]  ;;  %v4800_v21 = vpack.c.bf16 %v262_v14, %v261_v13  ;;  %v263_v22 = vld [vmem:[%s6734_s1 + $0x40] sm:$0xff] }
  0x22   : > { %4775 = vmatpush3.bf16.msra.mxu1 %v4772_v30  ;;  %v264_v24 = vld [vmem:[%s6734_s1 + $0x48] sm:$0xff]  ;;  %v3367_v26 = vld [vmem:[%s5535_s6 + $0x79] sm:$0xff]  ;;  %v4932_v27 = vpack.c.bf16 %v3448_v20, %v3447_v19  ;;  %v3449_v28 = vld [vmem:[%s6734_s1 + $0x2d0] sm:$0xff] }
  0x23   : > { %4903 = vmatpush3.bf16.msra.mxu0 %v5560_v31  ;;  %4777 = vmatprep.subr.bf16.mxu1 %v4776_v36  ;;  %v3366_v25 = vld [vmem:[%s5535_s6 + $0x69] sm:$0xff]  ;;  %v4804_v30 = vpack.c.bf16 %v264_v24, %v263_v22  ;;  %v266_v33 = vld [vmem:[%s6734_s1 + $0x58] sm:$0xff]  ;;  %v3368_v34 = vld [vmem:[%s5535_s6 + $0x81] sm:$0xff] }
  0x24   : > { %4905 = vmatprep.subr.bf16.mxu0 %v5576_v37  ;;  %v265_v32 = vld [vmem:[%s6734_s1 + $0x50] sm:$0xff]  ;;  %v3451_v38 = vld [vmem:[%s6734_s1 + $0x2e0] sm:$0xff]  ;;  %v3452_v39 = vld [vmem:[%s6734_s1 + $0x2e8] sm:$0xff] }
  0x25   : > { %v5697_v35 = vld [vmem:[%s5535_s6 + $0x91] sm:$0xff]  ;;  %v4808_v40 = vpack.c.bf16 %v266_v33, %v265_v32  ;;  %v267_v41 = vld [vmem:[%s6734_s1 + $0x60] sm:$0xff]  ;;  %v3371_v45 = vld [vmem:[%s5535_s6 + $0xa9] sm:$0xff]  ;;  %v4940_v46 = vpack.c.bf16 %v3452_v39, %v3451_v38 }
  0x26   : > { %4779 = vmatpush3.bf16.msra.mxu1 %v4776_v36  ;;  %v3370_v44 = vld [vmem:[%s5535_s6 + $0x99] sm:$0xff]  ;;  %v3453_v47 = vld [vmem:[%s6734_s1 + $0x2f0] sm:$0xff]  ;;  %v3488_v57 = vld [vmem:[%s6734_s1 + $0x308] sm:$0xff] }
  0x27   : > { %4907 = vmatpush3.bf16.msra.mxu0 %v5576_v37  ;;  %4781 = vmatprep.subr.bf16.mxu1 %v4780_v42  ;;  %v269_v51 = vld [vmem:[%s6734_s1 + $0x70] sm:$0xff]  ;;  %v270_v52 = vld [vmem:[%s6734_s1 + $0x78] sm:$0xff]  ;;  %v3487_v56 = vld [vmem:[%s6734_s1 + $0x300] sm:$0xff] }
  0x28   : > { %4909 = vmatprep.subr.bf16.mxu0 %v5592_v43  ;;  %v3372_v53 = vld [vmem:[%s5535_s6 + $0xb1] sm:$0xff]  ;;  %v3295_v59 = vld [vmem:[%s6734_s1 + $0x100] sm:$0xff]  ;;  %v3296_v60 = vld [vmem:[%s6734_s1 + $0x108] sm:$0xff] }
  0x29   : > { %v3490_v1 = vld [vmem:[%s6734_s1 + $0x318] sm:$0xff]  ;;  %v5756_v2 = vpack.c.bf16 %v3296_v60, %v3295_v59  ;;  %v5762_v3 = vld [vmem:[%s5535_s6 + $0x22] sm:$0xff]  ;;  %v5791_v14 = vld [vmem:[%s5535_s6 + $0x4a] sm:$0xff] }
  0x2a   : > { %4783 = vmatpush3.bf16.msra.mxu1 %v4780_v42  ;;  %v268_v42 = vld [vmem:[%s6734_s1 + $0x68] sm:$0xff]  ;;  %v5765_v4 = vld [vmem:[%s5535_s6 + $0xd9] sm:$0xff]  ;;  %v5788_v13 = vld [vmem:[%s5535_s6 + $0xf1] sm:$0xff] }
  0x2b   : > { %4911 = vmatpush3.bf16.msra.mxu0 %v5592_v43  ;;  %4785 = vmatprep.subr.bf16.mxu1 %v4784_v48  ;;  %v4812_v50 = vpack.c.bf16 %v268_v42, %v267_v41  ;;  %v3492_v9 = vld [vmem:[%s6734_s1 + $0x328] sm:$0xff]  ;;  %v5803_v19 = vld [vmem:[%s5535_s6 + $0xf9] sm:$0xff]  ;;  %v3497_v33 = vld [vmem:[%s6734_s1 + $0x350] sm:$0xff] }
  0x2c   : > { %4913 = vmatprep.subr.bf16.mxu0 %v5608_v49  ;;  %v5781_v10 = vld [vmem:[%s5535_s6 + $0xe1] sm:$0xff]  ;;  %v5807_v20 = vld [vmem:[%s5535_s6 + $0x52] sm:$0xff] }
  0x2d   : > { %v5813_v22 = vld [vmem:[%s5535_s6 + $0x62] sm:$0xff]  ;;  %v5854_v39 = vld [vmem:[%s5535_s6 + $0x139] sm:$0xff] }
  0x2e   : > { %4787 = vmatpush3.bf16.msra.mxu1 %v4784_v48  ;;  %v3454_v48 = vld [vmem:[%s6734_s1 + $0x2f8] sm:$0xff]  ;;  %v5851_v38 = vld [vmem:[%s5535_s6 + $0x82] sm:$0xff]  ;;  %6787 = vst [vmem:[#allocation13_spill] sm:$0xff] %v5854_v39 }
  0x2f   : > { %4915 = vmatpush3.bf16.msra.mxu0 %v5608_v49  ;;  %4789 = vmatprep.subr.bf16.mxu1 %v4788_v54  ;;  %v3499_v42 = vld [vmem:[%s6734_s1 + $0x360] sm:$0xff]  ;;  %v3536_v60 = vld [vmem:[%s6734_s1 + $0x388] sm:$0xff]  ;;  %v3306_v49 = vld [vmem:[%s6734_s1 + $0x158] sm:$0xff] }
  0x30   : > { %4917 = vmatprep.subr.bf16.mxu0 %v4916_v55  ;;  %v3535_v59 = vld [vmem:[%s6734_s1 + $0x380] sm:$0xff]  ;;  %v6031_v43 = vld [vmem:[%s5535_s6 + $0x152] sm:$0xff]  ;;  %v3344_v17 = vld [vmem:[%s6734_s1 + $0x188] sm:$0xff] }
  0x31   : > { %4069 = vmatmul.mubr.f32.vlgmr.msra.gmra.mrb[0].mxu1 %v272_v58  ;;  %v4816_v58 = vpack.c.bf16 %v270_v52, %v269_v51  ;;  %v3501_v51 = vld [vmem:[%s6734_s1 + $0x370] sm:$0xff]  ;;  %v3502_v52 = vld [vmem:[%s6734_s1 + $0x378] sm:$0xff]  ;;  %v3307_v37 = vld [vmem:[%s6734_s1 + $0x160] sm:$0xff] }
  0x32   : > { %4389 = vmatmul.mubr.f32.vlgmr.msra.gmra.mrb[0].mxu0 %v3360_v61  ;;  %4791 = vmatpush3.bf16.msra.mxu1 %v4788_v54  ;;  %v5729_v54 = vld [vmem:[%s5535_s6 + $0xc1] sm:$0xff]  ;;  %v3538_v12 = vld [vmem:[%s6734_s1 + $0x398] sm:$0xff] }
  0x33   : > { %4919 = vmatpush3.bf16.msra.mxu0 %v4916_v55  ;;  %4071 = vmatprep.mubr.f32.mxu1 %v5555_v29  ;;  %v3450_v29 = vld [vmem:[%s6734_s1 + $0x2d8] sm:$0xff]  ;;  %v4944_v55 = vpack.c.bf16 %v3454_v48, %v3453_v47  ;;  %v5879_v48 = vld [vmem:[%s5535_s6 + $0xaa] sm:$0xff]  ;;  %v3437_v23 = vld [vmem:[%s5535_s6 + $0x182] sm:$0xff] }
  0x34   : > { %4391 = vmatprep.mubr.f32.mxu0 %v3361_v63  ;;  %4921 = vmatprep.subr.bf16.mxu0 %v4920_v62  ;;  %v4936_v36 = vpack.c.bf16 %v3450_v29, %v3449_v28  ;;  %v5829_v28 = vld [vmem:[%s5535_s6 + $0x6a] sm:$0xff]  ;;  %v5832_v29 = vld [vmem:[%s5535_s6 + $0x121] sm:$0xff] }
  0x35   : > { %4072 = vmatmul.mubr.f32.gmra.mrb[2].mxu1 %v3360_v61  ;;  %4793 = vmatprep.subr.bf16.mxu1 %v4792_v0  ;;  %v5745_v61 = vld [vmem:[%s5535_s6 + $0xc9] sm:$0xff]  ;;  %6785 = vst [vmem:[#allocation11_spill] sm:$0xff] %v5832_v29  ;;  %v5876_v47 = vld [vmem:[%s5535_s6 + $0x151] sm:$0xff] }
  0x36   : > { %4392 = vmatmul.mubr.f32.gmra.mrb[2].mxu0 %v3362_v5  ;;  %4074 = vmatprep.mubr.f32.mxu1 %v3361_v63  ;;  %v4948_v63 = vpack.c.bf16 %v3488_v57, %v3487_v56  ;;  %6789 = vst [vmem:[#allocation15_spill] sm:$0xff] %v5876_v47  ;;  %v5898_v56 = vld [vmem:[%s5535_s6 + $0x169] sm:$0xff] }
  0x37   : > { %4923 = vmatpush3.bf16.msra.mxu0 %v4920_v62  ;;  %4394 = vmatprep.mubr.f32.mxu0 %v3363_v6  ;;  %v5748_v62 = vld [vmem:[%s5535_s6 + $0x1a] sm:$0xff]  ;;  %6791 = vst [vmem:[#allocation17_spill] sm:$0xff] %v5898_v56  ;;  %v5901_v57 = vld [vmem:[%s5535_s6 + $0xc2] sm:$0xff] }
  0x38   : > { %4925 = vmatprep.subr.bf16.mxu0 %v4924_v8  ;;  %4795 = vmatpush3.bf16.msra.mxu1 %v4792_v0  ;;  %v3489_v0 = vld [vmem:[%s6734_s1 + $0x310] sm:$0xff] }
  0x39   : > { %4075 = vmatmul.mubr.f32.gmra.mrb[4].mxu1 %v3362_v5  ;;  %4797 = vmatprep.subr.bf16.mxu1 %v4796_v11  ;;  %v5768_v5 = vld [vmem:[%s5535_s6 + $0x32] sm:$0xff] }
  0x3a   : > { %4395 = vmatmul.mubr.f32.gmra.mrb[4].mxu0 %v3364_v15  ;;  %4077 = vmatprep.mubr.f32.mxu1 %v3363_v6  ;;  %v4952_v6 = vpack.c.bf16 %v3490_v1, %v3489_v0  ;;  %v5917_v0 = vld [vmem:[%s5535_s6 + $0xca] sm:$0xff]  ;;  %v223_v1 = vld [vmem:[%s5535_s6] sm:$0xff] }
  0x3b   : > { %4927 = vmatpush3.bf16.msra.mxu0 %v4924_v8  ;;  %4397 = vmatprep.mubr.f32.mxu0 %v3365_v16  ;;  %v3491_v8 = vld [vmem:[%s6734_s1 + $0x320] sm:$0xff] }
  0x3c   : > { %4929 = vmatprep.subr.bf16.mxu0 %v4928_v18  ;;  %4799 = vmatpush3.bf16.msra.mxu1 %v4796_v11  ;;  %v5785_v11 = vld [vmem:[%s5535_s6 + $0x3a] sm:$0xff] }
  0x3d   : > { %4078 = vmatmul.mubr.f32.gmra.mrb[6].mxu1 %v3364_v15  ;;  %4801 = vmatprep.subr.bf16.mxu1 %v4800_v21  ;;  %v4956_v15 = vpack.c.bf16 %v3492_v9, %v3491_v8  ;;  %v5923_v8 = vpack.c.bf16 %v3536_v60, %v3535_v59  ;;  %v3297_v9 = vld [vmem:[%s6734_s1 + $0x110] sm:$0xff]  ;;  %v5984_v59 = vld [vmem:[%s5535_s6 + $0x48] sm:$0xff] }
  0x3e   : > { %4398 = vmatmul.mubr.f32.gmra.mrb[6].mxu0 %v3366_v25  ;;  %4080 = vmatprep.mubr.f32.mxu1 %v3365_v16  ;;  %v3493_v16 = vld [vmem:[%s6734_s1 + $0x330] sm:$0xff]  ;;  %6795 = vst [vmem:[#allocation21_spill] sm:$0xff] %v5984_v59  ;;  %v5987_v60 = vld [vmem:[%s5535_s6 + $0x122] sm:$0xff] }
  0x3f   : > { %4931 = vmatpush3.bf16.msra.mxu0 %v4928_v18  ;;  %4400 = vmatprep.mubr.f32.mxu0 %v3367_v26  ;;  %v3494_v18 = vld [vmem:[%s6734_s1 + $0x338] sm:$0xff] }
  0x40   : > { %4933 = vmatprep.subr.bf16.mxu0 %v4932_v27  ;;  %4803 = vmatpush3.bf16.msra.mxu1 %v4800_v21  ;;  %v5810_v21 = vld [vmem:[%s5535_s6 + $0x109] sm:$0xff]  ;;  %v4960_v24 = vpack.c.bf16 %v3494_v18, %v3493_v16 }
  0x41   : > { %4081 = vmatmul.mubr.f32.gmra.mrb[8].mxu1 %v3366_v25  ;;  %4805 = vmatprep.subr.bf16.mxu1 %v4804_v30  ;;  %6783 = vst [vmem:[#allocation9_spill] sm:$0xff] %v5810_v21  ;;  %v3495_v25 = vld [vmem:[%s6734_s1 + $0x340] sm:$0xff]  ;;  %v224_v16 = vld [vmem:[%s5535_s6 + $0x8] sm:$0xff] }
  0x42   : > { %4401 = vmatmul.mubr.f32.gmra.mrb[8].mxu0 %v3368_v34  ;;  %4083 = vmatprep.mubr.f32.mxu1 %v3367_v26  ;;  %v3496_v26 = vld [vmem:[%s6734_s1 + $0x348] sm:$0xff] }
  0x43   : > { %4935 = vmatpush3.bf16.msra.mxu0 %v4932_v27  ;;  %4403 = vmatprep.mubr.f32.mxu0 %v5697_v35  ;;  %v5825_v27 = vld [vmem:[%s5535_s6 + $0x111] sm:$0xff]  ;;  %v4964_v32 = vpack.c.bf16 %v3496_v26, %v3495_v25  ;;  %v5936_v18 = vld [vmem:[%s5535_s6 + $0xe2] sm:$0xff] }
  0x44   : > { %4937 = vmatprep.subr.bf16.mxu0 %v4936_v36  ;;  %4807 = vmatpush3.bf16.msra.mxu1 %v4804_v30  ;;  %6784 = vst [vmem:[#allocation10_spill] sm:$0xff] %v5825_v27  ;;  %v5835_v30 = vld [vmem:[%s5535_s6 + $0x7a] sm:$0xff]  ;;  %v5942_v25 = vld [vmem:[%s5535_s6 + $0xf2] sm:$0xff] }
  0x45   : > { %4084 = vmatmul.mubr.f32.gmra.mrb[10].mxu1 %v3368_v34  ;;  %4809 = vmatprep.subr.bf16.mxu1 %v4808_v40  ;;  %v3498_v34 = vld [vmem:[%s6734_s1 + $0x358] sm:$0xff] }
  0x46   : > { %4404 = vmatmul.mubr.f32.gmra.mrb[10].mxu0 %v3370_v44  ;;  %4086 = vmatprep.mubr.f32.mxu1 %v5697_v35  ;;  %v4968_v41 = vpack.c.bf16 %v3498_v34, %v3497_v33  ;;  %v3300_v33 = vld [vmem:[%s6734_s1 + $0x128] sm:$0xff]  ;;  %v5954_v34 = vld [vmem:[%s5535_s6 + $0x20] sm:$0xff] }
  0x47   : > { %4939 = vmatpush3.bf16.msra.mxu0 %v4936_v36  ;;  %4406 = vmatprep.mubr.f32.mxu0 %v3371_v45  ;;  %v5847_v36 = vld [vmem:[%s5535_s6 + $0x129] sm:$0xff] }
  0x48   : > { %4941 = vmatprep.subr.bf16.mxu0 %v4940_v46  ;;  %4811 = vmatpush3.bf16.msra.mxu1 %v4808_v40  ;;  %6786 = vst [vmem:[#allocation12_spill] sm:$0xff] %v5847_v36  ;;  %v5857_v40 = vld [vmem:[%s5535_s6 + $0x92] sm:$0xff] }
  0x49   : > { %4087 = vmatmul.mubr.f32.gmra.mrb[12].mxu1 %v3370_v44  ;;  %4813 = vmatprep.subr.bf16.mxu1 %v4812_v50  ;;  %v3500_v44 = vld [vmem:[%s6734_s1 + $0x368] sm:$0xff] }
  0x4a   : > { %4407 = vmatmul.mubr.f32.gmra.mrb[12].mxu0 %v3372_v53  ;;  %4089 = vmatprep.mubr.f32.mxu1 %v3371_v45  ;;  %v5869_v45 = vld [vmem:[%s5535_s6 + $0x141] sm:$0xff] }
  0x4b   : > { %4943 = vmatpush3.bf16.msra.mxu0 %v4940_v46  ;;  %4409 = vmatprep.mubr.f32.mxu0 %v5729_v54  ;;  %6788 = vst [vmem:[#allocation14_spill] sm:$0xff] %v5869_v45  ;;  %v5873_v46 = vld [vmem:[%s5535_s6 + $0x9a] sm:$0xff] }
  0x4c   : > { %4945 = vmatprep.subr.bf16.mxu0 %v4944_v55  ;;  %4815 = vmatpush3.bf16.msra.mxu1 %v4812_v50  ;;  %v4972_v50 = vpack.c.bf16 %v3500_v44, %v3499_v42  ;;  %v5962_v42 = vld [vmem:[%s5535_s6 + $0x30] sm:$0xff] }
  0x4d   : > { %4090 = vmatmul.mubr.f32.gmra.mrb[14].mxu1 %v3372_v53  ;;  %4817 = vmatprep.subr.bf16.mxu1 %v4816_v58  ;;  %v5891_v53 = vld [vmem:[%s5535_s6 + $0x159] sm:$0xff]  ;;  %6793 = vst [vmem:[#allocation19_spill] sm:$0xff] %v5962_v42  ;;  %v5965_v44 = vld [vmem:[%s5535_s6 + $0x10a] sm:$0xff] }
  0x4e   : > { %4410 = vmatmul.mubr.f32.gmra.mrb[14].mxu0 %v5745_v61  ;;  %4092 = vmatprep.mubr.f32.mxu1 %v5729_v54  ;;  %6790 = vst [vmem:[#allocation16_spill] sm:$0xff] %v5891_v53 }
  0x4f   : > { %4947 = vmatpush3.bf16.msra.mxu0 %v4944_v55  ;;  %4468 = vmatprep.mubr.f32.mxu0 %v5748_v62  ;;  %v5895_v55 = vld [vmem:[%s5535_s6 + $0xb2] sm:$0xff] }
  0x50   : > { %4949 = vmatprep.subr.bf16.mxu0 %v4948_v63  ;;  %4819 = vmatpush3.bf16.msra.mxu1 %v4816_v58  ;;  %v4976_v58 = vpack.c.bf16 %v3502_v52, %v3501_v51  ;;  %v3302_v51 = vld [vmem:[%s6734_s1 + $0x138] sm:$0xff] }
  0x51   : > { %4093 = vmatmul.mubr.f32.gmra.mrb[16].mxu1 %v5745_v61  ;;  %4821 = vmatprep.subr.bf16.mxu1 %v5756_v2  ;;  %v5977_v52 = vld [vmem:[%s5535_s6 + $0x38] sm:$0xff] }
  0x52   : > { %4469 = vmatmul.mubr.f32.vlgmr.msra.gmra.mrb[0].mxu0 %v5762_v3  ;;  %4095 = vmatprep.mubr.f32.mxu1 %v5765_v4  ;;  %6794 = vst [vmem:[#allocation20_spill] sm:$0xff] %v5977_v52 }
  0x53   : > { %4951 = vmatpush3.bf16.msra.mxu0 %v4948_v63  ;;  %4471 = vmatprep.mubr.f32.mxu0 %v5768_v5  ;;  %v5913_v63 = vld [vmem:[%s5535_s6 + $0x171] sm:$0xff] }
  0x54   : > { %4953 = vmatprep.subr.bf16.mxu0 %v4952_v6  ;;  %6792 = vst [vmem:[#allocation18_spill] sm:$0xff] %v5913_v63 }
  0x55   : > { %4096 = vmatmul.mubr.f32.gmra.mrb[18].mxu1 %v5781_v10 }
  0x56   : > { %4472 = vmatmul.mubr.f32.gmra.mrb[2].mxu0 %v5785_v11  ;;  %4098 = vmatprep.mubr.f32.mxu1 %v5788_v13 }
  0x57   : > { %4474 = vmatprep.mubr.f32.mxu0 %v5791_v14  ;;  %4955 = vmatpush3.bf16.msra.mxu0 %v4952_v6  ;;  %v5921_v6 = vld [vmem:[%s5535_s6 + $0xda] sm:$0xff] }
  0x58   : > { %4957 = vmatprep.subr.bf16.mxu0 %v4956_v15 }
  0x59   : > { %4099 = vmatmul.mubr.f32.gmra.mrb[20].mxu1 %v5803_v19 }
  0x5a   : > { %4475 = vmatmul.mubr.f32.gmra.mrb[4].mxu0 %v5807_v20  ;;  %4101 = vmatprep.mubr.f32.mxu1 %v5810_v21  ;;  %v3542_v21 = vld [vmem:[%s6734_s1 + $0x3b8] sm:$0xff] }
  0x5b   : > { %4477 = vmatprep.mubr.f32.mxu0 %v5813_v22  ;;  %4959 = vmatpush3.bf16.msra.mxu0 %v4956_v15  ;;  %v3298_v15 = vld [vmem:[%s6734_s1 + $0x118] sm:$0xff] }
  0x5c   : > { %4961 = vmatprep.subr.bf16.mxu0 %v4960_v24  ;;  %v4824_v26 = vpack.c.bf16 %v3298_v15, %v3297_v9  ;;  %v3303_v9 = vld [vmem:[%s6734_s1 + $0x140] sm:$0xff]  ;;  %v3304_v15 = vld [vmem:[%s6734_s1 + $0x148] sm:$0xff] }
  0x5d   : > { %4102 = vmatmul.mubr.f32.gmra.mrb[22].mxu1 %v5825_v27  ;;  %v3537_v27 = vld [vmem:[%s6734_s1 + $0x390] sm:$0xff] }
  0x5e   : > { %4478 = vmatmul.mubr.f32.gmra.mrb[6].mxu0 %v5829_v28  ;;  %4104 = vmatprep.mubr.f32.mxu1 %v5832_v29 }
  0x5f   : > { %4480 = vmatprep.mubr.f32.mxu0 %v5835_v30  ;;  %4963 = vmatpush3.bf16.msra.mxu0 %v4960_v24  ;;  %v5939_v24 = vld [vmem:[%s5535_s6 + $0x18] sm:$0xff] }
  0x60   : > { %4965 = vmatprep.subr.bf16.mxu0 %v4964_v32 }
  0x61   : > { %4105 = vmatmul.mubr.f32.gmra.mrb[24].mxu1 %v5847_v36  ;;  %v3343_v36 = vld [vmem:[%s6734_s1 + $0x180] sm:$0xff] }
  0x62   : > { %4481 = vmatmul.mubr.f32.gmra.mrb[8].mxu0 %v5851_v38  ;;  %4107 = vmatprep.mubr.f32.mxu1 %v5854_v39  ;;  %v6091_v29 = vpack.c.bf16 %v3344_v17, %v3343_v36  ;;  %v6106_v17 = vld [vmem:[%s5535_s6 + $0xd8] sm:$0xff]  ;;  %v3539_v36 = vld [vmem:[%s6734_s1 + $0x3a0] sm:$0xff] }
  0x63   : > { %4483 = vmatprep.mubr.f32.mxu0 %v5857_v40  ;;  %4967 = vmatpush3.bf16.msra.mxu0 %v4964_v32  ;;  %v3299_v32 = vld [vmem:[%s6734_s1 + $0x120] sm:$0xff] }
  0x64   : > { %4969 = vmatprep.subr.bf16.mxu0 %v4968_v41 }
  0x65   : > { %4108 = vmatmul.mubr.f32.gmra.mrb[26].mxu1 %v5869_v45  ;;  %v3310_v45 = vld [vmem:[%s6734_s1 + $0x178] sm:$0xff] }
  0x66   : > { %4484 = vmatmul.mubr.f32.gmra.mrb[10].mxu0 %v5873_v46  ;;  %4110 = vmatprep.mubr.f32.mxu1 %v5876_v47  ;;  %v3309_v47 = vld [vmem:[%s6734_s1 + $0x170] sm:$0xff] }
  0x67   : > { %4486 = vmatprep.mubr.f32.mxu0 %v5879_v48  ;;  %4971 = vmatpush3.bf16.msra.mxu0 %v4968_v41  ;;  %v5959_v41 = vld [vmem:[%s5535_s6 + $0xfa] sm:$0xff]  ;;  %v4848_v39 = vpack.c.bf16 %v3310_v45, %v3309_v47  ;;  %v3438_v45 = vld [vmem:[%s5535_s6 + $0x18a] sm:$0xff] }
  0x68   : > { %4973 = vmatprep.subr.bf16.mxu0 %v4972_v50  ;;  %v6089_v47 = vld [vmem:[%s5535_s6 + $0xc0] sm:$0xff] }
  0x69   : > { %4111 = vmatmul.mubr.f32.gmra.mrb[28].mxu1 %v5891_v53  ;;  %v6053_v53 = vld [vmem:[%s5535_s6 + $0x16a] sm:$0xff]  ;;  %6805 = vst [vmem:[#allocation31_spill] sm:$0xff] %v6089_v47 }
  0x6a   : > { %4487 = vmatmul.mubr.f32.gmra.mrb[12].mxu0 %v5895_v55  ;;  %4113 = vmatprep.mubr.f32.mxu1 %v5898_v56  ;;  %v3308_v56 = vld [vmem:[%s6734_s1 + $0x168] sm:$0xff] }
  0x6b   : > { %4489 = vmatprep.mubr.f32.mxu0 %v5901_v57  ;;  %4975 = vmatpush3.bf16.msra.mxu0 %v4972_v50  ;;  %v4828_v50 = vpack.c.bf16 %v3300_v33, %v3299_v32  ;;  %v6006_v32 = vld [vmem:[%s5535_s6 + $0x60] sm:$0xff]  ;;  %v4844_v31 = vpack.c.bf16 %v3308_v56, %v3307_v37  ;;  %v6069_v37 = vld [vmem:[%s5535_s6 + $0x172] sm:$0xff]  ;;  %v6072_v56 = vld [vmem:[%s5535_s6 + $0xa8] sm:$0xff] }
  0x6c   : > { %4977 = vmatprep.subr.bf16.mxu0 %v4976_v58  ;;  %6797 = vst [vmem:[#allocation23_spill] sm:$0xff] %v6006_v32  ;;  %v6009_v33 = vld [vmem:[%s5535_s6 + $0x13a] sm:$0xff]  ;;  %6803 = vst [vmem:[#allocation29_spill] sm:$0xff] %v6072_v56 }
  0x6d   : > { %4114 = vmatmul.mubr.f32.gmra.mrb[30].mxu1 %v5913_v63 }
  0x6e   : > { %4490 = vmatmul.mubr.f32.gmra.mrb[14].mxu0 %v5917_v0  ;;  %4148 = vmatprep.mubr.f32.mxu1 %v223_v1 }
  0x6f   : > { %4492 = vmatprep.mubr.f32.mxu0 %v5921_v6  ;;  %4979 = vmatpush3.bf16.msra.mxu0 %v4976_v58  ;;  %v5981_v58 = vld [vmem:[%s5535_s6 + $0x112] sm:$0xff] }
  0x70   : > { %4981 = vmatprep.subr.bf16.mxu0 %v5923_v8 }
  0x71   : > { %4149 = vmatmul.mubr.f32.vlgmr.msra.gmra.mrb[0].mxu1 %v224_v16  ;;  %v5999_v16 = vld [vmem:[%s5535_s6 + $0x50] sm:$0xff] }
  0x72   : > { %4493 = vmatmul.mubr.f32.gmra.mrb[16].mxu0 %v5936_v18  ;;  %4823 = vmatpush3.bf16.msra.mxu1 %v5756_v2  ;;  %v3301_v2 = vld [vmem:[%s6734_s1 + $0x130] sm:$0xff]  ;;  %6796 = vst [vmem:[#allocation22_spill] sm:$0xff] %v5999_v16 }
  0x73   : > { %4151 = vmatprep.mubr.f32.mxu1 %v5939_v24  ;;  %4495 = vmatprep.mubr.f32.mxu0 %v5942_v25  ;;  %v4832_v1 = vpack.c.bf16 %v3302_v51, %v3301_v2  ;;  %v4836_v2 = vpack.c.bf16 %v3304_v15, %v3303_v9  ;;  %v3305_v51 = vld [vmem:[%s6734_s1 + $0x150] sm:$0xff]  ;;  %v6025_v9 = vld [vmem:[%s5535_s6 + $0x142] sm:$0xff]  ;;  %v6028_v15 = vld [vmem:[%s5535_s6 + $0x78] sm:$0xff] }
  0x74   : > { %4825 = vmatprep.subr.bf16.mxu1 %v4824_v26  ;;  %6799 = vst [vmem:[#allocation25_spill] sm:$0xff] %v6028_v15  ;;  %v4840_v63 = vpack.c.bf16 %v3306_v49, %v3305_v51  ;;  %v6047_v49 = vld [vmem:[%s5535_s6 + $0x15a] sm:$0xff]  ;;  %v6050_v51 = vld [vmem:[%s5535_s6 + $0x90] sm:$0xff] }
  0x75   : > { %4152 = vmatmul.mubr.f32.gmra.mrb[2].mxu1 %v5954_v34  ;;  %6801 = vst [vmem:[#allocation27_spill] sm:$0xff] %v6050_v51 }
  0x76   : > { %4496 = vmatmul.mubr.f32.gmra.mrb[18].mxu0 %v5959_v41  ;;  %4154 = vmatprep.mubr.f32.mxu1 %v5962_v42 }
  0x77   : > { %4498 = vmatprep.mubr.f32.mxu0 %v5965_v44  ;;  %4827 = vmatpush3.bf16.msra.mxu1 %v4824_v26  ;;  %v6003_v26 = vld [vmem:[%s5535_s6 + $0x12a] sm:$0xff] }
  0x78   : > { %4829 = vmatprep.subr.bf16.mxu1 %v4828_v50 }
  0x79   : > { %4155 = vmatmul.mubr.f32.gmra.mrb[4].mxu1 %v5977_v52 }
  0x7a   : > { %4499 = vmatmul.mubr.f32.gmra.mrb[20].mxu0 %v5981_v58  ;;  %4157 = vmatprep.mubr.f32.mxu1 %v5984_v59 }
  0x7b   : > { %4501 = vmatprep.mubr.f32.mxu0 %v5987_v60  ;;  %4831 = vmatpush3.bf16.msra.mxu1 %v4828_v50  ;;  %v6021_v50 = vld [vmem:[%s5535_s6 + $0x68] sm:$0xff] }
  0x7c   : > { %4833 = vmatprep.subr.bf16.mxu1 %v4832_v1  ;;  %6798 = vst [vmem:[#allocation24_spill] sm:$0xff] %v6021_v50 }
  0x7d   : > { %4158 = vmatmul.mubr.f32.gmra.mrb[6].mxu1 %v5999_v16 }
  0x7e   : > { %4502 = vmatmul.mubr.f32.gmra.mrb[22].mxu0 %v6003_v26  ;;  %4160 = vmatprep.mubr.f32.mxu1 %v6006_v32 }
  0x7f   : > { %4504 = vmatprep.mubr.f32.mxu0 %v6009_v33  ;;  %4835 = vmatpush3.bf16.msra.mxu1 %v4832_v1  ;;  %v6043_v1 = vld [vmem:[%s5535_s6 + $0x80] sm:$0xff] }
  0x80   : > { %4837 = vmatprep.subr.bf16.mxu1 %v4836_v2  ;;  %6800 = vst [vmem:[#allocation26_spill] sm:$0xff] %v6043_v1 }
  0x81   : > { %4161 = vmatmul.mubr.f32.gmra.mrb[8].mxu1 %v6021_v50 }
  0x82   : > { %4505 = vmatmul.mubr.f32.gmra.mrb[24].mxu0 %v6025_v9  ;;  %4163 = vmatprep.mubr.f32.mxu1 %v6028_v15 }
  0x83   : > { %4507 = vmatprep.mubr.f32.mxu0 %v6031_v43  ;;  %4839 = vmatpush3.bf16.msra.mxu1 %v4836_v2  ;;  %v6065_v2 = vld [vmem:[%s5535_s6 + $0x98] sm:$0xff] }
  0x84   : > { %4841 = vmatprep.subr.bf16.mxu1 %v4840_v63  ;;  %6802 = vst [vmem:[#allocation28_spill] sm:$0xff] %v6065_v2 }
  0x85   : > { %4164 = vmatmul.mubr.f32.gmra.mrb[10].mxu1 %v6043_v1 }
  0x86   : > { %4508 = vmatmul.mubr.f32.gmra.mrb[26].mxu0 %v6047_v49  ;;  %4166 = vmatprep.mubr.f32.mxu1 %v6050_v51 }
  0x87   : > { %4510 = vmatprep.mubr.f32.mxu0 %v6053_v53  ;;  %4843 = vmatpush3.bf16.msra.mxu1 %v4840_v63  ;;  %v6085_v63 = vld [vmem:[%s5535_s6 + $0xb0] sm:$0xff] }
  0x88   : > { %4845 = vmatprep.subr.bf16.mxu1 %v4844_v31  ;;  %6804 = vst [vmem:[#allocation30_spill] sm:$0xff] %v6085_v63 }
  0x89   : > { %4167 = vmatmul.mubr.f32.gmra.mrb[12].mxu1 %v6065_v2 }
  0x8a   : > { %4511 = vmatmul.mubr.f32.gmra.mrb[28].mxu0 %v6069_v37  ;;  %4169 = vmatprep.mubr.f32.mxu1 %v6072_v56 }
  0x8b   : > { %4513 = vmatprep.mubr.f32.mxu0 %v3437_v23  ;;  %4847 = vmatpush3.bf16.msra.mxu1 %v4844_v31  ;;  %v6102_v23 = vld [vmem:[%s5535_s6 + $0xc8] sm:$0xff]  ;;  %v4984_v31 = vpack.c.bf16 %v3538_v12, %v3537_v27  ;;  %v6124_v12 = vld [vmem:[%s5535_s6 + $0xf0] sm:$0xff] }
  0x8c   : > { %4849 = vmatprep.subr.bf16.mxu1 %v4848_v39  ;;  %6806 = vst [vmem:[#allocation32_spill] sm:$0xff] %v6102_v23 }
  0x8d   : > { %4170 = vmatmul.mubr.f32.gmra.mrb[14].mxu1 %v6085_v63 }
  0x8e   : > { %4514 = vmatmul.mubr.f32.gmra.mrb[30].mxu0 %v3438_v45  ;;  %4172 = vmatprep.mubr.f32.mxu1 %v6089_v47  ;;  %v3540_v45 = vld [vmem:[%s6734_s1 + $0x3a8] sm:$0xff] }
  0x8f   : > { %4548 = vmatprep.mubr.f32.mxu0 %v5962_v42  ;;  %4851 = vmatpush3.bf16.msra.mxu1 %v4848_v39  ;;  %v6119_v39 = vld [vmem:[%s5535_s6 + $0xe0] sm:$0xff]  ;;  %v4988_v27 = vpack.c.bf16 %v3540_v45, %v3539_v36  ;;  %v6140_v36 = vld [vmem:[%s5535_s6 + $0x108] sm:$0xff] }
  0x90   : > { %4853 = vmatprep.subr.bf16.mxu1 %v6091_v29  ;;  %v771_v42 = vld [vmem:[%s5535_s6 + $0xa] sm:$0xff] }
  0x91   : > { %4173 = vmatmul.mubr.f32.gmra.mrb[16].mxu1 %v6102_v23 }
  0x92   : > { %4549 = vmatmul.mubr.f32.vlgmr.msra.gmra.mrb[0].mxu0 %v5977_v52  ;;  %4175 = vmatprep.mubr.f32.mxu1 %v6106_v17  ;;  %v3541_v52 = vld [vmem:[%s6734_s1 + $0x3b0] sm:$0xff] }
  0x93   : > { %4983 = vmatpush3.bf16.msra.mxu0 %v5923_v8  ;;  %4551 = vmatprep.mubr.f32.mxu0 %v5984_v59  ;;  %v6136_v8 = vld [vmem:[%s5535_s6 + $0xf8] sm:$0xff]  ;;  %v4992_v45 = vpack.c.bf16 %v3542_v21, %v3541_v52  ;;  %v3543_v59 = vld [vmem:[%s6734_s1 + $0x3c0] sm:$0xff] }
  0x94   : > { %4985 = vmatprep.subr.bf16.mxu0 %v4984_v31  ;;  %v6156_v21 = vld [vmem:[%s5535_s6 + $0x120] sm:$0xff] }
  0x95   : > { %4176 = vmatmul.mubr.f32.gmra.mrb[18].mxu1 %v6119_v39 }
  0x96   : > { %4552 = vmatmul.mubr.f32.gmra.mrb[2].mxu0 %v5999_v16  ;;  %4178 = vmatprep.mubr.f32.mxu1 %v6124_v12  ;;  %v3544_v16 = vld [vmem:[%s6734_s1 + $0x3c8] sm:$0xff] }
  0x97   : > { %4554 = vmatprep.mubr.f32.mxu0 %v6006_v32  ;;  %4987 = vmatpush3.bf16.msra.mxu0 %v4984_v31  ;;  %v6152_v31 = vld [vmem:[%s5535_s6 + $0x110] sm:$0xff]  ;;  %v4996_v52 = vpack.c.bf16 %v3544_v16, %v3543_v59  ;;  %v6172_v59 = vld [vmem:[%s5535_s6 + $0x138] sm:$0xff] }
  0x98   : > { %4989 = vmatprep.subr.bf16.mxu0 %v4988_v27  ;;  %v3545_v32 = vld [vmem:[%s6734_s1 + $0x3d0] sm:$0xff] }
  0x99   : > { %4179 = vmatmul.mubr.f32.gmra.mrb[20].mxu1 %v6136_v8 }
  0x9a   : > { %4555 = vmatmul.mubr.f32.gmra.mrb[4].mxu0 %v6021_v50  ;;  %4181 = vmatprep.mubr.f32.mxu1 %v6140_v36  ;;  %v3546_v50 = vld [vmem:[%s6734_s1 + $0x3d8] sm:$0xff] }
  0x9b   : > { %4557 = vmatprep.mubr.f32.mxu0 %v6028_v15  ;;  %4991 = vmatpush3.bf16.msra.mxu0 %v4988_v27  ;;  %v6168_v15 = vld [vmem:[%s5535_s6 + $0x128] sm:$0xff]  ;;  %v5000_v16 = vpack.c.bf16 %v3546_v50, %v3545_v32  ;;  %v3547_v27 = vld [vmem:[%s6734_s1 + $0x3e0] sm:$0xff]  ;;  %v6188_v32 = vld [vmem:[%s5535_s6 + $0x150] sm:$0xff] }
  0x9c   : > { %4993 = vmatprep.subr.bf16.mxu0 %v4992_v45 }
  0x9d   : > { %4182 = vmatmul.mubr.f32.gmra.mrb[22].mxu1 %v6152_v31 }
  0x9e   : > { %4558 = vmatmul.mubr.f32.gmra.mrb[6].mxu0 %v6043_v1  ;;  %4184 = vmatprep.mubr.f32.mxu1 %v6156_v21  ;;  %v3548_v1 = vld [vmem:[%s6734_s1 + $0x3e8] sm:$0xff] }
  0x9f   : > { %4560 = vmatprep.mubr.f32.mxu0 %v6050_v51  ;;  %4995 = vmatpush3.bf16.msra.mxu0 %v4992_v45  ;;  %v6184_v51 = vld [vmem:[%s5535_s6 + $0x140] sm:$0xff]  ;;  %v5004_v50 = vpack.c.bf16 %v3548_v1, %v3547_v27  ;;  %v3549_v45 = vld [vmem:[%s6734_s1 + $0x3f0] sm:$0xff]  ;;  %v6204_v1 = vld [vmem:[%s5535_s6 + $0x168] sm:$0xff] }
  0xa0   : > { %4997 = vmatprep.subr.bf16.mxu0 %v4996_v52  ;;  %v3583_v27 = vld [vmem:[%s6734_s1 + $0x400] sm:$0xff] }
  0xa1   : > { %4185 = vmatmul.mubr.f32.gmra.mrb[24].mxu1 %v6168_v15 }
  0xa2   : > { %4561 = vmatmul.mubr.f32.gmra.mrb[8].mxu0 %v6065_v2  ;;  %4187 = vmatprep.mubr.f32.mxu1 %v6172_v59  ;;  %v3550_v2 = vld [vmem:[%s6734_s1 + $0x3f8] sm:$0xff] }
  0xa3   : > { %4563 = vmatprep.mubr.f32.mxu0 %v6072_v56  ;;  %4999 = vmatpush3.bf16.msra.mxu0 %v4996_v52  ;;  %v6200_v56 = vld [vmem:[%s5535_s6 + $0x158] sm:$0xff]  ;;  %v5008_v52 = vpack.c.bf16 %v3550_v2, %v3549_v45  ;;  %v770_v2 = vld [vmem:[%s5535_s6 + $0x2] sm:$0xff]  ;;  %v3345_v45 = vld [vmem:[%s6734_s1 + $0x190] sm:$0xff] }
  0xa4   : > { %5001 = vmatprep.subr.bf16.mxu0 %v5000_v16 }
  0xa5   : > { %4188 = vmatmul.mubr.f32.gmra.mrb[26].mxu1 %v6184_v51 }
  0xa6   : > { %4564 = vmatmul.mubr.f32.gmra.mrb[10].mxu0 %v6085_v63  ;;  %4190 = vmatprep.mubr.f32.mxu1 %v6188_v32  ;;  %v3584_v63 = vld [vmem:[%s6734_s1 + $0x408] sm:$0xff] }
  0xa7   : > { %4566 = vmatprep.mubr.f32.mxu0 %v6089_v47  ;;  %5003 = vmatpush3.bf16.msra.mxu0 %v5000_v16  ;;  %v6216_v47 = vld [vmem:[%s5535_s6 + $0x170] sm:$0xff]  ;;  %v6220_v16 = vpack.c.bf16 %v3584_v63, %v3583_v27  ;;  %v3347_v63 = vld [vmem:[%s6734_s1 + $0x1a0] sm:$0xff]  ;;  %v3348_v27 = vld [vmem:[%s6734_s1 + $0x1a8] sm:$0xff] }
  0xa8   : > { %5005 = vmatprep.subr.bf16.mxu0 %v5004_v50 }
  0xa9   : > { %4191 = vmatmul.mubr.f32.gmra.mrb[28].mxu1 %v6200_v56 }
  0xaa   : > { %4567 = vmatmul.mubr.f32.gmra.mrb[12].mxu0 %v6102_v23  ;;  %4193 = vmatprep.mubr.f32.mxu1 %v6204_v1  ;;  %v3346_v23 = vld [vmem:[%s6734_s1 + $0x198] sm:$0xff] }
  0xab   : > { %4569 = vmatprep.mubr.f32.mxu0 %v6106_v17  ;;  %5007 = vmatpush3.bf16.msra.mxu0 %v5004_v50  ;;  %v4856_v50 = vpack.c.bf16 %v3346_v23, %v3345_v45  ;;  %v4860_v23 = vpack.c.bf16 %v3348_v27, %v3347_v63  ;;  %v3356_v45 = vld [vmem:[%s6734_s1 + $0x1e8] sm:$0xff]  ;;  %v3358_v63 = vld [vmem:[%s6734_s1 + $0x1f8] sm:$0xff] }
  0xac   : > { %5009 = vmatprep.subr.bf16.mxu0 %v5008_v52  ;;  %v3485_v27 = vld [vmem:[%s5535_s6 + $0x198] sm:$0xff] }
  0xad   : > { %4194 = vmatmul.mubr.f32.gmra.mrb[30].mxu1 %v6216_v47 }
  0xae   : > { %4570 = vmatmul.mubr.f32.gmra.mrb[14].mxu0 %v6119_v39  ;;  %4228 = vmatprep.mubr.f32.mxu1 %v770_v2  ;;  %v3354_v2 = vld [vmem:[%s6734_s1 + $0x1d8] sm:$0xff] }
  0xaf   : > { %4572 = vmatprep.mubr.f32.mxu0 %v6124_v12  ;;  %5011 = vmatpush3.bf16.msra.mxu0 %v5008_v52  ;;  %v3350_v52 = vld [vmem:[%s6734_s1 + $0x1b8] sm:$0xff] }
  0xb0   : > { %5013 = vmatprep.subr.bf16.mxu0 %v6220_v16 }
  0xb1   : > { %4229 = vmatmul.mubr.f32.vlgmr.msra.gmra.mrb[0].mxu1 %v771_v42  ;;  %v3349_v42 = vld [vmem:[%s6734_s1 + $0x1b0] sm:$0xff] }
  0xb2   : > { %4573 = vmatmul.mubr.f32.gmra.mrb[16].mxu0 %v6136_v8  ;;  %4855 = vmatpush3.bf16.msra.mxu1 %v6091_v29  ;;  %v3352_v29 = vld [vmem:[%s6734_s1 + $0x1c8] sm:$0xff] }
  0xb3   : > { %4231 = vmatprep.mubr.f32.mxu1 %v5748_v62  ;;  %4575 = vmatprep.mubr.f32.mxu0 %v6140_v36  ;;  %v4864_v62 = vpack.c.bf16 %v3350_v52, %v3349_v42  ;;  %v3585_v42 = vld [vmem:[%s6734_s1 + $0x410] sm:$0xff] }
  0xb4   : > { %4857 = vmatprep.subr.bf16.mxu1 %v4856_v50  ;;  %v3505_v52 = vld [vmem:[%s5535_s6 + $0x49] sm:$0xff] }
  0xb5   : > { %4232 = vmatmul.mubr.f32.gmra.mrb[2].mxu1 %v5762_v3  ;;  %v3351_v3 = vld [vmem:[%s6734_s1 + $0x1c0] sm:$0xff] }
  0xb6   : > { %4576 = vmatmul.mubr.f32.gmra.mrb[18].mxu0 %v6152_v31  ;;  %4234 = vmatprep.mubr.f32.mxu1 %v5768_v5  ;;  %v4868_v5 = vpack.c.bf16 %v3352_v29, %v3351_v3  ;;  %v3588_v3 = vld [vmem:[%s6734_s1 + $0x428] sm:$0xff] }
  0xb7   : > { %4578 = vmatprep.mubr.f32.mxu0 %v6156_v21  ;;  %4859 = vmatpush3.bf16.msra.mxu1 %v4856_v50  ;;  %v3357_v50 = vld [vmem:[%s6734_s1 + $0x1f0] sm:$0xff]  ;;  %v3507_v29 = vld [vmem:[%s5535_s6 + $0x61] sm:$0xff] }
  0xb8   : > { %4861 = vmatprep.subr.bf16.mxu1 %v4860_v23 }
  0xb9   : > { %4235 = vmatmul.mubr.f32.gmra.mrb[4].mxu1 %v5785_v11  ;;  %v3353_v11 = vld [vmem:[%s6734_s1 + $0x1d0] sm:$0xff] }
  0xba   : > { %4579 = vmatmul.mubr.f32.gmra.mrb[20].mxu0 %v6168_v15  ;;  %4237 = vmatprep.mubr.f32.mxu1 %v5791_v14  ;;  %v4872_v14 = vpack.c.bf16 %v3354_v2, %v3353_v11  ;;  %v3590_v11 = vld [vmem:[%s6734_s1 + $0x438] sm:$0xff] }
  0xbb   : > { %4581 = vmatprep.mubr.f32.mxu0 %v6172_v59  ;;  %4863 = vmatpush3.bf16.msra.mxu1 %v4860_v23  ;;  %v3486_v23 = vld [vmem:[%s5535_s6 + $0x1a0] sm:$0xff] }
  0xbc   : > { %4865 = vmatprep.subr.bf16.mxu1 %v4864_v62 }
  0xbd   : > { %4238 = vmatmul.mubr.f32.gmra.mrb[6].mxu1 %v5807_v20  ;;  %v3355_v20 = vld [vmem:[%s6734_s1 + $0x1e0] sm:$0xff] }
  0xbe   : > { %4582 = vmatmul.mubr.f32.gmra.mrb[22].mxu0 %v6184_v51  ;;  %4240 = vmatprep.mubr.f32.mxu1 %v5813_v22  ;;  %v6284_v22 = vld [vmem:[%s5535_s6 + $0x180] sm:$0xff] }
  0xbf   : > { %4584 = vmatprep.mubr.f32.mxu0 %v6188_v32  ;;  %4867 = vmatpush3.bf16.msra.mxu1 %v4864_v62 }
  0xc0   : > { %4869 = vmatprep.subr.bf16.mxu1 %v4868_v5 }
  0xc1   : > { %4241 = vmatmul.mubr.f32.gmra.mrb[8].mxu1 %v5829_v28  ;;  %v4876_v28 = vpack.c.bf16 %v3356_v45, %v3355_v20  ;;  %v3594_v45 = vld [vmem:[%s6734_s1 + $0x458] sm:$0xff] }
  0xc2   : > { %4585 = vmatmul.mubr.f32.gmra.mrb[24].mxu0 %v6200_v56  ;;  %4243 = vmatprep.mubr.f32.mxu1 %v5835_v30  ;;  %v6297_v30 = vld [vmem:[%s5535_s6 + $0x188] sm:$0xff] }
  0xc3   : > { %4587 = vmatprep.mubr.f32.mxu0 %v6204_v1  ;;  %4871 = vmatpush3.bf16.msra.mxu1 %v4868_v5  ;;  %v3589_v5 = vld [vmem:[%s6734_s1 + $0x430] sm:$0xff] }
  0xc4   : > { %4873 = vmatprep.subr.bf16.mxu1 %v4872_v14  ;;  %v5024_v2 = vpack.c.bf16 %v3590_v11, %v3589_v5  ;;  %v6421_v5 = vld [vmem:[%s5535_s6 + $0x189] sm:$0xff]  ;;  %v3533_v11 = vld [vmem:[%s5535_s6 + $0x199] sm:$0xff] }
  0xc5   : > { %4244 = vmatmul.mubr.f32.gmra.mrb[10].mxu1 %v5851_v38  ;;  %v4880_v38 = vpack.c.bf16 %v3358_v63, %v3357_v50  ;;  %v3596_v63 = vld [vmem:[%s6734_s1 + $0x468] sm:$0xff] }
  0xc6   : > { %4588 = vmatmul.mubr.f32.gmra.mrb[26].mxu0 %v6216_v47  ;;  %4246 = vmatprep.mubr.f32.mxu1 %v5857_v40  ;;  %v3503_v40 = vld [vmem:[%s5535_s6 + $0x31] sm:$0xff] }
  0xc7   : > { %4590 = vmatprep.mubr.f32.mxu0 %v6284_v22  ;;  %4875 = vmatpush3.bf16.msra.mxu1 %v4872_v14  ;;  %v3592_v14 = vld [vmem:[%s6734_s1 + $0x448] sm:$0xff] }
  0xc8   : > { %4877 = vmatprep.subr.bf16.mxu1 %v4876_v28 }
  0xc9   : > { %4247 = vmatmul.mubr.f32.gmra.mrb[12].mxu1 %v5873_v46  ;;  %v3586_v46 = vld [vmem:[%s6734_s1 + $0x418] sm:$0xff] }
  0xca   : > { %4591 = vmatmul.mubr.f32.gmra.mrb[28].mxu0 %v6297_v30  ;;  %4249 = vmatprep.mubr.f32.mxu1 %v5879_v48  ;;  %v3504_v48 = vld [vmem:[%s5535_s6 + $0x39] sm:$0xff]  ;;  %v5016_v62 = vpack.c.bf16 %v3586_v46, %v3585_v42 }
  0xcb   : > { %4593 = vmatprep.mubr.f32.mxu0 %v3485_v27  ;;  %4879 = vmatpush3.bf16.msra.mxu1 %v4876_v28  ;;  %v3513_v28 = vld [vmem:[%s5535_s6 + $0xa9] sm:$0xff]  ;;  %v3598_v27 = vld [vmem:[%s6734_s1 + $0x478] sm:$0xff]  ;;  %v6825_v46 = vld [vmem:[#allocation26_spill] sm:$0xff] }
  0xcc   : > { %4881 = vmatprep.subr.bf16.mxu1 %v4880_v38  ;;  %v6824_v42 = vld [vmem:[#allocation5_spill] sm:$0xff] }
  0xcd   : > { %4250 = vmatmul.mubr.f32.gmra.mrb[14].mxu1 %v5895_v55  ;;  %v3587_v55 = vld [vmem:[%s6734_s1 + $0x420] sm:$0xff] }
  0xce   : > { %4594 = vmatmul.mubr.f32.gmra.mrb[30].mxu0 %v3486_v23  ;;  %4252 = vmatprep.mubr.f32.mxu1 %v5901_v57  ;;  %v3506_v57 = vld [vmem:[%s5535_s6 + $0x51] sm:$0xff] }
  0xcf   : > { %4628 = vmatprep.mubr.f32.mxu0 %v3503_v40  ;;  %4883 = vmatpush3.bf16.msra.mxu1 %v4880_v38  ;;  %v6821_v38 = vld [vmem:[#allocation14_spill] sm:$0xff]  ;;  %v6822_v23 = vld [vmem:[#allocation25_spill] sm:$0xff]  ;;  %v6823_v40 = vld [vmem:[#allocation15_spill] sm:$0xff] }
  0xd0   : > { %5044 = vmatprep.subr.bf16.mxu1 %v5490_v7 }
  0xd1   : > { %4253 = vmatmul.mubr.f32.gmra.mrb[16].mxu1 %v5917_v0  ;;  %v5020_v0 = vpack.c.bf16 %v3588_v3, %v3587_v55  ;;  %v6413_v55 = vld [vmem:[%s5535_s6 + $0x181] sm:$0xff] }
  0xd2   : > { %4629 = vmatmul.mubr.f32.vlgmr.msra.gmra.mrb[0].mxu0 %v3504_v48  ;;  %4255 = vmatprep.mubr.f32.mxu1 %v5921_v6  ;;  %v3508_v6 = vld [vmem:[%s5535_s6 + $0x69] sm:$0xff]  ;;  %v6829_v3 = vld [vmem:[#allocation6_spill] sm:$0xff] }
  0xd3   : > { %5015 = vmatpush3.bf16.msra.mxu0 %v6220_v16  ;;  %4631 = vmatprep.mubr.f32.mxu0 %v3505_v52  ;;  %v3509_v16 = vld [vmem:[%s5535_s6 + $0x79] sm:$0xff]  ;;  %v6826_v48 = vld [vmem:[#allocation16_spill] sm:$0xff]  ;;  %v6827_v52 = vld [vmem:[#allocation27_spill] sm:$0xff] }
  0xd4   : > { %5017 = vmatprep.subr.bf16.mxu0 %v5016_v62 }
  0xd5   : > { %4256 = vmatmul.mubr.f32.gmra.mrb[18].mxu1 %v5936_v18  ;;  %v3591_v18 = vld [vmem:[%s6734_s1 + $0x440] sm:$0xff] }
  0xd6   : > { %4632 = vmatmul.mubr.f32.gmra.mrb[2].mxu0 %v3506_v57  ;;  %4258 = vmatprep.mubr.f32.mxu1 %v5942_v25  ;;  %v3510_v25 = vld [vmem:[%s5535_s6 + $0x81] sm:$0xff]  ;;  %v5028_v20 = vpack.c.bf16 %v3592_v14, %v3591_v18  ;;  %v6830_v57 = vld [vmem:[#allocation28_spill] sm:$0xff] }
  0xd7   : > { %4634 = vmatprep.mubr.f32.mxu0 %v3507_v29  ;;  %5019 = vmatpush3.bf16.msra.mxu0 %v5016_v62  ;;  %v6828_v62 = vld [vmem:[#allocation17_spill] sm:$0xff]  ;;  %v6831_v29 = vld [vmem:[#allocation18_spill] sm:$0xff] }
  0xd8   : > { %5021 = vmatprep.subr.bf16.mxu0 %v5020_v0  ;;  %v3534_v18 = vld [vmem:[%s5535_s6 + $0x1a1] sm:$0xff]  ;;  %v3551_v14 = vld [vmem:[%s5535_s6 + $0x32] sm:$0xff] }
  0xd9   : > { %4259 = vmatmul.mubr.f32.gmra.mrb[20].mxu1 %v5959_v41  ;;  %v3593_v41 = vld [vmem:[%s6734_s1 + $0x450] sm:$0xff] }
  0xda   : > { %4635 = vmatmul.mubr.f32.gmra.mrb[4].mxu0 %v3508_v6  ;;  %4261 = vmatprep.mubr.f32.mxu1 %v5965_v44  ;;  %v3512_v44 = vld [vmem:[%s5535_s6 + $0x99] sm:$0xff]  ;;  %v5032_v50 = vpack.c.bf16 %v3594_v45, %v3593_v41  ;;  %v6833_v6 = vld [vmem:[#allocation7_spill] sm:$0xff] }
  0xdb   : > { %4637 = vmatprep.mubr.f32.mxu0 %v3509_v16  ;;  %5023 = vmatpush3.bf16.msra.mxu0 %v5020_v0  ;;  %v6832_v0 = vld [vmem:[#allocation29_spill] sm:$0xff]  ;;  %v6834_v16 = vld [vmem:[#allocation30_spill] sm:$0xff]  ;;  %v3553_v45 = vld [vmem:[%s5535_s6 + $0x4a] sm:$0xff] }
  0xdc   : > { %5025 = vmatprep.subr.bf16.mxu0 %v5024_v2  ;;  %v3552_v41 = vld [vmem:[%s5535_s6 + $0x3a] sm:$0xff] }
  0xdd   : > { %4262 = vmatmul.mubr.f32.gmra.mrb[22].mxu1 %v5981_v58  ;;  %v3595_v58 = vld [vmem:[%s6734_s1 + $0x460] sm:$0xff] }
  0xde   : > { %4638 = vmatmul.mubr.f32.gmra.mrb[6].mxu0 %v3510_v25  ;;  %4264 = vmatprep.mubr.f32.mxu1 %v5987_v60  ;;  %v5036_v60 = vpack.c.bf16 %v3596_v63, %v3595_v58  ;;  %v6836_v25 = vld [vmem:[#allocation8_spill] sm:$0xff]  ;;  %v3568_v58 = vld [vmem:[%s5535_s6 + $0xfa] sm:$0xff] }
  0xdf   : > { %4640 = vmatprep.mubr.f32.mxu0 %v5697_v35  ;;  %5027 = vmatpush3.bf16.msra.mxu0 %v5024_v2  ;;  %v3514_v35 = vld [vmem:[%s5535_s6 + $0xb1] sm:$0xff]  ;;  %v6835_v2 = vld [vmem:[#allocation31_spill] sm:$0xff]  ;;  %v3378_v63 = vld [vmem:[%s5535_s6 + $0xf9] sm:$0xff] }
  0xe0   : > { %5029 = vmatprep.subr.bf16.mxu0 %v5028_v20 }
  0xe1   : > { %4265 = vmatmul.mubr.f32.gmra.mrb[24].mxu1 %v6003_v26  ;;  %v3597_v26 = vld [vmem:[%s6734_s1 + $0x470] sm:$0xff] }
  0xe2   : > { %4641 = vmatmul.mubr.f32.gmra.mrb[8].mxu0 %v3512_v44  ;;  %4267 = vmatprep.mubr.f32.mxu1 %v6009_v33  ;;  %v5040_v33 = vpack.c.bf16 %v3598_v27, %v3597_v26  ;;  %v3554_v44 = vld [vmem:[%s5535_s6 + $0x52] sm:$0xff]  ;;  %v3572_v27 = vld [vmem:[%s5535_s6 + $0x12a] sm:$0xff] }
  0xe3   : > { %4643 = vmatprep.mubr.f32.mxu0 %v3513_v28  ;;  %5031 = vmatpush3.bf16.msra.mxu0 %v5028_v20  ;;  %v6837_v20 = vld [vmem:[#allocation32_spill] sm:$0xff]  ;;  %v3555_v28 = vld [vmem:[%s5535_s6 + $0x62] sm:$0xff] }
  0xe4   : > { %5033 = vmatprep.subr.bf16.mxu0 %v5032_v50  ;;  %v3380_v26 = vld [vmem:[%s5535_s6 + $0x111] sm:$0xff] }
  0xe5   : > { %4268 = vmatmul.mubr.f32.gmra.mrb[26].mxu1 %v6025_v9  ;;  %v6818_v9 = vld [vmem:[#allocation13_spill] sm:$0xff] }
  0xe6   : > { %4644 = vmatmul.mubr.f32.gmra.mrb[10].mxu0 %v3514_v35  ;;  %4270 = vmatprep.mubr.f32.mxu1 %v6031_v43  ;;  %v6807_v43 = vld [vmem:[#allocation19_spill] sm:$0xff]  ;;  %v3570_v35 = vld [vmem:[%s5535_s6 + $0x112] sm:$0xff] }
  0xe7   : > { %4646 = vmatprep.mubr.f32.mxu0 %v5729_v54  ;;  %5035 = vmatpush3.bf16.msra.mxu0 %v5032_v50  ;;  %v6808_v54 = vld [vmem:[#allocation9_spill] sm:$0xff] }
  0xe8   : > { %5037 = vmatprep.subr.bf16.mxu0 %v5036_v60  ;;  %v3557_v50 = vld [vmem:[%s5535_s6 + $0x7a] sm:$0xff] }
  0xe9   : > { %4271 = vmatmul.mubr.f32.gmra.mrb[28].mxu1 %v6047_v49  ;;  %v6819_v49 = vld [vmem:[#allocation4_spill] sm:$0xff] }
  0xea   : > { %4647 = vmatmul.mubr.f32.gmra.mrb[12].mxu0 %v5745_v61  ;;  %4273 = vmatprep.mubr.f32.mxu1 %v6053_v53  ;;  %v6809_v61 = vld [vmem:[#allocation2_spill] sm:$0xff]  ;;  %v6812_v53 = vld [vmem:[#allocation21_spill] sm:$0xff] }
  0xeb   : > { %4649 = vmatprep.mubr.f32.mxu0 %v5765_v4  ;;  %5039 = vmatpush3.bf16.msra.mxu0 %v5036_v60  ;;  %v6810_v4 = vld [vmem:[#allocation20_spill] sm:$0xff]  ;;  %v3571_v60 = vld [vmem:[%s5535_s6 + $0x122] sm:$0xff] }
  0xec   : > { %5041 = vmatprep.subr.bf16.mxu0 %v5040_v33 }
  0xed   : > { %4274 = vmatmul.mubr.f32.gmra.mrb[30].mxu1 %v6069_v37  ;;  %v6820_v37 = vld [vmem:[#allocation24_spill] sm:$0xff] }
  0xee   : > { %4650 = vmatmul.mubr.f32.gmra.mrb[14].mxu0 %v5781_v10  ;;  %4308 = vmatprep.mubr.f32.mxu1 %v5939_v24  ;;  %v6811_v10 = vld [vmem:[#allocation10_spill] sm:$0xff]  ;;  %v6814_v24 = vld [vmem:[#allocation3_spill] sm:$0xff] }
  0xef   : > { %4652 = vmatprep.mubr.f32.mxu0 %v5788_v13  ;;  %5043 = vmatpush3.bf16.msra.mxu0 %v5040_v33  ;;  %v6813_v13 = vld [vmem:[#allocation11_spill] sm:$0xff] }
  0xf0   : > { %v3381_v33 = vld [vmem:[%s5535_s6 + $0x121] sm:$0xff] }
  0xf1   : > { %4309 = vmatmul.mubr.f32.vlgmr.msra.gmra.mrb[0].mxu1 %v5954_v34  ;;  %v6817_v34 = vld [vmem:[#allocation23_spill] sm:$0xff] }
  0xf2   : > { %4653 = vmatmul.mubr.f32.gmra.mrb[16].mxu0 %v5803_v19  ;;  %5052 = vmatpush3.bf16.msra.mxu1 %v5490_v7  ;;  %v6815_v19 = vld [vmem:[#allocation22_spill] sm:$0xff]  ;;  %v6816_v7 = vld [vmem:[#allocation12_spill] sm:$0xff] }
  0xf3   : > { %4311 = vmatprep.mubr.f32.mxu1 %v6807_v43  ;;  %4655 = vmatprep.mubr.f32.mxu0 %v6808_v54  ;;  %v3573_v43 = vld [vmem:[%s5535_s6 + $0x13a] sm:$0xff]  ;;  %v3382_v54 = vld [vmem:[%s5535_s6 + $0x129] sm:$0xff] }
  0xf4   : > { %5045 = vmatprep.subr.bf16.mxu1 %v6809_v61 }
  0xf5   : > { %4312 = vmatmul.mubr.f32.gmra.mrb[2].mxu1 %v6810_v4  ;;  %v3383_v4 = vld [vmem:[%s5535_s6 + $0x139] sm:$0xff] }
  0xf6   : > { %4656 = vmatmul.mubr.f32.gmra.mrb[18].mxu0 %v6811_v10  ;;  %4314 = vmatprep.mubr.f32.mxu1 %v6812_v53  ;;  %v3575_v10 = vld [vmem:[%s5535_s6 + $0x152] sm:$0xff]  ;;  %v3384_v53 = vld [vmem:[%s5535_s6 + $0x141] sm:$0xff] }
  0xf7   : > { %4658 = vmatprep.mubr.f32.mxu0 %v6813_v13  ;;  %5053 = vmatpush3.bf16.msra.mxu1 %v6809_v61  ;;  %v3574_v61 = vld [vmem:[%s5535_s6 + $0x142] sm:$0xff]  ;;  %v3576_v13 = vld [vmem:[%s5535_s6 + $0x15a] sm:$0xff] }
  0xf8   : > { %5046 = vmatprep.subr.bf16.mxu1 %v6814_v24 }
  0xf9   : > { %4315 = vmatmul.mubr.f32.gmra.mrb[4].mxu1 %v6815_v19  ;;  %v3577_v19 = vld [vmem:[%s5535_s6 + $0x16a] sm:$0xff] }
  0xfa   : > { %4659 = vmatmul.mubr.f32.gmra.mrb[20].mxu0 %v6816_v7  ;;  %4317 = vmatprep.mubr.f32.mxu1 %v6817_v34  ;;  %v3386_v7 = vld [vmem:[%s5535_s6 + $0x159] sm:$0xff] }
  0xfb   : > { %4661 = vmatprep.mubr.f32.mxu0 %v6818_v9  ;;  %5054 = vmatpush3.bf16.msra.mxu1 %v6814_v24  ;;  %v3385_v24 = vld [vmem:[%s5535_s6 + $0x151] sm:$0xff]  ;;  %v3387_v9 = vld [vmem:[%s5535_s6 + $0x169] sm:$0xff] }
  0xfc   : > { %5047 = vmatprep.subr.bf16.mxu1 %v6819_v49  ;;  %v3578_v34 = vld [vmem:[%s5535_s6 + $0x172] sm:$0xff] }
  0xfd   : > { %4318 = vmatmul.mubr.f32.gmra.mrb[6].mxu1 %v6820_v37  ;;  %v3388_v37 = vld [vmem:[%s5535_s6 + $0x171] sm:$0xff] }
  0xfe   : > { %4662 = vmatmul.mubr.f32.gmra.mrb[22].mxu0 %v6821_v38  ;;  %4320 = vmatprep.mubr.f32.mxu1 %v6822_v23  ;;  %v3580_v38 = vld [vmem:[%s5535_s6 + $0x18a] sm:$0xff]  ;;  %v3581_v23 = vld [vmem:[%s5535_s6 + $0x19a] sm:$0xff] }
  0xff   : > { %4664 = vmatprep.mubr.f32.mxu0 %v6823_v40  ;;  %5055 = vmatpush3.bf16.msra.mxu1 %v6819_v49  ;;  %v3579_v49 = vld [vmem:[%s5535_s6 + $0x182] sm:$0xff] }
 0x100   : > { %5048 = vmatprep.subr.bf16.mxu1 %v6824_v42  ;;  %v3582_v40 = vld [vmem:[%s5535_s6 + $0x1a2] sm:$0xff] }
 0x101   : > { %4321 = vmatmul.mubr.f32.gmra.mrb[8].mxu1 %v6825_v46 }
 0x102   : > { %4665 = vmatmul.mubr.f32.gmra.mrb[24].mxu0 %v6826_v48  ;;  %4323 = vmatprep.mubr.f32.mxu1 %v6827_v52 }
 0x103   : > { %4667 = vmatprep.mubr.f32.mxu0 %v6828_v62  ;;  %5056 = vmatpush3.bf16.msra.mxu1 %v6824_v42 }
 0x104   : > { %5049 = vmatprep.subr.bf16.mxu1 %v6829_v3 }
 0x105   : > { %4324 = vmatmul.mubr.f32.gmra.mrb[10].mxu1 %v6830_v57 }
 0x106   : > { %4668 = vmatmul.mubr.f32.gmra.mrb[26].mxu0 %v6831_v29  ;;  %4326 = vmatprep.mubr.f32.mxu1 %v6832_v0 }
 0x107   : > { %4670 = vmatprep.mubr.f32.mxu0 %v6413_v55  ;;  %5057 = vmatpush3.bf16.msra.mxu1 %v6829_v3 }
 0x108   : > { %5050 = vmatprep.subr.bf16.mxu1 %v6833_v6 }
 0x109   : > { %4327 = vmatmul.mubr.f32.gmra.mrb[12].mxu1 %v6834_v16 }
 0x10a   : > { %4671 = vmatmul.mubr.f32.gmra.mrb[28].mxu0 %v6421_v5  ;;  %4329 = vmatprep.mubr.f32.mxu1 %v6835_v2 }
 0x10b   : > { %4673 = vmatprep.mubr.f32.mxu0 %v3533_v11  ;;  %5058 = vmatpush3.bf16.msra.mxu1 %v6833_v6 }
 0x10c   : > { %5051 = vmatprep.subr.bf16.mxu1 %v6836_v25 }
 0x10d   : > { %4330 = vmatmul.mubr.f32.gmra.mrb[14].mxu1 %v6837_v20 }
 0x10e   : > { %4674 = vmatmul.mubr.f32.gmra.mrb[30].mxu0 %v3534_v18  ;;  %4332 = vmatprep.mubr.f32.mxu1 %v6106_v17  ;;  %v3556_v17 = vld [vmem:[%s5535_s6 + $0x6a] sm:$0xff] }
 0x10f   : > { %4708 = vmatprep.mubr.f32.mxu0 %v3551_v14  ;;  %5059 = vmatpush3.bf16.msra.mxu1 %v6836_v25  ;;  %v6513_v25 = vld [vmem:[%s6735_s2] ss:$0 sm:$0xff] }
 0x111   : > { %4333 = vmatmul.mubr.f32.gmra.mrb[16].mxu1 %v6119_v39  ;;  %v3558_v39 = vld [vmem:[%s5535_s6 + $0x82] sm:$0xff] }
 0x112   : > { %4709 = vmatmul.mubr.f32.vlgmr.msra.gmra.mrb[0].mxu0 %v3552_v41  ;;  %4335 = vmatprep.mubr.f32.mxu1 %v6124_v12  ;;  %v3559_v12 = vld [vmem:[%s5535_s6 + $0x92] sm:$0xff] }
 0x113   : > { %4711 = vmatprep.mubr.f32.mxu0 %v3553_v45  ;;  %v6518_v45 = vld [vmem:[%s6736_s3] ss:$0 sm:$0xff] }
 0x115   : > { %4336 = vmatmul.mubr.f32.gmra.mrb[18].mxu1 %v6136_v8  ;;  %v3560_v8 = vld [vmem:[%s5535_s6 + $0x9a] sm:$0xff] }
 0x116   : > { %4712 = vmatmul.mubr.f32.gmra.mrb[2].mxu0 %v3554_v44  ;;  %4338 = vmatprep.mubr.f32.mxu1 %v6140_v36  ;;  %v3561_v36 = vld [vmem:[%s5535_s6 + $0xaa] sm:$0xff] }
 0x117   : > { %4714 = vmatprep.mubr.f32.mxu0 %v3555_v28 }
 0x119   : > { %4339 = vmatmul.mubr.f32.gmra.mrb[20].mxu1 %v6152_v31  ;;  %v3562_v31 = vld [vmem:[%s5535_s6 + $0xb2] sm:$0xff] }
 0x11a   : > { %4715 = vmatmul.mubr.f32.gmra.mrb[4].mxu0 %v3556_v17  ;;  %4341 = vmatprep.mubr.f32.mxu1 %v6156_v21  ;;  %v3563_v21 = vld [vmem:[%s5535_s6 + $0xc2] sm:$0xff] }
 0x11b   : > { %4717 = vmatprep.mubr.f32.mxu0 %v3557_v50 }
 0x11d   : > { %4342 = vmatmul.mubr.f32.gmra.mrb[22].mxu1 %v6168_v15  ;;  %v3564_v15 = vld [vmem:[%s5535_s6 + $0xca] sm:$0xff] }
 0x11e   : > { %4718 = vmatmul.mubr.f32.gmra.mrb[6].mxu0 %v3558_v39  ;;  %4344 = vmatprep.mubr.f32.mxu1 %v6172_v59  ;;  %v3566_v59 = vld [vmem:[%s5535_s6 + $0xe2] sm:$0xff] }
 0x11f   : > { %4720 = vmatprep.mubr.f32.mxu0 %v3559_v12 }
 0x121   : > { %4345 = vmatmul.mubr.f32.gmra.mrb[24].mxu1 %v6184_v51  ;;  %v3565_v51 = vld [vmem:[%s5535_s6 + $0xda] sm:$0xff] }
 0x122   : > { %4721 = vmatmul.mubr.f32.gmra.mrb[8].mxu0 %v3560_v8  ;;  %4347 = vmatprep.mubr.f32.mxu1 %v6188_v32  ;;  %v3567_v32 = vld [vmem:[%s5535_s6 + $0xf2] sm:$0xff] }
 0x123   : > { %4723 = vmatprep.mubr.f32.mxu0 %v3561_v36 }
 0x125   : > { %4348 = vmatmul.mubr.f32.gmra.mrb[26].mxu1 %v6200_v56  ;;  %v3375_v56 = vld [vmem:[%s5535_s6 + $0xd9] sm:$0xff] }
 0x126   : > { %4724 = vmatmul.mubr.f32.gmra.mrb[10].mxu0 %v3562_v31  ;;  %4350 = vmatprep.mubr.f32.mxu1 %v6204_v1  ;;  %v3376_v1 = vld [vmem:[%s5535_s6 + $0xe1] sm:$0xff] }
 0x127   : > { %4726 = vmatprep.mubr.f32.mxu0 %v3563_v21 }
 0x129   : > { %4351 = vmatmul.mubr.f32.gmra.mrb[28].mxu1 %v6216_v47  ;;  %v3377_v47 = vld [vmem:[%s5535_s6 + $0xf1] sm:$0xff] }
 0x12a   : > { %4727 = vmatmul.mubr.f32.gmra.mrb[12].mxu0 %v3564_v15  ;;  %4353 = vmatprep.mubr.f32.mxu1 %v6284_v22  ;;  %v3569_v22 = vld [vmem:[%s5535_s6 + $0x10a] sm:$0xff] }
 0x12b   : > { %4729 = vmatprep.mubr.f32.mxu0 %v3565_v51 }
 0x12d   : > { %4354 = vmatmul.mubr.f32.gmra.mrb[30].mxu1 %v6297_v30  ;;  %v3379_v30 = vld [vmem:[%s5535_s6 + $0x109] sm:$0xff] }
 0x12e   : > { %4730 = vmatmul.mubr.f32.gmra.mrb[14].mxu0 %v3566_v59  ;;  %4412 = vmatprep.mubr.f32.mxu1 %v3375_v56 }
 0x12f   : > { %4732 = vmatprep.mubr.f32.mxu0 %v3567_v32 }
 0x131   : > { %4413 = vmatmul.mubr.f32.vlgmr.msra.gmra.mrb[16].mxu1 %v3376_v1 }
 0x132   : > { %4733 = vmatmul.mubr.f32.gmra.mrb[16].mxu0 %v3568_v58  ;;  %4415 = vmatprep.mubr.f32.mxu1 %v3377_v47 }
 0x133   : > { %4735 = vmatprep.mubr.f32.mxu0 %v3569_v22 }
 0x135   : > { %4416 = vmatmul.mubr.f32.gmra.mrb[18].mxu1 %v3378_v63 }
 0x136   : > { %4736 = vmatmul.mubr.f32.gmra.mrb[18].mxu0 %v3570_v35  ;;  %4418 = vmatprep.mubr.f32.mxu1 %v3379_v30 }
 0x137   : > { %4738 = vmatprep.mubr.f32.mxu0 %v3571_v60 }
 0x139   : > { %4419 = vmatmul.mubr.f32.gmra.mrb[20].mxu1 %v3380_v26 }
 0x13a   : > { %4739 = vmatmul.mubr.f32.gmra.mrb[20].mxu0 %v3572_v27  ;;  %4421 = vmatprep.mubr.f32.mxu1 %v3381_v33 }
 0x13b   : > { %4741 = vmatprep.mubr.f32.mxu0 %v3573_v43 }
 0x13d   : > { %4422 = vmatmul.mubr.f32.gmra.mrb[22].mxu1 %v3382_v54 }
 0x13e   : > { %4742 = vmatmul.mubr.f32.gmra.mrb[22].mxu0 %v3574_v61  ;;  %4424 = vmatprep.mubr.f32.mxu1 %v3383_v4 }
 0x13f   : > { %4744 = vmatprep.mubr.f32.mxu0 %v3575_v10 }
 0x141   : > { %4425 = vmatmul.mubr.f32.gmra.mrb[24].mxu1 %v3384_v53 }
 0x142   : > { %4745 = vmatmul.mubr.f32.gmra.mrb[24].mxu0 %v3576_v13  ;;  %4427 = vmatprep.mubr.f32.mxu1 %v3385_v24 }
 0x143   : > { %4747 = vmatprep.mubr.f32.mxu0 %v3577_v19 }
 0x145   : > { %4428 = vmatmul.mubr.f32.gmra.mrb[26].mxu1 %v3386_v7 }
 0x146   : > { %4748 = vmatmul.mubr.f32.gmra.mrb[26].mxu0 %v3578_v34  ;;  %4430 = vmatprep.mubr.f32.mxu1 %v3387_v9 }
 0x147   : > { %4750 = vmatprep.mubr.f32.mxu0 %v3579_v49 }
 0x149   : > { %4431 = vmatmul.mubr.f32.gmra.mrb[28].mxu1 %v3388_v37 }
 0x14a   : > { %4751 = vmatmul.mubr.f32.gmra.mrb[28].mxu0 %v3580_v38  ;;  %4433 = vmatprep.mubr.f32.mxu1 %v6413_v55 }
 0x14b   : > { %4753 = vmatprep.mubr.f32.mxu0 %v3581_v23 }
 0x14d   : > { %4434 = vmatmul.mubr.f32.gmra.mrb[30].mxu1 %v6421_v5 }
 0x14e   : > { %4754 = vmatmul.mubr.f32.gmra.mrb[30].mxu0 %v3582_v40 }
 0x1c4   : > { %v4310_v42 = vpop.f32.mrb[0].mxu1 }
 0x1c5   : > { %v1192_v46 = vpop.f32.mrb[1].mxu1 }
 0x1c8   : > { %v4313_v48 = vpop.f32.mrb[2].mxu1 }
 0x1c9   : > { %v1202_v52 = vpop.f32.mrb[3].mxu1 }
 0x1cc   : > { %v4316_v62 = vpop.f32.mrb[4].mxu1 }
 0x1cd   : > { %v1212_v3 = vpop.f32.mrb[5].mxu1 }
 0x1d0   : > { %v4319_v57 = vpop.f32.mrb[6].mxu1 }
 0x1d1   : > { %v1222_v29 = vpop.f32.mrb[7].mxu1 }
 0x1d4   : > { %v4322_v0 = vpop.f32.mrb[8].mxu1 }
 0x1d5   : > { %v1232_v11 = vpop.f32.mrb[9].mxu1 }
 0x1d8   : > { %v6498_v6 = vpop.f32.mrb[10].mxu1 }
 0x1d9   : > { %v6500_v16 = vpop.f32.mrb[11].mxu1 }
 0x1dc   : > { %v6502_v55 = vpop.f32.mrb[12].mxu1 }
 0x1dd   : > { %v6504_v2 = vpop.f32.mrb[13].mxu1 }
 0x1e0   : > { %v6506_v5 = vpop.f32.mrb[14].mxu1 }
 0x1e1   : > { %v6508_v18 = vpop.f32.mrb[15].mxu1 }
 0x1e5   : > { %v4710_v14 = vpop.f32.mrb[0].mxu0 }
 0x1e6   : > { %v5060_v20 = vadd.f32 %v4710_v14, %v4310_v42  ;;  %v2723_v41 = vpop.f32.mrb[1].mxu0 }
 0x1e7   : > { %v5061_v44 = vadd.f32 %v2723_v41, %v1192_v46 }
 0x1e8   : > { %v2922_v28 = vmul.f32 %v5060_v20, %v6513_v25 }
 0x1e9   : > { %v2921_v17 = vmul.f32 %v5061_v44, %v6513_v25  ;;  %v4713_v50 = vpop.f32.mrb[2].mxu0 }
 0x1ea   : > { %v2961_v39 = vadd.f32 %v6518_v45, %v2922_v28  ;;  %v5062_v12 = vadd.f32 %v4713_v50, %v4313_v48  ;;  %v2733_v8 = vpop.f32.mrb[3].mxu0 }
 0x1eb   : > { %v2960_v36 = vadd.f32 %v6518_v45, %v2921_v17  ;;  %v5063_v31 = vadd.f32 %v2733_v8, %v1202_v52 }
 0x1ec   : > { %v3025_v21 = vmul.f32 0.70710677, %v2961_v39  ;;  %v2924_v15 = vmul.f32 %v5062_v12, %v6513_v25  ;;  %v2993_v38 = vmul.f32 0.5, %v2961_v39 }
 0x1ed   : > { %v3024_v51 = vmul.f32 0.70710677, %v2960_v36  ;;  %v2923_v59 = vmul.f32 %v5063_v31, %v6513_v25  ;;  %v4716_v56 = vpop.f32.mrb[4].mxu0  ;;  %v2992_v48 = vmul.f32 0.5, %v2960_v36 }
 0x1ee   : > { %5341 = verf.f32 %v3025_v21  ;;  %v2963_v32 = vadd.f32 %v6518_v45, %v2924_v15  ;;  %v5064_v1 = vadd.f32 %v4716_v56, %v4316_v62  ;;  %v2743_v58 = vpop.f32.mrb[5].mxu0 }
 0x1ef   : > { %5343 = verf.f32 %v3024_v51  ;;  %v2962_v47 = vadd.f32 %v6518_v45, %v2923_v59  ;;  %v5065_v22 = vadd.f32 %v2743_v58, %v1212_v3 }
 0x1f0   : > { %v3027_v63 = vmul.f32 0.70710677, %v2963_v32  ;;  %v2926_v35 = vmul.f32 %v5064_v1, %v6513_v25  ;;  %v2995_v17 = vmul.f32 0.5, %v2963_v32 }
 0x1f1   : > { %v3026_v30 = vmul.f32 0.70710677, %v2962_v47  ;;  %v2925_v60 = vmul.f32 %v5065_v22, %v6513_v25  ;;  %v4719_v26 = vpop.f32.mrb[6].mxu0 }
 0x1f2   : > { %5345 = verf.f32 %v3027_v63  ;;  %v6531_v27 = vadd.f32 %v6518_v45, %v2926_v35  ;;  %v5066_v33 = vadd.f32 %v4719_v26, %v4319_v57  ;;  %v2753_v43 = vpop.f32.mrb[7].mxu0 }
 0x1f3   : > { %5347 = verf.f32 %v3026_v30  ;;  %v6534_v54 = vadd.f32 %v6518_v45, %v2925_v60  ;;  %v5067_v61 = vadd.f32 %v2753_v43, %v1222_v29 }
 0x1f4   : > { %v3029_v4 = vmul.f32 0.70710677, %v6531_v27  ;;  %v2928_v10 = vmul.f32 %v5066_v33, %v6513_v25  ;;  %v2997_v22 = vmul.f32 0.5, %v6531_v27 }
 0x1f5   : > { %v3028_v53 = vmul.f32 0.70710677, %v6534_v54  ;;  %v2927_v13 = vmul.f32 %v5067_v61, %v6513_v25  ;;  %v4722_v24 = vpop.f32.mrb[8].mxu0  ;;  %v2996_v60 = vmul.f32 0.5, %v6534_v54 }
 0x1f6   : > { %5349 = verf.f32 %v3029_v4  ;;  %v6541_v19 = vadd.f32 %v6518_v45, %v2928_v10  ;;  %v5068_v7 = vadd.f32 %v4722_v24, %v4322_v0  ;;  %v2763_v34 = vpop.f32.mrb[9].mxu0 }
 0x1f7   : > { %5351 = verf.f32 %v3028_v53  ;;  %v6545_v9 = vadd.f32 %v6518_v45, %v2927_v13  ;;  %v5069_v49 = vadd.f32 %v2763_v34, %v1232_v11 }
 0x1f8   : > { %v5342_v37 = vpop.eup %5341  ;;  %v3031_v23 = vmul.f32 0.70710677, %v6541_v19  ;;  %v2930_v40 = vmul.f32 %v5068_v7, %v6513_v25  ;;  %v2999_v7 = vmul.f32 0.5, %v6541_v19 }
 0x1f9   : > { %v5344_v42 = vpop.eup %5343  ;;  %v3089_v46 = vadd.f32 1.0, %v5342_v37  ;;  %v3030_v52 = vmul.f32 0.70710677, %v6545_v9  ;;  %v2929_v62 = vmul.f32 %v5069_v49, %v6513_v25  ;;  %v4725_v3 = vpop.f32.mrb[10].mxu0 }
 0x1fa   : > { %v3088_v57 = vadd.f32 1.0, %v5344_v42  ;;  %5353 = verf.f32 %v3031_v23  ;;  %v6557_v29 = vadd.f32 %v6518_v45, %v2930_v40  ;;  %v5070_v0 = vadd.f32 %v4725_v3, %v6498_v6  ;;  %v2773_v11 = vpop.f32.mrb[11].mxu0 }
 0x1fb   : > { %v3121_v14 = vmul.f32 %v3089_v46, %v2993_v38  ;;  %5355 = verf.f32 %v3030_v52  ;;  %v6561_v20 = vadd.f32 %v6518_v45, %v2929_v62  ;;  %v5071_v41 = vadd.f32 %v2773_v11, %v6500_v16 }
 0x1fc   : > { %v5346_v44 = vpop.eup %5345  ;;  %v3120_v28 = vmul.f32 %v3088_v57, %v2992_v48  ;;  %v3033_v50 = vmul.f32 0.70710677, %v6557_v29  ;;  %v2932_v39 = vmul.f32 %v5070_v0, %v6513_v25  ;;  %v2994_v6 = vmul.f32 0.5, %v2962_v47 }
 0x1fd   : > { %v5348_v12 = vpop.eup %5347  ;;  %3153 = vst [vmem:[%s6554_s20 + $0x8] sm:$0xff] %v3121_v14  ;;  %v3091_v8 = vadd.f32 1.0, %v5346_v44  ;;  %v3032_v36 = vmul.f32 0.70710677, %v6561_v20  ;;  %v2931_v31 = vmul.f32 %v5071_v41, %v6513_v25  ;;  %v4728_v21 = vpop.f32.mrb[12].mxu0  ;;  %v2998_v23 = vmul.f32 0.5, %v6545_v9 }
 0x1fe   : > { %3152 = vst [vmem:[%s6554_s20] sm:$0xff] %v3120_v28  ;;  %v3090_v15 = vadd.f32 1.0, %v5348_v12  ;;  %5357 = verf.f32 %v3033_v50  ;;  %v6571_v16 = vadd.f32 %v6518_v45, %v2932_v39  ;;  %v5072_v51 = vadd.f32 %v4728_v21, %v6502_v55  ;;  %v2783_v59 = vpop.f32.mrb[13].mxu0 }
 0x1ff   : > { %v3123_v56 = vmul.f32 %v3091_v8, %v2995_v17  ;;  %5359 = verf.f32 %v3032_v36  ;;  %v6575_v32 = vadd.f32 %v6518_v45, %v2931_v31  ;;  %v5073_v1 = vadd.f32 %v2783_v59, %v6504_v2 }
 0x200   : > { %v5350_v58 = vpop.eup %5349  ;;  %v3122_v47 = vmul.f32 %v3090_v15, %v2994_v6  ;;  %v3035_v63 = vmul.f32 0.70710677, %v6571_v16  ;;  %v2934_v35 = vmul.f32 %v5072_v51, %v6513_v25  ;;  %v3001_v14 = vmul.f32 0.5, %v6557_v29 }
 0x201   : > { %v5352_v30 = vpop.eup %5351  ;;  %3155 = vst [vmem:[%s6554_s20 + $0x18] sm:$0xff] %v3123_v56  ;;  %v3093_v55 = vadd.f32 1.0, %v5350_v58  ;;  %v3034_v26 = vmul.f32 0.70710677, %v6575_v32  ;;  %v2933_v33 = vmul.f32 %v5073_v1, %v6513_v25  ;;  %v4731_v43 = vpop.f32.mrb[14].mxu0  ;;  %v3000_v39 = vmul.f32 0.5, %v6561_v20 }
 0x202   : > { %3154 = vst [vmem:[%s6554_s20 + $0x10] sm:$0xff] %v3122_v47  ;;  %v3092_v2 = vadd.f32 1.0, %v5352_v30  ;;  %5361 = verf.f32 %v3035_v63  ;;  %v6587_v27 = vadd.f32 %v6518_v45, %v2934_v35  ;;  %v5074_v61 = vadd.f32 %v4731_v43, %v6506_v5  ;;  %v2793_v4 = vpop.f32.mrb[15].mxu0 }
 0x203   : > { %v3125_v10 = vmul.f32 %v3093_v55, %v2997_v22  ;;  %5363 = verf.f32 %v3034_v26  ;;  %v6591_v53 = vadd.f32 %v6518_v45, %v2933_v33  ;;  %v5075_v54 = vadd.f32 %v2793_v4, %v6508_v18 }
 0x204   : > { %v5354_v13 = vpop.eup %5353  ;;  %v3124_v24 = vmul.f32 %v3092_v2, %v2996_v60  ;;  %v3037_v34 = vmul.f32 0.70710677, %v6587_v27  ;;  %v2936_v49 = vmul.f32 %v5074_v61, %v6513_v25  ;;  %v4414_v37 = vpop.f32.mrb[16].mxu1  ;;  %v3003_v58 = vmul.f32 0.5, %v6571_v16 }
 0x205   : > { %v5356_v38 = vpop.eup %5355  ;;  %3157 = vst [vmem:[%s6554_s20 + $0x28] sm:$0xff] %v3125_v10  ;;  %v3095_v5 = vadd.f32 1.0, %v5354_v13  ;;  %v3036_v40 = vmul.f32 0.70710677, %v6591_v53  ;;  %v2935_v42 = vmul.f32 %v5075_v54, %v6513_v25  ;;  %v4734_v46 = vpop.f32.mrb[16].mxu0  ;;  %v3002_v55 = vmul.f32 0.5, %v6575_v32 }
 0x206   : > { %v1578_v18 = vpop.f32.mrb[17].mxu1  ;;  %3156 = vst [vmem:[%s6554_s20 + $0x20] sm:$0xff] %v3124_v24  ;;  %v3094_v48 = vadd.f32 1.0, %v5356_v38  ;;  %5365 = verf.f32 %v3037_v34  ;;  %v6603_v19 = vadd.f32 %v6518_v45, %v2936_v49  ;;  %v5076_v52 = vadd.f32 %v4734_v46, %v4414_v37  ;;  %v2803_v62 = vpop.f32.mrb[17].mxu0 }
 0x207   : > { %v3127_v3 = vmul.f32 %v3095_v5, %v2999_v7  ;;  %5367 = verf.f32 %v3036_v40  ;;  %v6606_v57 = vadd.f32 %v6518_v45, %v2935_v42  ;;  %v5077_v9 = vadd.f32 %v2803_v62, %v1578_v18 }
 0x208   : > { %v5358_v0 = vpop.eup %5357  ;;  %v3126_v11 = vmul.f32 %v3094_v48, %v2998_v23  ;;  %v3039_v41 = vmul.f32 0.70710677, %v6603_v19  ;;  %v2938_v44 = vmul.f32 %v5076_v52, %v6513_v25  ;;  %v4417_v28 = vpop.f32.mrb[18].mxu1  ;;  %v3005_v7 = vmul.f32 0.5, %v6587_v27 }
 0x209   : > { %v5360_v17 = vpop.eup %5359  ;;  %3159 = vst [vmem:[%s6554_s20 + $0x38] sm:$0xff] %v3127_v3  ;;  %v3097_v50 = vadd.f32 1.0, %v5358_v0  ;;  %v3038_v12 = vmul.f32 0.70710677, %v6606_v57  ;;  %v2937_v8 = vmul.f32 %v5077_v9, %v6513_v25  ;;  %v4737_v6 = vpop.f32.mrb[18].mxu0  ;;  %v3004_v23 = vmul.f32 0.5, %v6591_v53 }
 0x20a   : > { %v1588_v36 = vpop.f32.mrb[19].mxu1  ;;  %3158 = vst [vmem:[%s6554_s20 + $0x30] sm:$0xff] %v3126_v11  ;;  %v3096_v31 = vadd.f32 1.0, %v5360_v17  ;;  %5369 = verf.f32 %v3039_v41  ;;  %v6617_v29 = vadd.f32 %v6518_v45, %v2938_v44  ;;  %v5078_v21 = vadd.f32 %v4737_v6, %v4417_v28  ;;  %v2813_v15 = vpop.f32.mrb[19].mxu0 }
 0x20b   : > { %v3129_v51 = vmul.f32 %v3097_v50, %v3001_v14  ;;  %5371 = verf.f32 %v3038_v12  ;;  %v6620_v59 = vadd.f32 %v6518_v45, %v2937_v8  ;;  %v5079_v20 = vadd.f32 %v2813_v15, %v1588_v36 }
 0x20c   : > { %v5362_v56 = vpop.eup %5361  ;;  %v3128_v1 = vmul.f32 %v3096_v31, %v3000_v39  ;;  %v3041_v47 = vmul.f32 0.70710677, %v6617_v29  ;;  %v2940_v22 = vmul.f32 %v5078_v21, %v6513_v25  ;;  %v4420_v63 = vpop.f32.mrb[20].mxu1  ;;  %v3007_v14 = vmul.f32 0.5, %v6603_v19 }
 0x20d   : > { %v5364_v35 = vpop.eup %5363  ;;  %3161 = vst [vmem:[%s6554_s20 + $0x48] sm:$0xff] %v3129_v51  ;;  %v3099_v30 = vadd.f32 1.0, %v5362_v56  ;;  %v3040_v60 = vmul.f32 0.70710677, %v6620_v59  ;;  %v2939_v26 = vmul.f32 %v5079_v20, %v6513_v25  ;;  %v4740_v33 = vpop.f32.mrb[20].mxu0  ;;  %v3006_v39 = vmul.f32 0.5, %v6606_v57 }
 0x20e   : > { %v1598_v43 = vpop.f32.mrb[21].mxu1  ;;  %3160 = vst [vmem:[%s6554_s20 + $0x40] sm:$0xff] %v3128_v1  ;;  %v3098_v2 = vadd.f32 1.0, %v5364_v35  ;;  %5373 = verf.f32 %v3041_v47  ;;  %v6631_v16 = vadd.f32 %v6518_v45, %v2940_v22  ;;  %v5080_v61 = vadd.f32 %v4740_v33, %v4420_v63  ;;  %v2823_v4 = vpop.f32.mrb[21].mxu0 }
 0x20f   : > { %v3131_v10 = vmul.f32 %v3099_v30, %v3003_v58  ;;  %5375 = verf.f32 %v3040_v60  ;;  %v6634_v54 = vadd.f32 %v6518_v45, %v2939_v26  ;;  %v5081_v32 = vadd.f32 %v2823_v4, %v1598_v43 }
 0x210   : > { %v5366_v13 = vpop.eup %5365  ;;  %v3130_v24 = vmul.f32 %v3098_v2, %v3002_v55  ;;  %v3043_v34 = vmul.f32 0.70710677, %v6631_v16  ;;  %v2942_v49 = vmul.f32 %v5080_v61, %v6513_v25  ;;  %v4423_v37 = vpop.f32.mrb[22].mxu1  ;;  %v3009_v58 = vmul.f32 0.5, %v6617_v29 }
 0x211   : > { %v5368_v38 = vpop.eup %5367  ;;  %3163 = vst [vmem:[%s6554_s20 + $0x58] sm:$0xff] %v3131_v10  ;;  %v3101_v5 = vadd.f32 1.0, %v5366_v13  ;;  %v3042_v40 = vmul.f32 0.70710677, %v6634_v54  ;;  %v2941_v42 = vmul.f32 %v5081_v32, %v6513_v25  ;;  %v4743_v46 = vpop.f32.mrb[22].mxu0  ;;  %v3008_v55 = vmul.f32 0.5, %v6620_v59 }
 0x212   : > { %v1608_v18 = vpop.f32.mrb[23].mxu1  ;;  %3162 = vst [vmem:[%s6554_s20 + $0x50] sm:$0xff] %v3130_v24  ;;  %v3100_v48 = vadd.f32 1.0, %v5368_v38  ;;  %5377 = verf.f32 %v3043_v34  ;;  %v6645_v27 = vadd.f32 %v6518_v45, %v2942_v49  ;;  %v5082_v52 = vadd.f32 %v4743_v46, %v4423_v37  ;;  %v2833_v62 = vpop.f32.mrb[23].mxu0 }
 0x213   : > { %v3133_v3 = vmul.f32 %v3101_v5, %v3005_v7  ;;  %5379 = verf.f32 %v3042_v40  ;;  %v6648_v9 = vadd.f32 %v6518_v45, %v2941_v42  ;;  %v5083_v53 = vadd.f32 %v2833_v62, %v1608_v18 }
 0x214   : > { %v5370_v0 = vpop.eup %5369  ;;  %v3132_v11 = vmul.f32 %v3100_v48, %v3004_v23  ;;  %v3045_v41 = vmul.f32 0.70710677, %v6645_v27  ;;  %v2944_v44 = vmul.f32 %v5082_v52, %v6513_v25  ;;  %v4426_v28 = vpop.f32.mrb[24].mxu1  ;;  %v3011_v7 = vmul.f32 0.5, %v6631_v16 }
 0x215   : > { %v5372_v17 = vpop.eup %5371  ;;  %3165 = vst [vmem:[%s6554_s20 + $0x68] sm:$0xff] %v3133_v3  ;;  %v3103_v50 = vadd.f32 1.0, %v5370_v0  ;;  %v3044_v12 = vmul.f32 0.70710677, %v6648_v9  ;;  %v2943_v8 = vmul.f32 %v5083_v53, %v6513_v25  ;;  %v4746_v6 = vpop.f32.mrb[24].mxu0  ;;  %v3010_v23 = vmul.f32 0.5, %v6634_v54 }
 0x216   : > { %v1618_v36 = vpop.f32.mrb[25].mxu1  ;;  %3164 = vst [vmem:[%s6554_s20 + $0x60] sm:$0xff] %v3132_v11  ;;  %v3102_v31 = vadd.f32 1.0, %v5372_v17  ;;  %5381 = verf.f32 %v3045_v41  ;;  %v6659_v19 = vadd.f32 %v6518_v45, %v2944_v44  ;;  %v5084_v21 = vadd.f32 %v4746_v6, %v4426_v28  ;;  %v2843_v15 = vpop.f32.mrb[25].mxu0 }
 0x217   : > { %v3135_v51 = vmul.f32 %v3103_v50, %v3007_v14  ;;  %5383 = verf.f32 %v3044_v12  ;;  %v6662_v20 = vadd.f32 %v6518_v45, %v2943_v8  ;;  %v5085_v57 = vadd.f32 %v2843_v15, %v1618_v36 }
 0x218   : > { %v5374_v56 = vpop.eup %5373  ;;  %v3134_v1 = vmul.f32 %v3102_v31, %v3006_v39  ;;  %v3047_v47 = vmul.f32 0.70710677, %v6659_v19  ;;  %v2946_v22 = vmul.f32 %v5084_v21, %v6513_v25  ;;  %v4429_v63 = vpop.f32.mrb[26].mxu1  ;;  %v3013_v14 = vmul.f32 0.5, %v6645_v27 }
 0x219   : > { %v5376_v35 = vpop.eup %5375  ;;  %3167 = vst [vmem:[%s6554_s20 + $0x78] sm:$0xff] %v3135_v51  ;;  %v3105_v30 = vadd.f32 1.0, %v5374_v56  ;;  %v3046_v60 = vmul.f32 0.70710677, %v6662_v20  ;;  %v2945_v26 = vmul.f32 %v5085_v57, %v6513_v25  ;;  %v4749_v33 = vpop.f32.mrb[26].mxu0  ;;  %v3012_v39 = vmul.f32 0.5, %v6648_v9 }
 0x21a   : > { %v1628_v43 = vpop.f32.mrb[27].mxu1  ;;  %3166 = vst [vmem:[%s6554_s20 + $0x70] sm:$0xff] %v3134_v1  ;;  %v3104_v2 = vadd.f32 1.0, %v5376_v35  ;;  %5385 = verf.f32 %v3047_v47  ;;  %v6673_v29 = vadd.f32 %v6518_v45, %v2946_v22  ;;  %v5086_v61 = vadd.f32 %v4749_v33, %v4429_v63  ;;  %v2853_v4 = vpop.f32.mrb[27].mxu0 }
 0x21b   : > { %v3137_v10 = vmul.f32 %v3105_v30, %v3009_v58  ;;  %5387 = verf.f32 %v3046_v60  ;;  %v6676_v32 = vadd.f32 %v6518_v45, %v2945_v26  ;;  %v5087_v59 = vadd.f32 %v2853_v4, %v1628_v43 }
 0x21c   : > { %v5378_v13 = vpop.eup %5377  ;;  %v3136_v24 = vmul.f32 %v3104_v2, %v3008_v55  ;;  %v3049_v34 = vmul.f32 0.70710677, %v6673_v29  ;;  %v2948_v49 = vmul.f32 %v5086_v61, %v6513_v25  ;;  %v4432_v37 = vpop.f32.mrb[28].mxu1  ;;  %v3015_v63 = vmul.f32 0.5, %v6659_v19 }
 0x21d   : > { %v5380_v38 = vpop.eup %5379  ;;  %3169 = vst [vmem:[%s6554_s20 + $0x88] sm:$0xff] %v3137_v10  ;;  %v3107_v5 = vadd.f32 1.0, %v5378_v13  ;;  %v3048_v40 = vmul.f32 0.70710677, %v6676_v32  ;;  %v2947_v42 = vmul.f32 %v5087_v59, %v6513_v25  ;;  %v4752_v46 = vpop.f32.mrb[28].mxu0  ;;  %v3014_v60 = vmul.f32 0.5, %v6662_v20 }
 0x21e   : > { %v1638_v18 = vpop.f32.mrb[29].mxu1  ;;  %3168 = vst [vmem:[%s6554_s20 + $0x80] sm:$0xff] %v3136_v24  ;;  %v3106_v48 = vadd.f32 1.0, %v5380_v38  ;;  %5389 = verf.f32 %v3049_v34  ;;  %v6687_v16 = vadd.f32 %v6518_v45, %v2948_v49  ;;  %v5088_v52 = vadd.f32 %v4752_v46, %v4432_v37  ;;  %v2863_v62 = vpop.f32.mrb[29].mxu0 }
 0x21f   : > { %v3139_v3 = vmul.f32 %v3107_v5, %v3011_v7  ;;  %5391 = verf.f32 %v3048_v40  ;;  %v6690_v53 = vadd.f32 %v6518_v45, %v2947_v42  ;;  %v5089_v54 = vadd.f32 %v2863_v62, %v1638_v18 }
 0x220   : > { %v5382_v0 = vpop.eup %5381  ;;  %v3138_v11 = vmul.f32 %v3106_v48, %v3010_v23  ;;  %v3051_v41 = vmul.f32 0.70710677, %v6687_v16  ;;  %v2950_v44 = vmul.f32 %v5088_v52, %v6513_v25  ;;  %v4435_v28 = vpop.f32.mrb[30].mxu1  ;;  %v3016_v20 = vmul.f32 0.5, %v6676_v32 }
 0x221   : > { %v5384_v17 = vpop.eup %5383  ;;  %3171 = vst [vmem:[%s6554_s20 + $0x98] sm:$0xff] %v3139_v3  ;;  %v3109_v50 = vadd.f32 1.0, %v5382_v0  ;;  %v3050_v12 = vmul.f32 0.70710677, %v6690_v53  ;;  %v2949_v8 = vmul.f32 %v5089_v54, %v6513_v25  ;;  %v4755_v6 = vpop.f32.mrb[30].mxu0  ;;  %v3019_v37 = vmul.f32 0.5, %v6687_v16 }
 0x222   : > { %v1648_v36 = vpop.f32.mrb[31].mxu1  ;;  %3170 = vst [vmem:[%s6554_s20 + $0x90] sm:$0xff] %v3138_v11  ;;  %v3108_v31 = vadd.f32 1.0, %v5384_v17  ;;  %5393 = verf.f32 %v3051_v41  ;;  %v2989_v27 = vadd.f32 %v6518_v45, %v2950_v44  ;;  %v5090_v21 = vadd.f32 %v4755_v6, %v4435_v28  ;;  %v2873_v15 = vpop.f32.mrb[31].mxu0 }
 0x223   : > { %v3141_v51 = vmul.f32 %v3109_v50, %v3013_v14  ;;  %5395 = verf.f32 %v3050_v12  ;;  %v2988_v57 = vadd.f32 %v6518_v45, %v2949_v8  ;;  %v5091_v9 = vadd.f32 %v2873_v15, %v1648_v36 }
 0x224   : > { %v5386_v56 = vpop.eup %5385  ;;  %v3140_v1 = vmul.f32 %v3108_v31, %v3012_v39  ;;  %v3053_v58 = vmul.f32 0.70710677, %v2989_v27  ;;  %v2952_v47 = vmul.f32 %v5090_v21, %v6513_v25  ;;  %v3021_v46 = vmul.f32 0.5, %v2989_v27 }
 0x225   : > { %v5388_v22 = vpop.eup %5387  ;;  %3173 = vst [vmem:[%s6554_s20 + $0xa8] sm:$0xff] %v3141_v51  ;;  %v3111_v35 = vadd.f32 1.0, %v5386_v56  ;;  %v3052_v30 = vmul.f32 0.70710677, %v2988_v57  ;;  %v2951_v55 = vmul.f32 %v5091_v9, %v6513_v25  ;;  %v3017_v25 = vmul.f32 0.5, %v6673_v29 }
 0x226   : > { %3172 = vst [vmem:[%s6554_s20 + $0xa0] sm:$0xff] %v3140_v1  ;;  %v3110_v26 = vadd.f32 1.0, %v5388_v22  ;;  %5397 = verf.f32 %v3053_v58  ;;  %v2991_v33 = vadd.f32 %v6518_v45, %v2952_v47  ;;  %v3018_v29 = vmul.f32 0.5, %v6690_v53 }
 0x227   : > { %v3143_v43 = vmul.f32 %v3111_v35, %v3015_v63  ;;  %5399 = verf.f32 %v3052_v30  ;;  %v2990_v2 = vadd.f32 %v6518_v45, %v2951_v55  ;;  %v3020_v48 = vmul.f32 0.5, %v2988_v57 }
 0x228   : > { %v5390_v61 = vpop.eup %5389  ;;  %v3142_v4 = vmul.f32 %v3110_v26, %v3014_v60  ;;  %v3055_v19 = vmul.f32 0.70710677, %v2991_v33  ;;  %v3023_v53 = vmul.f32 0.5, %v2991_v33 }
 0x229   : > { %v5392_v10 = vpop.eup %5391  ;;  %3175 = vst [vmem:[%s6554_s20 + $0xb8] sm:$0xff] %v3143_v43  ;;  %v3113_v59 = vadd.f32 1.0, %v5390_v61  ;;  %v3054_v13 = vmul.f32 0.70710677, %v2990_v2  ;;  %v3022_v11 = vmul.f32 0.5, %v2990_v2 }
 0x22a   : > { %3174 = vst [vmem:[%s6554_s20 + $0xb0] sm:$0xff] %v3142_v4  ;;  %v3112_v24 = vadd.f32 1.0, %v5392_v10  ;;  %5401 = verf.f32 %v3055_v19 }
 0x22b   : > { %v3145_v7 = vmul.f32 %v3113_v59, %v3017_v25  ;;  %5403 = verf.f32 %v3054_v13 }
 0x22c   : > { %v5394_v45 = vpop.eup %5393  ;;  %v3144_v34 = vmul.f32 %v3112_v24, %v3016_v20 }
 0x22d   : > { %v5396_v49 = vpop.eup %5395  ;;  %3177 = vst [vmem:[%s6554_s20 + $0xc8] sm:$0xff] %v3145_v7  ;;  %v3115_v38 = vadd.f32 1.0, %v5394_v45 }
 0x22e   : > { %3176 = vst [vmem:[%s6554_s20 + $0xc0] sm:$0xff] %v3144_v34  ;;  %v3114_v5 = vadd.f32 1.0, %v5396_v49 }
 0x22f   : > { %v3147_v23 = vmul.f32 %v3115_v38, %v3019_v37 }
 0x230   : > { %v5398_v32 = vpop.eup %5397  ;;  %v3146_v40 = vmul.f32 %v3114_v5, %v3018_v29 }
 0x231   : > { %v5400_v42 = vpop.eup %5399  ;;  %3179 = vst [vmem:[%s6554_s20 + $0xd8] sm:$0xff] %v3147_v23  ;;  %v3117_v18 = vadd.f32 1.0, %v5398_v32 }
 0x232   : > { %3178 = vst [vmem:[%s6554_s20 + $0xd0] sm:$0xff] %v3146_v40  ;;  %v3116_v52 = vadd.f32 1.0, %v5400_v42 }
 0x233   : > { %v3149_v16 = vmul.f32 %v3117_v18, %v3021_v46 }
 0x234   : > { %v5402_v62 = vpop.eup %5401  ;;  %v3148_v3 = vmul.f32 %v3116_v52, %v3020_v48 }
 0x235   : > { %v5404_v54 = vpop.eup %5403  ;;  %3181 = vst [vmem:[%s6554_s20 + $0xe8] sm:$0xff] %v3149_v16  ;;  %v3119_v0 = vadd.f32 1.0, %v5402_v62 }
 0x236   : > { %3180 = vst [vmem:[%s6554_s20 + $0xe0] sm:$0xff] %v3148_v3  ;;  %v3118_v14 = vadd.f32 1.0, %v5404_v54 }
 0x237   : > { %v3151_v41 = vmul.f32 %v3119_v0, %v3023_v53 }
 0x238   : > { %v3150_v44 = vmul.f32 %v3118_v14, %v3022_v11 }
 0x239   : > { %3183 = vst [vmem:[%s6554_s20 + $0xf8] sm:$0xff] %v3151_v41 }
 0x23a   : > { %3182 = vst [vmem:[%s6554_s20 + $0xf0] sm:$0xff] %v3150_v44 }
 0x23b PF: > { %s14_s17 = sadd.s32 1, %s5427_s17   ;;  %s6838_s15 = smov %s5423_s16 }
 0x23c   : > { %p11_p5 = scmp.ge.s32.totalorder %s14_s17, 4   ;;  %s6839_s16 = smov %s6841_s18 }
 0x23e   :  { %13 = sbr.rel (!%p11_p5) target bundleno = 2 (0x2), region = 76 }

// kernel: unet_down_forward.7
= control target key start
LH: loop header
LB: loop body
LE: loop exit
PB: predicated region body
PF: predicated region fallthrough
CT: control target
= control target key end

     0   :  { %s5541_s15 = smov 0   ;;  %s5543_s16 = smov 0   ;;  %s6796_s0 = inlined_call_operand.vmem [shape: f32[2,18,18,128], index: 0, kind: input, shape index: {}]   ;;  %s6797_s1 = inlined_call_operand.vmem [shape: f32[3,3,128,128], index: 1, kind: input, shape index: {}]   ;;  %s6798_s2 = inlined_call_operand.vmem [shape: f32[1,128], index: 2, kind: input, shape index: {}]   ;;  %s6799_s3 = inlined_call_operand.vmem [shape: f32[1,128], index: 3, kind: input, shape index: {}]   ;;  %s6800_s4 = inlined_call_operand.vmem [shape: f32[2,8,8,128], index: 4, kind: output, shape index: {}]  }
   0x1   :  { %s5545_s17 = smov 0  }
   0x2 LB: > { %s26_s18 = sadd.s32 1, %s5510_s16  ;;  %p3362_p0 = scmp.ge.s32.totalorder %s5514_s17, 1  ;;  %s5514_s17 = sphi %s5545_s17, %s14_s17   ;;  %s5510_s16 = sphi %s5543_s16, %s6902_s16   ;;  %s5506_s15 = sphi %s5541_s15, %s6901_s15  }
   0x3   : > { %p28_p1 = scmp.ge.s32.totalorder %s26_s18, 2  ;;  %p176_p2 = scmp.lt.s32.totalorder %s5514_s17, 3 }
   0x5   : > { %s6904_s18 = smov (%p28_p1, %s26_s18), 0  ;;  %p177_p3 = pnand %p3362_p0, %p176_p2 }
   0x7   : > { %180 = sbr.rel (%p177_p3) target bundleno = 587 (0x24b), region = 36 }
   0xe   : > { %v3366_v0 = vld [vmem:[%s6797_s1 + $0x80] sm:$0xff]  ;;  %v3367_v1 = vld [vmem:[%s6797_s1 + $0x88] sm:$0xff]  ;;  %p206_p4 = scmp.lt.s32.totalorder %s5506_s15, 1  ;;  %v3368_v5 = vld [vmem:[%s6797_s1 + $0x90] sm:$0xff] }
   0xf   : > { %v3478_v2 = vld [vmem:[%s6797_s1 + $0x200] sm:$0xff]  ;;  %v4843_v3 = vpack.c.bf16 %v3367_v1, %v3366_v0  ;;  %v3479_v4 = vld [vmem:[%s6797_s1 + $0x208] sm:$0xff]  ;;  %v3369_v6 = vld [vmem:[%s6797_s1 + $0x98] sm:$0xff] }
  0x10   : > { %v5577_v7 = vpack.c.bf16 %v3479_v4, %v3478_v2  ;;  %v4847_v8 = vpack.c.bf16 %v3369_v6, %v3368_v5  ;;  %v3480_v9 = vld [vmem:[%s6797_s1 + $0x210] sm:$0xff]  ;;  %v3481_v10 = vld [vmem:[%s6797_s1 + $0x218] sm:$0xff]  ;;  %v3370_v11 = vld [vmem:[%s6797_s1 + $0xa0] sm:$0xff]  ;;  %s6906_s15 = smov (!%p206_p4, %s5506_s15), 1 }
  0x11   : > { %4844 = vmatprep.subr.bf16.mxu1 %v4843_v3  ;;  %v5590_v12 = vpack.c.bf16 %v3481_v10, %v3480_v9  ;;  %v3371_v13 = vld [vmem:[%s6797_s1 + $0xa8] sm:$0xff]  ;;  %v3482_v14 = vld [vmem:[%s6797_s1 + $0x220] sm:$0xff]  ;;  %s5403_s21 = smul.u32 432, %s6906_s15  ;;  %v3372_v18 = vld [vmem:[%s6797_s1 + $0xb0] sm:$0xff]  ;;  %s3690_s14 = sshll.u32 %s6906_s15, 6 }
  0x12   : > { %v3483_v15 = vld [vmem:[%s6797_s1 + $0x228] sm:$0xff]  ;;  %4972 = vmatprep.subr.bf16.mxu0 %v5577_v7  ;;  %4846 = vmatpush3.bf16.msra.mxu1 %v4843_v3  ;;  %v4851_v16 = vpack.c.bf16 %v3371_v13, %v3370_v11  ;;  %v3373_v19 = vld [vmem:[%s6797_s1 + $0xb8] sm:$0xff]  ;;  %v3484_v20 = vld [vmem:[%s6797_s1 + $0x230] sm:$0xff]  ;;  %s6684_s20 = scalar_lea.vmem %s6800_s4, %s3690_s14 }
  0x13   : > { %6839 = vst [vmem:[#allocation3_spill] sm:$0xff] %v5590_v12  ;;  %4974 = vmatpush3.bf16.msra.mxu0 %v5577_v7  ;;  %4848 = vmatprep.subr.bf16.mxu1 %v4847_v8  ;;  %v5605_v17 = vpack.c.bf16 %v3483_v15, %v3482_v14  ;;  %v3485_v21 = vld [vmem:[%s6797_s1 + $0x238] sm:$0xff]  ;;  %s5622_s6 = scalar_lea.vmem %s6796_s0, %s5403_s21  ;;  %v4855_v22 = vpack.c.bf16 %v3373_v19, %v3372_v18  ;;  %v3374_v24 = vld [vmem:[%s6797_s1 + $0xc0] sm:$0xff]  ;;  %v3375_v25 = vld [vmem:[%s6797_s1 + $0xc8] sm:$0xff] }
  0x14   : > { %4976 = vmatprep.subr.bf16.mxu0 %v5590_v12  ;;  %v5626_v23 = vpack.c.bf16 %v3485_v21, %v3484_v20  ;;  %v269_v26 = vld [vmem:[%s5622_s6 + $0x1] sm:$0xff]  ;;  %v5642_v29 = vld [vmem:[%s5622_s6 + $0x19] sm:$0xff]  ;;  %v4859_v30 = vpack.c.bf16 %v3375_v25, %v3374_v24  ;;  %v3376_v32 = vld [vmem:[%s6797_s1 + $0xd0] sm:$0xff] }
  0x15   : > { %6840 = vst [vmem:[#allocation4_spill] sm:$0xff] %v5605_v17  ;;  %v3486_v27 = vld [vmem:[%s6797_s1 + $0x240] sm:$0xff]  ;;  %v3487_v28 = vld [vmem:[%s6797_s1 + $0x248] sm:$0xff]  ;;  %4155 = vmatprep.mubr.f32.mxu1 %v269_v26  ;;  %4475 = vmatprep.mubr.f32.mxu0 %v5642_v29  ;;  %v3377_v33 = vld [vmem:[%s6797_s1 + $0xd8] sm:$0xff] }
  0x16   : > { %4850 = vmatpush3.bf16.msra.mxu1 %v4847_v8  ;;  %6841 = vst [vmem:[#allocation5_spill] sm:$0xff] %v5626_v23  ;;  %v5647_v31 = vpack.c.bf16 %v3487_v28, %v3486_v27  ;;  %v3488_v34 = vld [vmem:[%s6797_s1 + $0x250] sm:$0xff]  ;;  %v3489_v35 = vld [vmem:[%s6797_s1 + $0x258] sm:$0xff]  ;;  %v4863_v36 = vpack.c.bf16 %v3377_v33, %v3376_v32  ;;  %v3378_v38 = vld [vmem:[%s6797_s1 + $0xe0] sm:$0xff] }
  0x17   : > { %4978 = vmatpush3.bf16.msra.mxu0 %v5590_v12  ;;  %4852 = vmatprep.subr.bf16.mxu1 %v4851_v16  ;;  %v5663_v37 = vpack.c.bf16 %v3489_v35, %v3488_v34  ;;  %v3379_v39 = vld [vmem:[%s6797_s1 + $0xe8] sm:$0xff]  ;;  %v3490_v40 = vld [vmem:[%s6797_s1 + $0x260] sm:$0xff]  ;;  %v3380_v44 = vld [vmem:[%s6797_s1 + $0xf0] sm:$0xff] }
  0x18   : > { %4980 = vmatprep.subr.bf16.mxu0 %v5605_v17  ;;  %6842 = vst [vmem:[#allocation6_spill] sm:$0xff] %v5647_v31  ;;  %v3491_v41 = vld [vmem:[%s6797_s1 + $0x268] sm:$0xff]  ;;  %v4867_v42 = vpack.c.bf16 %v3379_v39, %v3378_v38  ;;  %v3381_v45 = vld [vmem:[%s6797_s1 + $0xf8] sm:$0xff]  ;;  %v3492_v46 = vld [vmem:[%s6797_s1 + $0x270] sm:$0xff] }
  0x19   : > { %6843 = vst [vmem:[#allocation7_spill] sm:$0xff] %v5663_v37  ;;  %v5679_v43 = vpack.c.bf16 %v3491_v41, %v3490_v40  ;;  %v3493_v47 = vld [vmem:[%s6797_s1 + $0x278] sm:$0xff]  ;;  %v4871_v48 = vpack.c.bf16 %v3381_v45, %v3380_v44  ;;  %v253_v50 = vld [vmem:[%s6797_s1] sm:$0xff]  ;;  %v254_v51 = vld [vmem:[%s6797_s1 + $0x8] sm:$0xff] }
  0x1a   : > { %4854 = vmatpush3.bf16.msra.mxu1 %v4851_v16  ;;  %v5695_v49 = vpack.c.bf16 %v3493_v47, %v3492_v46  ;;  %v3526_v52 = vld [vmem:[%s6797_s1 + $0x280] sm:$0xff]  ;;  %v3527_v53 = vld [vmem:[%s6797_s1 + $0x288] sm:$0xff]  ;;  %v4875_v54 = vpack.c.bf16 %v254_v51, %v253_v50  ;;  %v3528_v56 = vld [vmem:[%s6797_s1 + $0x290] sm:$0xff] }
  0x1b   : > { %4982 = vmatpush3.bf16.msra.mxu0 %v5605_v17  ;;  %4856 = vmatprep.subr.bf16.mxu1 %v4855_v22  ;;  %6844 = vst [vmem:[#allocation8_spill] sm:$0xff] %v5679_v43  ;;  %v5003_v55 = vpack.c.bf16 %v3527_v53, %v3526_v52  ;;  %v3529_v57 = vld [vmem:[%s6797_s1 + $0x298] sm:$0xff]  ;;  %v270_v58 = vld [vmem:[%s5622_s6 + $0x9] sm:$0xff]  ;;  %v3447_v61 = vld [vmem:[%s5622_s6 + $0x21] sm:$0xff] }
  0x1c   : > { %4984 = vmatprep.subr.bf16.mxu0 %v5626_v23  ;;  %6845 = vst [vmem:[#allocation9_spill] sm:$0xff] %v5695_v49  ;;  %v255_v59 = vld [vmem:[%s6797_s1 + $0x10] sm:$0xff]  ;;  %v256_v60 = vld [vmem:[%s6797_s1 + $0x18] sm:$0xff]  ;;  %v5007_v62 = vpack.c.bf16 %v3529_v57, %v3528_v56  ;;  %v3530_v1 = vld [vmem:[%s6797_s1 + $0x2a0] sm:$0xff] }
  0x1d   : > { %v3448_v63 = vld [vmem:[%s5622_s6 + $0x31] sm:$0xff]  ;;  %v4879_v0 = vpack.c.bf16 %v256_v60, %v255_v59  ;;  %v3531_v2 = vld [vmem:[%s6797_s1 + $0x2a8] sm:$0xff]  ;;  %v257_v3 = vld [vmem:[%s6797_s1 + $0x20] sm:$0xff] }
  0x1e   : > { %4858 = vmatpush3.bf16.msra.mxu1 %v4855_v22  ;;  %v258_v4 = vld [vmem:[%s6797_s1 + $0x28] sm:$0xff]  ;;  %v3449_v5 = vld [vmem:[%s5622_s6 + $0x39] sm:$0xff]  ;;  %v5011_v8 = vpack.c.bf16 %v3531_v2, %v3530_v1  ;;  %v3532_v9 = vld [vmem:[%s6797_s1 + $0x2b0] sm:$0xff] }
  0x1f   : > { %4986 = vmatpush3.bf16.msra.mxu0 %v5626_v23  ;;  %4860 = vmatprep.subr.bf16.mxu1 %v4859_v30  ;;  %v3450_v6 = vld [vmem:[%s5622_s6 + $0x49] sm:$0xff]  ;;  %v3533_v10 = vld [vmem:[%s6797_s1 + $0x2b8] sm:$0xff]  ;;  %v4883_v11 = vpack.c.bf16 %v258_v4, %v257_v3  ;;  %v3452_v16 = vld [vmem:[%s5622_s6 + $0x61] sm:$0xff] }
  0x20   : > { %4988 = vmatprep.subr.bf16.mxu0 %v5647_v31  ;;  %v259_v13 = vld [vmem:[%s6797_s1 + $0x30] sm:$0xff]  ;;  %v260_v14 = vld [vmem:[%s6797_s1 + $0x38] sm:$0xff]  ;;  %v5015_v18 = vpack.c.bf16 %v3533_v10, %v3532_v9  ;;  %v3534_v19 = vld [vmem:[%s6797_s1 + $0x2c0] sm:$0xff] }
  0x21   : > { %v3451_v15 = vld [vmem:[%s5622_s6 + $0x51] sm:$0xff]  ;;  %v3535_v20 = vld [vmem:[%s6797_s1 + $0x2c8] sm:$0xff]  ;;  %v4887_v21 = vpack.c.bf16 %v260_v14, %v259_v13  ;;  %v261_v22 = vld [vmem:[%s6797_s1 + $0x40] sm:$0xff] }
  0x22   : > { %4862 = vmatpush3.bf16.msra.mxu1 %v4859_v30  ;;  %v262_v24 = vld [vmem:[%s6797_s1 + $0x48] sm:$0xff]  ;;  %v3454_v26 = vld [vmem:[%s5622_s6 + $0x79] sm:$0xff]  ;;  %v5019_v27 = vpack.c.bf16 %v3535_v20, %v3534_v19  ;;  %v3536_v28 = vld [vmem:[%s6797_s1 + $0x2d0] sm:$0xff] }
  0x23   : > { %4990 = vmatpush3.bf16.msra.mxu0 %v5647_v31  ;;  %4864 = vmatprep.subr.bf16.mxu1 %v4863_v36  ;;  %v3453_v25 = vld [vmem:[%s5622_s6 + $0x69] sm:$0xff]  ;;  %v4891_v30 = vpack.c.bf16 %v262_v24, %v261_v22  ;;  %v264_v33 = vld [vmem:[%s6797_s1 + $0x58] sm:$0xff]  ;;  %v3455_v34 = vld [vmem:[%s5622_s6 + $0x81] sm:$0xff] }
  0x24   : > { %4992 = vmatprep.subr.bf16.mxu0 %v5663_v37  ;;  %v263_v32 = vld [vmem:[%s6797_s1 + $0x50] sm:$0xff]  ;;  %v3538_v38 = vld [vmem:[%s6797_s1 + $0x2e0] sm:$0xff]  ;;  %v3539_v39 = vld [vmem:[%s6797_s1 + $0x2e8] sm:$0xff] }
  0x25   : > { %v5784_v35 = vld [vmem:[%s5622_s6 + $0x91] sm:$0xff]  ;;  %v4895_v40 = vpack.c.bf16 %v264_v33, %v263_v32  ;;  %v265_v41 = vld [vmem:[%s6797_s1 + $0x60] sm:$0xff]  ;;  %v3458_v45 = vld [vmem:[%s5622_s6 + $0xa9] sm:$0xff]  ;;  %v5027_v46 = vpack.c.bf16 %v3539_v39, %v3538_v38 }
  0x26   : > { %4866 = vmatpush3.bf16.msra.mxu1 %v4863_v36  ;;  %v3457_v44 = vld [vmem:[%s5622_s6 + $0x99] sm:$0xff]  ;;  %v3540_v47 = vld [vmem:[%s6797_s1 + $0x2f0] sm:$0xff]  ;;  %v3575_v57 = vld [vmem:[%s6797_s1 + $0x308] sm:$0xff] }
  0x27   : > { %4994 = vmatpush3.bf16.msra.mxu0 %v5663_v37  ;;  %4868 = vmatprep.subr.bf16.mxu1 %v4867_v42  ;;  %v267_v51 = vld [vmem:[%s6797_s1 + $0x70] sm:$0xff]  ;;  %v268_v52 = vld [vmem:[%s6797_s1 + $0x78] sm:$0xff]  ;;  %v3574_v56 = vld [vmem:[%s6797_s1 + $0x300] sm:$0xff] }
  0x28   : > { %4996 = vmatprep.subr.bf16.mxu0 %v5679_v43  ;;  %v3459_v53 = vld [vmem:[%s5622_s6 + $0xb1] sm:$0xff]  ;;  %v3382_v59 = vld [vmem:[%s6797_s1 + $0x100] sm:$0xff]  ;;  %v3383_v60 = vld [vmem:[%s6797_s1 + $0x108] sm:$0xff] }
  0x29   : > { %v3577_v1 = vld [vmem:[%s6797_s1 + $0x318] sm:$0xff]  ;;  %v5843_v2 = vpack.c.bf16 %v3383_v60, %v3382_v59  ;;  %v5849_v3 = vld [vmem:[%s5622_s6 + $0x22] sm:$0xff]  ;;  %v5878_v14 = vld [vmem:[%s5622_s6 + $0x4a] sm:$0xff] }
  0x2a   : > { %4870 = vmatpush3.bf16.msra.mxu1 %v4867_v42  ;;  %v266_v42 = vld [vmem:[%s6797_s1 + $0x68] sm:$0xff]  ;;  %v5852_v4 = vld [vmem:[%s5622_s6 + $0xd9] sm:$0xff]  ;;  %v5875_v13 = vld [vmem:[%s5622_s6 + $0xf1] sm:$0xff] }
  0x2b   : > { %4998 = vmatpush3.bf16.msra.mxu0 %v5679_v43  ;;  %4872 = vmatprep.subr.bf16.mxu1 %v4871_v48  ;;  %v4899_v50 = vpack.c.bf16 %v266_v42, %v265_v41  ;;  %v3579_v9 = vld [vmem:[%s6797_s1 + $0x328] sm:$0xff]  ;;  %v5890_v19 = vld [vmem:[%s5622_s6 + $0xf9] sm:$0xff]  ;;  %v3584_v33 = vld [vmem:[%s6797_s1 + $0x350] sm:$0xff] }
  0x2c   : > { %5000 = vmatprep.subr.bf16.mxu0 %v5695_v49  ;;  %v5868_v10 = vld [vmem:[%s5622_s6 + $0xe1] sm:$0xff]  ;;  %v5894_v20 = vld [vmem:[%s5622_s6 + $0x52] sm:$0xff] }
  0x2d   : > { %v5900_v22 = vld [vmem:[%s5622_s6 + $0x62] sm:$0xff]  ;;  %v5941_v39 = vld [vmem:[%s5622_s6 + $0x139] sm:$0xff] }
  0x2e   : > { %4874 = vmatpush3.bf16.msra.mxu1 %v4871_v48  ;;  %v3541_v48 = vld [vmem:[%s6797_s1 + $0x2f8] sm:$0xff]  ;;  %v5938_v38 = vld [vmem:[%s5622_s6 + $0x82] sm:$0xff]  ;;  %6850 = vst [vmem:[#allocation14_spill] sm:$0xff] %v5941_v39 }
  0x2f   : > { %5002 = vmatpush3.bf16.msra.mxu0 %v5695_v49  ;;  %4876 = vmatprep.subr.bf16.mxu1 %v4875_v54  ;;  %v3586_v42 = vld [vmem:[%s6797_s1 + $0x360] sm:$0xff]  ;;  %v3623_v60 = vld [vmem:[%s6797_s1 + $0x388] sm:$0xff]  ;;  %v3393_v49 = vld [vmem:[%s6797_s1 + $0x158] sm:$0xff] }
  0x30   : > { %5004 = vmatprep.subr.bf16.mxu0 %v5003_v55  ;;  %v3622_v59 = vld [vmem:[%s6797_s1 + $0x380] sm:$0xff]  ;;  %v6118_v43 = vld [vmem:[%s5622_s6 + $0x152] sm:$0xff]  ;;  %v3431_v17 = vld [vmem:[%s6797_s1 + $0x188] sm:$0xff] }
  0x31   : > { %4156 = vmatmul.mubr.f32.vlgmr.msra.gmra.mrb[0].mxu1 %v270_v58  ;;  %v4903_v58 = vpack.c.bf16 %v268_v52, %v267_v51  ;;  %v3588_v51 = vld [vmem:[%s6797_s1 + $0x370] sm:$0xff]  ;;  %v3589_v52 = vld [vmem:[%s6797_s1 + $0x378] sm:$0xff]  ;;  %v3394_v37 = vld [vmem:[%s6797_s1 + $0x160] sm:$0xff] }
  0x32   : > { %4476 = vmatmul.mubr.f32.vlgmr.msra.gmra.mrb[0].mxu0 %v3447_v61  ;;  %4878 = vmatpush3.bf16.msra.mxu1 %v4875_v54  ;;  %v5816_v54 = vld [vmem:[%s5622_s6 + $0xc1] sm:$0xff]  ;;  %v3625_v12 = vld [vmem:[%s6797_s1 + $0x398] sm:$0xff] }
  0x33   : > { %5006 = vmatpush3.bf16.msra.mxu0 %v5003_v55  ;;  %4158 = vmatprep.mubr.f32.mxu1 %v5642_v29  ;;  %v3537_v29 = vld [vmem:[%s6797_s1 + $0x2d8] sm:$0xff]  ;;  %v5031_v55 = vpack.c.bf16 %v3541_v48, %v3540_v47  ;;  %v5966_v48 = vld [vmem:[%s5622_s6 + $0xaa] sm:$0xff]  ;;  %v3524_v23 = vld [vmem:[%s5622_s6 + $0x182] sm:$0xff] }
  0x34   : > { %4478 = vmatprep.mubr.f32.mxu0 %v3448_v63  ;;  %5008 = vmatprep.subr.bf16.mxu0 %v5007_v62  ;;  %v5023_v36 = vpack.c.bf16 %v3537_v29, %v3536_v28  ;;  %v5916_v28 = vld [vmem:[%s5622_s6 + $0x6a] sm:$0xff]  ;;  %v5919_v29 = vld [vmem:[%s5622_s6 + $0x121] sm:$0xff] }
  0x35   : > { %4159 = vmatmul.mubr.f32.gmra.mrb[2].mxu1 %v3447_v61  ;;  %4880 = vmatprep.subr.bf16.mxu1 %v4879_v0  ;;  %v5832_v61 = vld [vmem:[%s5622_s6 + $0xc9] sm:$0xff]  ;;  %6848 = vst [vmem:[#allocation12_spill] sm:$0xff] %v5919_v29  ;;  %v5963_v47 = vld [vmem:[%s5622_s6 + $0x151] sm:$0xff] }
  0x36   : > { %4479 = vmatmul.mubr.f32.gmra.mrb[2].mxu0 %v3449_v5  ;;  %4161 = vmatprep.mubr.f32.mxu1 %v3448_v63  ;;  %v5035_v63 = vpack.c.bf16 %v3575_v57, %v3574_v56  ;;  %6852 = vst [vmem:[#allocation16_spill] sm:$0xff] %v5963_v47  ;;  %v5985_v56 = vld [vmem:[%s5622_s6 + $0x169] sm:$0xff] }
  0x37   : > { %5010 = vmatpush3.bf16.msra.mxu0 %v5007_v62  ;;  %4481 = vmatprep.mubr.f32.mxu0 %v3450_v6  ;;  %v5835_v62 = vld [vmem:[%s5622_s6 + $0x1a] sm:$0xff]  ;;  %6854 = vst [vmem:[#allocation18_spill] sm:$0xff] %v5985_v56  ;;  %v5988_v57 = vld [vmem:[%s5622_s6 + $0xc2] sm:$0xff] }
  0x38   : > { %5012 = vmatprep.subr.bf16.mxu0 %v5011_v8  ;;  %4882 = vmatpush3.bf16.msra.mxu1 %v4879_v0  ;;  %v3576_v0 = vld [vmem:[%s6797_s1 + $0x310] sm:$0xff] }
  0x39   : > { %4162 = vmatmul.mubr.f32.gmra.mrb[4].mxu1 %v3449_v5  ;;  %4884 = vmatprep.subr.bf16.mxu1 %v4883_v11  ;;  %v5855_v5 = vld [vmem:[%s5622_s6 + $0x32] sm:$0xff] }
  0x3a   : > { %4482 = vmatmul.mubr.f32.gmra.mrb[4].mxu0 %v3451_v15  ;;  %4164 = vmatprep.mubr.f32.mxu1 %v3450_v6  ;;  %v5039_v6 = vpack.c.bf16 %v3577_v1, %v3576_v0  ;;  %v6004_v0 = vld [vmem:[%s5622_s6 + $0xca] sm:$0xff]  ;;  %v221_v1 = vld [vmem:[%s5622_s6] sm:$0xff] }
  0x3b   : > { %5014 = vmatpush3.bf16.msra.mxu0 %v5011_v8  ;;  %4484 = vmatprep.mubr.f32.mxu0 %v3452_v16  ;;  %v3578_v8 = vld [vmem:[%s6797_s1 + $0x320] sm:$0xff] }
  0x3c   : > { %5016 = vmatprep.subr.bf16.mxu0 %v5015_v18  ;;  %4886 = vmatpush3.bf16.msra.mxu1 %v4883_v11  ;;  %v5872_v11 = vld [vmem:[%s5622_s6 + $0x3a] sm:$0xff] }
  0x3d   : > { %4165 = vmatmul.mubr.f32.gmra.mrb[6].mxu1 %v3451_v15  ;;  %4888 = vmatprep.subr.bf16.mxu1 %v4887_v21  ;;  %v5043_v15 = vpack.c.bf16 %v3579_v9, %v3578_v8  ;;  %v6010_v8 = vpack.c.bf16 %v3623_v60, %v3622_v59  ;;  %v3384_v9 = vld [vmem:[%s6797_s1 + $0x110] sm:$0xff]  ;;  %v6071_v59 = vld [vmem:[%s5622_s6 + $0x48] sm:$0xff] }
  0x3e   : > { %4485 = vmatmul.mubr.f32.gmra.mrb[6].mxu0 %v3453_v25  ;;  %4167 = vmatprep.mubr.f32.mxu1 %v3452_v16  ;;  %v3580_v16 = vld [vmem:[%s6797_s1 + $0x330] sm:$0xff]  ;;  %6858 = vst [vmem:[#allocation22_spill] sm:$0xff] %v6071_v59  ;;  %v6074_v60 = vld [vmem:[%s5622_s6 + $0x122] sm:$0xff] }
  0x3f   : > { %5018 = vmatpush3.bf16.msra.mxu0 %v5015_v18  ;;  %4487 = vmatprep.mubr.f32.mxu0 %v3454_v26  ;;  %v3581_v18 = vld [vmem:[%s6797_s1 + $0x338] sm:$0xff] }
  0x40   : > { %5020 = vmatprep.subr.bf16.mxu0 %v5019_v27  ;;  %4890 = vmatpush3.bf16.msra.mxu1 %v4887_v21  ;;  %v5897_v21 = vld [vmem:[%s5622_s6 + $0x109] sm:$0xff]  ;;  %v5047_v24 = vpack.c.bf16 %v3581_v18, %v3580_v16 }
  0x41   : > { %4168 = vmatmul.mubr.f32.gmra.mrb[8].mxu1 %v3453_v25  ;;  %4892 = vmatprep.subr.bf16.mxu1 %v4891_v30  ;;  %6846 = vst [vmem:[#allocation10_spill] sm:$0xff] %v5897_v21  ;;  %v3582_v25 = vld [vmem:[%s6797_s1 + $0x340] sm:$0xff]  ;;  %v222_v16 = vld [vmem:[%s5622_s6 + $0x8] sm:$0xff] }
  0x42   : > { %4488 = vmatmul.mubr.f32.gmra.mrb[8].mxu0 %v3455_v34  ;;  %4170 = vmatprep.mubr.f32.mxu1 %v3454_v26  ;;  %v3583_v26 = vld [vmem:[%s6797_s1 + $0x348] sm:$0xff] }
  0x43   : > { %5022 = vmatpush3.bf16.msra.mxu0 %v5019_v27  ;;  %4490 = vmatprep.mubr.f32.mxu0 %v5784_v35  ;;  %v5912_v27 = vld [vmem:[%s5622_s6 + $0x111] sm:$0xff]  ;;  %v5051_v32 = vpack.c.bf16 %v3583_v26, %v3582_v25  ;;  %v6023_v18 = vld [vmem:[%s5622_s6 + $0xe2] sm:$0xff] }
  0x44   : > { %5024 = vmatprep.subr.bf16.mxu0 %v5023_v36  ;;  %4894 = vmatpush3.bf16.msra.mxu1 %v4891_v30  ;;  %6847 = vst [vmem:[#allocation11_spill] sm:$0xff] %v5912_v27  ;;  %v5922_v30 = vld [vmem:[%s5622_s6 + $0x7a] sm:$0xff]  ;;  %v6029_v25 = vld [vmem:[%s5622_s6 + $0xf2] sm:$0xff] }
  0x45   : > { %4171 = vmatmul.mubr.f32.gmra.mrb[10].mxu1 %v3455_v34  ;;  %4896 = vmatprep.subr.bf16.mxu1 %v4895_v40  ;;  %v3585_v34 = vld [vmem:[%s6797_s1 + $0x358] sm:$0xff] }
  0x46   : > { %4491 = vmatmul.mubr.f32.gmra.mrb[10].mxu0 %v3457_v44  ;;  %4173 = vmatprep.mubr.f32.mxu1 %v5784_v35  ;;  %v5055_v41 = vpack.c.bf16 %v3585_v34, %v3584_v33  ;;  %v3387_v33 = vld [vmem:[%s6797_s1 + $0x128] sm:$0xff]  ;;  %v6041_v34 = vld [vmem:[%s5622_s6 + $0x20] sm:$0xff] }
  0x47   : > { %5026 = vmatpush3.bf16.msra.mxu0 %v5023_v36  ;;  %4493 = vmatprep.mubr.f32.mxu0 %v3458_v45  ;;  %v5934_v36 = vld [vmem:[%s5622_s6 + $0x129] sm:$0xff] }
  0x48   : > { %5028 = vmatprep.subr.bf16.mxu0 %v5027_v46  ;;  %4898 = vmatpush3.bf16.msra.mxu1 %v4895_v40  ;;  %6849 = vst [vmem:[#allocation13_spill] sm:$0xff] %v5934_v36  ;;  %v5944_v40 = vld [vmem:[%s5622_s6 + $0x92] sm:$0xff] }
  0x49   : > { %4174 = vmatmul.mubr.f32.gmra.mrb[12].mxu1 %v3457_v44  ;;  %4900 = vmatprep.subr.bf16.mxu1 %v4899_v50  ;;  %v3587_v44 = vld [vmem:[%s6797_s1 + $0x368] sm:$0xff] }
  0x4a   : > { %4494 = vmatmul.mubr.f32.gmra.mrb[12].mxu0 %v3459_v53  ;;  %4176 = vmatprep.mubr.f32.mxu1 %v3458_v45  ;;  %v5956_v45 = vld [vmem:[%s5622_s6 + $0x141] sm:$0xff] }
  0x4b   : > { %5030 = vmatpush3.bf16.msra.mxu0 %v5027_v46  ;;  %4496 = vmatprep.mubr.f32.mxu0 %v5816_v54  ;;  %6851 = vst [vmem:[#allocation15_spill] sm:$0xff] %v5956_v45  ;;  %v5960_v46 = vld [vmem:[%s5622_s6 + $0x9a] sm:$0xff] }
  0x4c   : > { %5032 = vmatprep.subr.bf16.mxu0 %v5031_v55  ;;  %4902 = vmatpush3.bf16.msra.mxu1 %v4899_v50  ;;  %v5059_v50 = vpack.c.bf16 %v3587_v44, %v3586_v42  ;;  %v6049_v42 = vld [vmem:[%s5622_s6 + $0x30] sm:$0xff] }
  0x4d   : > { %4177 = vmatmul.mubr.f32.gmra.mrb[14].mxu1 %v3459_v53  ;;  %4904 = vmatprep.subr.bf16.mxu1 %v4903_v58  ;;  %v5978_v53 = vld [vmem:[%s5622_s6 + $0x159] sm:$0xff]  ;;  %6856 = vst [vmem:[#allocation20_spill] sm:$0xff] %v6049_v42  ;;  %v6052_v44 = vld [vmem:[%s5622_s6 + $0x10a] sm:$0xff] }
  0x4e   : > { %4497 = vmatmul.mubr.f32.gmra.mrb[14].mxu0 %v5832_v61  ;;  %4179 = vmatprep.mubr.f32.mxu1 %v5816_v54  ;;  %6853 = vst [vmem:[#allocation17_spill] sm:$0xff] %v5978_v53 }
  0x4f   : > { %5034 = vmatpush3.bf16.msra.mxu0 %v5031_v55  ;;  %4555 = vmatprep.mubr.f32.mxu0 %v5835_v62  ;;  %v5982_v55 = vld [vmem:[%s5622_s6 + $0xb2] sm:$0xff] }
  0x50   : > { %5036 = vmatprep.subr.bf16.mxu0 %v5035_v63  ;;  %4906 = vmatpush3.bf16.msra.mxu1 %v4903_v58  ;;  %v5063_v58 = vpack.c.bf16 %v3589_v52, %v3588_v51  ;;  %v3389_v51 = vld [vmem:[%s6797_s1 + $0x138] sm:$0xff] }
  0x51   : > { %4180 = vmatmul.mubr.f32.gmra.mrb[16].mxu1 %v5832_v61  ;;  %4908 = vmatprep.subr.bf16.mxu1 %v5843_v2  ;;  %v6064_v52 = vld [vmem:[%s5622_s6 + $0x38] sm:$0xff] }
  0x52   : > { %4556 = vmatmul.mubr.f32.vlgmr.msra.gmra.mrb[0].mxu0 %v5849_v3  ;;  %4182 = vmatprep.mubr.f32.mxu1 %v5852_v4  ;;  %6857 = vst [vmem:[#allocation21_spill] sm:$0xff] %v6064_v52 }
  0x53   : > { %5038 = vmatpush3.bf16.msra.mxu0 %v5035_v63  ;;  %4558 = vmatprep.mubr.f32.mxu0 %v5855_v5  ;;  %v6000_v63 = vld [vmem:[%s5622_s6 + $0x171] sm:$0xff] }
  0x54   : > { %5040 = vmatprep.subr.bf16.mxu0 %v5039_v6  ;;  %6855 = vst [vmem:[#allocation19_spill] sm:$0xff] %v6000_v63 }
  0x55   : > { %4183 = vmatmul.mubr.f32.gmra.mrb[18].mxu1 %v5868_v10 }
  0x56   : > { %4559 = vmatmul.mubr.f32.gmra.mrb[2].mxu0 %v5872_v11  ;;  %4185 = vmatprep.mubr.f32.mxu1 %v5875_v13 }
  0x57   : > { %4561 = vmatprep.mubr.f32.mxu0 %v5878_v14  ;;  %5042 = vmatpush3.bf16.msra.mxu0 %v5039_v6  ;;  %v6008_v6 = vld [vmem:[%s5622_s6 + $0xda] sm:$0xff] }
  0x58   : > { %5044 = vmatprep.subr.bf16.mxu0 %v5043_v15 }
  0x59   : > { %4186 = vmatmul.mubr.f32.gmra.mrb[20].mxu1 %v5890_v19 }
  0x5a   : > { %4562 = vmatmul.mubr.f32.gmra.mrb[4].mxu0 %v5894_v20  ;;  %4188 = vmatprep.mubr.f32.mxu1 %v5897_v21  ;;  %v3629_v21 = vld [vmem:[%s6797_s1 + $0x3b8] sm:$0xff] }
  0x5b   : > { %4564 = vmatprep.mubr.f32.mxu0 %v5900_v22  ;;  %5046 = vmatpush3.bf16.msra.mxu0 %v5043_v15  ;;  %v3385_v15 = vld [vmem:[%s6797_s1 + $0x118] sm:$0xff] }
  0x5c   : > { %5048 = vmatprep.subr.bf16.mxu0 %v5047_v24  ;;  %v4911_v26 = vpack.c.bf16 %v3385_v15, %v3384_v9  ;;  %v3390_v9 = vld [vmem:[%s6797_s1 + $0x140] sm:$0xff]  ;;  %v3391_v15 = vld [vmem:[%s6797_s1 + $0x148] sm:$0xff] }
  0x5d   : > { %4189 = vmatmul.mubr.f32.gmra.mrb[22].mxu1 %v5912_v27  ;;  %v3624_v27 = vld [vmem:[%s6797_s1 + $0x390] sm:$0xff] }
  0x5e   : > { %4565 = vmatmul.mubr.f32.gmra.mrb[6].mxu0 %v5916_v28  ;;  %4191 = vmatprep.mubr.f32.mxu1 %v5919_v29 }
  0x5f   : > { %4567 = vmatprep.mubr.f32.mxu0 %v5922_v30  ;;  %5050 = vmatpush3.bf16.msra.mxu0 %v5047_v24  ;;  %v6026_v24 = vld [vmem:[%s5622_s6 + $0x18] sm:$0xff] }
  0x60   : > { %5052 = vmatprep.subr.bf16.mxu0 %v5051_v32 }
  0x61   : > { %4192 = vmatmul.mubr.f32.gmra.mrb[24].mxu1 %v5934_v36  ;;  %v3430_v36 = vld [vmem:[%s6797_s1 + $0x180] sm:$0xff] }
  0x62   : > { %4568 = vmatmul.mubr.f32.gmra.mrb[8].mxu0 %v5938_v38  ;;  %4194 = vmatprep.mubr.f32.mxu1 %v5941_v39  ;;  %v6178_v29 = vpack.c.bf16 %v3431_v17, %v3430_v36  ;;  %v6193_v17 = vld [vmem:[%s5622_s6 + $0xd8] sm:$0xff]  ;;  %v3626_v36 = vld [vmem:[%s6797_s1 + $0x3a0] sm:$0xff] }
  0x63   : > { %4570 = vmatprep.mubr.f32.mxu0 %v5944_v40  ;;  %5054 = vmatpush3.bf16.msra.mxu0 %v5051_v32  ;;  %v3386_v32 = vld [vmem:[%s6797_s1 + $0x120] sm:$0xff] }
  0x64   : > { %5056 = vmatprep.subr.bf16.mxu0 %v5055_v41 }
  0x65   : > { %4195 = vmatmul.mubr.f32.gmra.mrb[26].mxu1 %v5956_v45  ;;  %v3397_v45 = vld [vmem:[%s6797_s1 + $0x178] sm:$0xff] }
  0x66   : > { %4571 = vmatmul.mubr.f32.gmra.mrb[10].mxu0 %v5960_v46  ;;  %4197 = vmatprep.mubr.f32.mxu1 %v5963_v47  ;;  %v3396_v47 = vld [vmem:[%s6797_s1 + $0x170] sm:$0xff] }
  0x67   : > { %4573 = vmatprep.mubr.f32.mxu0 %v5966_v48  ;;  %5058 = vmatpush3.bf16.msra.mxu0 %v5055_v41  ;;  %v6046_v41 = vld [vmem:[%s5622_s6 + $0xfa] sm:$0xff]  ;;  %v4935_v39 = vpack.c.bf16 %v3397_v45, %v3396_v47  ;;  %v3525_v45 = vld [vmem:[%s5622_s6 + $0x18a] sm:$0xff] }
  0x68   : > { %5060 = vmatprep.subr.bf16.mxu0 %v5059_v50  ;;  %v6176_v47 = vld [vmem:[%s5622_s6 + $0xc0] sm:$0xff] }
  0x69   : > { %4198 = vmatmul.mubr.f32.gmra.mrb[28].mxu1 %v5978_v53  ;;  %v6140_v53 = vld [vmem:[%s5622_s6 + $0x16a] sm:$0xff]  ;;  %6868 = vst [vmem:[#allocation32_spill] sm:$0xff] %v6176_v47 }
  0x6a   : > { %4574 = vmatmul.mubr.f32.gmra.mrb[12].mxu0 %v5982_v55  ;;  %4200 = vmatprep.mubr.f32.mxu1 %v5985_v56  ;;  %v3395_v56 = vld [vmem:[%s6797_s1 + $0x168] sm:$0xff] }
  0x6b   : > { %4576 = vmatprep.mubr.f32.mxu0 %v5988_v57  ;;  %5062 = vmatpush3.bf16.msra.mxu0 %v5059_v50  ;;  %v4915_v50 = vpack.c.bf16 %v3387_v33, %v3386_v32  ;;  %v6093_v32 = vld [vmem:[%s5622_s6 + $0x60] sm:$0xff]  ;;  %v4931_v31 = vpack.c.bf16 %v3395_v56, %v3394_v37  ;;  %v6156_v37 = vld [vmem:[%s5622_s6 + $0x172] sm:$0xff]  ;;  %v6159_v56 = vld [vmem:[%s5622_s6 + $0xa8] sm:$0xff] }
  0x6c   : > { %5064 = vmatprep.subr.bf16.mxu0 %v5063_v58  ;;  %6860 = vst [vmem:[#allocation24_spill] sm:$0xff] %v6093_v32  ;;  %v6096_v33 = vld [vmem:[%s5622_s6 + $0x13a] sm:$0xff]  ;;  %6866 = vst [vmem:[#allocation30_spill] sm:$0xff] %v6159_v56 }
  0x6d   : > { %4201 = vmatmul.mubr.f32.gmra.mrb[30].mxu1 %v6000_v63 }
  0x6e   : > { %4577 = vmatmul.mubr.f32.gmra.mrb[14].mxu0 %v6004_v0  ;;  %4235 = vmatprep.mubr.f32.mxu1 %v221_v1 }
  0x6f   : > { %4579 = vmatprep.mubr.f32.mxu0 %v6008_v6  ;;  %5066 = vmatpush3.bf16.msra.mxu0 %v5063_v58  ;;  %v6068_v58 = vld [vmem:[%s5622_s6 + $0x112] sm:$0xff] }
  0x70   : > { %5068 = vmatprep.subr.bf16.mxu0 %v6010_v8 }
  0x71   : > { %4236 = vmatmul.mubr.f32.vlgmr.msra.gmra.mrb[0].mxu1 %v222_v16  ;;  %v6086_v16 = vld [vmem:[%s5622_s6 + $0x50] sm:$0xff] }
  0x72   : > { %4580 = vmatmul.mubr.f32.gmra.mrb[16].mxu0 %v6023_v18  ;;  %4910 = vmatpush3.bf16.msra.mxu1 %v5843_v2  ;;  %v3388_v2 = vld [vmem:[%s6797_s1 + $0x130] sm:$0xff]  ;;  %6859 = vst [vmem:[#allocation23_spill] sm:$0xff] %v6086_v16 }
  0x73   : > { %4238 = vmatprep.mubr.f32.mxu1 %v6026_v24  ;;  %4582 = vmatprep.mubr.f32.mxu0 %v6029_v25  ;;  %v4919_v1 = vpack.c.bf16 %v3389_v51, %v3388_v2  ;;  %v4923_v2 = vpack.c.bf16 %v3391_v15, %v3390_v9  ;;  %v3392_v51 = vld [vmem:[%s6797_s1 + $0x150] sm:$0xff]  ;;  %v6112_v9 = vld [vmem:[%s5622_s6 + $0x142] sm:$0xff]  ;;  %v6115_v15 = vld [vmem:[%s5622_s6 + $0x78] sm:$0xff] }
  0x74   : > { %4912 = vmatprep.subr.bf16.mxu1 %v4911_v26  ;;  %6862 = vst [vmem:[#allocation26_spill] sm:$0xff] %v6115_v15  ;;  %v4927_v63 = vpack.c.bf16 %v3393_v49, %v3392_v51  ;;  %v6134_v49 = vld [vmem:[%s5622_s6 + $0x15a] sm:$0xff]  ;;  %v6137_v51 = vld [vmem:[%s5622_s6 + $0x90] sm:$0xff] }
  0x75   : > { %4239 = vmatmul.mubr.f32.gmra.mrb[2].mxu1 %v6041_v34  ;;  %6864 = vst [vmem:[#allocation28_spill] sm:$0xff] %v6137_v51 }
  0x76   : > { %4583 = vmatmul.mubr.f32.gmra.mrb[18].mxu0 %v6046_v41  ;;  %4241 = vmatprep.mubr.f32.mxu1 %v6049_v42 }
  0x77   : > { %4585 = vmatprep.mubr.f32.mxu0 %v6052_v44  ;;  %4914 = vmatpush3.bf16.msra.mxu1 %v4911_v26  ;;  %v6090_v26 = vld [vmem:[%s5622_s6 + $0x12a] sm:$0xff] }
  0x78   : > { %4916 = vmatprep.subr.bf16.mxu1 %v4915_v50 }
  0x79   : > { %4242 = vmatmul.mubr.f32.gmra.mrb[4].mxu1 %v6064_v52 }
  0x7a   : > { %4586 = vmatmul.mubr.f32.gmra.mrb[20].mxu0 %v6068_v58  ;;  %4244 = vmatprep.mubr.f32.mxu1 %v6071_v59 }
  0x7b   : > { %4588 = vmatprep.mubr.f32.mxu0 %v6074_v60  ;;  %4918 = vmatpush3.bf16.msra.mxu1 %v4915_v50  ;;  %v6108_v50 = vld [vmem:[%s5622_s6 + $0x68] sm:$0xff] }
  0x7c   : > { %4920 = vmatprep.subr.bf16.mxu1 %v4919_v1  ;;  %6861 = vst [vmem:[#allocation25_spill] sm:$0xff] %v6108_v50 }
  0x7d   : > { %4245 = vmatmul.mubr.f32.gmra.mrb[6].mxu1 %v6086_v16 }
  0x7e   : > { %4589 = vmatmul.mubr.f32.gmra.mrb[22].mxu0 %v6090_v26  ;;  %4247 = vmatprep.mubr.f32.mxu1 %v6093_v32 }
  0x7f   : > { %4591 = vmatprep.mubr.f32.mxu0 %v6096_v33  ;;  %4922 = vmatpush3.bf16.msra.mxu1 %v4919_v1  ;;  %v6130_v1 = vld [vmem:[%s5622_s6 + $0x80] sm:$0xff] }
  0x80   : > { %4924 = vmatprep.subr.bf16.mxu1 %v4923_v2  ;;  %6863 = vst [vmem:[#allocation27_spill] sm:$0xff] %v6130_v1 }
  0x81   : > { %4248 = vmatmul.mubr.f32.gmra.mrb[8].mxu1 %v6108_v50 }
  0x82   : > { %4592 = vmatmul.mubr.f32.gmra.mrb[24].mxu0 %v6112_v9  ;;  %4250 = vmatprep.mubr.f32.mxu1 %v6115_v15 }
  0x83   : > { %4594 = vmatprep.mubr.f32.mxu0 %v6118_v43  ;;  %4926 = vmatpush3.bf16.msra.mxu1 %v4923_v2  ;;  %v6152_v2 = vld [vmem:[%s5622_s6 + $0x98] sm:$0xff] }
  0x84   : > { %4928 = vmatprep.subr.bf16.mxu1 %v4927_v63  ;;  %6865 = vst [vmem:[#allocation29_spill] sm:$0xff] %v6152_v2 }
  0x85   : > { %4251 = vmatmul.mubr.f32.gmra.mrb[10].mxu1 %v6130_v1 }
  0x86   : > { %4595 = vmatmul.mubr.f32.gmra.mrb[26].mxu0 %v6134_v49  ;;  %4253 = vmatprep.mubr.f32.mxu1 %v6137_v51 }
  0x87   : > { %4597 = vmatprep.mubr.f32.mxu0 %v6140_v53  ;;  %4930 = vmatpush3.bf16.msra.mxu1 %v4927_v63  ;;  %v6172_v63 = vld [vmem:[%s5622_s6 + $0xb0] sm:$0xff] }
  0x88   : > { %4932 = vmatprep.subr.bf16.mxu1 %v4931_v31  ;;  %6867 = vst [vmem:[#allocation31_spill] sm:$0xff] %v6172_v63 }
  0x89   : > { %4254 = vmatmul.mubr.f32.gmra.mrb[12].mxu1 %v6152_v2 }
  0x8a   : > { %4598 = vmatmul.mubr.f32.gmra.mrb[28].mxu0 %v6156_v37  ;;  %4256 = vmatprep.mubr.f32.mxu1 %v6159_v56 }
  0x8b   : > { %4600 = vmatprep.mubr.f32.mxu0 %v3524_v23  ;;  %4934 = vmatpush3.bf16.msra.mxu1 %v4931_v31  ;;  %v6189_v23 = vld [vmem:[%s5622_s6 + $0xc8] sm:$0xff]  ;;  %v5071_v31 = vpack.c.bf16 %v3625_v12, %v3624_v27  ;;  %v6211_v12 = vld [vmem:[%s5622_s6 + $0xf0] sm:$0xff] }
  0x8c   : > { %4936 = vmatprep.subr.bf16.mxu1 %v4935_v39  ;;  %6869 = vst [vmem:[#allocation33_spill] sm:$0xff] %v6189_v23 }
  0x8d   : > { %4257 = vmatmul.mubr.f32.gmra.mrb[14].mxu1 %v6172_v63 }
  0x8e   : > { %4601 = vmatmul.mubr.f32.gmra.mrb[30].mxu0 %v3525_v45  ;;  %4259 = vmatprep.mubr.f32.mxu1 %v6176_v47  ;;  %v3627_v45 = vld [vmem:[%s6797_s1 + $0x3a8] sm:$0xff] }
  0x8f   : > { %4635 = vmatprep.mubr.f32.mxu0 %v6049_v42  ;;  %4938 = vmatpush3.bf16.msra.mxu1 %v4935_v39  ;;  %v6206_v39 = vld [vmem:[%s5622_s6 + $0xe0] sm:$0xff]  ;;  %v5075_v27 = vpack.c.bf16 %v3627_v45, %v3626_v36  ;;  %v6227_v36 = vld [vmem:[%s5622_s6 + $0x108] sm:$0xff] }
  0x90   : > { %4940 = vmatprep.subr.bf16.mxu1 %v6178_v29  ;;  %v769_v42 = vld [vmem:[%s5622_s6 + $0xa] sm:$0xff] }
  0x91   : > { %4260 = vmatmul.mubr.f32.gmra.mrb[16].mxu1 %v6189_v23 }
  0x92   : > { %4636 = vmatmul.mubr.f32.vlgmr.msra.gmra.mrb[0].mxu0 %v6064_v52  ;;  %4262 = vmatprep.mubr.f32.mxu1 %v6193_v17  ;;  %v3628_v52 = vld [vmem:[%s6797_s1 + $0x3b0] sm:$0xff] }
  0x93   : > { %5070 = vmatpush3.bf16.msra.mxu0 %v6010_v8  ;;  %4638 = vmatprep.mubr.f32.mxu0 %v6071_v59  ;;  %v6223_v8 = vld [vmem:[%s5622_s6 + $0xf8] sm:$0xff]  ;;  %v5079_v45 = vpack.c.bf16 %v3629_v21, %v3628_v52  ;;  %v3630_v59 = vld [vmem:[%s6797_s1 + $0x3c0] sm:$0xff] }
  0x94   : > { %5072 = vmatprep.subr.bf16.mxu0 %v5071_v31  ;;  %v6243_v21 = vld [vmem:[%s5622_s6 + $0x120] sm:$0xff] }
  0x95   : > { %4263 = vmatmul.mubr.f32.gmra.mrb[18].mxu1 %v6206_v39 }
  0x96   : > { %4639 = vmatmul.mubr.f32.gmra.mrb[2].mxu0 %v6086_v16  ;;  %4265 = vmatprep.mubr.f32.mxu1 %v6211_v12  ;;  %v3631_v16 = vld [vmem:[%s6797_s1 + $0x3c8] sm:$0xff] }
  0x97   : > { %4641 = vmatprep.mubr.f32.mxu0 %v6093_v32  ;;  %5074 = vmatpush3.bf16.msra.mxu0 %v5071_v31  ;;  %v6239_v31 = vld [vmem:[%s5622_s6 + $0x110] sm:$0xff]  ;;  %v5083_v52 = vpack.c.bf16 %v3631_v16, %v3630_v59  ;;  %v6259_v59 = vld [vmem:[%s5622_s6 + $0x138] sm:$0xff] }
  0x98   : > { %5076 = vmatprep.subr.bf16.mxu0 %v5075_v27  ;;  %v3632_v32 = vld [vmem:[%s6797_s1 + $0x3d0] sm:$0xff] }
  0x99   : > { %4266 = vmatmul.mubr.f32.gmra.mrb[20].mxu1 %v6223_v8 }
  0x9a   : > { %4642 = vmatmul.mubr.f32.gmra.mrb[4].mxu0 %v6108_v50  ;;  %4268 = vmatprep.mubr.f32.mxu1 %v6227_v36  ;;  %v3633_v50 = vld [vmem:[%s6797_s1 + $0x3d8] sm:$0xff] }
  0x9b   : > { %4644 = vmatprep.mubr.f32.mxu0 %v6115_v15  ;;  %5078 = vmatpush3.bf16.msra.mxu0 %v5075_v27  ;;  %v6255_v15 = vld [vmem:[%s5622_s6 + $0x128] sm:$0xff]  ;;  %v5087_v16 = vpack.c.bf16 %v3633_v50, %v3632_v32  ;;  %v3634_v27 = vld [vmem:[%s6797_s1 + $0x3e0] sm:$0xff]  ;;  %v6275_v32 = vld [vmem:[%s5622_s6 + $0x150] sm:$0xff] }
  0x9c   : > { %5080 = vmatprep.subr.bf16.mxu0 %v5079_v45 }
  0x9d   : > { %4269 = vmatmul.mubr.f32.gmra.mrb[22].mxu1 %v6239_v31 }
  0x9e   : > { %4645 = vmatmul.mubr.f32.gmra.mrb[6].mxu0 %v6130_v1  ;;  %4271 = vmatprep.mubr.f32.mxu1 %v6243_v21  ;;  %v3635_v1 = vld [vmem:[%s6797_s1 + $0x3e8] sm:$0xff] }
  0x9f   : > { %4647 = vmatprep.mubr.f32.mxu0 %v6137_v51  ;;  %5082 = vmatpush3.bf16.msra.mxu0 %v5079_v45  ;;  %v6271_v51 = vld [vmem:[%s5622_s6 + $0x140] sm:$0xff]  ;;  %v5091_v50 = vpack.c.bf16 %v3635_v1, %v3634_v27  ;;  %v3636_v45 = vld [vmem:[%s6797_s1 + $0x3f0] sm:$0xff]  ;;  %v6291_v1 = vld [vmem:[%s5622_s6 + $0x168] sm:$0xff] }
  0xa0   : > { %5084 = vmatprep.subr.bf16.mxu0 %v5083_v52  ;;  %v3670_v27 = vld [vmem:[%s6797_s1 + $0x400] sm:$0xff] }
  0xa1   : > { %4272 = vmatmul.mubr.f32.gmra.mrb[24].mxu1 %v6255_v15 }
  0xa2   : > { %4648 = vmatmul.mubr.f32.gmra.mrb[8].mxu0 %v6152_v2  ;;  %4274 = vmatprep.mubr.f32.mxu1 %v6259_v59  ;;  %v3637_v2 = vld [vmem:[%s6797_s1 + $0x3f8] sm:$0xff] }
  0xa3   : > { %4650 = vmatprep.mubr.f32.mxu0 %v6159_v56  ;;  %5086 = vmatpush3.bf16.msra.mxu0 %v5083_v52  ;;  %v6287_v56 = vld [vmem:[%s5622_s6 + $0x158] sm:$0xff]  ;;  %v5095_v52 = vpack.c.bf16 %v3637_v2, %v3636_v45  ;;  %v768_v2 = vld [vmem:[%s5622_s6 + $0x2] sm:$0xff]  ;;  %v3432_v45 = vld [vmem:[%s6797_s1 + $0x190] sm:$0xff] }
  0xa4   : > { %5088 = vmatprep.subr.bf16.mxu0 %v5087_v16 }
  0xa5   : > { %4275 = vmatmul.mubr.f32.gmra.mrb[26].mxu1 %v6271_v51 }
  0xa6   : > { %4651 = vmatmul.mubr.f32.gmra.mrb[10].mxu0 %v6172_v63  ;;  %4277 = vmatprep.mubr.f32.mxu1 %v6275_v32  ;;  %v3671_v63 = vld [vmem:[%s6797_s1 + $0x408] sm:$0xff] }
  0xa7   : > { %4653 = vmatprep.mubr.f32.mxu0 %v6176_v47  ;;  %5090 = vmatpush3.bf16.msra.mxu0 %v5087_v16  ;;  %v6303_v47 = vld [vmem:[%s5622_s6 + $0x170] sm:$0xff]  ;;  %v6307_v16 = vpack.c.bf16 %v3671_v63, %v3670_v27  ;;  %v3434_v63 = vld [vmem:[%s6797_s1 + $0x1a0] sm:$0xff]  ;;  %v3435_v27 = vld [vmem:[%s6797_s1 + $0x1a8] sm:$0xff] }
  0xa8   : > { %5092 = vmatprep.subr.bf16.mxu0 %v5091_v50 }
  0xa9   : > { %4278 = vmatmul.mubr.f32.gmra.mrb[28].mxu1 %v6287_v56 }
  0xaa   : > { %4654 = vmatmul.mubr.f32.gmra.mrb[12].mxu0 %v6189_v23  ;;  %4280 = vmatprep.mubr.f32.mxu1 %v6291_v1  ;;  %v3433_v23 = vld [vmem:[%s6797_s1 + $0x198] sm:$0xff] }
  0xab   : > { %4656 = vmatprep.mubr.f32.mxu0 %v6193_v17  ;;  %5094 = vmatpush3.bf16.msra.mxu0 %v5091_v50  ;;  %v4943_v50 = vpack.c.bf16 %v3433_v23, %v3432_v45  ;;  %v4947_v23 = vpack.c.bf16 %v3435_v27, %v3434_v63  ;;  %v3443_v45 = vld [vmem:[%s6797_s1 + $0x1e8] sm:$0xff]  ;;  %v3445_v63 = vld [vmem:[%s6797_s1 + $0x1f8] sm:$0xff] }
  0xac   : > { %5096 = vmatprep.subr.bf16.mxu0 %v5095_v52  ;;  %v3572_v27 = vld [vmem:[%s5622_s6 + $0x198] sm:$0xff] }
  0xad   : > { %4281 = vmatmul.mubr.f32.gmra.mrb[30].mxu1 %v6303_v47 }
  0xae   : > { %4657 = vmatmul.mubr.f32.gmra.mrb[14].mxu0 %v6206_v39  ;;  %4315 = vmatprep.mubr.f32.mxu1 %v768_v2  ;;  %v3441_v2 = vld [vmem:[%s6797_s1 + $0x1d8] sm:$0xff] }
  0xaf   : > { %4659 = vmatprep.mubr.f32.mxu0 %v6211_v12  ;;  %5098 = vmatpush3.bf16.msra.mxu0 %v5095_v52  ;;  %v3437_v52 = vld [vmem:[%s6797_s1 + $0x1b8] sm:$0xff] }
  0xb0   : > { %5100 = vmatprep.subr.bf16.mxu0 %v6307_v16 }
  0xb1   : > { %4316 = vmatmul.mubr.f32.vlgmr.msra.gmra.mrb[0].mxu1 %v769_v42  ;;  %v3436_v42 = vld [vmem:[%s6797_s1 + $0x1b0] sm:$0xff] }
  0xb2   : > { %4660 = vmatmul.mubr.f32.gmra.mrb[16].mxu0 %v6223_v8  ;;  %4942 = vmatpush3.bf16.msra.mxu1 %v6178_v29  ;;  %v3439_v29 = vld [vmem:[%s6797_s1 + $0x1c8] sm:$0xff] }
  0xb3   : > { %4318 = vmatprep.mubr.f32.mxu1 %v5835_v62  ;;  %4662 = vmatprep.mubr.f32.mxu0 %v6227_v36  ;;  %v4951_v62 = vpack.c.bf16 %v3437_v52, %v3436_v42  ;;  %v3672_v42 = vld [vmem:[%s6797_s1 + $0x410] sm:$0xff] }
  0xb4   : > { %4944 = vmatprep.subr.bf16.mxu1 %v4943_v50  ;;  %v3592_v52 = vld [vmem:[%s5622_s6 + $0x49] sm:$0xff] }
  0xb5   : > { %4319 = vmatmul.mubr.f32.gmra.mrb[2].mxu1 %v5849_v3  ;;  %v3438_v3 = vld [vmem:[%s6797_s1 + $0x1c0] sm:$0xff] }
  0xb6   : > { %4663 = vmatmul.mubr.f32.gmra.mrb[18].mxu0 %v6239_v31  ;;  %4321 = vmatprep.mubr.f32.mxu1 %v5855_v5  ;;  %v4955_v5 = vpack.c.bf16 %v3439_v29, %v3438_v3  ;;  %v3675_v3 = vld [vmem:[%s6797_s1 + $0x428] sm:$0xff] }
  0xb7   : > { %4665 = vmatprep.mubr.f32.mxu0 %v6243_v21  ;;  %4946 = vmatpush3.bf16.msra.mxu1 %v4943_v50  ;;  %v3444_v50 = vld [vmem:[%s6797_s1 + $0x1f0] sm:$0xff]  ;;  %v3594_v29 = vld [vmem:[%s5622_s6 + $0x61] sm:$0xff] }
  0xb8   : > { %4948 = vmatprep.subr.bf16.mxu1 %v4947_v23 }
  0xb9   : > { %4322 = vmatmul.mubr.f32.gmra.mrb[4].mxu1 %v5872_v11  ;;  %v3440_v11 = vld [vmem:[%s6797_s1 + $0x1d0] sm:$0xff] }
  0xba   : > { %4666 = vmatmul.mubr.f32.gmra.mrb[20].mxu0 %v6255_v15  ;;  %4324 = vmatprep.mubr.f32.mxu1 %v5878_v14  ;;  %v4959_v14 = vpack.c.bf16 %v3441_v2, %v3440_v11  ;;  %v3677_v11 = vld [vmem:[%s6797_s1 + $0x438] sm:$0xff] }
  0xbb   : > { %4668 = vmatprep.mubr.f32.mxu0 %v6259_v59  ;;  %4950 = vmatpush3.bf16.msra.mxu1 %v4947_v23  ;;  %v3573_v23 = vld [vmem:[%s5622_s6 + $0x1a0] sm:$0xff] }
  0xbc   : > { %4952 = vmatprep.subr.bf16.mxu1 %v4951_v62 }
  0xbd   : > { %4325 = vmatmul.mubr.f32.gmra.mrb[6].mxu1 %v5894_v20  ;;  %v3442_v20 = vld [vmem:[%s6797_s1 + $0x1e0] sm:$0xff] }
  0xbe   : > { %4669 = vmatmul.mubr.f32.gmra.mrb[22].mxu0 %v6271_v51  ;;  %4327 = vmatprep.mubr.f32.mxu1 %v5900_v22  ;;  %v6371_v22 = vld [vmem:[%s5622_s6 + $0x180] sm:$0xff] }
  0xbf   : > { %4671 = vmatprep.mubr.f32.mxu0 %v6275_v32  ;;  %4954 = vmatpush3.bf16.msra.mxu1 %v4951_v62 }
  0xc0   : > { %4956 = vmatprep.subr.bf16.mxu1 %v4955_v5 }
  0xc1   : > { %4328 = vmatmul.mubr.f32.gmra.mrb[8].mxu1 %v5916_v28  ;;  %v4963_v28 = vpack.c.bf16 %v3443_v45, %v3442_v20  ;;  %v3681_v45 = vld [vmem:[%s6797_s1 + $0x458] sm:$0xff] }
  0xc2   : > { %4672 = vmatmul.mubr.f32.gmra.mrb[24].mxu0 %v6287_v56  ;;  %4330 = vmatprep.mubr.f32.mxu1 %v5922_v30  ;;  %v6384_v30 = vld [vmem:[%s5622_s6 + $0x188] sm:$0xff] }
  0xc3   : > { %4674 = vmatprep.mubr.f32.mxu0 %v6291_v1  ;;  %4958 = vmatpush3.bf16.msra.mxu1 %v4955_v5  ;;  %v3676_v5 = vld [vmem:[%s6797_s1 + $0x430] sm:$0xff] }
  0xc4   : > { %4960 = vmatprep.subr.bf16.mxu1 %v4959_v14  ;;  %v5111_v2 = vpack.c.bf16 %v3677_v11, %v3676_v5  ;;  %v6508_v5 = vld [vmem:[%s5622_s6 + $0x189] sm:$0xff]  ;;  %v3620_v11 = vld [vmem:[%s5622_s6 + $0x199] sm:$0xff] }
  0xc5   : > { %4331 = vmatmul.mubr.f32.gmra.mrb[10].mxu1 %v5938_v38  ;;  %v4967_v38 = vpack.c.bf16 %v3445_v63, %v3444_v50  ;;  %v3683_v63 = vld [vmem:[%s6797_s1 + $0x468] sm:$0xff] }
  0xc6   : > { %4675 = vmatmul.mubr.f32.gmra.mrb[26].mxu0 %v6303_v47  ;;  %4333 = vmatprep.mubr.f32.mxu1 %v5944_v40  ;;  %v3590_v40 = vld [vmem:[%s5622_s6 + $0x31] sm:$0xff] }
  0xc7   : > { %4677 = vmatprep.mubr.f32.mxu0 %v6371_v22  ;;  %4962 = vmatpush3.bf16.msra.mxu1 %v4959_v14  ;;  %v3679_v14 = vld [vmem:[%s6797_s1 + $0x448] sm:$0xff] }
  0xc8   : > { %4964 = vmatprep.subr.bf16.mxu1 %v4963_v28 }
  0xc9   : > { %4334 = vmatmul.mubr.f32.gmra.mrb[12].mxu1 %v5960_v46  ;;  %v3673_v46 = vld [vmem:[%s6797_s1 + $0x418] sm:$0xff] }
  0xca   : > { %4678 = vmatmul.mubr.f32.gmra.mrb[28].mxu0 %v6384_v30  ;;  %4336 = vmatprep.mubr.f32.mxu1 %v5966_v48  ;;  %v3591_v48 = vld [vmem:[%s5622_s6 + $0x39] sm:$0xff]  ;;  %v5103_v62 = vpack.c.bf16 %v3673_v46, %v3672_v42 }
  0xcb   : > { %4680 = vmatprep.mubr.f32.mxu0 %v3572_v27  ;;  %4966 = vmatpush3.bf16.msra.mxu1 %v4963_v28  ;;  %v3600_v28 = vld [vmem:[%s5622_s6 + $0xa9] sm:$0xff]  ;;  %v3685_v27 = vld [vmem:[%s6797_s1 + $0x478] sm:$0xff]  ;;  %v6888_v46 = vld [vmem:[#allocation27_spill] sm:$0xff] }
  0xcc   : > { %4968 = vmatprep.subr.bf16.mxu1 %v4967_v38  ;;  %v6887_v42 = vld [vmem:[#allocation6_spill] sm:$0xff] }
  0xcd   : > { %4337 = vmatmul.mubr.f32.gmra.mrb[14].mxu1 %v5982_v55  ;;  %v3674_v55 = vld [vmem:[%s6797_s1 + $0x420] sm:$0xff] }
  0xce   : > { %4681 = vmatmul.mubr.f32.gmra.mrb[30].mxu0 %v3573_v23  ;;  %4339 = vmatprep.mubr.f32.mxu1 %v5988_v57  ;;  %v3593_v57 = vld [vmem:[%s5622_s6 + $0x51] sm:$0xff] }
  0xcf   : > { %4715 = vmatprep.mubr.f32.mxu0 %v3590_v40  ;;  %4970 = vmatpush3.bf16.msra.mxu1 %v4967_v38  ;;  %v6884_v38 = vld [vmem:[#allocation15_spill] sm:$0xff]  ;;  %v6885_v23 = vld [vmem:[#allocation26_spill] sm:$0xff]  ;;  %v6886_v40 = vld [vmem:[#allocation16_spill] sm:$0xff] }
  0xd0   : > { %5131 = vmatprep.subr.bf16.mxu1 %v5577_v7 }
  0xd1   : > { %4340 = vmatmul.mubr.f32.gmra.mrb[16].mxu1 %v6004_v0  ;;  %v5107_v0 = vpack.c.bf16 %v3675_v3, %v3674_v55  ;;  %v6500_v55 = vld [vmem:[%s5622_s6 + $0x181] sm:$0xff] }
  0xd2   : > { %4716 = vmatmul.mubr.f32.vlgmr.msra.gmra.mrb[0].mxu0 %v3591_v48  ;;  %4342 = vmatprep.mubr.f32.mxu1 %v6008_v6  ;;  %v3595_v6 = vld [vmem:[%s5622_s6 + $0x69] sm:$0xff]  ;;  %v6892_v3 = vld [vmem:[#allocation7_spill] sm:$0xff] }
  0xd3   : > { %5102 = vmatpush3.bf16.msra.mxu0 %v6307_v16  ;;  %4718 = vmatprep.mubr.f32.mxu0 %v3592_v52  ;;  %v3596_v16 = vld [vmem:[%s5622_s6 + $0x79] sm:$0xff]  ;;  %v6889_v48 = vld [vmem:[#allocation17_spill] sm:$0xff]  ;;  %v6890_v52 = vld [vmem:[#allocation28_spill] sm:$0xff] }
  0xd4   : > { %5104 = vmatprep.subr.bf16.mxu0 %v5103_v62 }
  0xd5   : > { %4343 = vmatmul.mubr.f32.gmra.mrb[18].mxu1 %v6023_v18  ;;  %v3678_v18 = vld [vmem:[%s6797_s1 + $0x440] sm:$0xff] }
  0xd6   : > { %4719 = vmatmul.mubr.f32.gmra.mrb[2].mxu0 %v3593_v57  ;;  %4345 = vmatprep.mubr.f32.mxu1 %v6029_v25  ;;  %v3597_v25 = vld [vmem:[%s5622_s6 + $0x81] sm:$0xff]  ;;  %v5115_v20 = vpack.c.bf16 %v3679_v14, %v3678_v18  ;;  %v6893_v57 = vld [vmem:[#allocation29_spill] sm:$0xff] }
  0xd7   : > { %4721 = vmatprep.mubr.f32.mxu0 %v3594_v29  ;;  %5106 = vmatpush3.bf16.msra.mxu0 %v5103_v62  ;;  %v6891_v62 = vld [vmem:[#allocation18_spill] sm:$0xff]  ;;  %v6894_v29 = vld [vmem:[#allocation19_spill] sm:$0xff] }
  0xd8   : > { %5108 = vmatprep.subr.bf16.mxu0 %v5107_v0  ;;  %v3621_v18 = vld [vmem:[%s5622_s6 + $0x1a1] sm:$0xff]  ;;  %v3638_v14 = vld [vmem:[%s5622_s6 + $0x32] sm:$0xff] }
  0xd9   : > { %4346 = vmatmul.mubr.f32.gmra.mrb[20].mxu1 %v6046_v41  ;;  %v3680_v41 = vld [vmem:[%s6797_s1 + $0x450] sm:$0xff] }
  0xda   : > { %4722 = vmatmul.mubr.f32.gmra.mrb[4].mxu0 %v3595_v6  ;;  %4348 = vmatprep.mubr.f32.mxu1 %v6052_v44  ;;  %v3599_v44 = vld [vmem:[%s5622_s6 + $0x99] sm:$0xff]  ;;  %v5119_v50 = vpack.c.bf16 %v3681_v45, %v3680_v41  ;;  %v6896_v6 = vld [vmem:[#allocation8_spill] sm:$0xff] }
  0xdb   : > { %4724 = vmatprep.mubr.f32.mxu0 %v3596_v16  ;;  %5110 = vmatpush3.bf16.msra.mxu0 %v5107_v0  ;;  %v6895_v0 = vld [vmem:[#allocation30_spill] sm:$0xff]  ;;  %v6897_v16 = vld [vmem:[#allocation31_spill] sm:$0xff]  ;;  %v3640_v45 = vld [vmem:[%s5622_s6 + $0x4a] sm:$0xff] }
  0xdc   : > { %5112 = vmatprep.subr.bf16.mxu0 %v5111_v2  ;;  %v3639_v41 = vld [vmem:[%s5622_s6 + $0x3a] sm:$0xff] }
  0xdd   : > { %4349 = vmatmul.mubr.f32.gmra.mrb[22].mxu1 %v6068_v58  ;;  %v3682_v58 = vld [vmem:[%s6797_s1 + $0x460] sm:$0xff] }
  0xde   : > { %4725 = vmatmul.mubr.f32.gmra.mrb[6].mxu0 %v3597_v25  ;;  %4351 = vmatprep.mubr.f32.mxu1 %v6074_v60  ;;  %v5123_v60 = vpack.c.bf16 %v3683_v63, %v3682_v58  ;;  %v6899_v25 = vld [vmem:[#allocation9_spill] sm:$0xff]  ;;  %v3655_v58 = vld [vmem:[%s5622_s6 + $0xfa] sm:$0xff] }
  0xdf   : > { %4727 = vmatprep.mubr.f32.mxu0 %v5784_v35  ;;  %5114 = vmatpush3.bf16.msra.mxu0 %v5111_v2  ;;  %v3601_v35 = vld [vmem:[%s5622_s6 + $0xb1] sm:$0xff]  ;;  %v6898_v2 = vld [vmem:[#allocation32_spill] sm:$0xff]  ;;  %v3465_v63 = vld [vmem:[%s5622_s6 + $0xf9] sm:$0xff] }
  0xe0   : > { %5116 = vmatprep.subr.bf16.mxu0 %v5115_v20 }
  0xe1   : > { %4352 = vmatmul.mubr.f32.gmra.mrb[24].mxu1 %v6090_v26  ;;  %v3684_v26 = vld [vmem:[%s6797_s1 + $0x470] sm:$0xff] }
  0xe2   : > { %4728 = vmatmul.mubr.f32.gmra.mrb[8].mxu0 %v3599_v44  ;;  %4354 = vmatprep.mubr.f32.mxu1 %v6096_v33  ;;  %v5127_v33 = vpack.c.bf16 %v3685_v27, %v3684_v26  ;;  %v3641_v44 = vld [vmem:[%s5622_s6 + $0x52] sm:$0xff]  ;;  %v3659_v27 = vld [vmem:[%s5622_s6 + $0x12a] sm:$0xff] }
  0xe3   : > { %4730 = vmatprep.mubr.f32.mxu0 %v3600_v28  ;;  %5118 = vmatpush3.bf16.msra.mxu0 %v5115_v20  ;;  %v6900_v20 = vld [vmem:[#allocation33_spill] sm:$0xff]  ;;  %v3642_v28 = vld [vmem:[%s5622_s6 + $0x62] sm:$0xff] }
  0xe4   : > { %5120 = vmatprep.subr.bf16.mxu0 %v5119_v50  ;;  %v3467_v26 = vld [vmem:[%s5622_s6 + $0x111] sm:$0xff] }
  0xe5   : > { %4355 = vmatmul.mubr.f32.gmra.mrb[26].mxu1 %v6112_v9  ;;  %v6881_v9 = vld [vmem:[#allocation14_spill] sm:$0xff] }
  0xe6   : > { %4731 = vmatmul.mubr.f32.gmra.mrb[10].mxu0 %v3601_v35  ;;  %4357 = vmatprep.mubr.f32.mxu1 %v6118_v43  ;;  %v6870_v43 = vld [vmem:[#allocation20_spill] sm:$0xff]  ;;  %v3657_v35 = vld [vmem:[%s5622_s6 + $0x112] sm:$0xff] }
  0xe7   : > { %4733 = vmatprep.mubr.f32.mxu0 %v5816_v54  ;;  %5122 = vmatpush3.bf16.msra.mxu0 %v5119_v50  ;;  %v6871_v54 = vld [vmem:[#allocation10_spill] sm:$0xff] }
  0xe8   : > { %5124 = vmatprep.subr.bf16.mxu0 %v5123_v60  ;;  %v3644_v50 = vld [vmem:[%s5622_s6 + $0x7a] sm:$0xff] }
  0xe9   : > { %4358 = vmatmul.mubr.f32.gmra.mrb[28].mxu1 %v6134_v49  ;;  %v6882_v49 = vld [vmem:[#allocation5_spill] sm:$0xff] }
  0xea   : > { %4734 = vmatmul.mubr.f32.gmra.mrb[12].mxu0 %v5832_v61  ;;  %4360 = vmatprep.mubr.f32.mxu1 %v6140_v53  ;;  %v6872_v61 = vld [vmem:[#allocation3_spill] sm:$0xff]  ;;  %v6875_v53 = vld [vmem:[#allocation22_spill] sm:$0xff] }
  0xeb   : > { %4736 = vmatprep.mubr.f32.mxu0 %v5852_v4  ;;  %5126 = vmatpush3.bf16.msra.mxu0 %v5123_v60  ;;  %v6873_v4 = vld [vmem:[#allocation21_spill] sm:$0xff]  ;;  %v3658_v60 = vld [vmem:[%s5622_s6 + $0x122] sm:$0xff] }
  0xec   : > { %5128 = vmatprep.subr.bf16.mxu0 %v5127_v33 }
  0xed   : > { %4361 = vmatmul.mubr.f32.gmra.mrb[30].mxu1 %v6156_v37  ;;  %v6883_v37 = vld [vmem:[#allocation25_spill] sm:$0xff] }
  0xee   : > { %4737 = vmatmul.mubr.f32.gmra.mrb[14].mxu0 %v5868_v10  ;;  %4395 = vmatprep.mubr.f32.mxu1 %v6026_v24  ;;  %v6874_v10 = vld [vmem:[#allocation11_spill] sm:$0xff]  ;;  %v6877_v24 = vld [vmem:[#allocation4_spill] sm:$0xff] }
  0xef   : > { %4739 = vmatprep.mubr.f32.mxu0 %v5875_v13  ;;  %5130 = vmatpush3.bf16.msra.mxu0 %v5127_v33  ;;  %v6876_v13 = vld [vmem:[#allocation12_spill] sm:$0xff] }
  0xf0   : > { %v3468_v33 = vld [vmem:[%s5622_s6 + $0x121] sm:$0xff] }
  0xf1   : > { %4396 = vmatmul.mubr.f32.vlgmr.msra.gmra.mrb[0].mxu1 %v6041_v34  ;;  %v6880_v34 = vld [vmem:[#allocation24_spill] sm:$0xff] }
  0xf2   : > { %4740 = vmatmul.mubr.f32.gmra.mrb[16].mxu0 %v5890_v19  ;;  %5139 = vmatpush3.bf16.msra.mxu1 %v5577_v7  ;;  %v6878_v19 = vld [vmem:[#allocation23_spill] sm:$0xff]  ;;  %v6879_v7 = vld [vmem:[#allocation13_spill] sm:$0xff] }
  0xf3   : > { %4398 = vmatprep.mubr.f32.mxu1 %v6870_v43  ;;  %4742 = vmatprep.mubr.f32.mxu0 %v6871_v54  ;;  %v3660_v43 = vld [vmem:[%s5622_s6 + $0x13a] sm:$0xff]  ;;  %v3469_v54 = vld [vmem:[%s5622_s6 + $0x129] sm:$0xff] }
  0xf4   : > { %5132 = vmatprep.subr.bf16.mxu1 %v6872_v61 }
  0xf5   : > { %4399 = vmatmul.mubr.f32.gmra.mrb[2].mxu1 %v6873_v4  ;;  %v3470_v4 = vld [vmem:[%s5622_s6 + $0x139] sm:$0xff] }
  0xf6   : > { %4743 = vmatmul.mubr.f32.gmra.mrb[18].mxu0 %v6874_v10  ;;  %4401 = vmatprep.mubr.f32.mxu1 %v6875_v53  ;;  %v3662_v10 = vld [vmem:[%s5622_s6 + $0x152] sm:$0xff]  ;;  %v3471_v53 = vld [vmem:[%s5622_s6 + $0x141] sm:$0xff] }
  0xf7   : > { %4745 = vmatprep.mubr.f32.mxu0 %v6876_v13  ;;  %5140 = vmatpush3.bf16.msra.mxu1 %v6872_v61  ;;  %v3661_v61 = vld [vmem:[%s5622_s6 + $0x142] sm:$0xff]  ;;  %v3663_v13 = vld [vmem:[%s5622_s6 + $0x15a] sm:$0xff] }
  0xf8   : > { %5133 = vmatprep.subr.bf16.mxu1 %v6877_v24 }
  0xf9   : > { %4402 = vmatmul.mubr.f32.gmra.mrb[4].mxu1 %v6878_v19  ;;  %v3664_v19 = vld [vmem:[%s5622_s6 + $0x16a] sm:$0xff] }
  0xfa   : > { %4746 = vmatmul.mubr.f32.gmra.mrb[20].mxu0 %v6879_v7  ;;  %4404 = vmatprep.mubr.f32.mxu1 %v6880_v34  ;;  %v3473_v7 = vld [vmem:[%s5622_s6 + $0x159] sm:$0xff] }
  0xfb   : > { %4748 = vmatprep.mubr.f32.mxu0 %v6881_v9  ;;  %5141 = vmatpush3.bf16.msra.mxu1 %v6877_v24  ;;  %v3472_v24 = vld [vmem:[%s5622_s6 + $0x151] sm:$0xff]  ;;  %v3474_v9 = vld [vmem:[%s5622_s6 + $0x169] sm:$0xff] }
  0xfc   : > { %5134 = vmatprep.subr.bf16.mxu1 %v6882_v49  ;;  %v3665_v34 = vld [vmem:[%s5622_s6 + $0x172] sm:$0xff] }
  0xfd   : > { %4405 = vmatmul.mubr.f32.gmra.mrb[6].mxu1 %v6883_v37  ;;  %v3475_v37 = vld [vmem:[%s5622_s6 + $0x171] sm:$0xff] }
  0xfe   : > { %4749 = vmatmul.mubr.f32.gmra.mrb[22].mxu0 %v6884_v38  ;;  %4407 = vmatprep.mubr.f32.mxu1 %v6885_v23  ;;  %v3667_v38 = vld [vmem:[%s5622_s6 + $0x18a] sm:$0xff]  ;;  %v3668_v23 = vld [vmem:[%s5622_s6 + $0x19a] sm:$0xff] }
  0xff   : > { %4751 = vmatprep.mubr.f32.mxu0 %v6886_v40  ;;  %5142 = vmatpush3.bf16.msra.mxu1 %v6882_v49  ;;  %v3666_v49 = vld [vmem:[%s5622_s6 + $0x182] sm:$0xff] }
 0x100   : > { %5135 = vmatprep.subr.bf16.mxu1 %v6887_v42  ;;  %v3669_v40 = vld [vmem:[%s5622_s6 + $0x1a2] sm:$0xff] }
 0x101   : > { %4408 = vmatmul.mubr.f32.gmra.mrb[8].mxu1 %v6888_v46 }
 0x102   : > { %4752 = vmatmul.mubr.f32.gmra.mrb[24].mxu0 %v6889_v48  ;;  %4410 = vmatprep.mubr.f32.mxu1 %v6890_v52 }
 0x103   : > { %4754 = vmatprep.mubr.f32.mxu0 %v6891_v62  ;;  %5143 = vmatpush3.bf16.msra.mxu1 %v6887_v42 }
 0x104   : > { %5136 = vmatprep.subr.bf16.mxu1 %v6892_v3 }
 0x105   : > { %4411 = vmatmul.mubr.f32.gmra.mrb[10].mxu1 %v6893_v57 }
 0x106   : > { %4755 = vmatmul.mubr.f32.gmra.mrb[26].mxu0 %v6894_v29  ;;  %4413 = vmatprep.mubr.f32.mxu1 %v6895_v0 }
 0x107   : > { %4757 = vmatprep.mubr.f32.mxu0 %v6500_v55  ;;  %5144 = vmatpush3.bf16.msra.mxu1 %v6892_v3 }
 0x108   : > { %5137 = vmatprep.subr.bf16.mxu1 %v6896_v6 }
 0x109   : > { %4414 = vmatmul.mubr.f32.gmra.mrb[12].mxu1 %v6897_v16 }
 0x10a   : > { %4758 = vmatmul.mubr.f32.gmra.mrb[28].mxu0 %v6508_v5  ;;  %4416 = vmatprep.mubr.f32.mxu1 %v6898_v2 }
 0x10b   : > { %4760 = vmatprep.mubr.f32.mxu0 %v3620_v11  ;;  %5145 = vmatpush3.bf16.msra.mxu1 %v6896_v6 }
 0x10c   : > { %5138 = vmatprep.subr.bf16.mxu1 %v6899_v25 }
 0x10d   : > { %4417 = vmatmul.mubr.f32.gmra.mrb[14].mxu1 %v6900_v20 }
 0x10e   : > { %4761 = vmatmul.mubr.f32.gmra.mrb[30].mxu0 %v3621_v18  ;;  %4419 = vmatprep.mubr.f32.mxu1 %v6193_v17  ;;  %v3643_v17 = vld [vmem:[%s5622_s6 + $0x6a] sm:$0xff] }
 0x10f   : > { %4795 = vmatprep.mubr.f32.mxu0 %v3638_v14  ;;  %5146 = vmatpush3.bf16.msra.mxu1 %v6899_v25  ;;  %v6600_v25 = vld [vmem:[%s6798_s2] ss:$0 sm:$0xff] }
 0x111   : > { %4420 = vmatmul.mubr.f32.gmra.mrb[16].mxu1 %v6206_v39  ;;  %v3645_v39 = vld [vmem:[%s5622_s6 + $0x82] sm:$0xff] }
 0x112   : > { %4796 = vmatmul.mubr.f32.vlgmr.msra.gmra.mrb[0].mxu0 %v3639_v41  ;;  %4422 = vmatprep.mubr.f32.mxu1 %v6211_v12  ;;  %v3646_v12 = vld [vmem:[%s5622_s6 + $0x92] sm:$0xff] }
 0x113   : > { %4798 = vmatprep.mubr.f32.mxu0 %v3640_v45  ;;  %v6605_v45 = vld [vmem:[%s6799_s3] ss:$0 sm:$0xff] }
 0x115   : > { %4423 = vmatmul.mubr.f32.gmra.mrb[18].mxu1 %v6223_v8  ;;  %v3647_v8 = vld [vmem:[%s5622_s6 + $0x9a] sm:$0xff] }
 0x116   : > { %4799 = vmatmul.mubr.f32.gmra.mrb[2].mxu0 %v3641_v44  ;;  %4425 = vmatprep.mubr.f32.mxu1 %v6227_v36  ;;  %v3648_v36 = vld [vmem:[%s5622_s6 + $0xaa] sm:$0xff] }
 0x117   : > { %4801 = vmatprep.mubr.f32.mxu0 %v3642_v28 }
 0x119   : > { %4426 = vmatmul.mubr.f32.gmra.mrb[20].mxu1 %v6239_v31  ;;  %v3649_v31 = vld [vmem:[%s5622_s6 + $0xb2] sm:$0xff] }
 0x11a   : > { %4802 = vmatmul.mubr.f32.gmra.mrb[4].mxu0 %v3643_v17  ;;  %4428 = vmatprep.mubr.f32.mxu1 %v6243_v21  ;;  %v3650_v21 = vld [vmem:[%s5622_s6 + $0xc2] sm:$0xff] }
 0x11b   : > { %4804 = vmatprep.mubr.f32.mxu0 %v3644_v50 }
 0x11d   : > { %4429 = vmatmul.mubr.f32.gmra.mrb[22].mxu1 %v6255_v15  ;;  %v3651_v15 = vld [vmem:[%s5622_s6 + $0xca] sm:$0xff] }
 0x11e   : > { %4805 = vmatmul.mubr.f32.gmra.mrb[6].mxu0 %v3645_v39  ;;  %4431 = vmatprep.mubr.f32.mxu1 %v6259_v59  ;;  %v3653_v59 = vld [vmem:[%s5622_s6 + $0xe2] sm:$0xff] }
 0x11f   : > { %4807 = vmatprep.mubr.f32.mxu0 %v3646_v12 }
 0x121   : > { %4432 = vmatmul.mubr.f32.gmra.mrb[24].mxu1 %v6271_v51  ;;  %v3652_v51 = vld [vmem:[%s5622_s6 + $0xda] sm:$0xff] }
 0x122   : > { %4808 = vmatmul.mubr.f32.gmra.mrb[8].mxu0 %v3647_v8  ;;  %4434 = vmatprep.mubr.f32.mxu1 %v6275_v32  ;;  %v3654_v32 = vld [vmem:[%s5622_s6 + $0xf2] sm:$0xff] }
 0x123   : > { %4810 = vmatprep.mubr.f32.mxu0 %v3648_v36 }
 0x125   : > { %4435 = vmatmul.mubr.f32.gmra.mrb[26].mxu1 %v6287_v56  ;;  %v3462_v56 = vld [vmem:[%s5622_s6 + $0xd9] sm:$0xff] }
 0x126   : > { %4811 = vmatmul.mubr.f32.gmra.mrb[10].mxu0 %v3649_v31  ;;  %4437 = vmatprep.mubr.f32.mxu1 %v6291_v1  ;;  %v3463_v1 = vld [vmem:[%s5622_s6 + $0xe1] sm:$0xff] }
 0x127   : > { %4813 = vmatprep.mubr.f32.mxu0 %v3650_v21 }
 0x129   : > { %4438 = vmatmul.mubr.f32.gmra.mrb[28].mxu1 %v6303_v47  ;;  %v3464_v47 = vld [vmem:[%s5622_s6 + $0xf1] sm:$0xff] }
 0x12a   : > { %4814 = vmatmul.mubr.f32.gmra.mrb[12].mxu0 %v3651_v15  ;;  %4440 = vmatprep.mubr.f32.mxu1 %v6371_v22  ;;  %v3656_v22 = vld [vmem:[%s5622_s6 + $0x10a] sm:$0xff] }
 0x12b   : > { %4816 = vmatprep.mubr.f32.mxu0 %v3652_v51 }
 0x12d   : > { %4441 = vmatmul.mubr.f32.gmra.mrb[30].mxu1 %v6384_v30  ;;  %v3466_v30 = vld [vmem:[%s5622_s6 + $0x109] sm:$0xff] }
 0x12e   : > { %4817 = vmatmul.mubr.f32.gmra.mrb[14].mxu0 %v3653_v59  ;;  %4499 = vmatprep.mubr.f32.mxu1 %v3462_v56 }
 0x12f   : > { %4819 = vmatprep.mubr.f32.mxu0 %v3654_v32 }
 0x131   : > { %4500 = vmatmul.mubr.f32.vlgmr.msra.gmra.mrb[16].mxu1 %v3463_v1 }
 0x132   : > { %4820 = vmatmul.mubr.f32.gmra.mrb[16].mxu0 %v3655_v58  ;;  %4502 = vmatprep.mubr.f32.mxu1 %v3464_v47 }
 0x133   : > { %4822 = vmatprep.mubr.f32.mxu0 %v3656_v22 }
 0x135   : > { %4503 = vmatmul.mubr.f32.gmra.mrb[18].mxu1 %v3465_v63 }
 0x136   : > { %4823 = vmatmul.mubr.f32.gmra.mrb[18].mxu0 %v3657_v35  ;;  %4505 = vmatprep.mubr.f32.mxu1 %v3466_v30 }
 0x137   : > { %4825 = vmatprep.mubr.f32.mxu0 %v3658_v60 }
 0x139   : > { %4506 = vmatmul.mubr.f32.gmra.mrb[20].mxu1 %v3467_v26 }
 0x13a   : > { %4826 = vmatmul.mubr.f32.gmra.mrb[20].mxu0 %v3659_v27  ;;  %4508 = vmatprep.mubr.f32.mxu1 %v3468_v33 }
 0x13b   : > { %4828 = vmatprep.mubr.f32.mxu0 %v3660_v43 }
 0x13d   : > { %4509 = vmatmul.mubr.f32.gmra.mrb[22].mxu1 %v3469_v54 }
 0x13e   : > { %4829 = vmatmul.mubr.f32.gmra.mrb[22].mxu0 %v3661_v61  ;;  %4511 = vmatprep.mubr.f32.mxu1 %v3470_v4 }
 0x13f   : > { %4831 = vmatprep.mubr.f32.mxu0 %v3662_v10 }
 0x141   : > { %4512 = vmatmul.mubr.f32.gmra.mrb[24].mxu1 %v3471_v53 }
 0x142   : > { %4832 = vmatmul.mubr.f32.gmra.mrb[24].mxu0 %v3663_v13  ;;  %4514 = vmatprep.mubr.f32.mxu1 %v3472_v24 }
 0x143   : > { %4834 = vmatprep.mubr.f32.mxu0 %v3664_v19 }
 0x145   : > { %4515 = vmatmul.mubr.f32.gmra.mrb[26].mxu1 %v3473_v7 }
 0x146   : > { %4835 = vmatmul.mubr.f32.gmra.mrb[26].mxu0 %v3665_v34  ;;  %4517 = vmatprep.mubr.f32.mxu1 %v3474_v9 }
 0x147   : > { %4837 = vmatprep.mubr.f32.mxu0 %v3666_v49 }
 0x149   : > { %4518 = vmatmul.mubr.f32.gmra.mrb[28].mxu1 %v3475_v37 }
 0x14a   : > { %4838 = vmatmul.mubr.f32.gmra.mrb[28].mxu0 %v3667_v38  ;;  %4520 = vmatprep.mubr.f32.mxu1 %v6500_v55 }
 0x14b   : > { %4840 = vmatprep.mubr.f32.mxu0 %v3668_v23 }
 0x14d   : > { %4521 = vmatmul.mubr.f32.gmra.mrb[30].mxu1 %v6508_v5 }
 0x14e   : > { %4841 = vmatmul.mubr.f32.gmra.mrb[30].mxu0 %v3669_v40 }
 0x1c4   : > { %v4397_v42 = vpop.f32.mrb[0].mxu1 }
 0x1c5   : > { %v1190_v46 = vpop.f32.mrb[1].mxu1 }
 0x1c8   : > { %v4400_v48 = vpop.f32.mrb[2].mxu1 }
 0x1c9   : > { %v1200_v52 = vpop.f32.mrb[3].mxu1 }
 0x1cc   : > { %v4403_v62 = vpop.f32.mrb[4].mxu1 }
 0x1cd   : > { %v1210_v3 = vpop.f32.mrb[5].mxu1 }
 0x1d0   : > { %v4406_v57 = vpop.f32.mrb[6].mxu1 }
 0x1d1   : > { %v1220_v29 = vpop.f32.mrb[7].mxu1 }
 0x1d4   : > { %v4409_v0 = vpop.f32.mrb[8].mxu1 }
 0x1d5   : > { %v1230_v11 = vpop.f32.mrb[9].mxu1 }
 0x1d8   : > { %v6585_v6 = vpop.f32.mrb[10].mxu1 }
 0x1d9   : > { %v6587_v16 = vpop.f32.mrb[11].mxu1 }
 0x1dc   : > { %v6589_v55 = vpop.f32.mrb[12].mxu1 }
 0x1dd   : > { %v6591_v2 = vpop.f32.mrb[13].mxu1 }
 0x1e0   : > { %v6593_v5 = vpop.f32.mrb[14].mxu1 }
 0x1e1   : > { %v6595_v18 = vpop.f32.mrb[15].mxu1 }
 0x1e5   : > { %v4797_v14 = vpop.f32.mrb[0].mxu0 }
 0x1e6   : > { %v5147_v20 = vadd.f32 %v4797_v14, %v4397_v42  ;;  %v2721_v41 = vpop.f32.mrb[1].mxu0 }
 0x1e7   : > { %v5148_v44 = vadd.f32 %v2721_v41, %v1190_v46 }
 0x1e8   : > { %v2920_v28 = vmul.f32 %v5147_v20, %v6600_v25 }
 0x1e9   : > { %v2919_v17 = vmul.f32 %v5148_v44, %v6600_v25  ;;  %v4800_v50 = vpop.f32.mrb[2].mxu0 }
 0x1ea   : > { %v2959_v39 = vadd.f32 %v6605_v45, %v2920_v28  ;;  %v5149_v12 = vadd.f32 %v4800_v50, %v4400_v48  ;;  %v2731_v8 = vpop.f32.mrb[3].mxu0 }
 0x1eb   : > { %v2958_v36 = vadd.f32 %v6605_v45, %v2919_v17  ;;  %v5150_v31 = vadd.f32 %v2731_v8, %v1200_v52 }
 0x1ec   : > { %v3023_v21 = vmul.f32 0.70710677, %v2959_v39  ;;  %v2922_v15 = vmul.f32 %v5149_v12, %v6600_v25  ;;  %v2991_v38 = vmul.f32 0.5, %v2959_v39 }
 0x1ed   : > { %v3022_v51 = vmul.f32 0.70710677, %v2958_v36  ;;  %v2921_v59 = vmul.f32 %v5150_v31, %v6600_v25  ;;  %v4803_v56 = vpop.f32.mrb[4].mxu0  ;;  %v2990_v48 = vmul.f32 0.5, %v2958_v36 }
 0x1ee   : > { %5428 = verf.f32 %v3023_v21  ;;  %v2961_v32 = vadd.f32 %v6605_v45, %v2922_v15  ;;  %v5151_v1 = vadd.f32 %v4803_v56, %v4403_v62  ;;  %v2741_v58 = vpop.f32.mrb[5].mxu0 }
 0x1ef   : > { %5430 = verf.f32 %v3022_v51  ;;  %v2960_v47 = vadd.f32 %v6605_v45, %v2921_v59  ;;  %v5152_v22 = vadd.f32 %v2741_v58, %v1210_v3 }
 0x1f0   : > { %v3025_v63 = vmul.f32 0.70710677, %v2961_v32  ;;  %v2924_v35 = vmul.f32 %v5151_v1, %v6600_v25  ;;  %v2993_v17 = vmul.f32 0.5, %v2961_v32 }
 0x1f1   : > { %v3024_v30 = vmul.f32 0.70710677, %v2960_v47  ;;  %v2923_v60 = vmul.f32 %v5152_v22, %v6600_v25  ;;  %v4806_v26 = vpop.f32.mrb[6].mxu0  ;;  %v2992_v36 = vmul.f32 0.5, %v2960_v47 }
 0x1f2   : > { %5432 = verf.f32 %v3025_v63  ;;  %v2963_v27 = vadd.f32 %v6605_v45, %v2924_v35  ;;  %v5153_v33 = vadd.f32 %v4806_v26, %v4406_v57  ;;  %v2751_v43 = vpop.f32.mrb[7].mxu0 }
 0x1f3   : > { %5434 = verf.f32 %v3024_v30  ;;  %v2962_v54 = vadd.f32 %v6605_v45, %v2923_v60  ;;  %v5154_v61 = vadd.f32 %v2751_v43, %v1220_v29 }
 0x1f4   : > { %v3027_v4 = vmul.f32 0.70710677, %v2963_v27  ;;  %v2926_v10 = vmul.f32 %v5153_v33, %v6600_v25  ;;  %v2995_v22 = vmul.f32 0.5, %v2963_v27 }
 0x1f5   : > { %v3026_v53 = vmul.f32 0.70710677, %v2962_v54  ;;  %v2925_v13 = vmul.f32 %v5154_v61, %v6600_v25  ;;  %v4809_v24 = vpop.f32.mrb[8].mxu0  ;;  %v2994_v26 = vmul.f32 0.5, %v2962_v54 }
 0x1f6   : > { %5436 = verf.f32 %v3027_v4  ;;  %v6622_v19 = vadd.f32 %v6605_v45, %v2926_v10  ;;  %v5155_v7 = vadd.f32 %v4809_v24, %v4409_v0  ;;  %v2761_v34 = vpop.f32.mrb[9].mxu0 }
 0x1f7   : > { %5438 = verf.f32 %v3026_v53  ;;  %v6625_v9 = vadd.f32 %v6605_v45, %v2925_v13  ;;  %v5156_v49 = vadd.f32 %v2761_v34, %v1230_v11 }
 0x1f8   : > { %v5429_v37 = vpop.eup %5428  ;;  %v3029_v23 = vmul.f32 0.70710677, %v6622_v19  ;;  %v2928_v40 = vmul.f32 %v5155_v7, %v6600_v25 }
 0x1f9   : > { %v5431_v42 = vpop.eup %5430  ;;  %v3087_v46 = vadd.f32 1.0, %v5429_v37  ;;  %v3028_v52 = vmul.f32 0.70710677, %v6625_v9  ;;  %v2927_v62 = vmul.f32 %v5156_v49, %v6600_v25  ;;  %v4812_v3 = vpop.f32.mrb[10].mxu0 }
 0x1fa   : > { %v3086_v57 = vadd.f32 1.0, %v5431_v42  ;;  %5440 = verf.f32 %v3029_v23  ;;  %v6632_v29 = vadd.f32 %v6605_v45, %v2928_v40  ;;  %v5157_v0 = vadd.f32 %v4812_v3, %v6585_v6  ;;  %v2771_v11 = vpop.f32.mrb[11].mxu0 }
 0x1fb   : > { %v3119_v14 = vmul.f32 %v3087_v46, %v2991_v38  ;;  %5442 = verf.f32 %v3028_v52  ;;  %v6636_v20 = vadd.f32 %v6605_v45, %v2927_v62  ;;  %v5158_v41 = vadd.f32 %v2771_v11, %v6587_v16 }
 0x1fc   : > { %v5433_v44 = vpop.eup %5432  ;;  %v3118_v28 = vmul.f32 %v3086_v57, %v2990_v48  ;;  %v3031_v50 = vmul.f32 0.70710677, %v6632_v29  ;;  %v2930_v39 = vmul.f32 %v5157_v0, %v6600_v25  ;;  %v2997_v38 = vmul.f32 0.5, %v6622_v19 }
 0x1fd   : > { %v5435_v12 = vpop.eup %5434  ;;  %3151 = vst [vmem:[#allocation2 + $0x8] sm:$0xff] %v3119_v14  ;;  %v3089_v8 = vadd.f32 1.0, %v5433_v44  ;;  %v3030_v6 = vmul.f32 0.70710677, %v6636_v20  ;;  %v2929_v31 = vmul.f32 %v5158_v41, %v6600_v25  ;;  %v4815_v21 = vpop.f32.mrb[12].mxu0  ;;  %v2996_v23 = vmul.f32 0.5, %v6625_v9 }
 0x1fe   : > { %3150 = vst [vmem:[#allocation2] sm:$0xff] %v3118_v28  ;;  %v3088_v15 = vadd.f32 1.0, %v5435_v12  ;;  %5444 = verf.f32 %v3031_v50  ;;  %v6644_v16 = vadd.f32 %v6605_v45, %v2930_v39  ;;  %v5159_v51 = vadd.f32 %v4815_v21, %v6589_v55  ;;  %v2781_v59 = vpop.f32.mrb[13].mxu0 }
 0x1ff   : > { %v3121_v56 = vmul.f32 %v3089_v8, %v2993_v17  ;;  %5446 = verf.f32 %v3030_v6  ;;  %v6648_v32 = vadd.f32 %v6605_v45, %v2929_v31  ;;  %v5160_v1 = vadd.f32 %v2781_v59, %v6591_v2 }
 0x200   : > { %v5437_v58 = vpop.eup %5436  ;;  %v3120_v47 = vmul.f32 %v3088_v15, %v2992_v36  ;;  %v3033_v63 = vmul.f32 0.70710677, %v6644_v16  ;;  %v2932_v35 = vmul.f32 %v5159_v51, %v6600_v25  ;;  %v3001_v8 = vmul.f32 0.5, %v6644_v16 }
 0x201   : > { %v5439_v30 = vpop.eup %5438  ;;  %3153 = vst [vmem:[#allocation2 + $0x18] sm:$0xff] %v3121_v56  ;;  %v3091_v60 = vadd.f32 1.0, %v5437_v58  ;;  %v3032_v55 = vmul.f32 0.70710677, %v6648_v32  ;;  %v2931_v33 = vmul.f32 %v5160_v1, %v6600_v25  ;;  %v4818_v43 = vpop.f32.mrb[14].mxu0 }
 0x202   : > { %3152 = vst [vmem:[#allocation2 + $0x10] sm:$0xff] %v3120_v47  ;;  %v3090_v61 = vadd.f32 1.0, %v5439_v30  ;;  %5448 = verf.f32 %v3033_v63  ;;  %v6656_v2 = vadd.f32 %v6605_v45, %v2932_v35  ;;  %v5161_v27 = vadd.f32 %v4818_v43, %v6593_v5  ;;  %v2791_v4 = vpop.f32.mrb[15].mxu0 }
 0x203   : > { %v3123_v10 = vmul.f32 %v3091_v60, %v2995_v22  ;;  %5450 = verf.f32 %v3032_v55  ;;  %v6660_v53 = vadd.f32 %v6605_v45, %v2931_v33  ;;  %v5162_v54 = vadd.f32 %v2791_v4, %v6595_v18 }
 0x204   : > { %v5441_v13 = vpop.eup %5440  ;;  %v3122_v24 = vmul.f32 %v3090_v61, %v2994_v26  ;;  %v3035_v7 = vmul.f32 0.70710677, %v6656_v2  ;;  %v2934_v34 = vmul.f32 %v5161_v27, %v6600_v25  ;;  %v4501_v49 = vpop.f32.mrb[16].mxu1  ;;  %v2999_v18 = vmul.f32 0.5, %v6632_v29 }
 0x205   : > { %v5443_v37 = vpop.eup %5442  ;;  %3155 = vst [vmem:[#allocation2 + $0x28] sm:$0xff] %v3123_v10  ;;  %v3093_v5 = vadd.f32 1.0, %v5441_v13  ;;  %v2933_v40 = vmul.f32 %v5162_v54, %v6600_v25  ;;  %v3034_v46 = vmul.f32 0.70710677, %v6660_v53  ;;  %v4821_v48 = vpop.f32.mrb[16].mxu0  ;;  %v2998_v29 = vmul.f32 0.5, %v6636_v20 }
 0x206   : > { %3154 = vst [vmem:[#allocation2 + $0x20] sm:$0xff] %v3122_v24  ;;  %v3092_v42 = vadd.f32 1.0, %v5443_v37  ;;  %5452 = verf.f32 %v3035_v7  ;;  %v1576_v52 = vpop.f32.mrb[17].mxu1  ;;  %v3182_v62 = vld [vmem:[#allocation2] ss:$2 sm:$0xff]  ;;  %v6671_v19 = vadd.f32 %v6605_v45, %v2934_v34  ;;  %v5163_v0 = vadd.f32 %v4821_v48, %v4501_v49  ;;  %v2801_v11 = vpop.f32.mrb[17].mxu0 }
 0x207   : > { %v3214_v3 = vld [vmem:[#allocation2 + $0x1] ss:$2 sm:$0xff]  ;;  %v3125_v57 = vmul.f32 %v3093_v5, %v2997_v38  ;;  %v6674_v9 = vadd.f32 %v6605_v45, %v2933_v40  ;;  %5454 = verf.f32 %v3034_v46  ;;  %v5164_v44 = vadd.f32 %v2801_v11, %v1576_v52 }
 0x208   : > { %v5445_v14 = vpop.eup %5444  ;;  %v3124_v41 = vmul.f32 %v3092_v42, %v2996_v23  ;;  %v4504_v28 = vpop.f32.mrb[18].mxu1  ;;  %v2936_v36 = vmul.f32 %v5163_v0, %v6600_v25  ;;  %v3245_v6 = vmax.f32 %v3182_v62, %v3214_v3  ;;  %v3037_v15 = vmul.f32 0.70710677, %v6671_v19 }
 0x209   : > { %v5447_v17 = vpop.eup %5446  ;;  %v3184_v50 = vld [vmem:[#allocation2 + $0x10] ss:$2 sm:$0xff]  ;;  %v3216_v39 = vld [vmem:[#allocation2 + $0x11] ss:$2 sm:$0xff]  ;;  %3157 = vst [vmem:[#allocation2 + $0x38] sm:$0xff] %v3125_v57  ;;  %v3095_v12 = vadd.f32 1.0, %v5445_v14  ;;  %v2935_v1 = vmul.f32 %v5164_v44, %v6600_v25 }
 0x20a   : > { %v3246_v31 = vmax.f32 %v3184_v50, %v3216_v39  ;;  %3156 = vst [vmem:[#allocation2 + $0x30] sm:$0xff] %v3124_v41  ;;  %v3094_v21 = vadd.f32 1.0, %v5447_v17  ;;  %v4824_v51 = vpop.f32.mrb[18].mxu0  ;;  %v1586_v20 = vpop.f32.mrb[19].mxu1  ;;  %v3036_v56 = vmul.f32 0.70710677, %v6674_v9  ;;  %v6688_v16 = vadd.f32 %v6605_v45, %v2936_v36 }
 0x20b   : > { %v3127_v59 = vmul.f32 %v3095_v12, %v2999_v18  ;;  %v2811_v58 = vpop.f32.mrb[19].mxu0  ;;  %5456 = verf.f32 %v3037_v15  ;;  %v5165_v35 = vadd.f32 %v4824_v51, %v4504_v28  ;;  %v3000_v33 = vmul.f32 0.5, %v6648_v32 }
 0x20c   : > { %v5449_v47 = vpop.eup %5448  ;;  %v3261_v22 = vmax.f32 %v3245_v6, %v3246_v31  ;;  %v3126_v63 = vmul.f32 %v3094_v21, %v2998_v29  ;;  %v4507_v30 = vpop.f32.mrb[20].mxu1  ;;  %5458 = verf.f32 %v3036_v56  ;;  %v6693_v43 = vadd.f32 %v6605_v45, %v2935_v1 }
 0x20d   : > { %v5451_v60 = vpop.eup %5450  ;;  %v3186_v26 = vld [vmem:[#allocation2 + $0x20] ss:$2 sm:$0xff]  ;;  %3159 = vst [vmem:[#allocation2 + $0x48] sm:$0xff] %v3127_v59  ;;  %v3097_v55 = vadd.f32 1.0, %v5449_v47  ;;  %v3003_v27 = vmul.f32 0.5, %v6656_v2  ;;  %v2938_v10 = vmul.f32 %v5165_v35, %v6600_v25  ;;  %v4827_v54 = vpop.f32.mrb[20].mxu0  ;;  %v5166_v49 = vadd.f32 %v2811_v58, %v1586_v20 }
 0x20e   : > { %3269 = vst [vmem:[%s6684_s20] sm:$0xff] %v3261_v22  ;;  %3158 = vst [vmem:[#allocation2 + $0x40] sm:$0xff] %v3126_v63  ;;  %v3096_v61 = vadd.f32 1.0, %v5451_v60  ;;  %v3039_v4 = vmul.f32 0.70710677, %v6688_v16  ;;  %v1596_v13 = vpop.f32.mrb[21].mxu1  ;;  %v3002_v34 = vmul.f32 0.5, %v6660_v53  ;;  %v5167_v2 = vadd.f32 %v4827_v54, %v4507_v30 }
 0x20f   : > { %v3218_v24 = vld [vmem:[#allocation2 + $0x21] ss:$2 sm:$0xff]  ;;  %v3129_v7 = vmul.f32 %v3097_v55, %v3001_v8  ;;  %v3038_v32 = vmul.f32 0.70710677, %v6693_v43  ;;  %v2821_v37 = vpop.f32.mrb[21].mxu0  ;;  %v6702_v23 = vadd.f32 %v6605_v45, %v2938_v10  ;;  %v2937_v48 = vmul.f32 %v5166_v49, %v6600_v25 }
 0x210   : > { %v5453_v38 = vpop.eup %5452  ;;  %v3128_v5 = vmul.f32 %v3096_v61, %v3000_v33  ;;  %5460 = verf.f32 %v3039_v4  ;;  %v4510_v40 = vpop.f32.mrb[22].mxu1  ;;  %v5168_v53 = vadd.f32 %v2821_v37, %v1596_v13  ;;  %v3247_v3 = vmax.f32 %v3186_v26, %v3218_v24 }
 0x211   : > { %v3188_v42 = vld [vmem:[#allocation2 + $0x30] ss:$2 sm:$0xff]  ;;  %v3220_v18 = vld [vmem:[#allocation2 + $0x31] ss:$2 sm:$0xff]  ;;  %3161 = vst [vmem:[#allocation2 + $0x58] sm:$0xff] %v3129_v7  ;;  %v3099_v46 = vadd.f32 1.0, %v5453_v38  ;;  %5462 = verf.f32 %v3038_v32  ;;  %v5455_v62 = vpop.eup %5454  ;;  %v2940_v11 = vmul.f32 %v5167_v2, %v6600_v25  ;;  %v6708_v28 = vadd.f32 %v6605_v45, %v2937_v48 }
 0x212   : > { %v4830_v52 = vpop.f32.mrb[22].mxu0  ;;  %v3248_v57 = vmax.f32 %v3188_v42, %v3220_v18  ;;  %3160 = vst [vmem:[#allocation2 + $0x50] sm:$0xff] %v3128_v5  ;;  %v3041_v0 = vmul.f32 0.70710677, %v6702_v23  ;;  %v1606_v14 = vpop.f32.mrb[23].mxu1  ;;  %v3098_v44 = vadd.f32 1.0, %v5455_v62  ;;  %v2939_v17 = vmul.f32 %v5168_v53, %v6600_v25 }
 0x213   : > { %v2831_v41 = vpop.f32.mrb[23].mxu0  ;;  %v3131_v29 = vmul.f32 %v3099_v46, %v3003_v27  ;;  %v6712_v39 = vadd.f32 %v6605_v45, %v2940_v11  ;;  %v5169_v12 = vadd.f32 %v4830_v52, %v4510_v40  ;;  %v3005_v21 = vmul.f32 0.5, %v6671_v19 }
 0x214   : > { %v3262_v50 = vmax.f32 %v3247_v3, %v3248_v57  ;;  %5464 = verf.f32 %v3041_v0  ;;  %v4513_v8 = vpop.f32.mrb[24].mxu1  ;;  %v3130_v31 = vmul.f32 %v3098_v44, %v3002_v34  ;;  %v6716_v15 = vadd.f32 %v6605_v45, %v2939_v17 }
 0x215   : > { %v3190_v36 = vld [vmem:[#allocation2 + $0x40] ss:$2 sm:$0xff]  ;;  %v3222_v6 = vld [vmem:[#allocation2 + $0x41] ss:$2 sm:$0xff]  ;;  %3163 = vst [vmem:[#allocation2 + $0x68] sm:$0xff] %v3131_v29  ;;  %v5170_v51 = vadd.f32 %v2831_v41, %v1606_v14  ;;  %v4833_v20 = vpop.f32.mrb[24].mxu0  ;;  %v5457_v59 = vpop.eup %5456  ;;  %v2942_v30 = vmul.f32 %v5169_v12, %v6600_v25 }
 0x216   : > { %3270 = vst [vmem:[%s6684_s20 + $0x8] sm:$0xff] %v3262_v50  ;;  %v3004_v56 = vmul.f32 0.5, %v6674_v9  ;;  %v3040_v1 = vmul.f32 0.70710677, %v6708_v28  ;;  %v3043_v58 = vmul.f32 0.70710677, %v6712_v39  ;;  %v5459_v22 = vpop.eup %5458  ;;  %v3249_v63 = vmax.f32 %v3190_v36, %v3222_v6 }
 0x217   : > { %v1616_v47 = vpop.f32.mrb[25].mxu1  ;;  %3162 = vst [vmem:[#allocation2 + $0x60] sm:$0xff] %v3130_v31  ;;  %v3101_v35 = vadd.f32 1.0, %v5457_v59  ;;  %v3042_v19 = vmul.f32 0.70710677, %v6716_v15  ;;  %v2841_v60 = vpop.f32.mrb[25].mxu0  ;;  %v2941_v55 = vmul.f32 %v5170_v51, %v6600_v25  ;;  %v5171_v33 = vadd.f32 %v4833_v20, %v4513_v8 }
 0x218   : > { %v3100_v26 = vadd.f32 1.0, %v5459_v22  ;;  %5466 = verf.f32 %v3040_v1  ;;  %v4516_v9 = vpop.f32.mrb[26].mxu1  ;;  %v6726_v10 = vadd.f32 %v6605_v45, %v2942_v30  ;;  %v5172_v54 = vadd.f32 %v2841_v60, %v1616_v47 }
 0x219   : > { %v3192_v61 = vld [vmem:[#allocation2 + $0x50] ss:$2 sm:$0xff]  ;;  %v3224_v27 = vld [vmem:[#allocation2 + $0x51] ss:$2 sm:$0xff]  ;;  %v3133_v4 = vmul.f32 %v3101_v35, %v3005_v21  ;;  %5468 = verf.f32 %v3043_v58  ;;  %v4836_v13 = vpop.f32.mrb[26].mxu0  ;;  %v1626_v24 = vpop.f32.mrb[27].mxu1  ;;  %v6729_v49 = vadd.f32 %v6605_v45, %v2941_v55  ;;  %v2944_v42 = vmul.f32 %v5171_v33, %v6600_v25 }
 0x21a   : > { %v5461_v7 = vpop.eup %5460  ;;  %v3250_v34 = vmax.f32 %v3192_v61, %v3224_v27  ;;  %v3132_v32 = vmul.f32 %v3100_v26, %v3004_v56  ;;  %5470 = verf.f32 %v3042_v19  ;;  %v2851_v37 = vpop.f32.mrb[27].mxu0  ;;  %v3007_v5 = vmul.f32 0.5, %v6688_v16 }
 0x21b   : > { %v5463_v38 = vpop.eup %5462  ;;  %3165 = vst [vmem:[#allocation2 + $0x78] sm:$0xff] %v3133_v4  ;;  %v3103_v2 = vadd.f32 1.0, %v5461_v7  ;;  %v3045_v40 = vmul.f32 0.70710677, %v6726_v10  ;;  %v3006_v46 = vmul.f32 0.5, %v6693_v43  ;;  %v6737_v3 = vadd.f32 %v6605_v45, %v2944_v42 }
 0x21c   : > { %v3263_v18 = vmax.f32 %v3249_v63, %v3250_v34  ;;  %3164 = vst [vmem:[#allocation2 + $0x70] sm:$0xff] %v3132_v32  ;;  %v3102_v48 = vadd.f32 1.0, %v5463_v38  ;;  %v3044_v53 = vmul.f32 0.70710677, %v6729_v49  ;;  %v4519_v52 = vpop.f32.mrb[28].mxu1  ;;  %v2943_v16 = vmul.f32 %v5172_v54, %v6600_v25 }
 0x21d   : > { %v3135_v62 = vmul.f32 %v3103_v2, %v3007_v5  ;;  %5472 = verf.f32 %v3045_v40  ;;  %v4839_v57 = vpop.f32.mrb[28].mxu0  ;;  %v1636_v0 = vpop.f32.mrb[29].mxu1  ;;  %v5173_v41 = vadd.f32 %v4836_v13, %v4516_v9  ;;  %v5174_v29 = vadd.f32 %v2851_v37, %v1626_v24 }
 0x21e   : > { %v5465_v11 = vpop.eup %5464  ;;  %3271 = vst [vmem:[%s6684_s20 + $0x10] sm:$0xff] %v3263_v18  ;;  %v3134_v14 = vmul.f32 %v3102_v48, %v3006_v46  ;;  %5474 = verf.f32 %v3044_v53  ;;  %v2861_v43 = vpop.f32.mrb[29].mxu0  ;;  %v3009_v44 = vmul.f32 0.5, %v6702_v23  ;;  %v3008_v50 = vmul.f32 0.5, %v6708_v28  ;;  %v3194_v51 = vld [vmem:[#allocation2 + $0x60] ss:$2 sm:$0xff] }
 0x21f   : > { %3167 = vst [vmem:[#allocation2 + $0x88] sm:$0xff] %v3135_v62  ;;  %v3105_v17 = vadd.f32 1.0, %v5465_v11  ;;  %v3047_v12 = vmul.f32 0.70710677, %v6737_v3  ;;  %v6745_v8 = vadd.f32 %v6605_v45, %v2943_v16  ;;  %v2946_v36 = vmul.f32 %v5173_v41, %v6600_v25  ;;  %v3226_v20 = vld [vmem:[#allocation2 + $0x61] ss:$2 sm:$0xff] }
 0x220   : > { %3166 = vst [vmem:[#allocation2 + $0x80] sm:$0xff] %v3134_v14  ;;  %v2945_v6 = vmul.f32 %v5174_v29, %v6600_v25  ;;  %v5175_v31 = vadd.f32 %v4839_v57, %v4519_v52  ;;  %v4522_v21 = vpop.f32.mrb[30].mxu1  ;;  %v5176_v23 = vadd.f32 %v2861_v43, %v1636_v0  ;;  %v3011_v58 = vmul.f32 0.5, %v6712_v39 }
 0x221   : > { %v3137_v59 = vmul.f32 %v3105_v17, %v3009_v44  ;;  %5476 = verf.f32 %v3047_v12  ;;  %v4842_v56 = vpop.f32.mrb[30].mxu0  ;;  %v1646_v1 = vpop.f32.mrb[31].mxu1  ;;  %v3046_v47 = vmul.f32 0.70710677, %v6745_v8  ;;  %v6752_v22 = vadd.f32 %v6605_v45, %v2946_v36 }
 0x222   : > { %v5467_v28 = vpop.eup %5466  ;;  %v6755_v63 = vadd.f32 %v6605_v45, %v2945_v6  ;;  %v2871_v35 = vpop.f32.mrb[31].mxu0  ;;  %v2948_v55 = vmul.f32 %v5175_v31, %v6600_v25  ;;  %v2947_v33 = vmul.f32 %v5176_v23, %v6600_v25  ;;  %v5177_v9 = vadd.f32 %v4842_v56, %v4522_v21 }
 0x223   : > { %v5469_v19 = vpop.eup %5468  ;;  %v3196_v30 = vld [vmem:[#allocation2 + $0x70] ss:$2 sm:$0xff]  ;;  %v3228_v60 = vld [vmem:[#allocation2 + $0x71] ss:$2 sm:$0xff]  ;;  %3169 = vst [vmem:[#allocation2 + $0x98] sm:$0xff] %v3137_v59  ;;  %v3104_v26 = vadd.f32 1.0, %v5467_v28  ;;  %v3251_v61 = vmax.f32 %v3194_v51, %v3226_v20  ;;  %5478 = verf.f32 %v3046_v47  ;;  %v5178_v0 = vadd.f32 %v2871_v35, %v1646_v1 }
 0x224   : > { %v5471_v39 = vpop.eup %5470  ;;  %v3252_v27 = vmax.f32 %v3196_v30, %v3228_v60  ;;  %v3107_v4 = vadd.f32 1.0, %v5469_v19  ;;  %v3010_v13 = vmul.f32 0.5, %v6716_v15  ;;  %v3049_v7 = vmul.f32 0.70710677, %v6752_v22 }
 0x225   : > { %v3136_v54 = vmul.f32 %v3104_v26, %v3008_v50  ;;  %v3106_v24 = vadd.f32 1.0, %v5471_v39  ;;  %v3048_v37 = vmul.f32 0.70710677, %v6755_v63  ;;  %v6763_v38 = vadd.f32 %v6605_v45, %v2948_v55 }
 0x226   : > { %v3264_v34 = vmax.f32 %v3251_v61, %v3252_v27  ;;  %v3139_v32 = vmul.f32 %v3107_v4, %v3011_v58  ;;  %5480 = verf.f32 %v3049_v7  ;;  %v6766_v40 = vadd.f32 %v6605_v45, %v2947_v33 }
 0x227   : > { %v5473_v5 = vpop.eup %5472  ;;  %3168 = vst [vmem:[#allocation2 + $0x90] sm:$0xff] %v3136_v54  ;;  %v3138_v2 = vmul.f32 %v3106_v24, %v3010_v13  ;;  %v2950_v42 = vmul.f32 %v5177_v9, %v6600_v25  ;;  %v3013_v18 = vmul.f32 0.5, %v6726_v10  ;;  %5482 = verf.f32 %v3048_v37  ;;  %v3198_v14 = vld [vmem:[#allocation2 + $0x80] ss:$2 sm:$0xff]  ;;  %v3230_v29 = vld [vmem:[#allocation2 + $0x81] ss:$2 sm:$0xff] }
 0x228   : > { %v5475_v15 = vpop.eup %5474  ;;  %3272 = vst [vmem:[%s6684_s20 + $0x18] sm:$0xff] %v3264_v34  ;;  %3171 = vst [vmem:[#allocation2 + $0xa8] sm:$0xff] %v3139_v32  ;;  %v3109_v46 = vadd.f32 1.0, %v5473_v5  ;;  %v3012_v48 = vmul.f32 0.5, %v6729_v49  ;;  %v3051_v52 = vmul.f32 0.70710677, %v6763_v38  ;;  %v2949_v44 = vmul.f32 %v5178_v0, %v6600_v25 }
 0x229   : > { %3170 = vst [vmem:[#allocation2 + $0xa0] sm:$0xff] %v3138_v2  ;;  %v3108_v53 = vadd.f32 1.0, %v5475_v15  ;;  %v3050_v62 = vmul.f32 0.70710677, %v6766_v40  ;;  %v2989_v57 = vadd.f32 %v6605_v45, %v2950_v42  ;;  %v3015_v10 = vmul.f32 0.5, %v6737_v3 }
 0x22a   : > { %v3141_v16 = vmul.f32 %v3109_v46, %v3013_v18  ;;  %5484 = verf.f32 %v3051_v52  ;;  %v3014_v6 = vmul.f32 0.5, %v6745_v8  ;;  %v3253_v31 = vmax.f32 %v3198_v14, %v3230_v29 }
 0x22b   : > { %v5477_v11 = vpop.eup %5476  ;;  %v3140_v41 = vmul.f32 %v3108_v53, %v3012_v48  ;;  %5486 = verf.f32 %v3050_v62  ;;  %v3053_v49 = vmul.f32 0.70710677, %v2989_v57  ;;  %v2988_v20 = vadd.f32 %v6605_v45, %v2949_v44 }
 0x22c   : > { %3173 = vst [vmem:[#allocation2 + $0xb8] sm:$0xff] %v3141_v16  ;;  %v3111_v43 = vadd.f32 1.0, %v5477_v11  ;;  %v3017_v28 = vmul.f32 0.5, %v6752_v22  ;;  %v3016_v8 = vmul.f32 0.5, %v6755_v63  ;;  %v3019_v22 = vmul.f32 0.5, %v6763_v38 }
 0x22d   : > { %3172 = vst [vmem:[#allocation2 + $0xb0] sm:$0xff] %v3140_v41  ;;  %v5479_v17 = vpop.eup %5478  ;;  %5488 = verf.f32 %v3053_v49  ;;  %v3052_v47 = vmul.f32 0.70710677, %v2988_v20  ;;  %v3018_v27 = vmul.f32 0.5, %v6766_v40  ;;  %v3021_v24 = vmul.f32 0.5, %v2989_v57 }
 0x22e   : > { %v3200_v50 = vld [vmem:[#allocation2 + $0x90] ss:$2 sm:$0xff]  ;;  %v3232_v12 = vld [vmem:[#allocation2 + $0x91] ss:$2 sm:$0xff]  ;;  %v3143_v36 = vmul.f32 %v3111_v43, %v3015_v10  ;;  %v3110_v51 = vadd.f32 1.0, %v5479_v17  ;;  %v3020_v15 = vmul.f32 0.5, %v2988_v20 }
 0x22f   : > { %v3254_v21 = vmax.f32 %v3200_v50, %v3232_v12  ;;  %5490 = verf.f32 %v3052_v47 }
 0x230   : > { %3175 = vst [vmem:[#allocation2 + $0xc8] sm:$0xff] %v3143_v36  ;;  %v5481_v3 = vpop.eup %5480  ;;  %v3202_v23 = vld [vmem:[#allocation2 + $0xa0] ss:$2 sm:$0xff]  ;;  %v3142_v56 = vmul.f32 %v3110_v51, %v3014_v6  ;;  %v3234_v25 = vld [vmem:[#allocation2 + $0xa1] ss:$2 sm:$0xff] }
 0x231   : > { %v3265_v59 = vmax.f32 %v3253_v31, %v3254_v21  ;;  %v5483_v1 = vpop.eup %5482  ;;  %v3113_v58 = vadd.f32 1.0, %v5481_v3  ;;  %v3255_v26 = vmax.f32 %v3202_v23, %v3234_v25 }
 0x232   : > { %3174 = vst [vmem:[#allocation2 + $0xc0] sm:$0xff] %v3142_v56  ;;  %v3112_v35 = vadd.f32 1.0, %v5483_v1 }
 0x233   : > { %3273 = vst [vmem:[%s6684_s20 + $0x20] sm:$0xff] %v3265_v59  ;;  %v3145_v60 = vmul.f32 %v3113_v58, %v3017_v28 }
 0x234   : > { %v3204_v19 = vld [vmem:[#allocation2 + $0xb0] ss:$2 sm:$0xff]  ;;  %v3236_v30 = vld [vmem:[#allocation2 + $0xb1] ss:$2 sm:$0xff]  ;;  %v5485_v45 = vpop.eup %5484  ;;  %v3144_v33 = vmul.f32 %v3112_v35, %v3016_v8 }
 0x235   : > { %v3256_v55 = vmax.f32 %v3204_v19, %v3236_v30  ;;  %v5487_v9 = vpop.eup %5486  ;;  %3177 = vst [vmem:[#allocation2 + $0xd8] sm:$0xff] %v3145_v60  ;;  %v3115_v39 = vadd.f32 1.0, %v5485_v45 }
 0x236   : > { %3176 = vst [vmem:[#allocation2 + $0xd0] sm:$0xff] %v3144_v33  ;;  %v3114_v63 = vadd.f32 1.0, %v5487_v9 }
 0x237   : > { %v3266_v61 = vmax.f32 %v3255_v26, %v3256_v55  ;;  %v5489_v4 = vpop.eup %5488  ;;  %v3147_v54 = vmul.f32 %v3115_v39, %v3019_v22 }
 0x238   : > { %v3146_v13 = vmul.f32 %v3114_v63, %v3018_v27  ;;  %v3117_v7 = vadd.f32 1.0, %v5489_v4 }
 0x239   : > { %3274 = vst [vmem:[%s6684_s20 + $0x28] sm:$0xff] %v3266_v61  ;;  %3179 = vst [vmem:[#allocation2 + $0xe8] sm:$0xff] %v3147_v54  ;;  %v3206_v32 = vld [vmem:[#allocation2 + $0xc0] ss:$2 sm:$0xff]  ;;  %v3238_v37 = vld [vmem:[#allocation2 + $0xc1] ss:$2 sm:$0xff]  ;;  %v5491_v38 = vpop.eup %5490 }
 0x23a   : > { %3178 = vst [vmem:[#allocation2 + $0xe0] sm:$0xff] %v3146_v13  ;;  %v3149_v34 = vmul.f32 %v3117_v7, %v3021_v24  ;;  %v3257_v42 = vmax.f32 %v3206_v32, %v3238_v37  ;;  %v3116_v18 = vadd.f32 1.0, %v5491_v38 }
 0x23c   : > { %3181 = vst [vmem:[#allocation2 + $0xf8] sm:$0xff] %v3149_v34  ;;  %v3148_v48 = vmul.f32 %v3116_v18, %v3020_v15 }
 0x23d   : > { %v3208_v5 = vld [vmem:[#allocation2 + $0xd0] ss:$2 sm:$0xff]  ;;  %v3240_v2 = vld [vmem:[#allocation2 + $0xd1] ss:$2 sm:$0xff] }
 0x23e   : > { %v3258_v40 = vmax.f32 %v3208_v5, %v3240_v2  ;;  %3180 = vst [vmem:[#allocation2 + $0xf0] sm:$0xff] %v3148_v48 }
 0x240   : > { %v3267_v46 = vmax.f32 %v3257_v42, %v3258_v40 }
 0x241   : > { %v3210_v53 = vld [vmem:[#allocation2 + $0xe0] ss:$2 sm:$0xff]  ;;  %v3242_v52 = vld [vmem:[#allocation2 + $0xe1] ss:$2 sm:$0xff] }
 0x242   : > { %3275 = vst [vmem:[%s6684_s20 + $0x30] sm:$0xff] %v3267_v46  ;;  %v3259_v57 = vmax.f32 %v3210_v53, %v3242_v52 }
 0x245   : > { %v3212_v62 = vld [vmem:[#allocation2 + $0xf0] ss:$2 sm:$0xff]  ;;  %v3244_v16 = vld [vmem:[#allocation2 + $0xf1] ss:$2 sm:$0xff] }
 0x246   : > { %v3260_v0 = vmax.f32 %v3212_v62, %v3244_v16 }
 0x248   : > { %v3268_v11 = vmax.f32 %v3259_v57, %v3260_v0 }
 0x24a   : > { %3276 = vst [vmem:[%s6684_s20 + $0x38] sm:$0xff] %v3268_v11 }
 0x24b PF: > { %s14_s17 = sadd.s32 1, %s5514_s17   ;;  %s6901_s15 = smov %s5510_s16 }
 0x24c   : > { %p11_p5 = scmp.ge.s32.totalorder %s14_s17, 4   ;;  %s6902_s16 = smov %s6904_s18 }
 0x24e   :  { %13 = sbr.rel (!%p11_p5) target bundleno = 2 (0x2), region = 107 }

</bundles_post_ra>
